<compile_context>
chip_gen: v5e
topology: v5e:2x2
jax: 0.10.0
libtpu: 0.0.40
codegen_flags: <defaults>
</compile_context>

<pallas_src>
import functools
from dataclasses import dataclass

import numpy as np

import jax
import jax.numpy as jnp
from jax.experimental import pallas as pl
from jax.experimental.pallas import tpu as pltpu


MXU_DTYPE = jnp.bfloat16   # MXU feed dtype (f32 accumulate everywhere).  Set to
                           # jnp.float32 for bit-closer parity with an f32 reference.


def _vmem_limit_bytes():
    # Per-stage working set is only a few MiB; pick a generous limit that is still
    # safely below the smallest physical VMEM (64 MiB on v7x, 128 MiB on v5e/v6e).
    try:
        cap = pltpu.get_tpu_info().vmem_capacity_bytes
        return int(min(cap // 2, 64 * 1024 * 1024))
    except Exception:
        return 32 * 1024 * 1024


def _round_up(v, m):
    return ((v + m - 1) // m) * m


# ----------------------------------------------------------------------------
# Static per-stage geometry
# ----------------------------------------------------------------------------
@dataclass(frozen=True)
class _StageGeom:
    name: str
    k: int
    cin: int
    cout: int
    h: int
    w: int
    mode: str      # "pool" | "up" | "final"
    relu: bool
    cin_pad: int   # cin rounded up to multiple of 8 (sublane alignment)
    cout_pad: int
    ph: int        # 'same' padding = k // 2
    hp: int
    wp: int        # padded width (row stride of the flattened plane)
    mp: int        # over-computed output columns per image = h * wp
    lseg: int      # per-image lane-segment length (multiple of 128)
    ktot: int      # stacked contraction length = k * k * cin_pad


def _make_geom(name, k, cin, cout, h, w, mode, relu):
    assert k % 2 == 1, "only odd kernel sizes supported (SegNet uses 9,5,7,5,1)"
    if mode == "pool":
        assert h % 2 == 0 and w % 2 == 0, "2x2 max-pool needs even spatial dims"
    ph = k // 2
    hp, wp = h + 2 * ph, w + 2 * ph
    mp = h * wp
    lseg = _round_up(hp * wp + (k - 1), 128)     # + tail so every tap window is in-bounds
    cin_pad = _round_up(cin, 8)
    cout_pad = _round_up(cout, 8)
    return _StageGeom(name=name, k=k, cin=cin, cout=cout, h=h, w=w, mode=mode,
                      relu=relu, cin_pad=cin_pad, cout_pad=cout_pad, ph=ph, hp=hp,
                      wp=wp, mp=mp, lseg=lseg, ktot=k * k * cin_pad)


# ----------------------------------------------------------------------------
# Host-side (numpy) spatial-transition matrices — built once per plan, shapes only
# ----------------------------------------------------------------------------
def _interp_matrix_np(n_in):
    """(2*n_in, n_in) bilinear x2 row-interp matrix, align_corners=True (PyTorch)."""
    n_out = 2 * n_in
    if n_in == 1:
        return np.ones((n_out, 1), np.float32)
    pos = np.arange(n_out, dtype=np.float64) * (n_in - 1) / (n_out - 1)
    lo = np.floor(pos).astype(np.int64)
    hi = np.minimum(lo + 1, n_in - 1)
    frac = (pos - lo).astype(np.float32)
    a = np.zeros((n_out, n_in), np.float32)
    a[np.arange(n_out), lo] += (1.0 - frac)
    a[np.arange(n_out), hi] += frac
    return a


def _pool_transition_np(g, gn):
    """Map the 4-way-maxed conv columns to the NEXT stage's padded flat plane."""
    h2, w2 = g.h // 2, g.w // 2
    assert gn.h == h2 and gn.w == w2
    span_m = g.mp - g.wp - 1
    t = np.zeros((span_m, gn.lseg), np.float32)
    for r2 in range(h2):
        for c2 in range(w2):
            p = (2 * r2) * g.wp + 2 * c2
            q = (r2 + gn.ph) * gn.wp + (c2 + gn.ph)
            t[p, q] = 1.0
    return t


def _up_transition_np(g, gn):
    """Bilinear x2 upsample + re-pad, folded into one (mp, next_lseg) matrix."""
    assert gn.h == 2 * g.h and gn.w == 2 * g.w
    ah = _interp_matrix_np(g.h)                      # (2h, h)
    aw = _interp_matrix_np(g.w)                      # (2w, w)
    kron = np.kron(ah, aw)                           # [(ro,co),(r,c)]
    t = np.zeros((g.mp, gn.lseg), np.float32)
    p_idx = (np.arange(g.h)[:, None] * g.wp + np.arange(g.w)[None, :]).reshape(-1)
    q_idx = ((np.arange(2 * g.h)[:, None] + gn.ph) * gn.wp
             + (np.arange(2 * g.w)[None, :] + gn.ph)).reshape(-1)
    t[np.ix_(p_idx, q_idx)] = kron.T
    return t


def build_plan(num_channels, n_filters, h, w):
    assert h % 16 == 0 and w % 16 == 0, "four 2x2 max-pools need spatial dims % 16 == 0"
    f = n_filters
    raw = [
        ("1", 9, num_channels, f,      h,       w,       "pool",  True),
        ("2", 5, f,            f,      h // 2,  w // 2,  "pool",  True),
        ("3", 5, f,            2 * f,  h // 4,  w // 4,  "pool",  True),
        ("4", 5, 2 * f,        2 * f,  h // 8,  w // 8,  "pool",  True),
        ("5", 5, 2 * f,        f,      h // 16, w // 16, "up",    True),
        ("6", 7, f,            f,      h // 8,  w // 8,  "up",    True),
        ("7", 5, f,            f,      h // 4,  w // 4,  "up",    True),
        ("8", 5, f,            f,      h // 2,  w // 2,  "up",    True),
        ("9", 1, f,            1,      h,       w,       "final", False),
    ]
    geoms = [_make_geom(*r) for r in raw]
    trans = []
    for i, g in enumerate(geoms):
        if g.mode == "final":
            trans.append(None)
        else:
            gn = geoms[i + 1]
            assert g.cout == gn.cin and g.cout_pad == gn.cin_pad
            tnp = _pool_transition_np(g, gn) if g.mode == "pool" else _up_transition_np(g, gn)
            trans.append(jnp.asarray(tnp, dtype=MXU_DTYPE))
    return geoms, trans


# ----------------------------------------------------------------------------
# Fused stage kernel:  stacked-K conv GEMM + bias + ReLU + (pool | upsample) + re-pad
# ----------------------------------------------------------------------------
def _conv_stage_kernel(*refs, taps, cin_pad, mp, wp, pool, relu, has_t):
    """One SegNet stage on one image.
       refs (in order): x (Cin_pad, Lseg), w (Cout_pad, Ktot), b (Cout_pad, 1),
                        [t (span_m, out_cols)], out (Cout_pad, out_cols),
                        k_scratch (Ktot, mp)."""
    if has_t:
        x_ref, w_ref, b_ref, t_ref, o_ref, k_ref = refs
    else:
        x_ref, w_ref, b_ref, o_ref, k_ref = refs
        t_ref = None

    # 1) VMEM-only im2col: stack the k*k taps along the contraction dimension.
    #    Each tap is a statically shifted lane window of the VMEM-resident padded plane.
    for t, off in enumerate(taps):
        k_ref[t * cin_pad:(t + 1) * cin_pad, :] = x_ref[:, off:off + mp]

    # 2) one lane-dense GEMM with K = k*k*Cin_pad (75..648), f32 accumulate, bias fused.
    acc = jnp.dot(w_ref[...], k_ref[...], preferred_element_type=jnp.float32)
    acc = acc + b_ref[...]
    if relu:
        acc = jnp.maximum(acc, 0.0)

    # 3) fused 2x2 max-pool on the VMEM accumulator (valid columns only are consumed).
    if pool:
        sm = mp - wp - 1
        m = jnp.maximum(jnp.maximum(acc[:, 0:sm], acc[:, 1:sm + 1]),
                        jnp.maximum(acc[:, wp:wp + sm], acc[:, wp + 1:wp + 1 + sm]))
    else:
        m = acc

    # 4) static spatial-transition GEMM: pool-compaction / bilinear x2 upsample and
    #    re-padding into the NEXT stage's flattened input plane (zero elsewhere).
    if t_ref is not None:
        o_ref[...] = jnp.dot(m.astype(t_ref.dtype), t_ref[...],
                             preferred_element_type=jnp.float32).astype(o_ref.dtype)
    else:
        o_ref[...] = m.astype(o_ref.dtype)          # final 1x1 conv: already dense (H, W)


def _run_stage(x, wk, bk, tmat, g, n_batch, vmem_limit):
    has_t = tmat is not None
    taps = tuple(di * g.wp + dj for di in range(g.k) for dj in range(g.k))
    out_cols = int(tmat.shape[1]) if has_t else g.mp
    out_dtype = x.dtype if has_t else jnp.float32

    kernel = functools.partial(
        _conv_stage_kernel, taps=taps, cin_pad=g.cin_pad, mp=g.mp, wp=g.wp,
        pool=(g.mode == "pool"), relu=g.relu, has_t=has_t)

    in_arrays = [x, wk, bk] + ([tmat] if has_t else [])
    in_specs = [
        pl.BlockSpec((g.cin_pad, g.lseg), lambda n: (0, n)),   # per-image lane segment
        pl.BlockSpec(wk.shape, lambda n: (0, 0)),              # shared, pre-packed weights
        pl.BlockSpec(bk.shape, lambda n: (0, 0)),              # shared bias
    ]
    if has_t:
        in_specs.append(pl.BlockSpec(tmat.shape, lambda n: (0, 0)))

    span_m = (g.mp - g.wp - 1) if g.mode == "pool" else g.mp
    flops = 2 * n_batch * g.cout_pad * (g.ktot * g.mp + (span_m * out_cols if has_t else 0))
    bytes_accessed = int(sum(int(a.size) * a.dtype.itemsize for a in in_arrays)
                         + g.cout_pad * n_batch * out_cols * jnp.dtype(out_dtype).itemsize)

    return pl.pallas_call(
        kernel,
        out_shape=jax.ShapeDtypeStruct((g.cout_pad, n_batch * out_cols), out_dtype),
        grid=(n_batch,),
        in_specs=in_specs,
        out_specs=pl.BlockSpec((g.cout_pad, out_cols), lambda n: (0, n)),
        scratch_shapes=[pltpu.VMEM((g.ktot, g.mp), x.dtype)],
        compiler_params=pltpu.CompilerParams(
            dimension_semantics=("parallel",),
            vmem_limit_bytes=vmem_limit),
        cost_estimate=pl.CostEstimate(flops=int(flops), transcendentals=0,
                                      bytes_accessed=bytes_accessed),
    )(*in_arrays)


# ----------------------------------------------------------------------------
# Parameters (PyTorch layout) + one-time conversion to kernel layout
# ----------------------------------------------------------------------------
def init_params(key, num_channels, n_filters):
    """w{i}: (k, k, Cin, Cout) f32, b{i}: (Cout,) f32 (PyTorch default uniform init)."""
    f = n_filters
    specs = [("1", 9, num_channels, f), ("2", 5, f, f), ("3", 5, f, 2 * f),
             ("4", 5, 2 * f, 2 * f), ("5", 5, 2 * f, f), ("6", 7, f, f),
             ("7", 5, f, f), ("8", 5, f, f), ("9", 1, f, 1)]
    params = {}
    for name, k, cin, cout in specs:
        key, wkey, bkey = jax.random.split(key, 3)
        bound = 1.0 / float(k * k * cin) ** 0.5
        params["w" + name] = jax.random.uniform(
            wkey, (k, k, cin, cout), jnp.float32, -bound, bound)
        params["b" + name] = jax.random.uniform(
            bkey, (cout,), jnp.float32, -bound, bound)
    return params


def prepare_params(params, plan):
    """One-time conversion (not per forward): W -> (Cout_pad, k*k*Cin_pad) MXU dtype,
    rows ordered tap-major / Cin_pad-minor (matching the kernel's scratch fill);
    bias -> (Cout_pad, 1) f32.  Padded rows/cols are zero."""
    geoms, _ = plan
    out = []
    for g in geoms:
        w = params["w" + g.name]
        b = params["b" + g.name]
        wpad = jnp.zeros((g.k, g.k, g.cin_pad, g.cout_pad), jnp.float32)
        wpad = wpad.at[:, :, :g.cin, :g.cout].set(w)
        wk = jnp.reshape(jnp.transpose(wpad, (3, 0, 1, 2)),
                         (g.cout_pad, g.ktot)).astype(MXU_DTYPE)
        bk = jnp.zeros((g.cout_pad, 1), jnp.float32).at[:g.cout, 0].set(b)
        out.append((wk, bk))
    return out


# ----------------------------------------------------------------------------
# SegNet forward
# ----------------------------------------------------------------------------
def segnet_forward(plan, kparams, x):
    """x: (N, num_channels, H, W) float32 (NCHW, as in PyTorch). Returns (N, 1, H, W) f32."""
    geoms, trans = plan
    g0 = geoms[0]
    n = x.shape[0]
    assert x.shape[1:] == (g0.cin, g0.h, g0.w)
    vmem_limit = _vmem_limit_bytes()

    # One-time ingest glue: pad channels to a multiple of 8, spatial by k//2, flatten
    # each padded plane and concatenate images along lanes (128-multiple segments).
    h = jnp.pad(x, ((0, 0), (0, g0.cin_pad - g0.cin), (g0.ph, g0.ph), (g0.ph, g0.ph)))
    h = jnp.reshape(h, (n, g0.cin_pad, g0.hp * g0.wp))
    h = jnp.pad(h, ((0, 0), (0, 0), (0, g0.lseg - g0.hp * g0.wp)))
    h = jnp.reshape(jnp.transpose(h, (1, 0, 2)), (g0.cin_pad, n * g0.lseg)).astype(MXU_DTYPE)

    # 9 fused stages; no XLA glue in between — every stage's output already is the
    # next stage's zero-padded, flattened, channel-padded input plane.
    for g, tmat, (wk, bk) in zip(geoms, trans, kparams):
        h = _run_stage(h, wk, bk, tmat, g, n, vmem_limit)

    g9 = geoms[-1]
    out = jnp.transpose(jnp.reshape(h, (g9.cout_pad, n, g9.h, g9.w)), (1, 0, 2, 3))
    # self.sigmoid is defined but never applied in the PyTorch forward() -> skip it.
    return out[:, :g9.cout]                                      # (N, 1, H, W) f32


if __name__ == "__main__":
    # small config: batch=2, num_channels=3, n_filters=4, input 16x16
    # (16 is divisible by 2^4, as the 4 max-pools require)
    batch, num_channels, n_filters, hw = 2, 3, 4, 16

    root = jax.random.PRNGKey(0)
    pkey, xkey = jax.random.split(root)
    params = init_params(pkey, num_channels, n_filters)
    plan = build_plan(num_channels, n_filters, hw, hw)
    kparams = prepare_params(params, plan)          # one-time weight packing
    x = jax.random.normal(xkey, (batch, num_channels, hw, hw), jnp.float32)

    fwd = jax.jit(functools.partial(segnet_forward, plan))
    out = jax.block_until_ready(fwd(kparams, x))
    assert out.shape == (batch, 1, hw, hw), out.shape
    assert out.dtype == jnp.float32
    assert bool(jnp.all(jnp.isfinite(out)))
    print("KERNEL_OK")
</pallas_src>

<mosaic_0001>
module attributes {stable_mosaic.version = 11 : i64} {
  func.func @_conv_stage_kernel(%arg0: i32, %arg1: memref<8x128xbf16, #tpu.memory_space<vmem>>, %arg2: memref<8x200xbf16, #tpu.memory_space<vmem>>, %arg3: memref<8x1xf32, #tpu.memory_space<vmem>>, %arg4: memref<5x128xbf16, #tpu.memory_space<vmem>>, %arg5: memref<8x128xbf16, #tpu.memory_space<vmem>>, %arg6: memref<200x12xbf16, #tpu.memory_space<vmem>>) attributes {dimension_semantics = [#tpu.dimension_semantics<parallel>], iteration_bounds = array<i64: 2>, scalar_prefetch = 0 : i64, scratch_operands = 1 : i64, tpu.core_type = #tpu.core_type<tc>, window_params = [{transform_indices = @transform_0, window_bounds = array<i64: 8, 128>}, {pipeline_mode = #tpu.pipeline_mode<synchronous>, transform_indices = @transform_1, window_bounds = array<i64: 8, 200>}, {pipeline_mode = #tpu.pipeline_mode<synchronous>, transform_indices = @transform_2, window_bounds = array<i64: 8, 1>}, {pipeline_mode = #tpu.pipeline_mode<synchronous>, transform_indices = @transform_3, window_bounds = array<i64: 5, 128>}, {transform_indices = @transform_4, window_bounds = array<i64: 8, 128>}]} {
    %c0 = arith.constant 0 : index
    %c0_0 = arith.constant 0 : index
    %0 = vector.load %arg1[%c0, %c0_0] : memref<8x128xbf16, #tpu.memory_space<vmem>>, vector<8x12xbf16>
    %c0_1 = arith.constant 0 : index
    %c0_2 = arith.constant 0 : index
    %1 = vector.load %arg6[%c0_1, %c0_2] : memref<200x12xbf16, #tpu.memory_space<vmem>>, vector<8x12xbf16>
    tpu.vector_store %arg6[%c0_1, %c0_2], %0 {strides = array<i32>} : memref<200x12xbf16, #tpu.memory_space<vmem>>, vector<8x12xbf16>,
    %c0_3 = arith.constant 0 : index
    %c1 = arith.constant 1 : index
    %2 = vector.load %arg1[%c0_3, %c1] : memref<8x128xbf16, #tpu.memory_space<vmem>>, vector<8x12xbf16>
    %c8 = arith.constant 8 : index
    %c0_4 = arith.constant 0 : index
    %3 = vector.load %arg6[%c8, %c0_4] : memref<200x12xbf16, #tpu.memory_space<vmem>>, vector<8x12xbf16>
    tpu.vector_store %arg6[%c8, %c0_4], %2 {strides = array<i32>} : memref<200x12xbf16, #tpu.memory_space<vmem>>, vector<8x12xbf16>,
    %c0_5 = arith.constant 0 : index
    %c2 = arith.constant 2 : index
    %4 = vector.load %arg1[%c0_5, %c2] : memref<8x128xbf16, #tpu.memory_space<vmem>>, vector<8x12xbf16>
    %c16 = arith.constant 16 : index
    %c0_6 = arith.constant 0 : index
    %5 = vector.load %arg6[%c16, %c0_6] : memref<200x12xbf16, #tpu.memory_space<vmem>>, vector<8x12xbf16>
    tpu.vector_store %arg6[%c16, %c0_6], %4 {strides = array<i32>} : memref<200x12xbf16, #tpu.memory_space<vmem>>, vector<8x12xbf16>,
    %c0_7 = arith.constant 0 : index
    %c3 = arith.constant 3 : index
    %6 = vector.load %arg1[%c0_7, %c3] : memref<8x128xbf16, #tpu.memory_space<vmem>>, vector<8x12xbf16>
    %c24 = arith.constant 24 : index
    %c0_8 = arith.constant 0 : index
    %7 = vector.load %arg6[%c24, %c0_8] : memref<200x12xbf16, #tpu.memory_space<vmem>>, vector<8x12xbf16>
    tpu.vector_store %arg6[%c24, %c0_8], %6 {strides = array<i32>} : memref<200x12xbf16, #tpu.memory_space<vmem>>, vector<8x12xbf16>,
    %c0_9 = arith.constant 0 : index
    %c4 = arith.constant 4 : index
    %8 = vector.load %arg1[%c0_9, %c4] : memref<8x128xbf16, #tpu.memory_space<vmem>>, vector<8x12xbf16>
    %c32 = arith.constant 32 : index
    %c0_10 = arith.constant 0 : index
    %9 = vector.load %arg6[%c32, %c0_10] : memref<200x12xbf16, #tpu.memory_space<vmem>>, vector<8x12xbf16>
    tpu.vector_store %arg6[%c32, %c0_10], %8 {strides = array<i32>} : memref<200x12xbf16, #tpu.memory_space<vmem>>, vector<8x12xbf16>,
    %c0_11 = arith.constant 0 : index
    %c6 = arith.constant 6 : index
    %10 = vector.load %arg1[%c0_11, %c6] : memref<8x128xbf16, #tpu.memory_space<vmem>>, vector<8x12xbf16>
    %c40 = arith.constant 40 : index
    %c0_12 = arith.constant 0 : index
    %11 = vector.load %arg6[%c40, %c0_12] : memref<200x12xbf16, #tpu.memory_space<vmem>>, vector<8x12xbf16>
    tpu.vector_store %arg6[%c40, %c0_12], %10 {strides = array<i32>} : memref<200x12xbf16, #tpu.memory_space<vmem>>, vector<8x12xbf16>,
    %c0_13 = arith.constant 0 : index
    %c7 = arith.constant 7 : index
    %12 = vector.load %arg1[%c0_13, %c7] : memref<8x128xbf16, #tpu.memory_space<vmem>>, vector<8x12xbf16>
    %c48 = arith.constant 48 : index
    %c0_14 = arith.constant 0 : index
    %13 = vector.load %arg6[%c48, %c0_14] : memref<200x12xbf16, #tpu.memory_space<vmem>>, vector<8x12xbf16>
    tpu.vector_store %arg6[%c48, %c0_14], %12 {strides = array<i32>} : memref<200x12xbf16, #tpu.memory_space<vmem>>, vector<8x12xbf16>,
    %c0_15 = arith.constant 0 : index
    %c8_16 = arith.constant 8 : index
    %14 = vector.load %arg1[%c0_15, %c8_16] : memref<8x128xbf16, #tpu.memory_space<vmem>>, vector<8x12xbf16>
    %c56 = arith.constant 56 : index
    %c0_17 = arith.constant 0 : index
    %15 = vector.load %arg6[%c56, %c0_17] : memref<200x12xbf16, #tpu.memory_space<vmem>>, vector<8x12xbf16>
    tpu.vector_store %arg6[%c56, %c0_17], %14 {strides = array<i32>} : memref<200x12xbf16, #tpu.memory_space<vmem>>, vector<8x12xbf16>,
    %c0_18 = arith.constant 0 : index
    %c9 = arith.constant 9 : index
    %16 = vector.load %arg1[%c0_18, %c9] : memref<8x128xbf16, #tpu.memory_space<vmem>>, vector<8x12xbf16>
    %c64 = arith.constant 64 : index
    %c0_19 = arith.constant 0 : index
    %17 = vector.load %arg6[%c64, %c0_19] : memref<200x12xbf16, #tpu.memory_space<vmem>>, vector<8x12xbf16>
    tpu.vector_store %arg6[%c64, %c0_19], %16 {strides = array<i32>} : memref<200x12xbf16, #tpu.memory_space<vmem>>, vector<8x12xbf16>,
    %c0_20 = arith.constant 0 : index
    %c10 = arith.constant 10 : index
    %18 = vector.load %arg1[%c0_20, %c10] : memref<8x128xbf16, #tpu.memory_space<vmem>>, vector<8x12xbf16>
    %c72 = arith.constant 72 : index
    %c0_21 = arith.constant 0 : index
    %19 = vector.load %arg6[%c72, %c0_21] : memref<200x12xbf16, #tpu.memory_space<vmem>>, vector<8x12xbf16>
    tpu.vector_store %arg6[%c72, %c0_21], %18 {strides = array<i32>} : memref<200x12xbf16, #tpu.memory_space<vmem>>, vector<8x12xbf16>,
    %c0_22 = arith.constant 0 : index
    %c12 = arith.constant 12 : index
    %20 = vector.load %arg1[%c0_22, %c12] : memref<8x128xbf16, #tpu.memory_space<vmem>>, vector<8x12xbf16>
    %c80 = arith.constant 80 : index
    %c0_23 = arith.constant 0 : index
    %21 = vector.load %arg6[%c80, %c0_23] : memref<200x12xbf16, #tpu.memory_space<vmem>>, vector<8x12xbf16>
    tpu.vector_store %arg6[%c80, %c0_23], %20 {strides = array<i32>} : memref<200x12xbf16, #tpu.memory_space<vmem>>, vector<8x12xbf16>,
    %c0_24 = arith.constant 0 : index
    %c13 = arith.constant 13 : index
    %22 = vector.load %arg1[%c0_24, %c13] : memref<8x128xbf16, #tpu.memory_space<vmem>>, vector<8x12xbf16>
    %c88 = arith.constant 88 : index
    %c0_25 = arith.constant 0 : index
    %23 = vector.load %arg6[%c88, %c0_25] : memref<200x12xbf16, #tpu.memory_space<vmem>>, vector<8x12xbf16>
    tpu.vector_store %arg6[%c88, %c0_25], %22 {strides = array<i32>} : memref<200x12xbf16, #tpu.memory_space<vmem>>, vector<8x12xbf16>,
    %c0_26 = arith.constant 0 : index
    %c14 = arith.constant 14 : index
    %24 = vector.load %arg1[%c0_26, %c14] : memref<8x128xbf16, #tpu.memory_space<vmem>>, vector<8x12xbf16>
    %c96 = arith.constant 96 : index
    %c0_27 = arith.constant 0 : index
    %25 = vector.load %arg6[%c96, %c0_27] : memref<200x12xbf16, #tpu.memory_space<vmem>>, vector<8x12xbf16>
    tpu.vector_store %arg6[%c96, %c0_27], %24 {strides = array<i32>} : memref<200x12xbf16, #tpu.memory_space<vmem>>, vector<8x12xbf16>,
    %c0_28 = arith.constant 0 : index
    %c15 = arith.constant 15 : index
    %26 = vector.load %arg1[%c0_28, %c15] : memref<8x128xbf16, #tpu.memory_space<vmem>>, vector<8x12xbf16>
    %c104 = arith.constant 104 : index
    %c0_29 = arith.constant 0 : index
    %27 = vector.load %arg6[%c104, %c0_29] : memref<200x12xbf16, #tpu.memory_space<vmem>>, vector<8x12xbf16>
    tpu.vector_store %arg6[%c104, %c0_29], %26 {strides = array<i32>} : memref<200x12xbf16, #tpu.memory_space<vmem>>, vector<8x12xbf16>,
    %c0_30 = arith.constant 0 : index
    %c16_31 = arith.constant 16 : index
    %28 = vector.load %arg1[%c0_30, %c16_31] : memref<8x128xbf16, #tpu.memory_space<vmem>>, vector<8x12xbf16>
    %c112 = arith.constant 112 : index
    %c0_32 = arith.constant 0 : index
    %29 = vector.load %arg6[%c112, %c0_32] : memref<200x12xbf16, #tpu.memory_space<vmem>>, vector<8x12xbf16>
    tpu.vector_store %arg6[%c112, %c0_32], %28 {strides = array<i32>} : memref<200x12xbf16, #tpu.memory_space<vmem>>, vector<8x12xbf16>,
    %c0_33 = arith.constant 0 : index
    %c18 = arith.constant 18 : index
    %30 = vector.load %arg1[%c0_33, %c18] : memref<8x128xbf16, #tpu.memory_space<vmem>>, vector<8x12xbf16>
    %c120 = arith.constant 120 : index
    %c0_34 = arith.constant 0 : index
    %31 = vector.load %arg6[%c120, %c0_34] : memref<200x12xbf16, #tpu.memory_space<vmem>>, vector<8x12xbf16>
    tpu.vector_store %arg6[%c120, %c0_34], %30 {strides = array<i32>} : memref<200x12xbf16, #tpu.memory_space<vmem>>, vector<8x12xbf16>,
    %c0_35 = arith.constant 0 : index
    %c19 = arith.constant 19 : index
    %32 = vector.load %arg1[%c0_35, %c19] : memref<8x128xbf16, #tpu.memory_space<vmem>>, vector<8x12xbf16>
    %c128 = arith.constant 128 : index
    %c0_36 = arith.constant 0 : index
    %33 = vector.load %arg6[%c128, %c0_36] : memref<200x12xbf16, #tpu.memory_space<vmem>>, vector<8x12xbf16>
    tpu.vector_store %arg6[%c128, %c0_36], %32 {strides = array<i32>} : memref<200x12xbf16, #tpu.memory_space<vmem>>, vector<8x12xbf16>,
    %c0_37 = arith.constant 0 : index
    %c20 = arith.constant 20 : index
    %34 = vector.load %arg1[%c0_37, %c20] : memref<8x128xbf16, #tpu.memory_space<vmem>>, vector<8x12xbf16>
    %c136 = arith.constant 136 : index
    %c0_38 = arith.constant 0 : index
    %35 = vector.load %arg6[%c136, %c0_38] : memref<200x12xbf16, #tpu.memory_space<vmem>>, vector<8x12xbf16>
    tpu.vector_store %arg6[%c136, %c0_38], %34 {strides = array<i32>} : memref<200x12xbf16, #tpu.memory_space<vmem>>, vector<8x12xbf16>,
    %c0_39 = arith.constant 0 : index
    %c21 = arith.constant 21 : index
    %36 = vector.load %arg1[%c0_39, %c21] : memref<8x128xbf16, #tpu.memory_space<vmem>>, vector<8x12xbf16>
    %c144 = arith.constant 144 : index
    %c0_40 = arith.constant 0 : index
    %37 = vector.load %arg6[%c144, %c0_40] : memref<200x12xbf16, #tpu.memory_space<vmem>>, vector<8x12xbf16>
    tpu.vector_store %arg6[%c144, %c0_40], %36 {strides = array<i32>} : memref<200x12xbf16, #tpu.memory_space<vmem>>, vector<8x12xbf16>,
    %c0_41 = arith.constant 0 : index
    %c22 = arith.constant 22 : index
    %38 = vector.load %arg1[%c0_41, %c22] : memref<8x128xbf16, #tpu.memory_space<vmem>>, vector<8x12xbf16>
    %c152 = arith.constant 152 : index
    %c0_42 = arith.constant 0 : index
    %39 = vector.load %arg6[%c152, %c0_42] : memref<200x12xbf16, #tpu.memory_space<vmem>>, vector<8x12xbf16>
    tpu.vector_store %arg6[%c152, %c0_42], %38 {strides = array<i32>} : memref<200x12xbf16, #tpu.memory_space<vmem>>, vector<8x12xbf16>,
    %c0_43 = arith.constant 0 : index
    %c24_44 = arith.constant 24 : index
    %40 = vector.load %arg1[%c0_43, %c24_44] : memref<8x128xbf16, #tpu.memory_space<vmem>>, vector<8x12xbf16>
    %c160 = arith.constant 160 : index
    %c0_45 = arith.constant 0 : index
    %41 = vector.load %arg6[%c160, %c0_45] : memref<200x12xbf16, #tpu.memory_space<vmem>>, vector<8x12xbf16>
    tpu.vector_store %arg6[%c160, %c0_45], %40 {strides = array<i32>} : memref<200x12xbf16, #tpu.memory_space<vmem>>, vector<8x12xbf16>,
    %c0_46 = arith.constant 0 : index
    %c25 = arith.constant 25 : index
    %42 = vector.load %arg1[%c0_46, %c25] : memref<8x128xbf16, #tpu.memory_space<vmem>>, vector<8x12xbf16>
    %c168 = arith.constant 168 : index
    %c0_47 = arith.constant 0 : index
    %43 = vector.load %arg6[%c168, %c0_47] : memref<200x12xbf16, #tpu.memory_space<vmem>>, vector<8x12xbf16>
    tpu.vector_store %arg6[%c168, %c0_47], %42 {strides = array<i32>} : memref<200x12xbf16, #tpu.memory_space<vmem>>, vector<8x12xbf16>,
    %c0_48 = arith.constant 0 : index
    %c26 = arith.constant 26 : index
    %44 = vector.load %arg1[%c0_48, %c26] : memref<8x128xbf16, #tpu.memory_space<vmem>>, vector<8x12xbf16>
    %c176 = arith.constant 176 : index
    %c0_49 = arith.constant 0 : index
    %45 = vector.load %arg6[%c176, %c0_49] : memref<200x12xbf16, #tpu.memory_space<vmem>>, vector<8x12xbf16>
    tpu.vector_store %arg6[%c176, %c0_49], %44 {strides = array<i32>} : memref<200x12xbf16, #tpu.memory_space<vmem>>, vector<8x12xbf16>,
    %c0_50 = arith.constant 0 : index
    %c27 = arith.constant 27 : index
    %46 = vector.load %arg1[%c0_50, %c27] : memref<8x128xbf16, #tpu.memory_space<vmem>>, vector<8x12xbf16>
    %c184 = arith.constant 184 : index
    %c0_51 = arith.constant 0 : index
    %47 = vector.load %arg6[%c184, %c0_51] : memref<200x12xbf16, #tpu.memory_space<vmem>>, vector<8x12xbf16>
    tpu.vector_store %arg6[%c184, %c0_51], %46 {strides = array<i32>} : memref<200x12xbf16, #tpu.memory_space<vmem>>, vector<8x12xbf16>,
    %c0_52 = arith.constant 0 : index
    %c28 = arith.constant 28 : index
    %48 = vector.load %arg1[%c0_52, %c28] : memref<8x128xbf16, #tpu.memory_space<vmem>>, vector<8x12xbf16>
    %c192 = arith.constant 192 : index
    %c0_53 = arith.constant 0 : index
    %49 = vector.load %arg6[%c192, %c0_53] : memref<200x12xbf16, #tpu.memory_space<vmem>>, vector<8x12xbf16>
    tpu.vector_store %arg6[%c192, %c0_53], %48 {strides = array<i32>} : memref<200x12xbf16, #tpu.memory_space<vmem>>, vector<8x12xbf16>,
    %c0_54 = arith.constant 0 : index
    %c0_55 = arith.constant 0 : index
    %50 = vector.load %arg2[%c0_54, %c0_55] : memref<8x200xbf16, #tpu.memory_space<vmem>>, vector<8x200xbf16>
    %c0_56 = arith.constant 0 : index
    %c0_57 = arith.constant 0 : index
    %51 = vector.load %arg6[%c0_56, %c0_57] : memref<200x12xbf16, #tpu.memory_space<vmem>>, vector<200x12xbf16>
    %cst = arith.constant dense<0.000000e+00> : vector<8x12xf32>
    %52 = tpu.matmul %50, %51, %cst {dimension_numbers = #tpu.dot_dimension_numbers<[1], [0], [0], [1], [0, 0, 1, 1], [], []>} : vector<8x200xbf16>, vector<200x12xbf16>, vector<8x12xf32> -> vector<8x12xf32>
    %c0_58 = arith.constant 0 : index
    %c0_59 = arith.constant 0 : index
    %53 = vector.load %arg3[%c0_58, %c0_59] : memref<8x1xf32, #tpu.memory_space<vmem>>, vector<8x1xf32>
    %54 = vector.broadcast %53 : vector<8x1xf32> to vector<8x12xf32>
    %55 = arith.addf %52, %54 : vector<8x12xf32>
    %cst_60 = arith.constant 0.000000e+00 : f32
    %56 = vector.broadcast %cst_60 : f32 to vector<8x12xf32>
    %57 = arith.maximumf %55, %56 : vector<8x12xf32>
    %58 = vector.extract_strided_slice %57 {offsets = [0, 0], sizes = [8, 5], strides = [1, 1]} : vector<8x12xf32> to vector<8x5xf32>
    %59 = vector.extract_strided_slice %57 {offsets = [0, 1], sizes = [8, 5], strides = [1, 1]} : vector<8x12xf32> to vector<8x5xf32>
    %60 = arith.maximumf %58, %59 : vector<8x5xf32>
    %61 = vector.extract_strided_slice %57 {offsets = [0, 6], sizes = [8, 5], strides = [1, 1]} : vector<8x12xf32> to vector<8x5xf32>
    %62 = vector.extract_strided_slice %57 {offsets = [0, 7], sizes = [8, 5], strides = [1, 1]} : vector<8x12xf32> to vector<8x5xf32>
    %63 = arith.maximumf %61, %62 : vector<8x5xf32>
    %64 = arith.maximumf %60, %63 : vector<8x5xf32>
    %65 = arith.truncf %64 : vector<8x5xf32> to vector<8x5xbf16>
    %c0_61 = arith.constant 0 : index
    %c0_62 = arith.constant 0 : index
    %66 = vector.load %arg4[%c0_61, %c0_62] : memref<5x128xbf16, #tpu.memory_space<vmem>>, vector<5x128xbf16>
    %cst_63 = arith.constant dense<0.000000e+00> : vector<8x128xf32>
    %67 = tpu.matmul %65, %66, %cst_63 {dimension_numbers = #tpu.dot_dimension_numbers<[1], [0], [0], [1], [0, 0, 1, 1], [], []>} : vector<8x5xbf16>, vector<5x128xbf16>, vector<8x128xf32> -> vector<8x128xf32>
    %68 = arith.truncf %67 : vector<8x128xf32> to vector<8x128xbf16>
    %c0_64 = arith.constant 0 : index
    %c0_65 = arith.constant 0 : index
    %69 = vector.load %arg5[%c0_64, %c0_65] : memref<8x128xbf16, #tpu.memory_space<vmem>>, vector<8x128xbf16>
    tpu.vector_store %arg5[%c0_64, %c0_65], %68 {strides = array<i32>} : memref<8x128xbf16, #tpu.memory_space<vmem>>, vector<8x128xbf16>,
    return
  }
  func.func @transform_0(%arg0: i32) -> (i32, i32) {
    %c0_i32 = arith.constant 0 : i32
    %c0_i32_0 = arith.constant 0 : i32
    return %c0_i32, %arg0 : i32, i32
  }
  func.func @transform_1(%arg0: i32) -> (i32, i32) {
    %c0_i32 = arith.constant 0 : i32
    %c0_i32_0 = arith.constant 0 : i32
    %c0_i32_1 = arith.constant 0 : i32
    return %c0_i32, %c0_i32_0 : i32, i32
  }
  func.func @transform_2(%arg0: i32) -> (i32, i32) {
    %c0_i32 = arith.constant 0 : i32
    %c0_i32_0 = arith.constant 0 : i32
    %c0_i32_1 = arith.constant 0 : i32
    return %c0_i32, %c0_i32_0 : i32, i32
  }
  func.func @transform_3(%arg0: i32) -> (i32, i32) {
    %c0_i32 = arith.constant 0 : i32
    %c0_i32_0 = arith.constant 0 : i32
    %c0_i32_1 = arith.constant 0 : i32
    return %c0_i32, %c0_i32_0 : i32, i32
  }
  func.func @transform_4(%arg0: i32) -> (i32, i32) {
    %c0_i32 = arith.constant 0 : i32
    %c0_i32_0 = arith.constant 0 : i32
    return %c0_i32, %arg0 : i32, i32
  }
}

module attributes {stable_mosaic.version = 11 : i64} {
  func.func @_conv_stage_kernel(%arg0: i32, %arg1: memref<8x256xbf16, #tpu.memory_space<vmem>>, %arg2: memref<8x200xbf16, #tpu.memory_space<vmem>>, %arg3: memref<8x1xf32, #tpu.memory_space<vmem>>, %arg4: memref<83x128xbf16, #tpu.memory_space<vmem>>, %arg5: memref<8x128xbf16, #tpu.memory_space<vmem>>, %arg6: memref<200x96xbf16, #tpu.memory_space<vmem>>) attributes {dimension_semantics = [#tpu.dimension_semantics<parallel>], iteration_bounds = array<i64: 2>, scalar_prefetch = 0 : i64, scratch_operands = 1 : i64, tpu.core_type = #tpu.core_type<tc>, window_params = [{transform_indices = @transform_0, window_bounds = array<i64: 8, 256>}, {pipeline_mode = #tpu.pipeline_mode<synchronous>, transform_indices = @transform_1, window_bounds = array<i64: 8, 200>}, {pipeline_mode = #tpu.pipeline_mode<synchronous>, transform_indices = @transform_2, window_bounds = array<i64: 8, 1>}, {pipeline_mode = #tpu.pipeline_mode<synchronous>, transform_indices = @transform_3, window_bounds = array<i64: 83, 128>}, {transform_indices = @transform_4, window_bounds = array<i64: 8, 128>}]} {
    %c0 = arith.constant 0 : index
    %c0_0 = arith.constant 0 : index
    %0 = vector.load %arg1[%c0, %c0_0] : memref<8x256xbf16, #tpu.memory_space<vmem>>, vector<8x96xbf16>
    %c0_1 = arith.constant 0 : index
    %c0_2 = arith.constant 0 : index
    %1 = vector.load %arg6[%c0_1, %c0_2] : memref<200x96xbf16, #tpu.memory_space<vmem>>, vector<8x96xbf16>
    tpu.vector_store %arg6[%c0_1, %c0_2], %0 {strides = array<i32>} : memref<200x96xbf16, #tpu.memory_space<vmem>>, vector<8x96xbf16>,
    %c0_3 = arith.constant 0 : index
    %c1 = arith.constant 1 : index
    %2 = vector.load %arg1[%c0_3, %c1] : memref<8x256xbf16, #tpu.memory_space<vmem>>, vector<8x96xbf16>
    %c8 = arith.constant 8 : index
    %c0_4 = arith.constant 0 : index
    %3 = vector.load %arg6[%c8, %c0_4] : memref<200x96xbf16, #tpu.memory_space<vmem>>, vector<8x96xbf16>
    tpu.vector_store %arg6[%c8, %c0_4], %2 {strides = array<i32>} : memref<200x96xbf16, #tpu.memory_space<vmem>>, vector<8x96xbf16>,
    %c0_5 = arith.constant 0 : index
    %c2 = arith.constant 2 : index
    %4 = vector.load %arg1[%c0_5, %c2] : memref<8x256xbf16, #tpu.memory_space<vmem>>, vector<8x96xbf16>
    %c16 = arith.constant 16 : index
    %c0_6 = arith.constant 0 : index
    %5 = vector.load %arg6[%c16, %c0_6] : memref<200x96xbf16, #tpu.memory_space<vmem>>, vector<8x96xbf16>
    tpu.vector_store %arg6[%c16, %c0_6], %4 {strides = array<i32>} : memref<200x96xbf16, #tpu.memory_space<vmem>>, vector<8x96xbf16>,
    %c0_7 = arith.constant 0 : index
    %c3 = arith.constant 3 : index
    %6 = vector.load %arg1[%c0_7, %c3] : memref<8x256xbf16, #tpu.memory_space<vmem>>, vector<8x96xbf16>
    %c24 = arith.constant 24 : index
    %c0_8 = arith.constant 0 : index
    %7 = vector.load %arg6[%c24, %c0_8] : memref<200x96xbf16, #tpu.memory_space<vmem>>, vector<8x96xbf16>
    tpu.vector_store %arg6[%c24, %c0_8], %6 {strides = array<i32>} : memref<200x96xbf16, #tpu.memory_space<vmem>>, vector<8x96xbf16>,
    %c0_9 = arith.constant 0 : index
    %c4 = arith.constant 4 : index
    %8 = vector.load %arg1[%c0_9, %c4] : memref<8x256xbf16, #tpu.memory_space<vmem>>, vector<8x96xbf16>
    %c32 = arith.constant 32 : index
    %c0_10 = arith.constant 0 : index
    %9 = vector.load %arg6[%c32, %c0_10] : memref<200x96xbf16, #tpu.memory_space<vmem>>, vector<8x96xbf16>
    tpu.vector_store %arg6[%c32, %c0_10], %8 {strides = array<i32>} : memref<200x96xbf16, #tpu.memory_space<vmem>>, vector<8x96xbf16>,
    %c0_11 = arith.constant 0 : index
    %c12 = arith.constant 12 : index
    %10 = vector.load %arg1[%c0_11, %c12] : memref<8x256xbf16, #tpu.memory_space<vmem>>, vector<8x96xbf16>
    %c40 = arith.constant 40 : index
    %c0_12 = arith.constant 0 : index
    %11 = vector.load %arg6[%c40, %c0_12] : memref<200x96xbf16, #tpu.memory_space<vmem>>, vector<8x96xbf16>
    tpu.vector_store %arg6[%c40, %c0_12], %10 {strides = array<i32>} : memref<200x96xbf16, #tpu.memory_space<vmem>>, vector<8x96xbf16>,
    %c0_13 = arith.constant 0 : index
    %c13 = arith.constant 13 : index
    %12 = vector.load %arg1[%c0_13, %c13] : memref<8x256xbf16, #tpu.memory_space<vmem>>, vector<8x96xbf16>
    %c48 = arith.constant 48 : index
    %c0_14 = arith.constant 0 : index
    %13 = vector.load %arg6[%c48, %c0_14] : memref<200x96xbf16, #tpu.memory_space<vmem>>, vector<8x96xbf16>
    tpu.vector_store %arg6[%c48, %c0_14], %12 {strides = array<i32>} : memref<200x96xbf16, #tpu.memory_space<vmem>>, vector<8x96xbf16>,
    %c0_15 = arith.constant 0 : index
    %c14 = arith.constant 14 : index
    %14 = vector.load %arg1[%c0_15, %c14] : memref<8x256xbf16, #tpu.memory_space<vmem>>, vector<8x96xbf16>
    %c56 = arith.constant 56 : index
    %c0_16 = arith.constant 0 : index
    %15 = vector.load %arg6[%c56, %c0_16] : memref<200x96xbf16, #tpu.memory_space<vmem>>, vector<8x96xbf16>
    tpu.vector_store %arg6[%c56, %c0_16], %14 {strides = array<i32>} : memref<200x96xbf16, #tpu.memory_space<vmem>>, vector<8x96xbf16>,
    %c0_17 = arith.constant 0 : index
    %c15 = arith.constant 15 : index
    %16 = vector.load %arg1[%c0_17, %c15] : memref<8x256xbf16, #tpu.memory_space<vmem>>, vector<8x96xbf16>
    %c64 = arith.constant 64 : index
    %c0_18 = arith.constant 0 : index
    %17 = vector.load %arg6[%c64, %c0_18] : memref<200x96xbf16, #tpu.memory_space<vmem>>, vector<8x96xbf16>
    tpu.vector_store %arg6[%c64, %c0_18], %16 {strides = array<i32>} : memref<200x96xbf16, #tpu.memory_space<vmem>>, vector<8x96xbf16>,
    %c0_19 = arith.constant 0 : index
    %c16_20 = arith.constant 16 : index
    %18 = vector.load %arg1[%c0_19, %c16_20] : memref<8x256xbf16, #tpu.memory_space<vmem>>, vector<8x96xbf16>
    %c72 = arith.constant 72 : index
    %c0_21 = arith.constant 0 : index
    %19 = vector.load %arg6[%c72, %c0_21] : memref<200x96xbf16, #tpu.memory_space<vmem>>, vector<8x96xbf16>
    tpu.vector_store %arg6[%c72, %c0_21], %18 {strides = array<i32>} : memref<200x96xbf16, #tpu.memory_space<vmem>>, vector<8x96xbf16>,
    %c0_22 = arith.constant 0 : index
    %c24_23 = arith.constant 24 : index
    %20 = vector.load %arg1[%c0_22, %c24_23] : memref<8x256xbf16, #tpu.memory_space<vmem>>, vector<8x96xbf16>
    %c80 = arith.constant 80 : index
    %c0_24 = arith.constant 0 : index
    %21 = vector.load %arg6[%c80, %c0_24] : memref<200x96xbf16, #tpu.memory_space<vmem>>, vector<8x96xbf16>
    tpu.vector_store %arg6[%c80, %c0_24], %20 {strides = array<i32>} : memref<200x96xbf16, #tpu.memory_space<vmem>>, vector<8x96xbf16>,
    %c0_25 = arith.constant 0 : index
    %c25 = arith.constant 25 : index
    %22 = vector.load %arg1[%c0_25, %c25] : memref<8x256xbf16, #tpu.memory_space<vmem>>, vector<8x96xbf16>
    %c88 = arith.constant 88 : index
    %c0_26 = arith.constant 0 : index
    %23 = vector.load %arg6[%c88, %c0_26] : memref<200x96xbf16, #tpu.memory_space<vmem>>, vector<8x96xbf16>
    tpu.vector_store %arg6[%c88, %c0_26], %22 {strides = array<i32>} : memref<200x96xbf16, #tpu.memory_space<vmem>>, vector<8x96xbf16>,
    %c0_27 = arith.constant 0 : index
    %c26 = arith.constant 26 : index
    %24 = vector.load %arg1[%c0_27, %c26] : memref<8x256xbf16, #tpu.memory_space<vmem>>, vector<8x96xbf16>
    %c96 = arith.constant 96 : index
    %c0_28 = arith.constant 0 : index
    %25 = vector.load %arg6[%c96, %c0_28] : memref<200x96xbf16, #tpu.memory_space<vmem>>, vector<8x96xbf16>
    tpu.vector_store %arg6[%c96, %c0_28], %24 {strides = array<i32>} : memref<200x96xbf16, #tpu.memory_space<vmem>>, vector<8x96xbf16>,
    %c0_29 = arith.constant 0 : index
    %c27 = arith.constant 27 : index
    %26 = vector.load %arg1[%c0_29, %c27] : memref<8x256xbf16, #tpu.memory_space<vmem>>, vector<8x96xbf16>
    %c104 = arith.constant 104 : index
    %c0_30 = arith.constant 0 : index
    %27 = vector.load %arg6[%c104, %c0_30] : memref<200x96xbf16, #tpu.memory_space<vmem>>, vector<8x96xbf16>
    tpu.vector_store %arg6[%c104, %c0_30], %26 {strides = array<i32>} : memref<200x96xbf16, #tpu.memory_space<vmem>>, vector<8x96xbf16>,
    %c0_31 = arith.constant 0 : index
    %c28 = arith.constant 28 : index
    %28 = vector.load %arg1[%c0_31, %c28] : memref<8x256xbf16, #tpu.memory_space<vmem>>, vector<8x96xbf16>
    %c112 = arith.constant 112 : index
    %c0_32 = arith.constant 0 : index
    %29 = vector.load %arg6[%c112, %c0_32] : memref<200x96xbf16, #tpu.memory_space<vmem>>, vector<8x96xbf16>
    tpu.vector_store %arg6[%c112, %c0_32], %28 {strides = array<i32>} : memref<200x96xbf16, #tpu.memory_space<vmem>>, vector<8x96xbf16>,
    %c0_33 = arith.constant 0 : index
    %c36 = arith.constant 36 : index
    %30 = vector.load %arg1[%c0_33, %c36] : memref<8x256xbf16, #tpu.memory_space<vmem>>, vector<8x96xbf16>
    %c120 = arith.constant 120 : index
    %c0_34 = arith.constant 0 : index
    %31 = vector.load %arg6[%c120, %c0_34] : memref<200x96xbf16, #tpu.memory_space<vmem>>, vector<8x96xbf16>
    tpu.vector_store %arg6[%c120, %c0_34], %30 {strides = array<i32>} : memref<200x96xbf16, #tpu.memory_space<vmem>>, vector<8x96xbf16>,
    %c0_35 = arith.constant 0 : index
    %c37 = arith.constant 37 : index
    %32 = vector.load %arg1[%c0_35, %c37] : memref<8x256xbf16, #tpu.memory_space<vmem>>, vector<8x96xbf16>
    %c128 = arith.constant 128 : index
    %c0_36 = arith.constant 0 : index
    %33 = vector.load %arg6[%c128, %c0_36] : memref<200x96xbf16, #tpu.memory_space<vmem>>, vector<8x96xbf16>
    tpu.vector_store %arg6[%c128, %c0_36], %32 {strides = array<i32>} : memref<200x96xbf16, #tpu.memory_space<vmem>>, vector<8x96xbf16>,
    %c0_37 = arith.constant 0 : index
    %c38 = arith.constant 38 : index
    %34 = vector.load %arg1[%c0_37, %c38] : memref<8x256xbf16, #tpu.memory_space<vmem>>, vector<8x96xbf16>
    %c136 = arith.constant 136 : index
    %c0_38 = arith.constant 0 : index
    %35 = vector.load %arg6[%c136, %c0_38] : memref<200x96xbf16, #tpu.memory_space<vmem>>, vector<8x96xbf16>
    tpu.vector_store %arg6[%c136, %c0_38], %34 {strides = array<i32>} : memref<200x96xbf16, #tpu.memory_space<vmem>>, vector<8x96xbf16>,
    %c0_39 = arith.constant 0 : index
    %c39 = arith.constant 39 : index
    %36 = vector.load %arg1[%c0_39, %c39] : memref<8x256xbf16, #tpu.memory_space<vmem>>, vector<8x96xbf16>
    %c144 = arith.constant 144 : index
    %c0_40 = arith.constant 0 : index
    %37 = vector.load %arg6[%c144, %c0_40] : memref<200x96xbf16, #tpu.memory_space<vmem>>, vector<8x96xbf16>
    tpu.vector_store %arg6[%c144, %c0_40], %36 {strides = array<i32>} : memref<200x96xbf16, #tpu.memory_space<vmem>>, vector<8x96xbf16>,
    %c0_41 = arith.constant 0 : index
    %c40_42 = arith.constant 40 : index
    %38 = vector.load %arg1[%c0_41, %c40_42] : memref<8x256xbf16, #tpu.memory_space<vmem>>, vector<8x96xbf16>
    %c152 = arith.constant 152 : index
    %c0_43 = arith.constant 0 : index
    %39 = vector.load %arg6[%c152, %c0_43] : memref<200x96xbf16, #tpu.memory_space<vmem>>, vector<8x96xbf16>
    tpu.vector_store %arg6[%c152, %c0_43], %38 {strides = array<i32>} : memref<200x96xbf16, #tpu.memory_space<vmem>>, vector<8x96xbf16>,
    %c0_44 = arith.constant 0 : index
    %c48_45 = arith.constant 48 : index
    %40 = vector.load %arg1[%c0_44, %c48_45] : memref<8x256xbf16, #tpu.memory_space<vmem>>, vector<8x96xbf16>
    %c160 = arith.constant 160 : index
    %c0_46 = arith.constant 0 : index
    %41 = vector.load %arg6[%c160, %c0_46] : memref<200x96xbf16, #tpu.memory_space<vmem>>, vector<8x96xbf16>
    tpu.vector_store %arg6[%c160, %c0_46], %40 {strides = array<i32>} : memref<200x96xbf16, #tpu.memory_space<vmem>>, vector<8x96xbf16>,
    %c0_47 = arith.constant 0 : index
    %c49 = arith.constant 49 : index
    %42 = vector.load %arg1[%c0_47, %c49] : memref<8x256xbf16, #tpu.memory_space<vmem>>, vector<8x96xbf16>
    %c168 = arith.constant 168 : index
    %c0_48 = arith.constant 0 : index
    %43 = vector.load %arg6[%c168, %c0_48] : memref<200x96xbf16, #tpu.memory_space<vmem>>, vector<8x96xbf16>
    tpu.vector_store %arg6[%c168, %c0_48], %42 {strides = array<i32>} : memref<200x96xbf16, #tpu.memory_space<vmem>>, vector<8x96xbf16>,
    %c0_49 = arith.constant 0 : index
    %c50 = arith.constant 50 : index
    %44 = vector.load %arg1[%c0_49, %c50] : memref<8x256xbf16, #tpu.memory_space<vmem>>, vector<8x96xbf16>
    %c176 = arith.constant 176 : index
    %c0_50 = arith.constant 0 : index
    %45 = vector.load %arg6[%c176, %c0_50] : memref<200x96xbf16, #tpu.memory_space<vmem>>, vector<8x96xbf16>
    tpu.vector_store %arg6[%c176, %c0_50], %44 {strides = array<i32>} : memref<200x96xbf16, #tpu.memory_space<vmem>>, vector<8x96xbf16>,
    %c0_51 = arith.constant 0 : index
    %c51 = arith.constant 51 : index
    %46 = vector.load %arg1[%c0_51, %c51] : memref<8x256xbf16, #tpu.memory_space<vmem>>, vector<8x96xbf16>
    %c184 = arith.constant 184 : index
    %c0_52 = arith.constant 0 : index
    %47 = vector.load %arg6[%c184, %c0_52] : memref<200x96xbf16, #tpu.memory_space<vmem>>, vector<8x96xbf16>
    tpu.vector_store %arg6[%c184, %c0_52], %46 {strides = array<i32>} : memref<200x96xbf16, #tpu.memory_space<vmem>>, vector<8x96xbf16>,
    %c0_53 = arith.constant 0 : index
    %c52 = arith.constant 52 : index
    %48 = vector.load %arg1[%c0_53, %c52] : memref<8x256xbf16, #tpu.memory_space<vmem>>, vector<8x96xbf16>
    %c192 = arith.constant 192 : index
    %c0_54 = arith.constant 0 : index
    %49 = vector.load %arg6[%c192, %c0_54] : memref<200x96xbf16, #tpu.memory_space<vmem>>, vector<8x96xbf16>
    tpu.vector_store %arg6[%c192, %c0_54], %48 {strides = array<i32>} : memref<200x96xbf16, #tpu.memory_space<vmem>>, vector<8x96xbf16>,
    %c0_55 = arith.constant 0 : index
    %c0_56 = arith.constant 0 : index
    %50 = vector.load %arg2[%c0_55, %c0_56] : memref<8x200xbf16, #tpu.memory_space<vmem>>, vector<8x200xbf16>
    %c0_57 = arith.constant 0 : index
    %c0_58 = arith.constant 0 : index
    %51 = vector.load %arg6[%c0_57, %c0_58] : memref<200x96xbf16, #tpu.memory_space<vmem>>, vector<200x96xbf16>
    %cst = arith.constant dense<0.000000e+00> : vector<8x96xf32>
    %52 = tpu.matmul %50, %51, %cst {dimension_numbers = #tpu.dot_dimension_numbers<[1], [0], [0], [1], [0, 0, 1, 1], [], []>} : vector<8x200xbf16>, vector<200x96xbf16>, vector<8x96xf32> -> vector<8x96xf32>
    %c0_59 = arith.constant 0 : index
    %c0_60 = arith.constant 0 : index
    %53 = vector.load %arg3[%c0_59, %c0_60] : memref<8x1xf32, #tpu.memory_space<vmem>>, vector<8x1xf32>
    %54 = vector.broadcast %53 : vector<8x1xf32> to vector<8x96xf32>
    %55 = arith.addf %52, %54 : vector<8x96xf32>
    %cst_61 = arith.constant 0.000000e+00 : f32
    %56 = vector.broadcast %cst_61 : f32 to vector<8x96xf32>
    %57 = arith.maximumf %55, %56 : vector<8x96xf32>
    %58 = vector.extract_strided_slice %57 {offsets = [0, 0], sizes = [8, 83], strides = [1, 1]} : vector<8x96xf32> to vector<8x83xf32>
    %59 = vector.extract_strided_slice %57 {offsets = [0, 1], sizes = [8, 83], strides = [1, 1]} : vector<8x96xf32> to vector<8x83xf32>
    %60 = arith.maximumf %58, %59 : vector<8x83xf32>
    %61 = vector.extract_strided_slice %57 {offsets = [0, 12], sizes = [8, 83], strides = [1, 1]} : vector<8x96xf32> to vector<8x83xf32>
    %62 = vector.extract_strided_slice %57 {offsets = [0, 13], sizes = [8, 83], strides = [1, 1]} : vector<8x96xf32> to vector<8x83xf32>
    %63 = arith.maximumf %61, %62 : vector<8x83xf32>
    %64 = arith.maximumf %60, %63 : vector<8x83xf32>
    %65 = arith.truncf %64 : vector<8x83xf32> to vector<8x83xbf16>
    %c0_62 = arith.constant 0 : index
    %c0_63 = arith.constant 0 : index
    %66 = vector.load %arg4[%c0_62, %c0_63] : memref<83x128xbf16, #tpu.memory_space<vmem>>, vector<83x128xbf16>
    %cst_64 = arith.constant dense<0.000000e+00> : vector<8x128xf32>
    %67 = tpu.matmul %65, %66, %cst_64 {dimension_numbers = #tpu.dot_dimension_numbers<[1], [0], [0], [1], [0, 0, 1, 1], [], []>} : vector<8x83xbf16>, vector<83x128xbf16>, vector<8x128xf32> -> vector<8x128xf32>
    %68 = arith.truncf %67 : vector<8x128xf32> to vector<8x128xbf16>
    %c0_65 = arith.constant 0 : index
    %c0_66 = arith.constant 0 : index
    %69 = vector.load %arg5[%c0_65, %c0_66] : memref<8x128xbf16, #tpu.memory_space<vmem>>, vector<8x128xbf16>
    tpu.vector_store %arg5[%c0_65, %c0_66], %68 {strides = array<i32>} : memref<8x128xbf16, #tpu.memory_space<vmem>>, vector<8x128xbf16>,
    return
  }
  func.func @transform_0(%arg0: i32) -> (i32, i32) {
    %c0_i32 = arith.constant 0 : i32
    %c0_i32_0 = arith.constant 0 : i32
    return %c0_i32, %arg0 : i32, i32
  }
  func.func @transform_1(%arg0: i32) -> (i32, i32) {
    %c0_i32 = arith.constant 0 : i32
    %c0_i32_0 = arith.constant 0 : i32
    %c0_i32_1 = arith.constant 0 : i32
    return %c0_i32, %c0_i32_0 : i32, i32
  }
  func.func @transform_2(%arg0: i32) -> (i32, i32) {
    %c0_i32 = arith.constant 0 : i32
    %c0_i32_0 = arith.constant 0 : i32
    %c0_i32_1 = arith.constant 0 : i32
    return %c0_i32, %c0_i32_0 : i32, i32
  }
  func.func @transform_3(%arg0: i32) -> (i32, i32) {
    %c0_i32 = arith.constant 0 : i32
    %c0_i32_0 = arith.constant 0 : i32
    %c0_i32_1 = arith.constant 0 : i32
    return %c0_i32, %c0_i32_0 : i32, i32
  }
  func.func @transform_4(%arg0: i32) -> (i32, i32) {
    %c0_i32 = arith.constant 0 : i32
    %c0_i32_0 = arith.constant 0 : i32
    return %c0_i32, %arg0 : i32, i32
  }
}

module attributes {stable_mosaic.version = 11 : i64} {
  func.func @_conv_stage_kernel(%arg0: i32, %arg1: memref<8x640xbf16, #tpu.memory_space<vmem>>, %arg2: memref<8x648xbf16, #tpu.memory_space<vmem>>, %arg3: memref<8x1xf32, #tpu.memory_space<vmem>>, %arg4: memref<359x256xbf16, #tpu.memory_space<vmem>>, %arg5: memref<8x256xbf16, #tpu.memory_space<vmem>>, %arg6: memref<648x384xbf16, #tpu.memory_space<vmem>>) attributes {dimension_semantics = [#tpu.dimension_semantics<parallel>], iteration_bounds = array<i64: 2>, scalar_prefetch = 0 : i64, scratch_operands = 1 : i64, tpu.core_type = #tpu.core_type<tc>, window_params = [{transform_indices = @transform_0, window_bounds = array<i64: 8, 640>}, {pipeline_mode = #tpu.pipeline_mode<synchronous>, transform_indices = @transform_1, window_bounds = array<i64: 8, 648>}, {pipeline_mode = #tpu.pipeline_mode<synchronous>, transform_indices = @transform_2, window_bounds = array<i64: 8, 1>}, {pipeline_mode = #tpu.pipeline_mode<synchronous>, transform_indices = @transform_3, window_bounds = array<i64: 359, 256>}, {transform_indices = @transform_4, window_bounds = array<i64: 8, 256>}]} {
    %c0 = arith.constant 0 : index
    %c0_0 = arith.constant 0 : index
    %0 = vector.load %arg1[%c0, %c0_0] : memref<8x640xbf16, #tpu.memory_space<vmem>>, vector<8x384xbf16>
    %c0_1 = arith.constant 0 : index
    %c0_2 = arith.constant 0 : index
    %1 = vector.load %arg6[%c0_1, %c0_2] : memref<648x384xbf16, #tpu.memory_space<vmem>>, vector<8x384xbf16>
    tpu.vector_store %arg6[%c0_1, %c0_2], %0 {strides = array<i32>} : memref<648x384xbf16, #tpu.memory_space<vmem>>, vector<8x384xbf16>,
    %c0_3 = arith.constant 0 : index
    %c1 = arith.constant 1 : index
    %2 = vector.load %arg1[%c0_3, %c1] : memref<8x640xbf16, #tpu.memory_space<vmem>>, vector<8x384xbf16>
    %c8 = arith.constant 8 : index
    %c0_4 = arith.constant 0 : index
    %3 = vector.load %arg6[%c8, %c0_4] : memref<648x384xbf16, #tpu.memory_space<vmem>>, vector<8x384xbf16>
    tpu.vector_store %arg6[%c8, %c0_4], %2 {strides = array<i32>} : memref<648x384xbf16, #tpu.memory_space<vmem>>, vector<8x384xbf16>,
    %c0_5 = arith.constant 0 : index
    %c2 = arith.constant 2 : index
    %4 = vector.load %arg1[%c0_5, %c2] : memref<8x640xbf16, #tpu.memory_space<vmem>>, vector<8x384xbf16>
    %c16 = arith.constant 16 : index
    %c0_6 = arith.constant 0 : index
    %5 = vector.load %arg6[%c16, %c0_6] : memref<648x384xbf16, #tpu.memory_space<vmem>>, vector<8x384xbf16>
    tpu.vector_store %arg6[%c16, %c0_6], %4 {strides = array<i32>} : memref<648x384xbf16, #tpu.memory_space<vmem>>, vector<8x384xbf16>,
    %c0_7 = arith.constant 0 : index
    %c3 = arith.constant 3 : index
    %6 = vector.load %arg1[%c0_7, %c3] : memref<8x640xbf16, #tpu.memory_space<vmem>>, vector<8x384xbf16>
    %c24 = arith.constant 24 : index
    %c0_8 = arith.constant 0 : index
    %7 = vector.load %arg6[%c24, %c0_8] : memref<648x384xbf16, #tpu.memory_space<vmem>>, vector<8x384xbf16>
    tpu.vector_store %arg6[%c24, %c0_8], %6 {strides = array<i32>} : memref<648x384xbf16, #tpu.memory_space<vmem>>, vector<8x384xbf16>,
    %c0_9 = arith.constant 0 : index
    %c4 = arith.constant 4 : index
    %8 = vector.load %arg1[%c0_9, %c4] : memref<8x640xbf16, #tpu.memory_space<vmem>>, vector<8x384xbf16>
    %c32 = arith.constant 32 : index
    %c0_10 = arith.constant 0 : index
    %9 = vector.load %arg6[%c32, %c0_10] : memref<648x384xbf16, #tpu.memory_space<vmem>>, vector<8x384xbf16>
    tpu.vector_store %arg6[%c32, %c0_10], %8 {strides = array<i32>} : memref<648x384xbf16, #tpu.memory_space<vmem>>, vector<8x384xbf16>,
    %c0_11 = arith.constant 0 : index
    %c5 = arith.constant 5 : index
    %10 = vector.load %arg1[%c0_11, %c5] : memref<8x640xbf16, #tpu.memory_space<vmem>>, vector<8x384xbf16>
    %c40 = arith.constant 40 : index
    %c0_12 = arith.constant 0 : index
    %11 = vector.load %arg6[%c40, %c0_12] : memref<648x384xbf16, #tpu.memory_space<vmem>>, vector<8x384xbf16>
    tpu.vector_store %arg6[%c40, %c0_12], %10 {strides = array<i32>} : memref<648x384xbf16, #tpu.memory_space<vmem>>, vector<8x384xbf16>,
    %c0_13 = arith.constant 0 : index
    %c6 = arith.constant 6 : index
    %12 = vector.load %arg1[%c0_13, %c6] : memref<8x640xbf16, #tpu.memory_space<vmem>>, vector<8x384xbf16>
    %c48 = arith.constant 48 : index
    %c0_14 = arith.constant 0 : index
    %13 = vector.load %arg6[%c48, %c0_14] : memref<648x384xbf16, #tpu.memory_space<vmem>>, vector<8x384xbf16>
    tpu.vector_store %arg6[%c48, %c0_14], %12 {strides = array<i32>} : memref<648x384xbf16, #tpu.memory_space<vmem>>, vector<8x384xbf16>,
    %c0_15 = arith.constant 0 : index
    %c7 = arith.constant 7 : index
    %14 = vector.load %arg1[%c0_15, %c7] : memref<8x640xbf16, #tpu.memory_space<vmem>>, vector<8x384xbf16>
    %c56 = arith.constant 56 : index
    %c0_16 = arith.constant 0 : index
    %15 = vector.load %arg6[%c56, %c0_16] : memref<648x384xbf16, #tpu.memory_space<vmem>>, vector<8x384xbf16>
    tpu.vector_store %arg6[%c56, %c0_16], %14 {strides = array<i32>} : memref<648x384xbf16, #tpu.memory_space<vmem>>, vector<8x384xbf16>,
    %c0_17 = arith.constant 0 : index
    %c8_18 = arith.constant 8 : index
    %16 = vector.load %arg1[%c0_17, %c8_18] : memref<8x640xbf16, #tpu.memory_space<vmem>>, vector<8x384xbf16>
    %c64 = arith.constant 64 : index
    %c0_19 = arith.constant 0 : index
    %17 = vector.load %arg6[%c64, %c0_19] : memref<648x384xbf16, #tpu.memory_space<vmem>>, vector<8x384xbf16>
    tpu.vector_store %arg6[%c64, %c0_19], %16 {strides = array<i32>} : memref<648x384xbf16, #tpu.memory_space<vmem>>, vector<8x384xbf16>,
    %c0_20 = arith.constant 0 : index
    %c24_21 = arith.constant 24 : index
    %18 = vector.load %arg1[%c0_20, %c24_21] : memref<8x640xbf16, #tpu.memory_space<vmem>>, vector<8x384xbf16>
    %c72 = arith.constant 72 : index
    %c0_22 = arith.constant 0 : index
    %19 = vector.load %arg6[%c72, %c0_22] : memref<648x384xbf16, #tpu.memory_space<vmem>>, vector<8x384xbf16>
    tpu.vector_store %arg6[%c72, %c0_22], %18 {strides = array<i32>} : memref<648x384xbf16, #tpu.memory_space<vmem>>, vector<8x384xbf16>,
    %c0_23 = arith.constant 0 : index
    %c25 = arith.constant 25 : index
    %20 = vector.load %arg1[%c0_23, %c25] : memref<8x640xbf16, #tpu.memory_space<vmem>>, vector<8x384xbf16>
    %c80 = arith.constant 80 : index
    %c0_24 = arith.constant 0 : index
    %21 = vector.load %arg6[%c80, %c0_24] : memref<648x384xbf16, #tpu.memory_space<vmem>>, vector<8x384xbf16>
    tpu.vector_store %arg6[%c80, %c0_24], %20 {strides = array<i32>} : memref<648x384xbf16, #tpu.memory_space<vmem>>, vector<8x384xbf16>,
    %c0_25 = arith.constant 0 : index
    %c26 = arith.constant 26 : index
    %22 = vector.load %arg1[%c0_25, %c26] : memref<8x640xbf16, #tpu.memory_space<vmem>>, vector<8x384xbf16>
    %c88 = arith.constant 88 : index
    %c0_26 = arith.constant 0 : index
    %23 = vector.load %arg6[%c88, %c0_26] : memref<648x384xbf16, #tpu.memory_space<vmem>>, vector<8x384xbf16>
    tpu.vector_store %arg6[%c88, %c0_26], %22 {strides = array<i32>} : memref<648x384xbf16, #tpu.memory_space<vmem>>, vector<8x384xbf16>,
    %c0_27 = arith.constant 0 : index
    %c27 = arith.constant 27 : index
    %24 = vector.load %arg1[%c0_27, %c27] : memref<8x640xbf16, #tpu.memory_space<vmem>>, vector<8x384xbf16>
    %c96 = arith.constant 96 : index
    %c0_28 = arith.constant 0 : index
    %25 = vector.load %arg6[%c96, %c0_28] : memref<648x384xbf16, #tpu.memory_space<vmem>>, vector<8x384xbf16>
    tpu.vector_store %arg6[%c96, %c0_28], %24 {strides = array<i32>} : memref<648x384xbf16, #tpu.memory_space<vmem>>, vector<8x384xbf16>,
    %c0_29 = arith.constant 0 : index
    %c28 = arith.constant 28 : index
    %26 = vector.load %arg1[%c0_29, %c28] : memref<8x640xbf16, #tpu.memory_space<vmem>>, vector<8x384xbf16>
    %c104 = arith.constant 104 : index
    %c0_30 = arith.constant 0 : index
    %27 = vector.load %arg6[%c104, %c0_30] : memref<648x384xbf16, #tpu.memory_space<vmem>>, vector<8x384xbf16>
    tpu.vector_store %arg6[%c104, %c0_30], %26 {strides = array<i32>} : memref<648x384xbf16, #tpu.memory_space<vmem>>, vector<8x384xbf16>,
    %c0_31 = arith.constant 0 : index
    %c29 = arith.constant 29 : index
    %28 = vector.load %arg1[%c0_31, %c29] : memref<8x640xbf16, #tpu.memory_space<vmem>>, vector<8x384xbf16>
    %c112 = arith.constant 112 : index
    %c0_32 = arith.constant 0 : index
    %29 = vector.load %arg6[%c112, %c0_32] : memref<648x384xbf16, #tpu.memory_space<vmem>>, vector<8x384xbf16>
    tpu.vector_store %arg6[%c112, %c0_32], %28 {strides = array<i32>} : memref<648x384xbf16, #tpu.memory_space<vmem>>, vector<8x384xbf16>,
    %c0_33 = arith.constant 0 : index
    %c30 = arith.constant 30 : index
    %30 = vector.load %arg1[%c0_33, %c30] : memref<8x640xbf16, #tpu.memory_space<vmem>>, vector<8x384xbf16>
    %c120 = arith.constant 120 : index
    %c0_34 = arith.constant 0 : index
    %31 = vector.load %arg6[%c120, %c0_34] : memref<648x384xbf16, #tpu.memory_space<vmem>>, vector<8x384xbf16>
    tpu.vector_store %arg6[%c120, %c0_34], %30 {strides = array<i32>} : memref<648x384xbf16, #tpu.memory_space<vmem>>, vector<8x384xbf16>,
    %c0_35 = arith.constant 0 : index
    %c31 = arith.constant 31 : index
    %32 = vector.load %arg1[%c0_35, %c31] : memref<8x640xbf16, #tpu.memory_space<vmem>>, vector<8x384xbf16>
    %c128 = arith.constant 128 : index
    %c0_36 = arith.constant 0 : index
    %33 = vector.load %arg6[%c128, %c0_36] : memref<648x384xbf16, #tpu.memory_space<vmem>>, vector<8x384xbf16>
    tpu.vector_store %arg6[%c128, %c0_36], %32 {strides = array<i32>} : memref<648x384xbf16, #tpu.memory_space<vmem>>, vector<8x384xbf16>,
    %c0_37 = arith.constant 0 : index
    %c32_38 = arith.constant 32 : index
    %34 = vector.load %arg1[%c0_37, %c32_38] : memref<8x640xbf16, #tpu.memory_space<vmem>>, vector<8x384xbf16>
    %c136 = arith.constant 136 : index
    %c0_39 = arith.constant 0 : index
    %35 = vector.load %arg6[%c136, %c0_39] : memref<648x384xbf16, #tpu.memory_space<vmem>>, vector<8x384xbf16>
    tpu.vector_store %arg6[%c136, %c0_39], %34 {strides = array<i32>} : memref<648x384xbf16, #tpu.memory_space<vmem>>, vector<8x384xbf16>,
    %c0_40 = arith.constant 0 : index
    %c48_41 = arith.constant 48 : index
    %36 = vector.load %arg1[%c0_40, %c48_41] : memref<8x640xbf16, #tpu.memory_space<vmem>>, vector<8x384xbf16>
    %c144 = arith.constant 144 : index
    %c0_42 = arith.constant 0 : index
    %37 = vector.load %arg6[%c144, %c0_42] : memref<648x384xbf16, #tpu.memory_space<vmem>>, vector<8x384xbf16>
    tpu.vector_store %arg6[%c144, %c0_42], %36 {strides = array<i32>} : memref<648x384xbf16, #tpu.memory_space<vmem>>, vector<8x384xbf16>,
    %c0_43 = arith.constant 0 : index
    %c49 = arith.constant 49 : index
    %38 = vector.load %arg1[%c0_43, %c49] : memref<8x640xbf16, #tpu.memory_space<vmem>>, vector<8x384xbf16>
    %c152 = arith.constant 152 : index
    %c0_44 = arith.constant 0 : index
    %39 = vector.load %arg6[%c152, %c0_44] : memref<648x384xbf16, #tpu.memory_space<vmem>>, vector<8x384xbf16>
    tpu.vector_store %arg6[%c152, %c0_44], %38 {strides = array<i32>} : memref<648x384xbf16, #tpu.memory_space<vmem>>, vector<8x384xbf16>,
    %c0_45 = arith.constant 0 : index
    %c50 = arith.constant 50 : index
    %40 = vector.load %arg1[%c0_45, %c50] : memref<8x640xbf16, #tpu.memory_space<vmem>>, vector<8x384xbf16>
    %c160 = arith.constant 160 : index
    %c0_46 = arith.constant 0 : index
    %41 = vector.load %arg6[%c160, %c0_46] : memref<648x384xbf16, #tpu.memory_space<vmem>>, vector<8x384xbf16>
    tpu.vector_store %arg6[%c160, %c0_46], %40 {strides = array<i32>} : memref<648x384xbf16, #tpu.memory_space<vmem>>, vector<8x384xbf16>,
    %c0_47 = arith.constant 0 : index
    %c51 = arith.constant 51 : index
    %42 = vector.load %arg1[%c0_47, %c51] : memref<8x640xbf16, #tpu.memory_space<vmem>>, vector<8x384xbf16>
    %c168 = arith.constant 168 : index
    %c0_48 = arith.constant 0 : index
    %43 = vector.load %arg6[%c168, %c0_48] : memref<648x384xbf16, #tpu.memory_space<vmem>>, vector<8x384xbf16>
    tpu.vector_store %arg6[%c168, %c0_48], %42 {strides = array<i32>} : memref<648x384xbf16, #tpu.memory_space<vmem>>, vector<8x384xbf16>,
    %c0_49 = arith.constant 0 : index
    %c52 = arith.constant 52 : index
    %44 = vector.load %arg1[%c0_49, %c52] : memref<8x640xbf16, #tpu.memory_space<vmem>>, vector<8x384xbf16>
    %c176 = arith.constant 176 : index
    %c0_50 = arith.constant 0 : index
    %45 = vector.load %arg6[%c176, %c0_50] : memref<648x384xbf16, #tpu.memory_space<vmem>>, vector<8x384xbf16>
    tpu.vector_store %arg6[%c176, %c0_50], %44 {strides = array<i32>} : memref<648x384xbf16, #tpu.memory_space<vmem>>, vector<8x384xbf16>,
    %c0_51 = arith.constant 0 : index
    %c53 = arith.constant 53 : index
    %46 = vector.load %arg1[%c0_51, %c53] : memref<8x640xbf16, #tpu.memory_space<vmem>>, vector<8x384xbf16>
    %c184 = arith.constant 184 : index
    %c0_52 = arith.constant 0 : index
    %47 = vector.load %arg6[%c184, %c0_52] : memref<648x384xbf16, #tpu.memory_space<vmem>>, vector<8x384xbf16>
    tpu.vector_store %arg6[%c184, %c0_52], %46 {strides = array<i32>} : memref<648x384xbf16, #tpu.memory_space<vmem>>, vector<8x384xbf16>,
    %c0_53 = arith.constant 0 : index
    %c54 = arith.constant 54 : index
    %48 = vector.load %arg1[%c0_53, %c54] : memref<8x640xbf16, #tpu.memory_space<vmem>>, vector<8x384xbf16>
    %c192 = arith.constant 192 : index
    %c0_54 = arith.constant 0 : index
    %49 = vector.load %arg6[%c192, %c0_54] : memref<648x384xbf16, #tpu.memory_space<vmem>>, vector<8x384xbf16>
    tpu.vector_store %arg6[%c192, %c0_54], %48 {strides = array<i32>} : memref<648x384xbf16, #tpu.memory_space<vmem>>, vector<8x384xbf16>,
    %c0_55 = arith.constant 0 : index
    %c55 = arith.constant 55 : index
    %50 = vector.load %arg1[%c0_55, %c55] : memref<8x640xbf16, #tpu.memory_space<vmem>>, vector<8x384xbf16>
    %c200 = arith.constant 200 : index
    %c0_56 = arith.constant 0 : index
    %51 = vector.load %arg6[%c200, %c0_56] : memref<648x384xbf16, #tpu.memory_space<vmem>>, vector<8x384xbf16>
    tpu.vector_store %arg6[%c200, %c0_56], %50 {strides = array<i32>} : memref<648x384xbf16, #tpu.memory_space<vmem>>, vector<8x384xbf16>,
    %c0_57 = arith.constant 0 : index
    %c56_58 = arith.constant 56 : index
    %52 = vector.load %arg1[%c0_57, %c56_58] : memref<8x640xbf16, #tpu.memory_space<vmem>>, vector<8x384xbf16>
    %c208 = arith.constant 208 : index
    %c0_59 = arith.constant 0 : index
    %53 = vector.load %arg6[%c208, %c0_59] : memref<648x384xbf16, #tpu.memory_space<vmem>>, vector<8x384xbf16>
    tpu.vector_store %arg6[%c208, %c0_59], %52 {strides = array<i32>} : memref<648x384xbf16, #tpu.memory_space<vmem>>, vector<8x384xbf16>,
    %c0_60 = arith.constant 0 : index
    %c72_61 = arith.constant 72 : index
    %54 = vector.load %arg1[%c0_60, %c72_61] : memref<8x640xbf16, #tpu.memory_space<vmem>>, vector<8x384xbf16>
    %c216 = arith.constant 216 : index
    %c0_62 = arith.constant 0 : index
    %55 = vector.load %arg6[%c216, %c0_62] : memref<648x384xbf16, #tpu.memory_space<vmem>>, vector<8x384xbf16>
    tpu.vector_store %arg6[%c216, %c0_62], %54 {strides = array<i32>} : memref<648x384xbf16, #tpu.memory_space<vmem>>, vector<8x384xbf16>,
    %c0_63 = arith.constant 0 : index
    %c73 = arith.constant 73 : index
    %56 = vector.load %arg1[%c0_63, %c73] : memref<8x640xbf16, #tpu.memory_space<vmem>>, vector<8x384xbf16>
    %c224 = arith.constant 224 : index
    %c0_64 = arith.constant 0 : index
    %57 = vector.load %arg6[%c224, %c0_64] : memref<648x384xbf16, #tpu.memory_space<vmem>>, vector<8x384xbf16>
    tpu.vector_store %arg6[%c224, %c0_64], %56 {strides = array<i32>} : memref<648x384xbf16, #tpu.memory_space<vmem>>, vector<8x384xbf16>,
    %c0_65 = arith.constant 0 : index
    %c74 = arith.constant 74 : index
    %58 = vector.load %arg1[%c0_65, %c74] : memref<8x640xbf16, #tpu.memory_space<vmem>>, vector<8x384xbf16>
    %c232 = arith.constant 232 : index
    %c0_66 = arith.constant 0 : index
    %59 = vector.load %arg6[%c232, %c0_66] : memref<648x384xbf16, #tpu.memory_space<vmem>>, vector<8x384xbf16>
    tpu.vector_store %arg6[%c232, %c0_66], %58 {strides = array<i32>} : memref<648x384xbf16, #tpu.memory_space<vmem>>, vector<8x384xbf16>,
    %c0_67 = arith.constant 0 : index
    %c75 = arith.constant 75 : index
    %60 = vector.load %arg1[%c0_67, %c75] : memref<8x640xbf16, #tpu.memory_space<vmem>>, vector<8x384xbf16>
    %c240 = arith.constant 240 : index
    %c0_68 = arith.constant 0 : index
    %61 = vector.load %arg6[%c240, %c0_68] : memref<648x384xbf16, #tpu.memory_space<vmem>>, vector<8x384xbf16>
    tpu.vector_store %arg6[%c240, %c0_68], %60 {strides = array<i32>} : memref<648x384xbf16, #tpu.memory_space<vmem>>, vector<8x384xbf16>,
    %c0_69 = arith.constant 0 : index
    %c76 = arith.constant 76 : index
    %62 = vector.load %arg1[%c0_69, %c76] : memref<8x640xbf16, #tpu.memory_space<vmem>>, vector<8x384xbf16>
    %c248 = arith.constant 248 : index
    %c0_70 = arith.constant 0 : index
    %63 = vector.load %arg6[%c248, %c0_70] : memref<648x384xbf16, #tpu.memory_space<vmem>>, vector<8x384xbf16>
    tpu.vector_store %arg6[%c248, %c0_70], %62 {strides = array<i32>} : memref<648x384xbf16, #tpu.memory_space<vmem>>, vector<8x384xbf16>,
    %c0_71 = arith.constant 0 : index
    %c77 = arith.constant 77 : index
    %64 = vector.load %arg1[%c0_71, %c77] : memref<8x640xbf16, #tpu.memory_space<vmem>>, vector<8x384xbf16>
    %c256 = arith.constant 256 : index
    %c0_72 = arith.constant 0 : index
    %65 = vector.load %arg6[%c256, %c0_72] : memref<648x384xbf16, #tpu.memory_space<vmem>>, vector<8x384xbf16>
    tpu.vector_store %arg6[%c256, %c0_72], %64 {strides = array<i32>} : memref<648x384xbf16, #tpu.memory_space<vmem>>, vector<8x384xbf16>,
    %c0_73 = arith.constant 0 : index
    %c78 = arith.constant 78 : index
    %66 = vector.load %arg1[%c0_73, %c78] : memref<8x640xbf16, #tpu.memory_space<vmem>>, vector<8x384xbf16>
    %c264 = arith.constant 264 : index
    %c0_74 = arith.constant 0 : index
    %67 = vector.load %arg6[%c264, %c0_74] : memref<648x384xbf16, #tpu.memory_space<vmem>>, vector<8x384xbf16>
    tpu.vector_store %arg6[%c264, %c0_74], %66 {strides = array<i32>} : memref<648x384xbf16, #tpu.memory_space<vmem>>, vector<8x384xbf16>,
    %c0_75 = arith.constant 0 : index
    %c79 = arith.constant 79 : index
    %68 = vector.load %arg1[%c0_75, %c79] : memref<8x640xbf16, #tpu.memory_space<vmem>>, vector<8x384xbf16>
    %c272 = arith.constant 272 : index
    %c0_76 = arith.constant 0 : index
    %69 = vector.load %arg6[%c272, %c0_76] : memref<648x384xbf16, #tpu.memory_space<vmem>>, vector<8x384xbf16>
    tpu.vector_store %arg6[%c272, %c0_76], %68 {strides = array<i32>} : memref<648x384xbf16, #tpu.memory_space<vmem>>, vector<8x384xbf16>,
    %c0_77 = arith.constant 0 : index
    %c80_78 = arith.constant 80 : index
    %70 = vector.load %arg1[%c0_77, %c80_78] : memref<8x640xbf16, #tpu.memory_space<vmem>>, vector<8x384xbf16>
    %c280 = arith.constant 280 : index
    %c0_79 = arith.constant 0 : index
    %71 = vector.load %arg6[%c280, %c0_79] : memref<648x384xbf16, #tpu.memory_space<vmem>>, vector<8x384xbf16>
    tpu.vector_store %arg6[%c280, %c0_79], %70 {strides = array<i32>} : memref<648x384xbf16, #tpu.memory_space<vmem>>, vector<8x384xbf16>,
    %c0_80 = arith.constant 0 : index
    %c96_81 = arith.constant 96 : index
    %72 = vector.load %arg1[%c0_80, %c96_81] : memref<8x640xbf16, #tpu.memory_space<vmem>>, vector<8x384xbf16>
    %c288 = arith.constant 288 : index
    %c0_82 = arith.constant 0 : index
    %73 = vector.load %arg6[%c288, %c0_82] : memref<648x384xbf16, #tpu.memory_space<vmem>>, vector<8x384xbf16>
    tpu.vector_store %arg6[%c288, %c0_82], %72 {strides = array<i32>} : memref<648x384xbf16, #tpu.memory_space<vmem>>, vector<8x384xbf16>,
    %c0_83 = arith.constant 0 : index
    %c97 = arith.constant 97 : index
    %74 = vector.load %arg1[%c0_83, %c97] : memref<8x640xbf16, #tpu.memory_space<vmem>>, vector<8x384xbf16>
    %c296 = arith.constant 296 : index
    %c0_84 = arith.constant 0 : index
    %75 = vector.load %arg6[%c296, %c0_84] : memref<648x384xbf16, #tpu.memory_space<vmem>>, vector<8x384xbf16>
    tpu.vector_store %arg6[%c296, %c0_84], %74 {strides = array<i32>} : memref<648x384xbf16, #tpu.memory_space<vmem>>, vector<8x384xbf16>,
    %c0_85 = arith.constant 0 : index
    %c98 = arith.constant 98 : index
    %76 = vector.load %arg1[%c0_85, %c98] : memref<8x640xbf16, #tpu.memory_space<vmem>>, vector<8x384xbf16>
    %c304 = arith.constant 304 : index
    %c0_86 = arith.constant 0 : index
    %77 = vector.load %arg6[%c304, %c0_86] : memref<648x384xbf16, #tpu.memory_space<vmem>>, vector<8x384xbf16>
    tpu.vector_store %arg6[%c304, %c0_86], %76 {strides = array<i32>} : memref<648x384xbf16, #tpu.memory_space<vmem>>, vector<8x384xbf16>,
    %c0_87 = arith.constant 0 : index
    %c99 = arith.constant 99 : index
    %78 = vector.load %arg1[%c0_87, %c99] : memref<8x640xbf16, #tpu.memory_space<vmem>>, vector<8x384xbf16>
    %c312 = arith.constant 312 : index
    %c0_88 = arith.constant 0 : index
    %79 = vector.load %arg6[%c312, %c0_88] : memref<648x384xbf16, #tpu.memory_space<vmem>>, vector<8x384xbf16>
    tpu.vector_store %arg6[%c312, %c0_88], %78 {strides = array<i32>} : memref<648x384xbf16, #tpu.memory_space<vmem>>, vector<8x384xbf16>,
    %c0_89 = arith.constant 0 : index
    %c100 = arith.constant 100 : index
    %80 = vector.load %arg1[%c0_89, %c100] : memref<8x640xbf16, #tpu.memory_space<vmem>>, vector<8x384xbf16>
    %c320 = arith.constant 320 : index
    %c0_90 = arith.constant 0 : index
    %81 = vector.load %arg6[%c320, %c0_90] : memref<648x384xbf16, #tpu.memory_space<vmem>>, vector<8x384xbf16>
    tpu.vector_store %arg6[%c320, %c0_90], %80 {strides = array<i32>} : memref<648x384xbf16, #tpu.memory_space<vmem>>, vector<8x384xbf16>,
    %c0_91 = arith.constant 0 : index
    %c101 = arith.constant 101 : index
    %82 = vector.load %arg1[%c0_91, %c101] : memref<8x640xbf16, #tpu.memory_space<vmem>>, vector<8x384xbf16>
    %c328 = arith.constant 328 : index
    %c0_92 = arith.constant 0 : index
    %83 = vector.load %arg6[%c328, %c0_92] : memref<648x384xbf16, #tpu.memory_space<vmem>>, vector<8x384xbf16>
    tpu.vector_store %arg6[%c328, %c0_92], %82 {strides = array<i32>} : memref<648x384xbf16, #tpu.memory_space<vmem>>, vector<8x384xbf16>,
    %c0_93 = arith.constant 0 : index
    %c102 = arith.constant 102 : index
    %84 = vector.load %arg1[%c0_93, %c102] : memref<8x640xbf16, #tpu.memory_space<vmem>>, vector<8x384xbf16>
    %c336 = arith.constant 336 : index
    %c0_94 = arith.constant 0 : index
    %85 = vector.load %arg6[%c336, %c0_94] : memref<648x384xbf16, #tpu.memory_space<vmem>>, vector<8x384xbf16>
    tpu.vector_store %arg6[%c336, %c0_94], %84 {strides = array<i32>} : memref<648x384xbf16, #tpu.memory_space<vmem>>, vector<8x384xbf16>,
    %c0_95 = arith.constant 0 : index
    %c103 = arith.constant 103 : index
    %86 = vector.load %arg1[%c0_95, %c103] : memref<8x640xbf16, #tpu.memory_space<vmem>>, vector<8x384xbf16>
    %c344 = arith.constant 344 : index
    %c0_96 = arith.constant 0 : index
    %87 = vector.load %arg6[%c344, %c0_96] : memref<648x384xbf16, #tpu.memory_space<vmem>>, vector<8x384xbf16>
    tpu.vector_store %arg6[%c344, %c0_96], %86 {strides = array<i32>} : memref<648x384xbf16, #tpu.memory_space<vmem>>, vector<8x384xbf16>,
    %c0_97 = arith.constant 0 : index
    %c104_98 = arith.constant 104 : index
    %88 = vector.load %arg1[%c0_97, %c104_98] : memref<8x640xbf16, #tpu.memory_space<vmem>>, vector<8x384xbf16>
    %c352 = arith.constant 352 : index
    %c0_99 = arith.constant 0 : index
    %89 = vector.load %arg6[%c352, %c0_99] : memref<648x384xbf16, #tpu.memory_space<vmem>>, vector<8x384xbf16>
    tpu.vector_store %arg6[%c352, %c0_99], %88 {strides = array<i32>} : memref<648x384xbf16, #tpu.memory_space<vmem>>, vector<8x384xbf16>,
    %c0_100 = arith.constant 0 : index
    %c120_101 = arith.constant 120 : index
    %90 = vector.load %arg1[%c0_100, %c120_101] : memref<8x640xbf16, #tpu.memory_space<vmem>>, vector<8x384xbf16>
    %c360 = arith.constant 360 : index
    %c0_102 = arith.constant 0 : index
    %91 = vector.load %arg6[%c360, %c0_102] : memref<648x384xbf16, #tpu.memory_space<vmem>>, vector<8x384xbf16>
    tpu.vector_store %arg6[%c360, %c0_102], %90 {strides = array<i32>} : memref<648x384xbf16, #tpu.memory_space<vmem>>, vector<8x384xbf16>,
    %c0_103 = arith.constant 0 : index
    %c121 = arith.constant 121 : index
    %92 = vector.load %arg1[%c0_103, %c121] : memref<8x640xbf16, #tpu.memory_space<vmem>>, vector<8x384xbf16>
    %c368 = arith.constant 368 : index
    %c0_104 = arith.constant 0 : index
    %93 = vector.load %arg6[%c368, %c0_104] : memref<648x384xbf16, #tpu.memory_space<vmem>>, vector<8x384xbf16>
    tpu.vector_store %arg6[%c368, %c0_104], %92 {strides = array<i32>} : memref<648x384xbf16, #tpu.memory_space<vmem>>, vector<8x384xbf16>,
    %c0_105 = arith.constant 0 : index
    %c122 = arith.constant 122 : index
    %94 = vector.load %arg1[%c0_105, %c122] : memref<8x640xbf16, #tpu.memory_space<vmem>>, vector<8x384xbf16>
    %c376 = arith.constant 376 : index
    %c0_106 = arith.constant 0 : index
    %95 = vector.load %arg6[%c376, %c0_106] : memref<648x384xbf16, #tpu.memory_space<vmem>>, vector<8x384xbf16>
    tpu.vector_store %arg6[%c376, %c0_106], %94 {strides = array<i32>} : memref<648x384xbf16, #tpu.memory_space<vmem>>, vector<8x384xbf16>,
    %c0_107 = arith.constant 0 : index
    %c123 = arith.constant 123 : index
    %96 = vector.load %arg1[%c0_107, %c123] : memref<8x640xbf16, #tpu.memory_space<vmem>>, vector<8x384xbf16>
    %c384 = arith.constant 384 : index
    %c0_108 = arith.constant 0 : index
    %97 = vector.load %arg6[%c384, %c0_108] : memref<648x384xbf16, #tpu.memory_space<vmem>>, vector<8x384xbf16>
    tpu.vector_store %arg6[%c384, %c0_108], %96 {strides = array<i32>} : memref<648x384xbf16, #tpu.memory_space<vmem>>, vector<8x384xbf16>,
    %c0_109 = arith.constant 0 : index
    %c124 = arith.constant 124 : index
    %98 = vector.load %arg1[%c0_109, %c124] : memref<8x640xbf16, #tpu.memory_space<vmem>>, vector<8x384xbf16>
    %c392 = arith.constant 392 : index
    %c0_110 = arith.constant 0 : index
    %99 = vector.load %arg6[%c392, %c0_110] : memref<648x384xbf16, #tpu.memory_space<vmem>>, vector<8x384xbf16>
    tpu.vector_store %arg6[%c392, %c0_110], %98 {strides = array<i32>} : memref<648x384xbf16, #tpu.memory_space<vmem>>, vector<8x384xbf16>,
    %c0_111 = arith.constant 0 : index
    %c125 = arith.constant 125 : index
    %100 = vector.load %arg1[%c0_111, %c125] : memref<8x640xbf16, #tpu.memory_space<vmem>>, vector<8x384xbf16>
    %c400 = arith.constant 400 : index
    %c0_112 = arith.constant 0 : index
    %101 = vector.load %arg6[%c400, %c0_112] : memref<648x384xbf16, #tpu.memory_space<vmem>>, vector<8x384xbf16>
    tpu.vector_store %arg6[%c400, %c0_112], %100 {strides = array<i32>} : memref<648x384xbf16, #tpu.memory_space<vmem>>, vector<8x384xbf16>,
    %c0_113 = arith.constant 0 : index
    %c126 = arith.constant 126 : index
    %102 = vector.load %arg1[%c0_113, %c126] : memref<8x640xbf16, #tpu.memory_space<vmem>>, vector<8x384xbf16>
    %c408 = arith.constant 408 : index
    %c0_114 = arith.constant 0 : index
    %103 = vector.load %arg6[%c408, %c0_114] : memref<648x384xbf16, #tpu.memory_space<vmem>>, vector<8x384xbf16>
    tpu.vector_store %arg6[%c408, %c0_114], %102 {strides = array<i32>} : memref<648x384xbf16, #tpu.memory_space<vmem>>, vector<8x384xbf16>,
    %c0_115 = arith.constant 0 : index
    %c127 = arith.constant 127 : index
    %104 = vector.load %arg1[%c0_115, %c127] : memref<8x640xbf16, #tpu.memory_space<vmem>>, vector<8x384xbf16>
    %c416 = arith.constant 416 : index
    %c0_116 = arith.constant 0 : index
    %105 = vector.load %arg6[%c416, %c0_116] : memref<648x384xbf16, #tpu.memory_space<vmem>>, vector<8x384xbf16>
    tpu.vector_store %arg6[%c416, %c0_116], %104 {strides = array<i32>} : memref<648x384xbf16, #tpu.memory_space<vmem>>, vector<8x384xbf16>,
    %c0_117 = arith.constant 0 : index
    %c128_118 = arith.constant 128 : index
    %106 = vector.load %arg1[%c0_117, %c128_118] : memref<8x640xbf16, #tpu.memory_space<vmem>>, vector<8x384xbf16>
    %c424 = arith.constant 424 : index
    %c0_119 = arith.constant 0 : index
    %107 = vector.load %arg6[%c424, %c0_119] : memref<648x384xbf16, #tpu.memory_space<vmem>>, vector<8x384xbf16>
    tpu.vector_store %arg6[%c424, %c0_119], %106 {strides = array<i32>} : memref<648x384xbf16, #tpu.memory_space<vmem>>, vector<8x384xbf16>,
    %c0_120 = arith.constant 0 : index
    %c144_121 = arith.constant 144 : index
    %108 = vector.load %arg1[%c0_120, %c144_121] : memref<8x640xbf16, #tpu.memory_space<vmem>>, vector<8x384xbf16>
    %c432 = arith.constant 432 : index
    %c0_122 = arith.constant 0 : index
    %109 = vector.load %arg6[%c432, %c0_122] : memref<648x384xbf16, #tpu.memory_space<vmem>>, vector<8x384xbf16>
    tpu.vector_store %arg6[%c432, %c0_122], %108 {strides = array<i32>} : memref<648x384xbf16, #tpu.memory_space<vmem>>, vector<8x384xbf16>,
    %c0_123 = arith.constant 0 : index
    %c145 = arith.constant 145 : index
    %110 = vector.load %arg1[%c0_123, %c145] : memref<8x640xbf16, #tpu.memory_space<vmem>>, vector<8x384xbf16>
    %c440 = arith.constant 440 : index
    %c0_124 = arith.constant 0 : index
    %111 = vector.load %arg6[%c440, %c0_124] : memref<648x384xbf16, #tpu.memory_space<vmem>>, vector<8x384xbf16>
    tpu.vector_store %arg6[%c440, %c0_124], %110 {strides = array<i32>} : memref<648x384xbf16, #tpu.memory_space<vmem>>, vector<8x384xbf16>,
    %c0_125 = arith.constant 0 : index
    %c146 = arith.constant 146 : index
    %112 = vector.load %arg1[%c0_125, %c146] : memref<8x640xbf16, #tpu.memory_space<vmem>>, vector<8x384xbf16>
    %c448 = arith.constant 448 : index
    %c0_126 = arith.constant 0 : index
    %113 = vector.load %arg6[%c448, %c0_126] : memref<648x384xbf16, #tpu.memory_space<vmem>>, vector<8x384xbf16>
    tpu.vector_store %arg6[%c448, %c0_126], %112 {strides = array<i32>} : memref<648x384xbf16, #tpu.memory_space<vmem>>, vector<8x384xbf16>,
    %c0_127 = arith.constant 0 : index
    %c147 = arith.constant 147 : index
    %114 = vector.load %arg1[%c0_127, %c147] : memref<8x640xbf16, #tpu.memory_space<vmem>>, vector<8x384xbf16>
    %c456 = arith.constant 456 : index
    %c0_128 = arith.constant 0 : index
    %115 = vector.load %arg6[%c456, %c0_128] : memref<648x384xbf16, #tpu.memory_space<vmem>>, vector<8x384xbf16>
    tpu.vector_store %arg6[%c456, %c0_128], %114 {strides = array<i32>} : memref<648x384xbf16, #tpu.memory_space<vmem>>, vector<8x384xbf16>,
    %c0_129 = arith.constant 0 : index
    %c148 = arith.constant 148 : index
    %116 = vector.load %arg1[%c0_129, %c148] : memref<8x640xbf16, #tpu.memory_space<vmem>>, vector<8x384xbf16>
    %c464 = arith.constant 464 : index
    %c0_130 = arith.constant 0 : index
    %117 = vector.load %arg6[%c464, %c0_130] : memref<648x384xbf16, #tpu.memory_space<vmem>>, vector<8x384xbf16>
    tpu.vector_store %arg6[%c464, %c0_130], %116 {strides = array<i32>} : memref<648x384xbf16, #tpu.memory_space<vmem>>, vector<8x384xbf16>,
    %c0_131 = arith.constant 0 : index
    %c149 = arith.constant 149 : index
    %118 = vector.load %arg1[%c0_131, %c149] : memref<8x640xbf16, #tpu.memory_space<vmem>>, vector<8x384xbf16>
    %c472 = arith.constant 472 : index
    %c0_132 = arith.constant 0 : index
    %119 = vector.load %arg6[%c472, %c0_132] : memref<648x384xbf16, #tpu.memory_space<vmem>>, vector<8x384xbf16>
    tpu.vector_store %arg6[%c472, %c0_132], %118 {strides = array<i32>} : memref<648x384xbf16, #tpu.memory_space<vmem>>, vector<8x384xbf16>,
    %c0_133 = arith.constant 0 : index
    %c150 = arith.constant 150 : index
    %120 = vector.load %arg1[%c0_133, %c150] : memref<8x640xbf16, #tpu.memory_space<vmem>>, vector<8x384xbf16>
    %c480 = arith.constant 480 : index
    %c0_134 = arith.constant 0 : index
    %121 = vector.load %arg6[%c480, %c0_134] : memref<648x384xbf16, #tpu.memory_space<vmem>>, vector<8x384xbf16>
    tpu.vector_store %arg6[%c480, %c0_134], %120 {strides = array<i32>} : memref<648x384xbf16, #tpu.memory_space<vmem>>, vector<8x384xbf16>,
    %c0_135 = arith.constant 0 : index
    %c151 = arith.constant 151 : index
    %122 = vector.load %arg1[%c0_135, %c151] : memref<8x640xbf16, #tpu.memory_space<vmem>>, vector<8x384xbf16>
    %c488 = arith.constant 488 : index
    %c0_136 = arith.constant 0 : index
    %123 = vector.load %arg6[%c488, %c0_136] : memref<648x384xbf16, #tpu.memory_space<vmem>>, vector<8x384xbf16>
    tpu.vector_store %arg6[%c488, %c0_136], %122 {strides = array<i32>} : memref<648x384xbf16, #tpu.memory_space<vmem>>, vector<8x384xbf16>,
    %c0_137 = arith.constant 0 : index
    %c152_138 = arith.constant 152 : index
    %124 = vector.load %arg1[%c0_137, %c152_138] : memref<8x640xbf16, #tpu.memory_space<vmem>>, vector<8x384xbf16>
    %c496 = arith.constant 496 : index
    %c0_139 = arith.constant 0 : index
    %125 = vector.load %arg6[%c496, %c0_139] : memref<648x384xbf16, #tpu.memory_space<vmem>>, vector<8x384xbf16>
    tpu.vector_store %arg6[%c496, %c0_139], %124 {strides = array<i32>} : memref<648x384xbf16, #tpu.memory_space<vmem>>, vector<8x384xbf16>,
    %c0_140 = arith.constant 0 : index
    %c168_141 = arith.constant 168 : index
    %126 = vector.load %arg1[%c0_140, %c168_141] : memref<8x640xbf16, #tpu.memory_space<vmem>>, vector<8x384xbf16>
    %c504 = arith.constant 504 : index
    %c0_142 = arith.constant 0 : index
    %127 = vector.load %arg6[%c504, %c0_142] : memref<648x384xbf16, #tpu.memory_space<vmem>>, vector<8x384xbf16>
    tpu.vector_store %arg6[%c504, %c0_142], %126 {strides = array<i32>} : memref<648x384xbf16, #tpu.memory_space<vmem>>, vector<8x384xbf16>,
    %c0_143 = arith.constant 0 : index
    %c169 = arith.constant 169 : index
    %128 = vector.load %arg1[%c0_143, %c169] : memref<8x640xbf16, #tpu.memory_space<vmem>>, vector<8x384xbf16>
    %c512 = arith.constant 512 : index
    %c0_144 = arith.constant 0 : index
    %129 = vector.load %arg6[%c512, %c0_144] : memref<648x384xbf16, #tpu.memory_space<vmem>>, vector<8x384xbf16>
    tpu.vector_store %arg6[%c512, %c0_144], %128 {strides = array<i32>} : memref<648x384xbf16, #tpu.memory_space<vmem>>, vector<8x384xbf16>,
    %c0_145 = arith.constant 0 : index
    %c170 = arith.constant 170 : index
    %130 = vector.load %arg1[%c0_145, %c170] : memref<8x640xbf16, #tpu.memory_space<vmem>>, vector<8x384xbf16>
    %c520 = arith.constant 520 : index
    %c0_146 = arith.constant 0 : index
    %131 = vector.load %arg6[%c520, %c0_146] : memref<648x384xbf16, #tpu.memory_space<vmem>>, vector<8x384xbf16>
    tpu.vector_store %arg6[%c520, %c0_146], %130 {strides = array<i32>} : memref<648x384xbf16, #tpu.memory_space<vmem>>, vector<8x384xbf16>,
    %c0_147 = arith.constant 0 : index
    %c171 = arith.constant 171 : index
    %132 = vector.load %arg1[%c0_147, %c171] : memref<8x640xbf16, #tpu.memory_space<vmem>>, vector<8x384xbf16>
    %c528 = arith.constant 528 : index
    %c0_148 = arith.constant 0 : index
    %133 = vector.load %arg6[%c528, %c0_148] : memref<648x384xbf16, #tpu.memory_space<vmem>>, vector<8x384xbf16>
    tpu.vector_store %arg6[%c528, %c0_148], %132 {strides = array<i32>} : memref<648x384xbf16, #tpu.memory_space<vmem>>, vector<8x384xbf16>,
    %c0_149 = arith.constant 0 : index
    %c172 = arith.constant 172 : index
    %134 = vector.load %arg1[%c0_149, %c172] : memref<8x640xbf16, #tpu.memory_space<vmem>>, vector<8x384xbf16>
    %c536 = arith.constant 536 : index
    %c0_150 = arith.constant 0 : index
    %135 = vector.load %arg6[%c536, %c0_150] : memref<648x384xbf16, #tpu.memory_space<vmem>>, vector<8x384xbf16>
    tpu.vector_store %arg6[%c536, %c0_150], %134 {strides = array<i32>} : memref<648x384xbf16, #tpu.memory_space<vmem>>, vector<8x384xbf16>,
    %c0_151 = arith.constant 0 : index
    %c173 = arith.constant 173 : index
    %136 = vector.load %arg1[%c0_151, %c173] : memref<8x640xbf16, #tpu.memory_space<vmem>>, vector<8x384xbf16>
    %c544 = arith.constant 544 : index
    %c0_152 = arith.constant 0 : index
    %137 = vector.load %arg6[%c544, %c0_152] : memref<648x384xbf16, #tpu.memory_space<vmem>>, vector<8x384xbf16>
    tpu.vector_store %arg6[%c544, %c0_152], %136 {strides = array<i32>} : memref<648x384xbf16, #tpu.memory_space<vmem>>, vector<8x384xbf16>,
    %c0_153 = arith.constant 0 : index
    %c174 = arith.constant 174 : index
    %138 = vector.load %arg1[%c0_153, %c174] : memref<8x640xbf16, #tpu.memory_space<vmem>>, vector<8x384xbf16>
    %c552 = arith.constant 552 : index
    %c0_154 = arith.constant 0 : index
    %139 = vector.load %arg6[%c552, %c0_154] : memref<648x384xbf16, #tpu.memory_space<vmem>>, vector<8x384xbf16>
    tpu.vector_store %arg6[%c552, %c0_154], %138 {strides = array<i32>} : memref<648x384xbf16, #tpu.memory_space<vmem>>, vector<8x384xbf16>,
    %c0_155 = arith.constant 0 : index
    %c175 = arith.constant 175 : index
    %140 = vector.load %arg1[%c0_155, %c175] : memref<8x640xbf16, #tpu.memory_space<vmem>>, vector<8x384xbf16>
    %c560 = arith.constant 560 : index
    %c0_156 = arith.constant 0 : index
    %141 = vector.load %arg6[%c560, %c0_156] : memref<648x384xbf16, #tpu.memory_space<vmem>>, vector<8x384xbf16>
    tpu.vector_store %arg6[%c560, %c0_156], %140 {strides = array<i32>} : memref<648x384xbf16, #tpu.memory_space<vmem>>, vector<8x384xbf16>,
    %c0_157 = arith.constant 0 : index
    %c176_158 = arith.constant 176 : index
    %142 = vector.load %arg1[%c0_157, %c176_158] : memref<8x640xbf16, #tpu.memory_space<vmem>>, vector<8x384xbf16>
    %c568 = arith.constant 568 : index
    %c0_159 = arith.constant 0 : index
    %143 = vector.load %arg6[%c568, %c0_159] : memref<648x384xbf16, #tpu.memory_space<vmem>>, vector<8x384xbf16>
    tpu.vector_store %arg6[%c568, %c0_159], %142 {strides = array<i32>} : memref<648x384xbf16, #tpu.memory_space<vmem>>, vector<8x384xbf16>,
    %c0_160 = arith.constant 0 : index
    %c192_161 = arith.constant 192 : index
    %144 = vector.load %arg1[%c0_160, %c192_161] : memref<8x640xbf16, #tpu.memory_space<vmem>>, vector<8x384xbf16>
    %c576 = arith.constant 576 : index
    %c0_162 = arith.constant 0 : index
    %145 = vector.load %arg6[%c576, %c0_162] : memref<648x384xbf16, #tpu.memory_space<vmem>>, vector<8x384xbf16>
    tpu.vector_store %arg6[%c576, %c0_162], %144 {strides = array<i32>} : memref<648x384xbf16, #tpu.memory_space<vmem>>, vector<8x384xbf16>,
    %c0_163 = arith.constant 0 : index
    %c193 = arith.constant 193 : index
    %146 = vector.load %arg1[%c0_163, %c193] : memref<8x640xbf16, #tpu.memory_space<vmem>>, vector<8x384xbf16>
    %c584 = arith.constant 584 : index
    %c0_164 = arith.constant 0 : index
    %147 = vector.load %arg6[%c584, %c0_164] : memref<648x384xbf16, #tpu.memory_space<vmem>>, vector<8x384xbf16>
    tpu.vector_store %arg6[%c584, %c0_164], %146 {strides = array<i32>} : memref<648x384xbf16, #tpu.memory_space<vmem>>, vector<8x384xbf16>,
    %c0_165 = arith.constant 0 : index
    %c194 = arith.constant 194 : index
    %148 = vector.load %arg1[%c0_165, %c194] : memref<8x640xbf16, #tpu.memory_space<vmem>>, vector<8x384xbf16>
    %c592 = arith.constant 592 : index
    %c0_166 = arith.constant 0 : index
    %149 = vector.load %arg6[%c592, %c0_166] : memref<648x384xbf16, #tpu.memory_space<vmem>>, vector<8x384xbf16>
    tpu.vector_store %arg6[%c592, %c0_166], %148 {strides = array<i32>} : memref<648x384xbf16, #tpu.memory_space<vmem>>, vector<8x384xbf16>,
    %c0_167 = arith.constant 0 : index
    %c195 = arith.constant 195 : index
    %150 = vector.load %arg1[%c0_167, %c195] : memref<8x640xbf16, #tpu.memory_space<vmem>>, vector<8x384xbf16>
    %c600 = arith.constant 600 : index
    %c0_168 = arith.constant 0 : index
    %151 = vector.load %arg6[%c600, %c0_168] : memref<648x384xbf16, #tpu.memory_space<vmem>>, vector<8x384xbf16>
    tpu.vector_store %arg6[%c600, %c0_168], %150 {strides = array<i32>} : memref<648x384xbf16, #tpu.memory_space<vmem>>, vector<8x384xbf16>,
    %c0_169 = arith.constant 0 : index
    %c196 = arith.constant 196 : index
    %152 = vector.load %arg1[%c0_169, %c196] : memref<8x640xbf16, #tpu.memory_space<vmem>>, vector<8x384xbf16>
    %c608 = arith.constant 608 : index
    %c0_170 = arith.constant 0 : index
    %153 = vector.load %arg6[%c608, %c0_170] : memref<648x384xbf16, #tpu.memory_space<vmem>>, vector<8x384xbf16>
    tpu.vector_store %arg6[%c608, %c0_170], %152 {strides = array<i32>} : memref<648x384xbf16, #tpu.memory_space<vmem>>, vector<8x384xbf16>,
    %c0_171 = arith.constant 0 : index
    %c197 = arith.constant 197 : index
    %154 = vector.load %arg1[%c0_171, %c197] : memref<8x640xbf16, #tpu.memory_space<vmem>>, vector<8x384xbf16>
    %c616 = arith.constant 616 : index
    %c0_172 = arith.constant 0 : index
    %155 = vector.load %arg6[%c616, %c0_172] : memref<648x384xbf16, #tpu.memory_space<vmem>>, vector<8x384xbf16>
    tpu.vector_store %arg6[%c616, %c0_172], %154 {strides = array<i32>} : memref<648x384xbf16, #tpu.memory_space<vmem>>, vector<8x384xbf16>,
    %c0_173 = arith.constant 0 : index
    %c198 = arith.constant 198 : index
    %156 = vector.load %arg1[%c0_173, %c198] : memref<8x640xbf16, #tpu.memory_space<vmem>>, vector<8x384xbf16>
    %c624 = arith.constant 624 : index
    %c0_174 = arith.constant 0 : index
    %157 = vector.load %arg6[%c624, %c0_174] : memref<648x384xbf16, #tpu.memory_space<vmem>>, vector<8x384xbf16>
    tpu.vector_store %arg6[%c624, %c0_174], %156 {strides = array<i32>} : memref<648x384xbf16, #tpu.memory_space<vmem>>, vector<8x384xbf16>,
    %c0_175 = arith.constant 0 : index
    %c199 = arith.constant 199 : index
    %158 = vector.load %arg1[%c0_175, %c199] : memref<8x640xbf16, #tpu.memory_space<vmem>>, vector<8x384xbf16>
    %c632 = arith.constant 632 : index
    %c0_176 = arith.constant 0 : index
    %159 = vector.load %arg6[%c632, %c0_176] : memref<648x384xbf16, #tpu.memory_space<vmem>>, vector<8x384xbf16>
    tpu.vector_store %arg6[%c632, %c0_176], %158 {strides = array<i32>} : memref<648x384xbf16, #tpu.memory_space<vmem>>, vector<8x384xbf16>,
    %c0_177 = arith.constant 0 : index
    %c200_178 = arith.constant 200 : index
    %160 = vector.load %arg1[%c0_177, %c200_178] : memref<8x640xbf16, #tpu.memory_space<vmem>>, vector<8x384xbf16>
    %c640 = arith.constant 640 : index
    %c0_179 = arith.constant 0 : index
    %161 = vector.load %arg6[%c640, %c0_179] : memref<648x384xbf16, #tpu.memory_space<vmem>>, vector<8x384xbf16>
    tpu.vector_store %arg6[%c640, %c0_179], %160 {strides = array<i32>} : memref<648x384xbf16, #tpu.memory_space<vmem>>, vector<8x384xbf16>,
    %c0_180 = arith.constant 0 : index
    %c0_181 = arith.constant 0 : index
    %162 = vector.load %arg2[%c0_180, %c0_181] : memref<8x648xbf16, #tpu.memory_space<vmem>>, vector<8x648xbf16>
    %c0_182 = arith.constant 0 : index
    %c0_183 = arith.constant 0 : index
    %163 = vector.load %arg6[%c0_182, %c0_183] : memref<648x384xbf16, #tpu.memory_space<vmem>>, vector<648x384xbf16>
    %cst = arith.constant dense<0.000000e+00> : vector<8x384xf32>
    %164 = tpu.matmul %162, %163, %cst {dimension_numbers = #tpu.dot_dimension_numbers<[1], [0], [0], [1], [0, 0, 1, 1], [], []>} : vector<8x648xbf16>, vector<648x384xbf16>, vector<8x384xf32> -> vector<8x384xf32>
    %c0_184 = arith.constant 0 : index
    %c0_185 = arith.constant 0 : index
    %165 = vector.load %arg3[%c0_184, %c0_185] : memref<8x1xf32, #tpu.memory_space<vmem>>, vector<8x1xf32>
    %166 = vector.broadcast %165 : vector<8x1xf32> to vector<8x384xf32>
    %167 = arith.addf %164, %166 : vector<8x384xf32>
    %cst_186 = arith.constant 0.000000e+00 : f32
    %168 = vector.broadcast %cst_186 : f32 to vector<8x384xf32>
    %169 = arith.maximumf %167, %168 : vector<8x384xf32>
    %170 = vector.extract_strided_slice %169 {offsets = [0, 0], sizes = [8, 359], strides = [1, 1]} : vector<8x384xf32> to vector<8x359xf32>
    %171 = vector.extract_strided_slice %169 {offsets = [0, 1], sizes = [8, 359], strides = [1, 1]} : vector<8x384xf32> to vector<8x359xf32>
    %172 = arith.maximumf %170, %171 : vector<8x359xf32>
    %173 = vector.extract_strided_slice %169 {offsets = [0, 24], sizes = [8, 359], strides = [1, 1]} : vector<8x384xf32> to vector<8x359xf32>
    %174 = vector.extract_strided_slice %169 {offsets = [0, 25], sizes = [8, 359], strides = [1, 1]} : vector<8x384xf32> to vector<8x359xf32>
    %175 = arith.maximumf %173, %174 : vector<8x359xf32>
    %176 = arith.maximumf %172, %175 : vector<8x359xf32>
    %177 = arith.truncf %176 : vector<8x359xf32> to vector<8x359xbf16>
    %c0_187 = arith.constant 0 : index
    %c0_188 = arith.constant 0 : index
    %178 = vector.load %arg4[%c0_187, %c0_188] : memref<359x256xbf16, #tpu.memory_space<vmem>>, vector<359x256xbf16>
    %cst_189 = arith.constant dense<0.000000e+00> : vector<8x256xf32>
    %179 = tpu.matmul %177, %178, %cst_189 {dimension_numbers = #tpu.dot_dimension_numbers<[1], [0], [0], [1], [0, 0, 1, 1], [], []>} : vector<8x359xbf16>, vector<359x256xbf16>, vector<8x256xf32> -> vector<8x256xf32>
    %180 = arith.truncf %179 : vector<8x256xf32> to vector<8x256xbf16>
    %c0_190 = arith.constant 0 : index
    %c0_191 = arith.constant 0 : index
    %181 = vector.load %arg5[%c0_190, %c0_191] : memref<8x256xbf16, #tpu.memory_space<vmem>>, vector<8x256xbf16>
    tpu.vector_store %arg5[%c0_190, %c0_191], %180 {strides = array<i32>} : memref<8x256xbf16, #tpu.memory_space<vmem>>, vector<8x256xbf16>,
    return
  }
  func.func @transform_0(%arg0: i32) -> (i32, i32) {
    %c0_i32 = arith.constant 0 : i32
    %c0_i32_0 = arith.constant 0 : i32
    return %c0_i32, %arg0 : i32, i32
  }
  func.func @transform_1(%arg0: i32) -> (i32, i32) {
    %c0_i32 = arith.constant 0 : i32
    %c0_i32_0 = arith.constant 0 : i32
    %c0_i32_1 = arith.constant 0 : i32
    return %c0_i32, %c0_i32_0 : i32, i32
  }
  func.func @transform_2(%arg0: i32) -> (i32, i32) {
    %c0_i32 = arith.constant 0 : i32
    %c0_i32_0 = arith.constant 0 : i32
    %c0_i32_1 = arith.constant 0 : i32
    return %c0_i32, %c0_i32_0 : i32, i32
  }
  func.func @transform_3(%arg0: i32) -> (i32, i32) {
    %c0_i32 = arith.constant 0 : i32
    %c0_i32_0 = arith.constant 0 : i32
    %c0_i32_1 = arith.constant 0 : i32
    return %c0_i32, %c0_i32_0 : i32, i32
  }
  func.func @transform_4(%arg0: i32) -> (i32, i32) {
    %c0_i32 = arith.constant 0 : i32
    %c0_i32_0 = arith.constant 0 : i32
    return %c0_i32, %arg0 : i32, i32
  }
}

module attributes {stable_mosaic.version = 11 : i64} {
  func.func @_conv_stage_kernel(%arg0: i32, %arg1: memref<8x128xbf16, #tpu.memory_space<vmem>>, %arg2: memref<8x200xbf16, #tpu.memory_space<vmem>>, %arg3: memref<8x1xf32, #tpu.memory_space<vmem>>, %arg4: memref<23x128xbf16, #tpu.memory_space<vmem>>, %arg5: memref<8x128xbf16, #tpu.memory_space<vmem>>, %arg6: memref<200x32xbf16, #tpu.memory_space<vmem>>) attributes {dimension_semantics = [#tpu.dimension_semantics<parallel>], iteration_bounds = array<i64: 2>, scalar_prefetch = 0 : i64, scratch_operands = 1 : i64, tpu.core_type = #tpu.core_type<tc>, window_params = [{transform_indices = @transform_0, window_bounds = array<i64: 8, 128>}, {pipeline_mode = #tpu.pipeline_mode<synchronous>, transform_indices = @transform_1, window_bounds = array<i64: 8, 200>}, {pipeline_mode = #tpu.pipeline_mode<synchronous>, transform_indices = @transform_2, window_bounds = array<i64: 8, 1>}, {pipeline_mode = #tpu.pipeline_mode<synchronous>, transform_indices = @transform_3, window_bounds = array<i64: 23, 128>}, {transform_indices = @transform_4, window_bounds = array<i64: 8, 128>}]} {
    %c0 = arith.constant 0 : index
    %c0_0 = arith.constant 0 : index
    %0 = vector.load %arg1[%c0, %c0_0] : memref<8x128xbf16, #tpu.memory_space<vmem>>, vector<8x32xbf16>
    %c0_1 = arith.constant 0 : index
    %c0_2 = arith.constant 0 : index
    %1 = vector.load %arg6[%c0_1, %c0_2] : memref<200x32xbf16, #tpu.memory_space<vmem>>, vector<8x32xbf16>
    tpu.vector_store %arg6[%c0_1, %c0_2], %0 {strides = array<i32>} : memref<200x32xbf16, #tpu.memory_space<vmem>>, vector<8x32xbf16>,
    %c0_3 = arith.constant 0 : index
    %c1 = arith.constant 1 : index
    %2 = vector.load %arg1[%c0_3, %c1] : memref<8x128xbf16, #tpu.memory_space<vmem>>, vector<8x32xbf16>
    %c8 = arith.constant 8 : index
    %c0_4 = arith.constant 0 : index
    %3 = vector.load %arg6[%c8, %c0_4] : memref<200x32xbf16, #tpu.memory_space<vmem>>, vector<8x32xbf16>
    tpu.vector_store %arg6[%c8, %c0_4], %2 {strides = array<i32>} : memref<200x32xbf16, #tpu.memory_space<vmem>>, vector<8x32xbf16>,
    %c0_5 = arith.constant 0 : index
    %c2 = arith.constant 2 : index
    %4 = vector.load %arg1[%c0_5, %c2] : memref<8x128xbf16, #tpu.memory_space<vmem>>, vector<8x32xbf16>
    %c16 = arith.constant 16 : index
    %c0_6 = arith.constant 0 : index
    %5 = vector.load %arg6[%c16, %c0_6] : memref<200x32xbf16, #tpu.memory_space<vmem>>, vector<8x32xbf16>
    tpu.vector_store %arg6[%c16, %c0_6], %4 {strides = array<i32>} : memref<200x32xbf16, #tpu.memory_space<vmem>>, vector<8x32xbf16>,
    %c0_7 = arith.constant 0 : index
    %c3 = arith.constant 3 : index
    %6 = vector.load %arg1[%c0_7, %c3] : memref<8x128xbf16, #tpu.memory_space<vmem>>, vector<8x32xbf16>
    %c24 = arith.constant 24 : index
    %c0_8 = arith.constant 0 : index
    %7 = vector.load %arg6[%c24, %c0_8] : memref<200x32xbf16, #tpu.memory_space<vmem>>, vector<8x32xbf16>
    tpu.vector_store %arg6[%c24, %c0_8], %6 {strides = array<i32>} : memref<200x32xbf16, #tpu.memory_space<vmem>>, vector<8x32xbf16>,
    %c0_9 = arith.constant 0 : index
    %c4 = arith.constant 4 : index
    %8 = vector.load %arg1[%c0_9, %c4] : memref<8x128xbf16, #tpu.memory_space<vmem>>, vector<8x32xbf16>
    %c32 = arith.constant 32 : index
    %c0_10 = arith.constant 0 : index
    %9 = vector.load %arg6[%c32, %c0_10] : memref<200x32xbf16, #tpu.memory_space<vmem>>, vector<8x32xbf16>
    tpu.vector_store %arg6[%c32, %c0_10], %8 {strides = array<i32>} : memref<200x32xbf16, #tpu.memory_space<vmem>>, vector<8x32xbf16>,
    %c0_11 = arith.constant 0 : index
    %c8_12 = arith.constant 8 : index
    %10 = vector.load %arg1[%c0_11, %c8_12] : memref<8x128xbf16, #tpu.memory_space<vmem>>, vector<8x32xbf16>
    %c40 = arith.constant 40 : index
    %c0_13 = arith.constant 0 : index
    %11 = vector.load %arg6[%c40, %c0_13] : memref<200x32xbf16, #tpu.memory_space<vmem>>, vector<8x32xbf16>
    tpu.vector_store %arg6[%c40, %c0_13], %10 {strides = array<i32>} : memref<200x32xbf16, #tpu.memory_space<vmem>>, vector<8x32xbf16>,
    %c0_14 = arith.constant 0 : index
    %c9 = arith.constant 9 : index
    %12 = vector.load %arg1[%c0_14, %c9] : memref<8x128xbf16, #tpu.memory_space<vmem>>, vector<8x32xbf16>
    %c48 = arith.constant 48 : index
    %c0_15 = arith.constant 0 : index
    %13 = vector.load %arg6[%c48, %c0_15] : memref<200x32xbf16, #tpu.memory_space<vmem>>, vector<8x32xbf16>
    tpu.vector_store %arg6[%c48, %c0_15], %12 {strides = array<i32>} : memref<200x32xbf16, #tpu.memory_space<vmem>>, vector<8x32xbf16>,
    %c0_16 = arith.constant 0 : index
    %c10 = arith.constant 10 : index
    %14 = vector.load %arg1[%c0_16, %c10] : memref<8x128xbf16, #tpu.memory_space<vmem>>, vector<8x32xbf16>
    %c56 = arith.constant 56 : index
    %c0_17 = arith.constant 0 : index
    %15 = vector.load %arg6[%c56, %c0_17] : memref<200x32xbf16, #tpu.memory_space<vmem>>, vector<8x32xbf16>
    tpu.vector_store %arg6[%c56, %c0_17], %14 {strides = array<i32>} : memref<200x32xbf16, #tpu.memory_space<vmem>>, vector<8x32xbf16>,
    %c0_18 = arith.constant 0 : index
    %c11 = arith.constant 11 : index
    %16 = vector.load %arg1[%c0_18, %c11] : memref<8x128xbf16, #tpu.memory_space<vmem>>, vector<8x32xbf16>
    %c64 = arith.constant 64 : index
    %c0_19 = arith.constant 0 : index
    %17 = vector.load %arg6[%c64, %c0_19] : memref<200x32xbf16, #tpu.memory_space<vmem>>, vector<8x32xbf16>
    tpu.vector_store %arg6[%c64, %c0_19], %16 {strides = array<i32>} : memref<200x32xbf16, #tpu.memory_space<vmem>>, vector<8x32xbf16>,
    %c0_20 = arith.constant 0 : index
    %c12 = arith.constant 12 : index
    %18 = vector.load %arg1[%c0_20, %c12] : memref<8x128xbf16, #tpu.memory_space<vmem>>, vector<8x32xbf16>
    %c72 = arith.constant 72 : index
    %c0_21 = arith.constant 0 : index
    %19 = vector.load %arg6[%c72, %c0_21] : memref<200x32xbf16, #tpu.memory_space<vmem>>, vector<8x32xbf16>
    tpu.vector_store %arg6[%c72, %c0_21], %18 {strides = array<i32>} : memref<200x32xbf16, #tpu.memory_space<vmem>>, vector<8x32xbf16>,
    %c0_22 = arith.constant 0 : index
    %c16_23 = arith.constant 16 : index
    %20 = vector.load %arg1[%c0_22, %c16_23] : memref<8x128xbf16, #tpu.memory_space<vmem>>, vector<8x32xbf16>
    %c80 = arith.constant 80 : index
    %c0_24 = arith.constant 0 : index
    %21 = vector.load %arg6[%c80, %c0_24] : memref<200x32xbf16, #tpu.memory_space<vmem>>, vector<8x32xbf16>
    tpu.vector_store %arg6[%c80, %c0_24], %20 {strides = array<i32>} : memref<200x32xbf16, #tpu.memory_space<vmem>>, vector<8x32xbf16>,
    %c0_25 = arith.constant 0 : index
    %c17 = arith.constant 17 : index
    %22 = vector.load %arg1[%c0_25, %c17] : memref<8x128xbf16, #tpu.memory_space<vmem>>, vector<8x32xbf16>
    %c88 = arith.constant 88 : index
    %c0_26 = arith.constant 0 : index
    %23 = vector.load %arg6[%c88, %c0_26] : memref<200x32xbf16, #tpu.memory_space<vmem>>, vector<8x32xbf16>
    tpu.vector_store %arg6[%c88, %c0_26], %22 {strides = array<i32>} : memref<200x32xbf16, #tpu.memory_space<vmem>>, vector<8x32xbf16>,
    %c0_27 = arith.constant 0 : index
    %c18 = arith.constant 18 : index
    %24 = vector.load %arg1[%c0_27, %c18] : memref<8x128xbf16, #tpu.memory_space<vmem>>, vector<8x32xbf16>
    %c96 = arith.constant 96 : index
    %c0_28 = arith.constant 0 : index
    %25 = vector.load %arg6[%c96, %c0_28] : memref<200x32xbf16, #tpu.memory_space<vmem>>, vector<8x32xbf16>
    tpu.vector_store %arg6[%c96, %c0_28], %24 {strides = array<i32>} : memref<200x32xbf16, #tpu.memory_space<vmem>>, vector<8x32xbf16>,
    %c0_29 = arith.constant 0 : index
    %c19 = arith.constant 19 : index
    %26 = vector.load %arg1[%c0_29, %c19] : memref<8x128xbf16, #tpu.memory_space<vmem>>, vector<8x32xbf16>
    %c104 = arith.constant 104 : index
    %c0_30 = arith.constant 0 : index
    %27 = vector.load %arg6[%c104, %c0_30] : memref<200x32xbf16, #tpu.memory_space<vmem>>, vector<8x32xbf16>
    tpu.vector_store %arg6[%c104, %c0_30], %26 {strides = array<i32>} : memref<200x32xbf16, #tpu.memory_space<vmem>>, vector<8x32xbf16>,
    %c0_31 = arith.constant 0 : index
    %c20 = arith.constant 20 : index
    %28 = vector.load %arg1[%c0_31, %c20] : memref<8x128xbf16, #tpu.memory_space<vmem>>, vector<8x32xbf16>
    %c112 = arith.constant 112 : index
    %c0_32 = arith.constant 0 : index
    %29 = vector.load %arg6[%c112, %c0_32] : memref<200x32xbf16, #tpu.memory_space<vmem>>, vector<8x32xbf16>
    tpu.vector_store %arg6[%c112, %c0_32], %28 {strides = array<i32>} : memref<200x32xbf16, #tpu.memory_space<vmem>>, vector<8x32xbf16>,
    %c0_33 = arith.constant 0 : index
    %c24_34 = arith.constant 24 : index
    %30 = vector.load %arg1[%c0_33, %c24_34] : memref<8x128xbf16, #tpu.memory_space<vmem>>, vector<8x32xbf16>
    %c120 = arith.constant 120 : index
    %c0_35 = arith.constant 0 : index
    %31 = vector.load %arg6[%c120, %c0_35] : memref<200x32xbf16, #tpu.memory_space<vmem>>, vector<8x32xbf16>
    tpu.vector_store %arg6[%c120, %c0_35], %30 {strides = array<i32>} : memref<200x32xbf16, #tpu.memory_space<vmem>>, vector<8x32xbf16>,
    %c0_36 = arith.constant 0 : index
    %c25 = arith.constant 25 : index
    %32 = vector.load %arg1[%c0_36, %c25] : memref<8x128xbf16, #tpu.memory_space<vmem>>, vector<8x32xbf16>
    %c128 = arith.constant 128 : index
    %c0_37 = arith.constant 0 : index
    %33 = vector.load %arg6[%c128, %c0_37] : memref<200x32xbf16, #tpu.memory_space<vmem>>, vector<8x32xbf16>
    tpu.vector_store %arg6[%c128, %c0_37], %32 {strides = array<i32>} : memref<200x32xbf16, #tpu.memory_space<vmem>>, vector<8x32xbf16>,
    %c0_38 = arith.constant 0 : index
    %c26 = arith.constant 26 : index
    %34 = vector.load %arg1[%c0_38, %c26] : memref<8x128xbf16, #tpu.memory_space<vmem>>, vector<8x32xbf16>
    %c136 = arith.constant 136 : index
    %c0_39 = arith.constant 0 : index
    %35 = vector.load %arg6[%c136, %c0_39] : memref<200x32xbf16, #tpu.memory_space<vmem>>, vector<8x32xbf16>
    tpu.vector_store %arg6[%c136, %c0_39], %34 {strides = array<i32>} : memref<200x32xbf16, #tpu.memory_space<vmem>>, vector<8x32xbf16>,
    %c0_40 = arith.constant 0 : index
    %c27 = arith.constant 27 : index
    %36 = vector.load %arg1[%c0_40, %c27] : memref<8x128xbf16, #tpu.memory_space<vmem>>, vector<8x32xbf16>
    %c144 = arith.constant 144 : index
    %c0_41 = arith.constant 0 : index
    %37 = vector.load %arg6[%c144, %c0_41] : memref<200x32xbf16, #tpu.memory_space<vmem>>, vector<8x32xbf16>
    tpu.vector_store %arg6[%c144, %c0_41], %36 {strides = array<i32>} : memref<200x32xbf16, #tpu.memory_space<vmem>>, vector<8x32xbf16>,
    %c0_42 = arith.constant 0 : index
    %c28 = arith.constant 28 : index
    %38 = vector.load %arg1[%c0_42, %c28] : memref<8x128xbf16, #tpu.memory_space<vmem>>, vector<8x32xbf16>
    %c152 = arith.constant 152 : index
    %c0_43 = arith.constant 0 : index
    %39 = vector.load %arg6[%c152, %c0_43] : memref<200x32xbf16, #tpu.memory_space<vmem>>, vector<8x32xbf16>
    tpu.vector_store %arg6[%c152, %c0_43], %38 {strides = array<i32>} : memref<200x32xbf16, #tpu.memory_space<vmem>>, vector<8x32xbf16>,
    %c0_44 = arith.constant 0 : index
    %c32_45 = arith.constant 32 : index
    %40 = vector.load %arg1[%c0_44, %c32_45] : memref<8x128xbf16, #tpu.memory_space<vmem>>, vector<8x32xbf16>
    %c160 = arith.constant 160 : index
    %c0_46 = arith.constant 0 : index
    %41 = vector.load %arg6[%c160, %c0_46] : memref<200x32xbf16, #tpu.memory_space<vmem>>, vector<8x32xbf16>
    tpu.vector_store %arg6[%c160, %c0_46], %40 {strides = array<i32>} : memref<200x32xbf16, #tpu.memory_space<vmem>>, vector<8x32xbf16>,
    %c0_47 = arith.constant 0 : index
    %c33 = arith.constant 33 : index
    %42 = vector.load %arg1[%c0_47, %c33] : memref<8x128xbf16, #tpu.memory_space<vmem>>, vector<8x32xbf16>
    %c168 = arith.constant 168 : index
    %c0_48 = arith.constant 0 : index
    %43 = vector.load %arg6[%c168, %c0_48] : memref<200x32xbf16, #tpu.memory_space<vmem>>, vector<8x32xbf16>
    tpu.vector_store %arg6[%c168, %c0_48], %42 {strides = array<i32>} : memref<200x32xbf16, #tpu.memory_space<vmem>>, vector<8x32xbf16>,
    %c0_49 = arith.constant 0 : index
    %c34 = arith.constant 34 : index
    %44 = vector.load %arg1[%c0_49, %c34] : memref<8x128xbf16, #tpu.memory_space<vmem>>, vector<8x32xbf16>
    %c176 = arith.constant 176 : index
    %c0_50 = arith.constant 0 : index
    %45 = vector.load %arg6[%c176, %c0_50] : memref<200x32xbf16, #tpu.memory_space<vmem>>, vector<8x32xbf16>
    tpu.vector_store %arg6[%c176, %c0_50], %44 {strides = array<i32>} : memref<200x32xbf16, #tpu.memory_space<vmem>>, vector<8x32xbf16>,
    %c0_51 = arith.constant 0 : index
    %c35 = arith.constant 35 : index
    %46 = vector.load %arg1[%c0_51, %c35] : memref<8x128xbf16, #tpu.memory_space<vmem>>, vector<8x32xbf16>
    %c184 = arith.constant 184 : index
    %c0_52 = arith.constant 0 : index
    %47 = vector.load %arg6[%c184, %c0_52] : memref<200x32xbf16, #tpu.memory_space<vmem>>, vector<8x32xbf16>
    tpu.vector_store %arg6[%c184, %c0_52], %46 {strides = array<i32>} : memref<200x32xbf16, #tpu.memory_space<vmem>>, vector<8x32xbf16>,
    %c0_53 = arith.constant 0 : index
    %c36 = arith.constant 36 : index
    %48 = vector.load %arg1[%c0_53, %c36] : memref<8x128xbf16, #tpu.memory_space<vmem>>, vector<8x32xbf16>
    %c192 = arith.constant 192 : index
    %c0_54 = arith.constant 0 : index
    %49 = vector.load %arg6[%c192, %c0_54] : memref<200x32xbf16, #tpu.memory_space<vmem>>, vector<8x32xbf16>
    tpu.vector_store %arg6[%c192, %c0_54], %48 {strides = array<i32>} : memref<200x32xbf16, #tpu.memory_space<vmem>>, vector<8x32xbf16>,
    %c0_55 = arith.constant 0 : index
    %c0_56 = arith.constant 0 : index
    %50 = vector.load %arg2[%c0_55, %c0_56] : memref<8x200xbf16, #tpu.memory_space<vmem>>, vector<8x200xbf16>
    %c0_57 = arith.constant 0 : index
    %c0_58 = arith.constant 0 : index
    %51 = vector.load %arg6[%c0_57, %c0_58] : memref<200x32xbf16, #tpu.memory_space<vmem>>, vector<200x32xbf16>
    %cst = arith.constant dense<0.000000e+00> : vector<8x32xf32>
    %52 = tpu.matmul %50, %51, %cst {dimension_numbers = #tpu.dot_dimension_numbers<[1], [0], [0], [1], [0, 0, 1, 1], [], []>} : vector<8x200xbf16>, vector<200x32xbf16>, vector<8x32xf32> -> vector<8x32xf32>
    %c0_59 = arith.constant 0 : index
    %c0_60 = arith.constant 0 : index
    %53 = vector.load %arg3[%c0_59, %c0_60] : memref<8x1xf32, #tpu.memory_space<vmem>>, vector<8x1xf32>
    %54 = vector.broadcast %53 : vector<8x1xf32> to vector<8x32xf32>
    %55 = arith.addf %52, %54 : vector<8x32xf32>
    %cst_61 = arith.constant 0.000000e+00 : f32
    %56 = vector.broadcast %cst_61 : f32 to vector<8x32xf32>
    %57 = arith.maximumf %55, %56 : vector<8x32xf32>
    %58 = vector.extract_strided_slice %57 {offsets = [0, 0], sizes = [8, 23], strides = [1, 1]} : vector<8x32xf32> to vector<8x23xf32>
    %59 = vector.extract_strided_slice %57 {offsets = [0, 1], sizes = [8, 23], strides = [1, 1]} : vector<8x32xf32> to vector<8x23xf32>
    %60 = arith.maximumf %58, %59 : vector<8x23xf32>
    %61 = vector.extract_strided_slice %57 {offsets = [0, 8], sizes = [8, 23], strides = [1, 1]} : vector<8x32xf32> to vector<8x23xf32>
    %62 = vector.extract_strided_slice %57 {offsets = [0, 9], sizes = [8, 23], strides = [1, 1]} : vector<8x32xf32> to vector<8x23xf32>
    %63 = arith.maximumf %61, %62 : vector<8x23xf32>
    %64 = arith.maximumf %60, %63 : vector<8x23xf32>
    %65 = arith.truncf %64 : vector<8x23xf32> to vector<8x23xbf16>
    %c0_62 = arith.constant 0 : index
    %c0_63 = arith.constant 0 : index
    %66 = vector.load %arg4[%c0_62, %c0_63] : memref<23x128xbf16, #tpu.memory_space<vmem>>, vector<23x128xbf16>
    %cst_64 = arith.constant dense<0.000000e+00> : vector<8x128xf32>
    %67 = tpu.matmul %65, %66, %cst_64 {dimension_numbers = #tpu.dot_dimension_numbers<[1], [0], [0], [1], [0, 0, 1, 1], [], []>} : vector<8x23xbf16>, vector<23x128xbf16>, vector<8x128xf32> -> vector<8x128xf32>
    %68 = arith.truncf %67 : vector<8x128xf32> to vector<8x128xbf16>
    %c0_65 = arith.constant 0 : index
    %c0_66 = arith.constant 0 : index
    %69 = vector.load %arg5[%c0_65, %c0_66] : memref<8x128xbf16, #tpu.memory_space<vmem>>, vector<8x128xbf16>
    tpu.vector_store %arg5[%c0_65, %c0_66], %68 {strides = array<i32>} : memref<8x128xbf16, #tpu.memory_space<vmem>>, vector<8x128xbf16>,
    return
  }
  func.func @transform_0(%arg0: i32) -> (i32, i32) {
    %c0_i32 = arith.constant 0 : i32
    %c0_i32_0 = arith.constant 0 : i32
    return %c0_i32, %arg0 : i32, i32
  }
  func.func @transform_1(%arg0: i32) -> (i32, i32) {
    %c0_i32 = arith.constant 0 : i32
    %c0_i32_0 = arith.constant 0 : i32
    %c0_i32_1 = arith.constant 0 : i32
    return %c0_i32, %c0_i32_0 : i32, i32
  }
  func.func @transform_2(%arg0: i32) -> (i32, i32) {
    %c0_i32 = arith.constant 0 : i32
    %c0_i32_0 = arith.constant 0 : i32
    %c0_i32_1 = arith.constant 0 : i32
    return %c0_i32, %c0_i32_0 : i32, i32
  }
  func.func @transform_3(%arg0: i32) -> (i32, i32) {
    %c0_i32 = arith.constant 0 : i32
    %c0_i32_0 = arith.constant 0 : i32
    %c0_i32_1 = arith.constant 0 : i32
    return %c0_i32, %c0_i32_0 : i32, i32
  }
  func.func @transform_4(%arg0: i32) -> (i32, i32) {
    %c0_i32 = arith.constant 0 : i32
    %c0_i32_0 = arith.constant 0 : i32
    return %c0_i32, %arg0 : i32, i32
  }
}

module attributes {stable_mosaic.version = 11 : i64} {
  func.func @_conv_stage_kernel(%arg0: i32, %arg1: memref<8x128xbf16, #tpu.memory_space<vmem>>, %arg2: memref<8x200xbf16, #tpu.memory_space<vmem>>, %arg3: memref<8x1xf32, #tpu.memory_space<vmem>>, %arg4: memref<32x256xbf16, #tpu.memory_space<vmem>>, %arg5: memref<8x256xbf16, #tpu.memory_space<vmem>>, %arg6: memref<200x32xbf16, #tpu.memory_space<vmem>>) attributes {dimension_semantics = [#tpu.dimension_semantics<parallel>], iteration_bounds = array<i64: 2>, scalar_prefetch = 0 : i64, scratch_operands = 1 : i64, tpu.core_type = #tpu.core_type<tc>, window_params = [{transform_indices = @transform_0, window_bounds = array<i64: 8, 128>}, {pipeline_mode = #tpu.pipeline_mode<synchronous>, transform_indices = @transform_1, window_bounds = array<i64: 8, 200>}, {pipeline_mode = #tpu.pipeline_mode<synchronous>, transform_indices = @transform_2, window_bounds = array<i64: 8, 1>}, {pipeline_mode = #tpu.pipeline_mode<synchronous>, transform_indices = @transform_3, window_bounds = array<i64: 32, 256>}, {transform_indices = @transform_4, window_bounds = array<i64: 8, 256>}]} {
    %c0 = arith.constant 0 : index
    %c0_0 = arith.constant 0 : index
    %0 = vector.load %arg1[%c0, %c0_0] : memref<8x128xbf16, #tpu.memory_space<vmem>>, vector<8x32xbf16>
    %c0_1 = arith.constant 0 : index
    %c0_2 = arith.constant 0 : index
    %1 = vector.load %arg6[%c0_1, %c0_2] : memref<200x32xbf16, #tpu.memory_space<vmem>>, vector<8x32xbf16>
    tpu.vector_store %arg6[%c0_1, %c0_2], %0 {strides = array<i32>} : memref<200x32xbf16, #tpu.memory_space<vmem>>, vector<8x32xbf16>,
    %c0_3 = arith.constant 0 : index
    %c1 = arith.constant 1 : index
    %2 = vector.load %arg1[%c0_3, %c1] : memref<8x128xbf16, #tpu.memory_space<vmem>>, vector<8x32xbf16>
    %c8 = arith.constant 8 : index
    %c0_4 = arith.constant 0 : index
    %3 = vector.load %arg6[%c8, %c0_4] : memref<200x32xbf16, #tpu.memory_space<vmem>>, vector<8x32xbf16>
    tpu.vector_store %arg6[%c8, %c0_4], %2 {strides = array<i32>} : memref<200x32xbf16, #tpu.memory_space<vmem>>, vector<8x32xbf16>,
    %c0_5 = arith.constant 0 : index
    %c2 = arith.constant 2 : index
    %4 = vector.load %arg1[%c0_5, %c2] : memref<8x128xbf16, #tpu.memory_space<vmem>>, vector<8x32xbf16>
    %c16 = arith.constant 16 : index
    %c0_6 = arith.constant 0 : index
    %5 = vector.load %arg6[%c16, %c0_6] : memref<200x32xbf16, #tpu.memory_space<vmem>>, vector<8x32xbf16>
    tpu.vector_store %arg6[%c16, %c0_6], %4 {strides = array<i32>} : memref<200x32xbf16, #tpu.memory_space<vmem>>, vector<8x32xbf16>,
    %c0_7 = arith.constant 0 : index
    %c3 = arith.constant 3 : index
    %6 = vector.load %arg1[%c0_7, %c3] : memref<8x128xbf16, #tpu.memory_space<vmem>>, vector<8x32xbf16>
    %c24 = arith.constant 24 : index
    %c0_8 = arith.constant 0 : index
    %7 = vector.load %arg6[%c24, %c0_8] : memref<200x32xbf16, #tpu.memory_space<vmem>>, vector<8x32xbf16>
    tpu.vector_store %arg6[%c24, %c0_8], %6 {strides = array<i32>} : memref<200x32xbf16, #tpu.memory_space<vmem>>, vector<8x32xbf16>,
    %c0_9 = arith.constant 0 : index
    %c4 = arith.constant 4 : index
    %8 = vector.load %arg1[%c0_9, %c4] : memref<8x128xbf16, #tpu.memory_space<vmem>>, vector<8x32xbf16>
    %c32 = arith.constant 32 : index
    %c0_10 = arith.constant 0 : index
    %9 = vector.load %arg6[%c32, %c0_10] : memref<200x32xbf16, #tpu.memory_space<vmem>>, vector<8x32xbf16>
    tpu.vector_store %arg6[%c32, %c0_10], %8 {strides = array<i32>} : memref<200x32xbf16, #tpu.memory_space<vmem>>, vector<8x32xbf16>,
    %c0_11 = arith.constant 0 : index
    %c8_12 = arith.constant 8 : index
    %10 = vector.load %arg1[%c0_11, %c8_12] : memref<8x128xbf16, #tpu.memory_space<vmem>>, vector<8x32xbf16>
    %c40 = arith.constant 40 : index
    %c0_13 = arith.constant 0 : index
    %11 = vector.load %arg6[%c40, %c0_13] : memref<200x32xbf16, #tpu.memory_space<vmem>>, vector<8x32xbf16>
    tpu.vector_store %arg6[%c40, %c0_13], %10 {strides = array<i32>} : memref<200x32xbf16, #tpu.memory_space<vmem>>, vector<8x32xbf16>,
    %c0_14 = arith.constant 0 : index
    %c9 = arith.constant 9 : index
    %12 = vector.load %arg1[%c0_14, %c9] : memref<8x128xbf16, #tpu.memory_space<vmem>>, vector<8x32xbf16>
    %c48 = arith.constant 48 : index
    %c0_15 = arith.constant 0 : index
    %13 = vector.load %arg6[%c48, %c0_15] : memref<200x32xbf16, #tpu.memory_space<vmem>>, vector<8x32xbf16>
    tpu.vector_store %arg6[%c48, %c0_15], %12 {strides = array<i32>} : memref<200x32xbf16, #tpu.memory_space<vmem>>, vector<8x32xbf16>,
    %c0_16 = arith.constant 0 : index
    %c10 = arith.constant 10 : index
    %14 = vector.load %arg1[%c0_16, %c10] : memref<8x128xbf16, #tpu.memory_space<vmem>>, vector<8x32xbf16>
    %c56 = arith.constant 56 : index
    %c0_17 = arith.constant 0 : index
    %15 = vector.load %arg6[%c56, %c0_17] : memref<200x32xbf16, #tpu.memory_space<vmem>>, vector<8x32xbf16>
    tpu.vector_store %arg6[%c56, %c0_17], %14 {strides = array<i32>} : memref<200x32xbf16, #tpu.memory_space<vmem>>, vector<8x32xbf16>,
    %c0_18 = arith.constant 0 : index
    %c11 = arith.constant 11 : index
    %16 = vector.load %arg1[%c0_18, %c11] : memref<8x128xbf16, #tpu.memory_space<vmem>>, vector<8x32xbf16>
    %c64 = arith.constant 64 : index
    %c0_19 = arith.constant 0 : index
    %17 = vector.load %arg6[%c64, %c0_19] : memref<200x32xbf16, #tpu.memory_space<vmem>>, vector<8x32xbf16>
    tpu.vector_store %arg6[%c64, %c0_19], %16 {strides = array<i32>} : memref<200x32xbf16, #tpu.memory_space<vmem>>, vector<8x32xbf16>,
    %c0_20 = arith.constant 0 : index
    %c12 = arith.constant 12 : index
    %18 = vector.load %arg1[%c0_20, %c12] : memref<8x128xbf16, #tpu.memory_space<vmem>>, vector<8x32xbf16>
    %c72 = arith.constant 72 : index
    %c0_21 = arith.constant 0 : index
    %19 = vector.load %arg6[%c72, %c0_21] : memref<200x32xbf16, #tpu.memory_space<vmem>>, vector<8x32xbf16>
    tpu.vector_store %arg6[%c72, %c0_21], %18 {strides = array<i32>} : memref<200x32xbf16, #tpu.memory_space<vmem>>, vector<8x32xbf16>,
    %c0_22 = arith.constant 0 : index
    %c16_23 = arith.constant 16 : index
    %20 = vector.load %arg1[%c0_22, %c16_23] : memref<8x128xbf16, #tpu.memory_space<vmem>>, vector<8x32xbf16>
    %c80 = arith.constant 80 : index
    %c0_24 = arith.constant 0 : index
    %21 = vector.load %arg6[%c80, %c0_24] : memref<200x32xbf16, #tpu.memory_space<vmem>>, vector<8x32xbf16>
    tpu.vector_store %arg6[%c80, %c0_24], %20 {strides = array<i32>} : memref<200x32xbf16, #tpu.memory_space<vmem>>, vector<8x32xbf16>,
    %c0_25 = arith.constant 0 : index
    %c17 = arith.constant 17 : index
    %22 = vector.load %arg1[%c0_25, %c17] : memref<8x128xbf16, #tpu.memory_space<vmem>>, vector<8x32xbf16>
    %c88 = arith.constant 88 : index
    %c0_26 = arith.constant 0 : index
    %23 = vector.load %arg6[%c88, %c0_26] : memref<200x32xbf16, #tpu.memory_space<vmem>>, vector<8x32xbf16>
    tpu.vector_store %arg6[%c88, %c0_26], %22 {strides = array<i32>} : memref<200x32xbf16, #tpu.memory_space<vmem>>, vector<8x32xbf16>,
    %c0_27 = arith.constant 0 : index
    %c18 = arith.constant 18 : index
    %24 = vector.load %arg1[%c0_27, %c18] : memref<8x128xbf16, #tpu.memory_space<vmem>>, vector<8x32xbf16>
    %c96 = arith.constant 96 : index
    %c0_28 = arith.constant 0 : index
    %25 = vector.load %arg6[%c96, %c0_28] : memref<200x32xbf16, #tpu.memory_space<vmem>>, vector<8x32xbf16>
    tpu.vector_store %arg6[%c96, %c0_28], %24 {strides = array<i32>} : memref<200x32xbf16, #tpu.memory_space<vmem>>, vector<8x32xbf16>,
    %c0_29 = arith.constant 0 : index
    %c19 = arith.constant 19 : index
    %26 = vector.load %arg1[%c0_29, %c19] : memref<8x128xbf16, #tpu.memory_space<vmem>>, vector<8x32xbf16>
    %c104 = arith.constant 104 : index
    %c0_30 = arith.constant 0 : index
    %27 = vector.load %arg6[%c104, %c0_30] : memref<200x32xbf16, #tpu.memory_space<vmem>>, vector<8x32xbf16>
    tpu.vector_store %arg6[%c104, %c0_30], %26 {strides = array<i32>} : memref<200x32xbf16, #tpu.memory_space<vmem>>, vector<8x32xbf16>,
    %c0_31 = arith.constant 0 : index
    %c20 = arith.constant 20 : index
    %28 = vector.load %arg1[%c0_31, %c20] : memref<8x128xbf16, #tpu.memory_space<vmem>>, vector<8x32xbf16>
    %c112 = arith.constant 112 : index
    %c0_32 = arith.constant 0 : index
    %29 = vector.load %arg6[%c112, %c0_32] : memref<200x32xbf16, #tpu.memory_space<vmem>>, vector<8x32xbf16>
    tpu.vector_store %arg6[%c112, %c0_32], %28 {strides = array<i32>} : memref<200x32xbf16, #tpu.memory_space<vmem>>, vector<8x32xbf16>,
    %c0_33 = arith.constant 0 : index
    %c24_34 = arith.constant 24 : index
    %30 = vector.load %arg1[%c0_33, %c24_34] : memref<8x128xbf16, #tpu.memory_space<vmem>>, vector<8x32xbf16>
    %c120 = arith.constant 120 : index
    %c0_35 = arith.constant 0 : index
    %31 = vector.load %arg6[%c120, %c0_35] : memref<200x32xbf16, #tpu.memory_space<vmem>>, vector<8x32xbf16>
    tpu.vector_store %arg6[%c120, %c0_35], %30 {strides = array<i32>} : memref<200x32xbf16, #tpu.memory_space<vmem>>, vector<8x32xbf16>,
    %c0_36 = arith.constant 0 : index
    %c25 = arith.constant 25 : index
    %32 = vector.load %arg1[%c0_36, %c25] : memref<8x128xbf16, #tpu.memory_space<vmem>>, vector<8x32xbf16>
    %c128 = arith.constant 128 : index
    %c0_37 = arith.constant 0 : index
    %33 = vector.load %arg6[%c128, %c0_37] : memref<200x32xbf16, #tpu.memory_space<vmem>>, vector<8x32xbf16>
    tpu.vector_store %arg6[%c128, %c0_37], %32 {strides = array<i32>} : memref<200x32xbf16, #tpu.memory_space<vmem>>, vector<8x32xbf16>,
    %c0_38 = arith.constant 0 : index
    %c26 = arith.constant 26 : index
    %34 = vector.load %arg1[%c0_38, %c26] : memref<8x128xbf16, #tpu.memory_space<vmem>>, vector<8x32xbf16>
    %c136 = arith.constant 136 : index
    %c0_39 = arith.constant 0 : index
    %35 = vector.load %arg6[%c136, %c0_39] : memref<200x32xbf16, #tpu.memory_space<vmem>>, vector<8x32xbf16>
    tpu.vector_store %arg6[%c136, %c0_39], %34 {strides = array<i32>} : memref<200x32xbf16, #tpu.memory_space<vmem>>, vector<8x32xbf16>,
    %c0_40 = arith.constant 0 : index
    %c27 = arith.constant 27 : index
    %36 = vector.load %arg1[%c0_40, %c27] : memref<8x128xbf16, #tpu.memory_space<vmem>>, vector<8x32xbf16>
    %c144 = arith.constant 144 : index
    %c0_41 = arith.constant 0 : index
    %37 = vector.load %arg6[%c144, %c0_41] : memref<200x32xbf16, #tpu.memory_space<vmem>>, vector<8x32xbf16>
    tpu.vector_store %arg6[%c144, %c0_41], %36 {strides = array<i32>} : memref<200x32xbf16, #tpu.memory_space<vmem>>, vector<8x32xbf16>,
    %c0_42 = arith.constant 0 : index
    %c28 = arith.constant 28 : index
    %38 = vector.load %arg1[%c0_42, %c28] : memref<8x128xbf16, #tpu.memory_space<vmem>>, vector<8x32xbf16>
    %c152 = arith.constant 152 : index
    %c0_43 = arith.constant 0 : index
    %39 = vector.load %arg6[%c152, %c0_43] : memref<200x32xbf16, #tpu.memory_space<vmem>>, vector<8x32xbf16>
    tpu.vector_store %arg6[%c152, %c0_43], %38 {strides = array<i32>} : memref<200x32xbf16, #tpu.memory_space<vmem>>, vector<8x32xbf16>,
    %c0_44 = arith.constant 0 : index
    %c32_45 = arith.constant 32 : index
    %40 = vector.load %arg1[%c0_44, %c32_45] : memref<8x128xbf16, #tpu.memory_space<vmem>>, vector<8x32xbf16>
    %c160 = arith.constant 160 : index
    %c0_46 = arith.constant 0 : index
    %41 = vector.load %arg6[%c160, %c0_46] : memref<200x32xbf16, #tpu.memory_space<vmem>>, vector<8x32xbf16>
    tpu.vector_store %arg6[%c160, %c0_46], %40 {strides = array<i32>} : memref<200x32xbf16, #tpu.memory_space<vmem>>, vector<8x32xbf16>,
    %c0_47 = arith.constant 0 : index
    %c33 = arith.constant 33 : index
    %42 = vector.load %arg1[%c0_47, %c33] : memref<8x128xbf16, #tpu.memory_space<vmem>>, vector<8x32xbf16>
    %c168 = arith.constant 168 : index
    %c0_48 = arith.constant 0 : index
    %43 = vector.load %arg6[%c168, %c0_48] : memref<200x32xbf16, #tpu.memory_space<vmem>>, vector<8x32xbf16>
    tpu.vector_store %arg6[%c168, %c0_48], %42 {strides = array<i32>} : memref<200x32xbf16, #tpu.memory_space<vmem>>, vector<8x32xbf16>,
    %c0_49 = arith.constant 0 : index
    %c34 = arith.constant 34 : index
    %44 = vector.load %arg1[%c0_49, %c34] : memref<8x128xbf16, #tpu.memory_space<vmem>>, vector<8x32xbf16>
    %c176 = arith.constant 176 : index
    %c0_50 = arith.constant 0 : index
    %45 = vector.load %arg6[%c176, %c0_50] : memref<200x32xbf16, #tpu.memory_space<vmem>>, vector<8x32xbf16>
    tpu.vector_store %arg6[%c176, %c0_50], %44 {strides = array<i32>} : memref<200x32xbf16, #tpu.memory_space<vmem>>, vector<8x32xbf16>,
    %c0_51 = arith.constant 0 : index
    %c35 = arith.constant 35 : index
    %46 = vector.load %arg1[%c0_51, %c35] : memref<8x128xbf16, #tpu.memory_space<vmem>>, vector<8x32xbf16>
    %c184 = arith.constant 184 : index
    %c0_52 = arith.constant 0 : index
    %47 = vector.load %arg6[%c184, %c0_52] : memref<200x32xbf16, #tpu.memory_space<vmem>>, vector<8x32xbf16>
    tpu.vector_store %arg6[%c184, %c0_52], %46 {strides = array<i32>} : memref<200x32xbf16, #tpu.memory_space<vmem>>, vector<8x32xbf16>,
    %c0_53 = arith.constant 0 : index
    %c36 = arith.constant 36 : index
    %48 = vector.load %arg1[%c0_53, %c36] : memref<8x128xbf16, #tpu.memory_space<vmem>>, vector<8x32xbf16>
    %c192 = arith.constant 192 : index
    %c0_54 = arith.constant 0 : index
    %49 = vector.load %arg6[%c192, %c0_54] : memref<200x32xbf16, #tpu.memory_space<vmem>>, vector<8x32xbf16>
    tpu.vector_store %arg6[%c192, %c0_54], %48 {strides = array<i32>} : memref<200x32xbf16, #tpu.memory_space<vmem>>, vector<8x32xbf16>,
    %c0_55 = arith.constant 0 : index
    %c0_56 = arith.constant 0 : index
    %50 = vector.load %arg2[%c0_55, %c0_56] : memref<8x200xbf16, #tpu.memory_space<vmem>>, vector<8x200xbf16>
    %c0_57 = arith.constant 0 : index
    %c0_58 = arith.constant 0 : index
    %51 = vector.load %arg6[%c0_57, %c0_58] : memref<200x32xbf16, #tpu.memory_space<vmem>>, vector<200x32xbf16>
    %cst = arith.constant dense<0.000000e+00> : vector<8x32xf32>
    %52 = tpu.matmul %50, %51, %cst {dimension_numbers = #tpu.dot_dimension_numbers<[1], [0], [0], [1], [0, 0, 1, 1], [], []>} : vector<8x200xbf16>, vector<200x32xbf16>, vector<8x32xf32> -> vector<8x32xf32>
    %c0_59 = arith.constant 0 : index
    %c0_60 = arith.constant 0 : index
    %53 = vector.load %arg3[%c0_59, %c0_60] : memref<8x1xf32, #tpu.memory_space<vmem>>, vector<8x1xf32>
    %54 = vector.broadcast %53 : vector<8x1xf32> to vector<8x32xf32>
    %55 = arith.addf %52, %54 : vector<8x32xf32>
    %cst_61 = arith.constant 0.000000e+00 : f32
    %56 = vector.broadcast %cst_61 : f32 to vector<8x32xf32>
    %57 = arith.maximumf %55, %56 : vector<8x32xf32>
    %58 = arith.truncf %57 : vector<8x32xf32> to vector<8x32xbf16>
    %c0_62 = arith.constant 0 : index
    %c0_63 = arith.constant 0 : index
    %59 = vector.load %arg4[%c0_62, %c0_63] : memref<32x256xbf16, #tpu.memory_space<vmem>>, vector<32x256xbf16>
    %cst_64 = arith.constant dense<0.000000e+00> : vector<8x256xf32>
    %60 = tpu.matmul %58, %59, %cst_64 {dimension_numbers = #tpu.dot_dimension_numbers<[1], [0], [0], [1], [0, 0, 1, 1], [], []>} : vector<8x32xbf16>, vector<32x256xbf16>, vector<8x256xf32> -> vector<8x256xf32>
    %61 = arith.truncf %60 : vector<8x256xf32> to vector<8x256xbf16>
    %c0_65 = arith.constant 0 : index
    %c0_66 = arith.constant 0 : index
    %62 = vector.load %arg5[%c0_65, %c0_66] : memref<8x256xbf16, #tpu.memory_space<vmem>>, vector<8x256xbf16>
    tpu.vector_store %arg5[%c0_65, %c0_66], %61 {strides = array<i32>} : memref<8x256xbf16, #tpu.memory_space<vmem>>, vector<8x256xbf16>,
    return
  }
  func.func @transform_0(%arg0: i32) -> (i32, i32) {
    %c0_i32 = arith.constant 0 : i32
    %c0_i32_0 = arith.constant 0 : i32
    return %c0_i32, %arg0 : i32, i32
  }
  func.func @transform_1(%arg0: i32) -> (i32, i32) {
    %c0_i32 = arith.constant 0 : i32
    %c0_i32_0 = arith.constant 0 : i32
    %c0_i32_1 = arith.constant 0 : i32
    return %c0_i32, %c0_i32_0 : i32, i32
  }
  func.func @transform_2(%arg0: i32) -> (i32, i32) {
    %c0_i32 = arith.constant 0 : i32
    %c0_i32_0 = arith.constant 0 : i32
    %c0_i32_1 = arith.constant 0 : i32
    return %c0_i32, %c0_i32_0 : i32, i32
  }
  func.func @transform_3(%arg0: i32) -> (i32, i32) {
    %c0_i32 = arith.constant 0 : i32
    %c0_i32_0 = arith.constant 0 : i32
    %c0_i32_1 = arith.constant 0 : i32
    return %c0_i32, %c0_i32_0 : i32, i32
  }
  func.func @transform_4(%arg0: i32) -> (i32, i32) {
    %c0_i32 = arith.constant 0 : i32
    %c0_i32_0 = arith.constant 0 : i32
    return %c0_i32, %arg0 : i32, i32
  }
}

module attributes {stable_mosaic.version = 11 : i64} {
  func.func @_conv_stage_kernel(%arg0: i32, %arg1: memref<8x128xbf16, #tpu.memory_space<vmem>>, %arg2: memref<8x200xbf16, #tpu.memory_space<vmem>>, %arg3: memref<8x1xf32, #tpu.memory_space<vmem>>, %arg4: memref<5x128xbf16, #tpu.memory_space<vmem>>, %arg5: memref<8x128xbf16, #tpu.memory_space<vmem>>, %arg6: memref<200x5xbf16, #tpu.memory_space<vmem>>) attributes {dimension_semantics = [#tpu.dimension_semantics<parallel>], iteration_bounds = array<i64: 2>, scalar_prefetch = 0 : i64, scratch_operands = 1 : i64, tpu.core_type = #tpu.core_type<tc>, window_params = [{transform_indices = @transform_0, window_bounds = array<i64: 8, 128>}, {pipeline_mode = #tpu.pipeline_mode<synchronous>, transform_indices = @transform_1, window_bounds = array<i64: 8, 200>}, {pipeline_mode = #tpu.pipeline_mode<synchronous>, transform_indices = @transform_2, window_bounds = array<i64: 8, 1>}, {pipeline_mode = #tpu.pipeline_mode<synchronous>, transform_indices = @transform_3, window_bounds = array<i64: 5, 128>}, {transform_indices = @transform_4, window_bounds = array<i64: 8, 128>}]} {
    %c0 = arith.constant 0 : index
    %c0_0 = arith.constant 0 : index
    %0 = vector.load %arg1[%c0, %c0_0] : memref<8x128xbf16, #tpu.memory_space<vmem>>, vector<8x5xbf16>
    %c0_1 = arith.constant 0 : index
    %c0_2 = arith.constant 0 : index
    %1 = vector.load %arg6[%c0_1, %c0_2] : memref<200x5xbf16, #tpu.memory_space<vmem>>, vector<8x5xbf16>
    tpu.vector_store %arg6[%c0_1, %c0_2], %0 {strides = array<i32>} : memref<200x5xbf16, #tpu.memory_space<vmem>>, vector<8x5xbf16>,
    %c0_3 = arith.constant 0 : index
    %c1 = arith.constant 1 : index
    %2 = vector.load %arg1[%c0_3, %c1] : memref<8x128xbf16, #tpu.memory_space<vmem>>, vector<8x5xbf16>
    %c8 = arith.constant 8 : index
    %c0_4 = arith.constant 0 : index
    %3 = vector.load %arg6[%c8, %c0_4] : memref<200x5xbf16, #tpu.memory_space<vmem>>, vector<8x5xbf16>
    tpu.vector_store %arg6[%c8, %c0_4], %2 {strides = array<i32>} : memref<200x5xbf16, #tpu.memory_space<vmem>>, vector<8x5xbf16>,
    %c0_5 = arith.constant 0 : index
    %c2 = arith.constant 2 : index
    %4 = vector.load %arg1[%c0_5, %c2] : memref<8x128xbf16, #tpu.memory_space<vmem>>, vector<8x5xbf16>
    %c16 = arith.constant 16 : index
    %c0_6 = arith.constant 0 : index
    %5 = vector.load %arg6[%c16, %c0_6] : memref<200x5xbf16, #tpu.memory_space<vmem>>, vector<8x5xbf16>
    tpu.vector_store %arg6[%c16, %c0_6], %4 {strides = array<i32>} : memref<200x5xbf16, #tpu.memory_space<vmem>>, vector<8x5xbf16>,
    %c0_7 = arith.constant 0 : index
    %c3 = arith.constant 3 : index
    %6 = vector.load %arg1[%c0_7, %c3] : memref<8x128xbf16, #tpu.memory_space<vmem>>, vector<8x5xbf16>
    %c24 = arith.constant 24 : index
    %c0_8 = arith.constant 0 : index
    %7 = vector.load %arg6[%c24, %c0_8] : memref<200x5xbf16, #tpu.memory_space<vmem>>, vector<8x5xbf16>
    tpu.vector_store %arg6[%c24, %c0_8], %6 {strides = array<i32>} : memref<200x5xbf16, #tpu.memory_space<vmem>>, vector<8x5xbf16>,
    %c0_9 = arith.constant 0 : index
    %c4 = arith.constant 4 : index
    %8 = vector.load %arg1[%c0_9, %c4] : memref<8x128xbf16, #tpu.memory_space<vmem>>, vector<8x5xbf16>
    %c32 = arith.constant 32 : index
    %c0_10 = arith.constant 0 : index
    %9 = vector.load %arg6[%c32, %c0_10] : memref<200x5xbf16, #tpu.memory_space<vmem>>, vector<8x5xbf16>
    tpu.vector_store %arg6[%c32, %c0_10], %8 {strides = array<i32>} : memref<200x5xbf16, #tpu.memory_space<vmem>>, vector<8x5xbf16>,
    %c0_11 = arith.constant 0 : index
    %c5 = arith.constant 5 : index
    %10 = vector.load %arg1[%c0_11, %c5] : memref<8x128xbf16, #tpu.memory_space<vmem>>, vector<8x5xbf16>
    %c40 = arith.constant 40 : index
    %c0_12 = arith.constant 0 : index
    %11 = vector.load %arg6[%c40, %c0_12] : memref<200x5xbf16, #tpu.memory_space<vmem>>, vector<8x5xbf16>
    tpu.vector_store %arg6[%c40, %c0_12], %10 {strides = array<i32>} : memref<200x5xbf16, #tpu.memory_space<vmem>>, vector<8x5xbf16>,
    %c0_13 = arith.constant 0 : index
    %c6 = arith.constant 6 : index
    %12 = vector.load %arg1[%c0_13, %c6] : memref<8x128xbf16, #tpu.memory_space<vmem>>, vector<8x5xbf16>
    %c48 = arith.constant 48 : index
    %c0_14 = arith.constant 0 : index
    %13 = vector.load %arg6[%c48, %c0_14] : memref<200x5xbf16, #tpu.memory_space<vmem>>, vector<8x5xbf16>
    tpu.vector_store %arg6[%c48, %c0_14], %12 {strides = array<i32>} : memref<200x5xbf16, #tpu.memory_space<vmem>>, vector<8x5xbf16>,
    %c0_15 = arith.constant 0 : index
    %c7 = arith.constant 7 : index
    %14 = vector.load %arg1[%c0_15, %c7] : memref<8x128xbf16, #tpu.memory_space<vmem>>, vector<8x5xbf16>
    %c56 = arith.constant 56 : index
    %c0_16 = arith.constant 0 : index
    %15 = vector.load %arg6[%c56, %c0_16] : memref<200x5xbf16, #tpu.memory_space<vmem>>, vector<8x5xbf16>
    tpu.vector_store %arg6[%c56, %c0_16], %14 {strides = array<i32>} : memref<200x5xbf16, #tpu.memory_space<vmem>>, vector<8x5xbf16>,
    %c0_17 = arith.constant 0 : index
    %c8_18 = arith.constant 8 : index
    %16 = vector.load %arg1[%c0_17, %c8_18] : memref<8x128xbf16, #tpu.memory_space<vmem>>, vector<8x5xbf16>
    %c64 = arith.constant 64 : index
    %c0_19 = arith.constant 0 : index
    %17 = vector.load %arg6[%c64, %c0_19] : memref<200x5xbf16, #tpu.memory_space<vmem>>, vector<8x5xbf16>
    tpu.vector_store %arg6[%c64, %c0_19], %16 {strides = array<i32>} : memref<200x5xbf16, #tpu.memory_space<vmem>>, vector<8x5xbf16>,
    %c0_20 = arith.constant 0 : index
    %c9 = arith.constant 9 : index
    %18 = vector.load %arg1[%c0_20, %c9] : memref<8x128xbf16, #tpu.memory_space<vmem>>, vector<8x5xbf16>
    %c72 = arith.constant 72 : index
    %c0_21 = arith.constant 0 : index
    %19 = vector.load %arg6[%c72, %c0_21] : memref<200x5xbf16, #tpu.memory_space<vmem>>, vector<8x5xbf16>
    tpu.vector_store %arg6[%c72, %c0_21], %18 {strides = array<i32>} : memref<200x5xbf16, #tpu.memory_space<vmem>>, vector<8x5xbf16>,
    %c0_22 = arith.constant 0 : index
    %c10 = arith.constant 10 : index
    %20 = vector.load %arg1[%c0_22, %c10] : memref<8x128xbf16, #tpu.memory_space<vmem>>, vector<8x5xbf16>
    %c80 = arith.constant 80 : index
    %c0_23 = arith.constant 0 : index
    %21 = vector.load %arg6[%c80, %c0_23] : memref<200x5xbf16, #tpu.memory_space<vmem>>, vector<8x5xbf16>
    tpu.vector_store %arg6[%c80, %c0_23], %20 {strides = array<i32>} : memref<200x5xbf16, #tpu.memory_space<vmem>>, vector<8x5xbf16>,
    %c0_24 = arith.constant 0 : index
    %c11 = arith.constant 11 : index
    %22 = vector.load %arg1[%c0_24, %c11] : memref<8x128xbf16, #tpu.memory_space<vmem>>, vector<8x5xbf16>
    %c88 = arith.constant 88 : index
    %c0_25 = arith.constant 0 : index
    %23 = vector.load %arg6[%c88, %c0_25] : memref<200x5xbf16, #tpu.memory_space<vmem>>, vector<8x5xbf16>
    tpu.vector_store %arg6[%c88, %c0_25], %22 {strides = array<i32>} : memref<200x5xbf16, #tpu.memory_space<vmem>>, vector<8x5xbf16>,
    %c0_26 = arith.constant 0 : index
    %c12 = arith.constant 12 : index
    %24 = vector.load %arg1[%c0_26, %c12] : memref<8x128xbf16, #tpu.memory_space<vmem>>, vector<8x5xbf16>
    %c96 = arith.constant 96 : index
    %c0_27 = arith.constant 0 : index
    %25 = vector.load %arg6[%c96, %c0_27] : memref<200x5xbf16, #tpu.memory_space<vmem>>, vector<8x5xbf16>
    tpu.vector_store %arg6[%c96, %c0_27], %24 {strides = array<i32>} : memref<200x5xbf16, #tpu.memory_space<vmem>>, vector<8x5xbf16>,
    %c0_28 = arith.constant 0 : index
    %c13 = arith.constant 13 : index
    %26 = vector.load %arg1[%c0_28, %c13] : memref<8x128xbf16, #tpu.memory_space<vmem>>, vector<8x5xbf16>
    %c104 = arith.constant 104 : index
    %c0_29 = arith.constant 0 : index
    %27 = vector.load %arg6[%c104, %c0_29] : memref<200x5xbf16, #tpu.memory_space<vmem>>, vector<8x5xbf16>
    tpu.vector_store %arg6[%c104, %c0_29], %26 {strides = array<i32>} : memref<200x5xbf16, #tpu.memory_space<vmem>>, vector<8x5xbf16>,
    %c0_30 = arith.constant 0 : index
    %c14 = arith.constant 14 : index
    %28 = vector.load %arg1[%c0_30, %c14] : memref<8x128xbf16, #tpu.memory_space<vmem>>, vector<8x5xbf16>
    %c112 = arith.constant 112 : index
    %c0_31 = arith.constant 0 : index
    %29 = vector.load %arg6[%c112, %c0_31] : memref<200x5xbf16, #tpu.memory_space<vmem>>, vector<8x5xbf16>
    tpu.vector_store %arg6[%c112, %c0_31], %28 {strides = array<i32>} : memref<200x5xbf16, #tpu.memory_space<vmem>>, vector<8x5xbf16>,
    %c0_32 = arith.constant 0 : index
    %c15 = arith.constant 15 : index
    %30 = vector.load %arg1[%c0_32, %c15] : memref<8x128xbf16, #tpu.memory_space<vmem>>, vector<8x5xbf16>
    %c120 = arith.constant 120 : index
    %c0_33 = arith.constant 0 : index
    %31 = vector.load %arg6[%c120, %c0_33] : memref<200x5xbf16, #tpu.memory_space<vmem>>, vector<8x5xbf16>
    tpu.vector_store %arg6[%c120, %c0_33], %30 {strides = array<i32>} : memref<200x5xbf16, #tpu.memory_space<vmem>>, vector<8x5xbf16>,
    %c0_34 = arith.constant 0 : index
    %c16_35 = arith.constant 16 : index
    %32 = vector.load %arg1[%c0_34, %c16_35] : memref<8x128xbf16, #tpu.memory_space<vmem>>, vector<8x5xbf16>
    %c128 = arith.constant 128 : index
    %c0_36 = arith.constant 0 : index
    %33 = vector.load %arg6[%c128, %c0_36] : memref<200x5xbf16, #tpu.memory_space<vmem>>, vector<8x5xbf16>
    tpu.vector_store %arg6[%c128, %c0_36], %32 {strides = array<i32>} : memref<200x5xbf16, #tpu.memory_space<vmem>>, vector<8x5xbf16>,
    %c0_37 = arith.constant 0 : index
    %c17 = arith.constant 17 : index
    %34 = vector.load %arg1[%c0_37, %c17] : memref<8x128xbf16, #tpu.memory_space<vmem>>, vector<8x5xbf16>
    %c136 = arith.constant 136 : index
    %c0_38 = arith.constant 0 : index
    %35 = vector.load %arg6[%c136, %c0_38] : memref<200x5xbf16, #tpu.memory_space<vmem>>, vector<8x5xbf16>
    tpu.vector_store %arg6[%c136, %c0_38], %34 {strides = array<i32>} : memref<200x5xbf16, #tpu.memory_space<vmem>>, vector<8x5xbf16>,
    %c0_39 = arith.constant 0 : index
    %c18 = arith.constant 18 : index
    %36 = vector.load %arg1[%c0_39, %c18] : memref<8x128xbf16, #tpu.memory_space<vmem>>, vector<8x5xbf16>
    %c144 = arith.constant 144 : index
    %c0_40 = arith.constant 0 : index
    %37 = vector.load %arg6[%c144, %c0_40] : memref<200x5xbf16, #tpu.memory_space<vmem>>, vector<8x5xbf16>
    tpu.vector_store %arg6[%c144, %c0_40], %36 {strides = array<i32>} : memref<200x5xbf16, #tpu.memory_space<vmem>>, vector<8x5xbf16>,
    %c0_41 = arith.constant 0 : index
    %c19 = arith.constant 19 : index
    %38 = vector.load %arg1[%c0_41, %c19] : memref<8x128xbf16, #tpu.memory_space<vmem>>, vector<8x5xbf16>
    %c152 = arith.constant 152 : index
    %c0_42 = arith.constant 0 : index
    %39 = vector.load %arg6[%c152, %c0_42] : memref<200x5xbf16, #tpu.memory_space<vmem>>, vector<8x5xbf16>
    tpu.vector_store %arg6[%c152, %c0_42], %38 {strides = array<i32>} : memref<200x5xbf16, #tpu.memory_space<vmem>>, vector<8x5xbf16>,
    %c0_43 = arith.constant 0 : index
    %c20 = arith.constant 20 : index
    %40 = vector.load %arg1[%c0_43, %c20] : memref<8x128xbf16, #tpu.memory_space<vmem>>, vector<8x5xbf16>
    %c160 = arith.constant 160 : index
    %c0_44 = arith.constant 0 : index
    %41 = vector.load %arg6[%c160, %c0_44] : memref<200x5xbf16, #tpu.memory_space<vmem>>, vector<8x5xbf16>
    tpu.vector_store %arg6[%c160, %c0_44], %40 {strides = array<i32>} : memref<200x5xbf16, #tpu.memory_space<vmem>>, vector<8x5xbf16>,
    %c0_45 = arith.constant 0 : index
    %c21 = arith.constant 21 : index
    %42 = vector.load %arg1[%c0_45, %c21] : memref<8x128xbf16, #tpu.memory_space<vmem>>, vector<8x5xbf16>
    %c168 = arith.constant 168 : index
    %c0_46 = arith.constant 0 : index
    %43 = vector.load %arg6[%c168, %c0_46] : memref<200x5xbf16, #tpu.memory_space<vmem>>, vector<8x5xbf16>
    tpu.vector_store %arg6[%c168, %c0_46], %42 {strides = array<i32>} : memref<200x5xbf16, #tpu.memory_space<vmem>>, vector<8x5xbf16>,
    %c0_47 = arith.constant 0 : index
    %c22 = arith.constant 22 : index
    %44 = vector.load %arg1[%c0_47, %c22] : memref<8x128xbf16, #tpu.memory_space<vmem>>, vector<8x5xbf16>
    %c176 = arith.constant 176 : index
    %c0_48 = arith.constant 0 : index
    %45 = vector.load %arg6[%c176, %c0_48] : memref<200x5xbf16, #tpu.memory_space<vmem>>, vector<8x5xbf16>
    tpu.vector_store %arg6[%c176, %c0_48], %44 {strides = array<i32>} : memref<200x5xbf16, #tpu.memory_space<vmem>>, vector<8x5xbf16>,
    %c0_49 = arith.constant 0 : index
    %c23 = arith.constant 23 : index
    %46 = vector.load %arg1[%c0_49, %c23] : memref<8x128xbf16, #tpu.memory_space<vmem>>, vector<8x5xbf16>
    %c184 = arith.constant 184 : index
    %c0_50 = arith.constant 0 : index
    %47 = vector.load %arg6[%c184, %c0_50] : memref<200x5xbf16, #tpu.memory_space<vmem>>, vector<8x5xbf16>
    tpu.vector_store %arg6[%c184, %c0_50], %46 {strides = array<i32>} : memref<200x5xbf16, #tpu.memory_space<vmem>>, vector<8x5xbf16>,
    %c0_51 = arith.constant 0 : index
    %c24_52 = arith.constant 24 : index
    %48 = vector.load %arg1[%c0_51, %c24_52] : memref<8x128xbf16, #tpu.memory_space<vmem>>, vector<8x5xbf16>
    %c192 = arith.constant 192 : index
    %c0_53 = arith.constant 0 : index
    %49 = vector.load %arg6[%c192, %c0_53] : memref<200x5xbf16, #tpu.memory_space<vmem>>, vector<8x5xbf16>
    tpu.vector_store %arg6[%c192, %c0_53], %48 {strides = array<i32>} : memref<200x5xbf16, #tpu.memory_space<vmem>>, vector<8x5xbf16>,
    %c0_54 = arith.constant 0 : index
    %c0_55 = arith.constant 0 : index
    %50 = vector.load %arg2[%c0_54, %c0_55] : memref<8x200xbf16, #tpu.memory_space<vmem>>, vector<8x200xbf16>
    %c0_56 = arith.constant 0 : index
    %c0_57 = arith.constant 0 : index
    %51 = vector.load %arg6[%c0_56, %c0_57] : memref<200x5xbf16, #tpu.memory_space<vmem>>, vector<200x5xbf16>
    %cst = arith.constant dense<0.000000e+00> : vector<8x5xf32>
    %52 = tpu.matmul %50, %51, %cst {dimension_numbers = #tpu.dot_dimension_numbers<[1], [0], [0], [1], [0, 0, 1, 1], [], []>} : vector<8x200xbf16>, vector<200x5xbf16>, vector<8x5xf32> -> vector<8x5xf32>
    %c0_58 = arith.constant 0 : index
    %c0_59 = arith.constant 0 : index
    %53 = vector.load %arg3[%c0_58, %c0_59] : memref<8x1xf32, #tpu.memory_space<vmem>>, vector<8x1xf32>
    %54 = vector.broadcast %53 : vector<8x1xf32> to vector<8x5xf32>
    %55 = arith.addf %52, %54 : vector<8x5xf32>
    %cst_60 = arith.constant 0.000000e+00 : f32
    %56 = vector.broadcast %cst_60 : f32 to vector<8x5xf32>
    %57 = arith.maximumf %55, %56 : vector<8x5xf32>
    %58 = arith.truncf %57 : vector<8x5xf32> to vector<8x5xbf16>
    %c0_61 = arith.constant 0 : index
    %c0_62 = arith.constant 0 : index
    %59 = vector.load %arg4[%c0_61, %c0_62] : memref<5x128xbf16, #tpu.memory_space<vmem>>, vector<5x128xbf16>
    %cst_63 = arith.constant dense<0.000000e+00> : vector<8x128xf32>
    %60 = tpu.matmul %58, %59, %cst_63 {dimension_numbers = #tpu.dot_dimension_numbers<[1], [0], [0], [1], [0, 0, 1, 1], [], []>} : vector<8x5xbf16>, vector<5x128xbf16>, vector<8x128xf32> -> vector<8x128xf32>
    %61 = arith.truncf %60 : vector<8x128xf32> to vector<8x128xbf16>
    %c0_64 = arith.constant 0 : index
    %c0_65 = arith.constant 0 : index
    %62 = vector.load %arg5[%c0_64, %c0_65] : memref<8x128xbf16, #tpu.memory_space<vmem>>, vector<8x128xbf16>
    tpu.vector_store %arg5[%c0_64, %c0_65], %61 {strides = array<i32>} : memref<8x128xbf16, #tpu.memory_space<vmem>>, vector<8x128xbf16>,
    return
  }
  func.func @transform_0(%arg0: i32) -> (i32, i32) {
    %c0_i32 = arith.constant 0 : i32
    %c0_i32_0 = arith.constant 0 : i32
    return %c0_i32, %arg0 : i32, i32
  }
  func.func @transform_1(%arg0: i32) -> (i32, i32) {
    %c0_i32 = arith.constant 0 : i32
    %c0_i32_0 = arith.constant 0 : i32
    %c0_i32_1 = arith.constant 0 : i32
    return %c0_i32, %c0_i32_0 : i32, i32
  }
  func.func @transform_2(%arg0: i32) -> (i32, i32) {
    %c0_i32 = arith.constant 0 : i32
    %c0_i32_0 = arith.constant 0 : i32
    %c0_i32_1 = arith.constant 0 : i32
    return %c0_i32, %c0_i32_0 : i32, i32
  }
  func.func @transform_3(%arg0: i32) -> (i32, i32) {
    %c0_i32 = arith.constant 0 : i32
    %c0_i32_0 = arith.constant 0 : i32
    %c0_i32_1 = arith.constant 0 : i32
    return %c0_i32, %c0_i32_0 : i32, i32
  }
  func.func @transform_4(%arg0: i32) -> (i32, i32) {
    %c0_i32 = arith.constant 0 : i32
    %c0_i32_0 = arith.constant 0 : i32
    return %c0_i32, %arg0 : i32, i32
  }
}

module attributes {stable_mosaic.version = 11 : i64} {
  func.func @_conv_stage_kernel(%arg0: i32, %arg1: memref<8x128xbf16, #tpu.memory_space<vmem>>, %arg2: memref<8x392xbf16, #tpu.memory_space<vmem>>, %arg3: memref<8x1xf32, #tpu.memory_space<vmem>>, %arg4: memref<16x128xbf16, #tpu.memory_space<vmem>>, %arg5: memref<8x128xbf16, #tpu.memory_space<vmem>>, %arg6: memref<392x16xbf16, #tpu.memory_space<vmem>>) attributes {dimension_semantics = [#tpu.dimension_semantics<parallel>], iteration_bounds = array<i64: 2>, scalar_prefetch = 0 : i64, scratch_operands = 1 : i64, tpu.core_type = #tpu.core_type<tc>, window_params = [{transform_indices = @transform_0, window_bounds = array<i64: 8, 128>}, {pipeline_mode = #tpu.pipeline_mode<synchronous>, transform_indices = @transform_1, window_bounds = array<i64: 8, 392>}, {pipeline_mode = #tpu.pipeline_mode<synchronous>, transform_indices = @transform_2, window_bounds = array<i64: 8, 1>}, {pipeline_mode = #tpu.pipeline_mode<synchronous>, transform_indices = @transform_3, window_bounds = array<i64: 16, 128>}, {transform_indices = @transform_4, window_bounds = array<i64: 8, 128>}]} {
    %c0 = arith.constant 0 : index
    %c0_0 = arith.constant 0 : index
    %0 = vector.load %arg1[%c0, %c0_0] : memref<8x128xbf16, #tpu.memory_space<vmem>>, vector<8x16xbf16>
    %c0_1 = arith.constant 0 : index
    %c0_2 = arith.constant 0 : index
    %1 = vector.load %arg6[%c0_1, %c0_2] : memref<392x16xbf16, #tpu.memory_space<vmem>>, vector<8x16xbf16>
    tpu.vector_store %arg6[%c0_1, %c0_2], %0 {strides = array<i32>} : memref<392x16xbf16, #tpu.memory_space<vmem>>, vector<8x16xbf16>,
    %c0_3 = arith.constant 0 : index
    %c1 = arith.constant 1 : index
    %2 = vector.load %arg1[%c0_3, %c1] : memref<8x128xbf16, #tpu.memory_space<vmem>>, vector<8x16xbf16>
    %c8 = arith.constant 8 : index
    %c0_4 = arith.constant 0 : index
    %3 = vector.load %arg6[%c8, %c0_4] : memref<392x16xbf16, #tpu.memory_space<vmem>>, vector<8x16xbf16>
    tpu.vector_store %arg6[%c8, %c0_4], %2 {strides = array<i32>} : memref<392x16xbf16, #tpu.memory_space<vmem>>, vector<8x16xbf16>,
    %c0_5 = arith.constant 0 : index
    %c2 = arith.constant 2 : index
    %4 = vector.load %arg1[%c0_5, %c2] : memref<8x128xbf16, #tpu.memory_space<vmem>>, vector<8x16xbf16>
    %c16 = arith.constant 16 : index
    %c0_6 = arith.constant 0 : index
    %5 = vector.load %arg6[%c16, %c0_6] : memref<392x16xbf16, #tpu.memory_space<vmem>>, vector<8x16xbf16>
    tpu.vector_store %arg6[%c16, %c0_6], %4 {strides = array<i32>} : memref<392x16xbf16, #tpu.memory_space<vmem>>, vector<8x16xbf16>,
    %c0_7 = arith.constant 0 : index
    %c3 = arith.constant 3 : index
    %6 = vector.load %arg1[%c0_7, %c3] : memref<8x128xbf16, #tpu.memory_space<vmem>>, vector<8x16xbf16>
    %c24 = arith.constant 24 : index
    %c0_8 = arith.constant 0 : index
    %7 = vector.load %arg6[%c24, %c0_8] : memref<392x16xbf16, #tpu.memory_space<vmem>>, vector<8x16xbf16>
    tpu.vector_store %arg6[%c24, %c0_8], %6 {strides = array<i32>} : memref<392x16xbf16, #tpu.memory_space<vmem>>, vector<8x16xbf16>,
    %c0_9 = arith.constant 0 : index
    %c4 = arith.constant 4 : index
    %8 = vector.load %arg1[%c0_9, %c4] : memref<8x128xbf16, #tpu.memory_space<vmem>>, vector<8x16xbf16>
    %c32 = arith.constant 32 : index
    %c0_10 = arith.constant 0 : index
    %9 = vector.load %arg6[%c32, %c0_10] : memref<392x16xbf16, #tpu.memory_space<vmem>>, vector<8x16xbf16>
    tpu.vector_store %arg6[%c32, %c0_10], %8 {strides = array<i32>} : memref<392x16xbf16, #tpu.memory_space<vmem>>, vector<8x16xbf16>,
    %c0_11 = arith.constant 0 : index
    %c5 = arith.constant 5 : index
    %10 = vector.load %arg1[%c0_11, %c5] : memref<8x128xbf16, #tpu.memory_space<vmem>>, vector<8x16xbf16>
    %c40 = arith.constant 40 : index
    %c0_12 = arith.constant 0 : index
    %11 = vector.load %arg6[%c40, %c0_12] : memref<392x16xbf16, #tpu.memory_space<vmem>>, vector<8x16xbf16>
    tpu.vector_store %arg6[%c40, %c0_12], %10 {strides = array<i32>} : memref<392x16xbf16, #tpu.memory_space<vmem>>, vector<8x16xbf16>,
    %c0_13 = arith.constant 0 : index
    %c6 = arith.constant 6 : index
    %12 = vector.load %arg1[%c0_13, %c6] : memref<8x128xbf16, #tpu.memory_space<vmem>>, vector<8x16xbf16>
    %c48 = arith.constant 48 : index
    %c0_14 = arith.constant 0 : index
    %13 = vector.load %arg6[%c48, %c0_14] : memref<392x16xbf16, #tpu.memory_space<vmem>>, vector<8x16xbf16>
    tpu.vector_store %arg6[%c48, %c0_14], %12 {strides = array<i32>} : memref<392x16xbf16, #tpu.memory_space<vmem>>, vector<8x16xbf16>,
    %c0_15 = arith.constant 0 : index
    %c8_16 = arith.constant 8 : index
    %14 = vector.load %arg1[%c0_15, %c8_16] : memref<8x128xbf16, #tpu.memory_space<vmem>>, vector<8x16xbf16>
    %c56 = arith.constant 56 : index
    %c0_17 = arith.constant 0 : index
    %15 = vector.load %arg6[%c56, %c0_17] : memref<392x16xbf16, #tpu.memory_space<vmem>>, vector<8x16xbf16>
    tpu.vector_store %arg6[%c56, %c0_17], %14 {strides = array<i32>} : memref<392x16xbf16, #tpu.memory_space<vmem>>, vector<8x16xbf16>,
    %c0_18 = arith.constant 0 : index
    %c9 = arith.constant 9 : index
    %16 = vector.load %arg1[%c0_18, %c9] : memref<8x128xbf16, #tpu.memory_space<vmem>>, vector<8x16xbf16>
    %c64 = arith.constant 64 : index
    %c0_19 = arith.constant 0 : index
    %17 = vector.load %arg6[%c64, %c0_19] : memref<392x16xbf16, #tpu.memory_space<vmem>>, vector<8x16xbf16>
    tpu.vector_store %arg6[%c64, %c0_19], %16 {strides = array<i32>} : memref<392x16xbf16, #tpu.memory_space<vmem>>, vector<8x16xbf16>,
    %c0_20 = arith.constant 0 : index
    %c10 = arith.constant 10 : index
    %18 = vector.load %arg1[%c0_20, %c10] : memref<8x128xbf16, #tpu.memory_space<vmem>>, vector<8x16xbf16>
    %c72 = arith.constant 72 : index
    %c0_21 = arith.constant 0 : index
    %19 = vector.load %arg6[%c72, %c0_21] : memref<392x16xbf16, #tpu.memory_space<vmem>>, vector<8x16xbf16>
    tpu.vector_store %arg6[%c72, %c0_21], %18 {strides = array<i32>} : memref<392x16xbf16, #tpu.memory_space<vmem>>, vector<8x16xbf16>,
    %c0_22 = arith.constant 0 : index
    %c11 = arith.constant 11 : index
    %20 = vector.load %arg1[%c0_22, %c11] : memref<8x128xbf16, #tpu.memory_space<vmem>>, vector<8x16xbf16>
    %c80 = arith.constant 80 : index
    %c0_23 = arith.constant 0 : index
    %21 = vector.load %arg6[%c80, %c0_23] : memref<392x16xbf16, #tpu.memory_space<vmem>>, vector<8x16xbf16>
    tpu.vector_store %arg6[%c80, %c0_23], %20 {strides = array<i32>} : memref<392x16xbf16, #tpu.memory_space<vmem>>, vector<8x16xbf16>,
    %c0_24 = arith.constant 0 : index
    %c12 = arith.constant 12 : index
    %22 = vector.load %arg1[%c0_24, %c12] : memref<8x128xbf16, #tpu.memory_space<vmem>>, vector<8x16xbf16>
    %c88 = arith.constant 88 : index
    %c0_25 = arith.constant 0 : index
    %23 = vector.load %arg6[%c88, %c0_25] : memref<392x16xbf16, #tpu.memory_space<vmem>>, vector<8x16xbf16>
    tpu.vector_store %arg6[%c88, %c0_25], %22 {strides = array<i32>} : memref<392x16xbf16, #tpu.memory_space<vmem>>, vector<8x16xbf16>,
    %c0_26 = arith.constant 0 : index
    %c13 = arith.constant 13 : index
    %24 = vector.load %arg1[%c0_26, %c13] : memref<8x128xbf16, #tpu.memory_space<vmem>>, vector<8x16xbf16>
    %c96 = arith.constant 96 : index
    %c0_27 = arith.constant 0 : index
    %25 = vector.load %arg6[%c96, %c0_27] : memref<392x16xbf16, #tpu.memory_space<vmem>>, vector<8x16xbf16>
    tpu.vector_store %arg6[%c96, %c0_27], %24 {strides = array<i32>} : memref<392x16xbf16, #tpu.memory_space<vmem>>, vector<8x16xbf16>,
    %c0_28 = arith.constant 0 : index
    %c14 = arith.constant 14 : index
    %26 = vector.load %arg1[%c0_28, %c14] : memref<8x128xbf16, #tpu.memory_space<vmem>>, vector<8x16xbf16>
    %c104 = arith.constant 104 : index
    %c0_29 = arith.constant 0 : index
    %27 = vector.load %arg6[%c104, %c0_29] : memref<392x16xbf16, #tpu.memory_space<vmem>>, vector<8x16xbf16>
    tpu.vector_store %arg6[%c104, %c0_29], %26 {strides = array<i32>} : memref<392x16xbf16, #tpu.memory_space<vmem>>, vector<8x16xbf16>,
    %c0_30 = arith.constant 0 : index
    %c16_31 = arith.constant 16 : index
    %28 = vector.load %arg1[%c0_30, %c16_31] : memref<8x128xbf16, #tpu.memory_space<vmem>>, vector<8x16xbf16>
    %c112 = arith.constant 112 : index
    %c0_32 = arith.constant 0 : index
    %29 = vector.load %arg6[%c112, %c0_32] : memref<392x16xbf16, #tpu.memory_space<vmem>>, vector<8x16xbf16>
    tpu.vector_store %arg6[%c112, %c0_32], %28 {strides = array<i32>} : memref<392x16xbf16, #tpu.memory_space<vmem>>, vector<8x16xbf16>,
    %c0_33 = arith.constant 0 : index
    %c17 = arith.constant 17 : index
    %30 = vector.load %arg1[%c0_33, %c17] : memref<8x128xbf16, #tpu.memory_space<vmem>>, vector<8x16xbf16>
    %c120 = arith.constant 120 : index
    %c0_34 = arith.constant 0 : index
    %31 = vector.load %arg6[%c120, %c0_34] : memref<392x16xbf16, #tpu.memory_space<vmem>>, vector<8x16xbf16>
    tpu.vector_store %arg6[%c120, %c0_34], %30 {strides = array<i32>} : memref<392x16xbf16, #tpu.memory_space<vmem>>, vector<8x16xbf16>,
    %c0_35 = arith.constant 0 : index
    %c18 = arith.constant 18 : index
    %32 = vector.load %arg1[%c0_35, %c18] : memref<8x128xbf16, #tpu.memory_space<vmem>>, vector<8x16xbf16>
    %c128 = arith.constant 128 : index
    %c0_36 = arith.constant 0 : index
    %33 = vector.load %arg6[%c128, %c0_36] : memref<392x16xbf16, #tpu.memory_space<vmem>>, vector<8x16xbf16>
    tpu.vector_store %arg6[%c128, %c0_36], %32 {strides = array<i32>} : memref<392x16xbf16, #tpu.memory_space<vmem>>, vector<8x16xbf16>,
    %c0_37 = arith.constant 0 : index
    %c19 = arith.constant 19 : index
    %34 = vector.load %arg1[%c0_37, %c19] : memref<8x128xbf16, #tpu.memory_space<vmem>>, vector<8x16xbf16>
    %c136 = arith.constant 136 : index
    %c0_38 = arith.constant 0 : index
    %35 = vector.load %arg6[%c136, %c0_38] : memref<392x16xbf16, #tpu.memory_space<vmem>>, vector<8x16xbf16>
    tpu.vector_store %arg6[%c136, %c0_38], %34 {strides = array<i32>} : memref<392x16xbf16, #tpu.memory_space<vmem>>, vector<8x16xbf16>,
    %c0_39 = arith.constant 0 : index
    %c20 = arith.constant 20 : index
    %36 = vector.load %arg1[%c0_39, %c20] : memref<8x128xbf16, #tpu.memory_space<vmem>>, vector<8x16xbf16>
    %c144 = arith.constant 144 : index
    %c0_40 = arith.constant 0 : index
    %37 = vector.load %arg6[%c144, %c0_40] : memref<392x16xbf16, #tpu.memory_space<vmem>>, vector<8x16xbf16>
    tpu.vector_store %arg6[%c144, %c0_40], %36 {strides = array<i32>} : memref<392x16xbf16, #tpu.memory_space<vmem>>, vector<8x16xbf16>,
    %c0_41 = arith.constant 0 : index
    %c21 = arith.constant 21 : index
    %38 = vector.load %arg1[%c0_41, %c21] : memref<8x128xbf16, #tpu.memory_space<vmem>>, vector<8x16xbf16>
    %c152 = arith.constant 152 : index
    %c0_42 = arith.constant 0 : index
    %39 = vector.load %arg6[%c152, %c0_42] : memref<392x16xbf16, #tpu.memory_space<vmem>>, vector<8x16xbf16>
    tpu.vector_store %arg6[%c152, %c0_42], %38 {strides = array<i32>} : memref<392x16xbf16, #tpu.memory_space<vmem>>, vector<8x16xbf16>,
    %c0_43 = arith.constant 0 : index
    %c22 = arith.constant 22 : index
    %40 = vector.load %arg1[%c0_43, %c22] : memref<8x128xbf16, #tpu.memory_space<vmem>>, vector<8x16xbf16>
    %c160 = arith.constant 160 : index
    %c0_44 = arith.constant 0 : index
    %41 = vector.load %arg6[%c160, %c0_44] : memref<392x16xbf16, #tpu.memory_space<vmem>>, vector<8x16xbf16>
    tpu.vector_store %arg6[%c160, %c0_44], %40 {strides = array<i32>} : memref<392x16xbf16, #tpu.memory_space<vmem>>, vector<8x16xbf16>,
    %c0_45 = arith.constant 0 : index
    %c24_46 = arith.constant 24 : index
    %42 = vector.load %arg1[%c0_45, %c24_46] : memref<8x128xbf16, #tpu.memory_space<vmem>>, vector<8x16xbf16>
    %c168 = arith.constant 168 : index
    %c0_47 = arith.constant 0 : index
    %43 = vector.load %arg6[%c168, %c0_47] : memref<392x16xbf16, #tpu.memory_space<vmem>>, vector<8x16xbf16>
    tpu.vector_store %arg6[%c168, %c0_47], %42 {strides = array<i32>} : memref<392x16xbf16, #tpu.memory_space<vmem>>, vector<8x16xbf16>,
    %c0_48 = arith.constant 0 : index
    %c25 = arith.constant 25 : index
    %44 = vector.load %arg1[%c0_48, %c25] : memref<8x128xbf16, #tpu.memory_space<vmem>>, vector<8x16xbf16>
    %c176 = arith.constant 176 : index
    %c0_49 = arith.constant 0 : index
    %45 = vector.load %arg6[%c176, %c0_49] : memref<392x16xbf16, #tpu.memory_space<vmem>>, vector<8x16xbf16>
    tpu.vector_store %arg6[%c176, %c0_49], %44 {strides = array<i32>} : memref<392x16xbf16, #tpu.memory_space<vmem>>, vector<8x16xbf16>,
    %c0_50 = arith.constant 0 : index
    %c26 = arith.constant 26 : index
    %46 = vector.load %arg1[%c0_50, %c26] : memref<8x128xbf16, #tpu.memory_space<vmem>>, vector<8x16xbf16>
    %c184 = arith.constant 184 : index
    %c0_51 = arith.constant 0 : index
    %47 = vector.load %arg6[%c184, %c0_51] : memref<392x16xbf16, #tpu.memory_space<vmem>>, vector<8x16xbf16>
    tpu.vector_store %arg6[%c184, %c0_51], %46 {strides = array<i32>} : memref<392x16xbf16, #tpu.memory_space<vmem>>, vector<8x16xbf16>,
    %c0_52 = arith.constant 0 : index
    %c27 = arith.constant 27 : index
    %48 = vector.load %arg1[%c0_52, %c27] : memref<8x128xbf16, #tpu.memory_space<vmem>>, vector<8x16xbf16>
    %c192 = arith.constant 192 : index
    %c0_53 = arith.constant 0 : index
    %49 = vector.load %arg6[%c192, %c0_53] : memref<392x16xbf16, #tpu.memory_space<vmem>>, vector<8x16xbf16>
    tpu.vector_store %arg6[%c192, %c0_53], %48 {strides = array<i32>} : memref<392x16xbf16, #tpu.memory_space<vmem>>, vector<8x16xbf16>,
    %c0_54 = arith.constant 0 : index
    %c28 = arith.constant 28 : index
    %50 = vector.load %arg1[%c0_54, %c28] : memref<8x128xbf16, #tpu.memory_space<vmem>>, vector<8x16xbf16>
    %c200 = arith.constant 200 : index
    %c0_55 = arith.constant 0 : index
    %51 = vector.load %arg6[%c200, %c0_55] : memref<392x16xbf16, #tpu.memory_space<vmem>>, vector<8x16xbf16>
    tpu.vector_store %arg6[%c200, %c0_55], %50 {strides = array<i32>} : memref<392x16xbf16, #tpu.memory_space<vmem>>, vector<8x16xbf16>,
    %c0_56 = arith.constant 0 : index
    %c29 = arith.constant 29 : index
    %52 = vector.load %arg1[%c0_56, %c29] : memref<8x128xbf16, #tpu.memory_space<vmem>>, vector<8x16xbf16>
    %c208 = arith.constant 208 : index
    %c0_57 = arith.constant 0 : index
    %53 = vector.load %arg6[%c208, %c0_57] : memref<392x16xbf16, #tpu.memory_space<vmem>>, vector<8x16xbf16>
    tpu.vector_store %arg6[%c208, %c0_57], %52 {strides = array<i32>} : memref<392x16xbf16, #tpu.memory_space<vmem>>, vector<8x16xbf16>,
    %c0_58 = arith.constant 0 : index
    %c30 = arith.constant 30 : index
    %54 = vector.load %arg1[%c0_58, %c30] : memref<8x128xbf16, #tpu.memory_space<vmem>>, vector<8x16xbf16>
    %c216 = arith.constant 216 : index
    %c0_59 = arith.constant 0 : index
    %55 = vector.load %arg6[%c216, %c0_59] : memref<392x16xbf16, #tpu.memory_space<vmem>>, vector<8x16xbf16>
    tpu.vector_store %arg6[%c216, %c0_59], %54 {strides = array<i32>} : memref<392x16xbf16, #tpu.memory_space<vmem>>, vector<8x16xbf16>,
    %c0_60 = arith.constant 0 : index
    %c32_61 = arith.constant 32 : index
    %56 = vector.load %arg1[%c0_60, %c32_61] : memref<8x128xbf16, #tpu.memory_space<vmem>>, vector<8x16xbf16>
    %c224 = arith.constant 224 : index
    %c0_62 = arith.constant 0 : index
    %57 = vector.load %arg6[%c224, %c0_62] : memref<392x16xbf16, #tpu.memory_space<vmem>>, vector<8x16xbf16>
    tpu.vector_store %arg6[%c224, %c0_62], %56 {strides = array<i32>} : memref<392x16xbf16, #tpu.memory_space<vmem>>, vector<8x16xbf16>,
    %c0_63 = arith.constant 0 : index
    %c33 = arith.constant 33 : index
    %58 = vector.load %arg1[%c0_63, %c33] : memref<8x128xbf16, #tpu.memory_space<vmem>>, vector<8x16xbf16>
    %c232 = arith.constant 232 : index
    %c0_64 = arith.constant 0 : index
    %59 = vector.load %arg6[%c232, %c0_64] : memref<392x16xbf16, #tpu.memory_space<vmem>>, vector<8x16xbf16>
    tpu.vector_store %arg6[%c232, %c0_64], %58 {strides = array<i32>} : memref<392x16xbf16, #tpu.memory_space<vmem>>, vector<8x16xbf16>,
    %c0_65 = arith.constant 0 : index
    %c34 = arith.constant 34 : index
    %60 = vector.load %arg1[%c0_65, %c34] : memref<8x128xbf16, #tpu.memory_space<vmem>>, vector<8x16xbf16>
    %c240 = arith.constant 240 : index
    %c0_66 = arith.constant 0 : index
    %61 = vector.load %arg6[%c240, %c0_66] : memref<392x16xbf16, #tpu.memory_space<vmem>>, vector<8x16xbf16>
    tpu.vector_store %arg6[%c240, %c0_66], %60 {strides = array<i32>} : memref<392x16xbf16, #tpu.memory_space<vmem>>, vector<8x16xbf16>,
    %c0_67 = arith.constant 0 : index
    %c35 = arith.constant 35 : index
    %62 = vector.load %arg1[%c0_67, %c35] : memref<8x128xbf16, #tpu.memory_space<vmem>>, vector<8x16xbf16>
    %c248 = arith.constant 248 : index
    %c0_68 = arith.constant 0 : index
    %63 = vector.load %arg6[%c248, %c0_68] : memref<392x16xbf16, #tpu.memory_space<vmem>>, vector<8x16xbf16>
    tpu.vector_store %arg6[%c248, %c0_68], %62 {strides = array<i32>} : memref<392x16xbf16, #tpu.memory_space<vmem>>, vector<8x16xbf16>,
    %c0_69 = arith.constant 0 : index
    %c36 = arith.constant 36 : index
    %64 = vector.load %arg1[%c0_69, %c36] : memref<8x128xbf16, #tpu.memory_space<vmem>>, vector<8x16xbf16>
    %c256 = arith.constant 256 : index
    %c0_70 = arith.constant 0 : index
    %65 = vector.load %arg6[%c256, %c0_70] : memref<392x16xbf16, #tpu.memory_space<vmem>>, vector<8x16xbf16>
    tpu.vector_store %arg6[%c256, %c0_70], %64 {strides = array<i32>} : memref<392x16xbf16, #tpu.memory_space<vmem>>, vector<8x16xbf16>,
    %c0_71 = arith.constant 0 : index
    %c37 = arith.constant 37 : index
    %66 = vector.load %arg1[%c0_71, %c37] : memref<8x128xbf16, #tpu.memory_space<vmem>>, vector<8x16xbf16>
    %c264 = arith.constant 264 : index
    %c0_72 = arith.constant 0 : index
    %67 = vector.load %arg6[%c264, %c0_72] : memref<392x16xbf16, #tpu.memory_space<vmem>>, vector<8x16xbf16>
    tpu.vector_store %arg6[%c264, %c0_72], %66 {strides = array<i32>} : memref<392x16xbf16, #tpu.memory_space<vmem>>, vector<8x16xbf16>,
    %c0_73 = arith.constant 0 : index
    %c38 = arith.constant 38 : index
    %68 = vector.load %arg1[%c0_73, %c38] : memref<8x128xbf16, #tpu.memory_space<vmem>>, vector<8x16xbf16>
    %c272 = arith.constant 272 : index
    %c0_74 = arith.constant 0 : index
    %69 = vector.load %arg6[%c272, %c0_74] : memref<392x16xbf16, #tpu.memory_space<vmem>>, vector<8x16xbf16>
    tpu.vector_store %arg6[%c272, %c0_74], %68 {strides = array<i32>} : memref<392x16xbf16, #tpu.memory_space<vmem>>, vector<8x16xbf16>,
    %c0_75 = arith.constant 0 : index
    %c40_76 = arith.constant 40 : index
    %70 = vector.load %arg1[%c0_75, %c40_76] : memref<8x128xbf16, #tpu.memory_space<vmem>>, vector<8x16xbf16>
    %c280 = arith.constant 280 : index
    %c0_77 = arith.constant 0 : index
    %71 = vector.load %arg6[%c280, %c0_77] : memref<392x16xbf16, #tpu.memory_space<vmem>>, vector<8x16xbf16>
    tpu.vector_store %arg6[%c280, %c0_77], %70 {strides = array<i32>} : memref<392x16xbf16, #tpu.memory_space<vmem>>, vector<8x16xbf16>,
    %c0_78 = arith.constant 0 : index
    %c41 = arith.constant 41 : index
    %72 = vector.load %arg1[%c0_78, %c41] : memref<8x128xbf16, #tpu.memory_space<vmem>>, vector<8x16xbf16>
    %c288 = arith.constant 288 : index
    %c0_79 = arith.constant 0 : index
    %73 = vector.load %arg6[%c288, %c0_79] : memref<392x16xbf16, #tpu.memory_space<vmem>>, vector<8x16xbf16>
    tpu.vector_store %arg6[%c288, %c0_79], %72 {strides = array<i32>} : memref<392x16xbf16, #tpu.memory_space<vmem>>, vector<8x16xbf16>,
    %c0_80 = arith.constant 0 : index
    %c42 = arith.constant 42 : index
    %74 = vector.load %arg1[%c0_80, %c42] : memref<8x128xbf16, #tpu.memory_space<vmem>>, vector<8x16xbf16>
    %c296 = arith.constant 296 : index
    %c0_81 = arith.constant 0 : index
    %75 = vector.load %arg6[%c296, %c0_81] : memref<392x16xbf16, #tpu.memory_space<vmem>>, vector<8x16xbf16>
    tpu.vector_store %arg6[%c296, %c0_81], %74 {strides = array<i32>} : memref<392x16xbf16, #tpu.memory_space<vmem>>, vector<8x16xbf16>,
    %c0_82 = arith.constant 0 : index
    %c43 = arith.constant 43 : index
    %76 = vector.load %arg1[%c0_82, %c43] : memref<8x128xbf16, #tpu.memory_space<vmem>>, vector<8x16xbf16>
    %c304 = arith.constant 304 : index
    %c0_83 = arith.constant 0 : index
    %77 = vector.load %arg6[%c304, %c0_83] : memref<392x16xbf16, #tpu.memory_space<vmem>>, vector<8x16xbf16>
    tpu.vector_store %arg6[%c304, %c0_83], %76 {strides = array<i32>} : memref<392x16xbf16, #tpu.memory_space<vmem>>, vector<8x16xbf16>,
    %c0_84 = arith.constant 0 : index
    %c44 = arith.constant 44 : index
    %78 = vector.load %arg1[%c0_84, %c44] : memref<8x128xbf16, #tpu.memory_space<vmem>>, vector<8x16xbf16>
    %c312 = arith.constant 312 : index
    %c0_85 = arith.constant 0 : index
    %79 = vector.load %arg6[%c312, %c0_85] : memref<392x16xbf16, #tpu.memory_space<vmem>>, vector<8x16xbf16>
    tpu.vector_store %arg6[%c312, %c0_85], %78 {strides = array<i32>} : memref<392x16xbf16, #tpu.memory_space<vmem>>, vector<8x16xbf16>,
    %c0_86 = arith.constant 0 : index
    %c45 = arith.constant 45 : index
    %80 = vector.load %arg1[%c0_86, %c45] : memref<8x128xbf16, #tpu.memory_space<vmem>>, vector<8x16xbf16>
    %c320 = arith.constant 320 : index
    %c0_87 = arith.constant 0 : index
    %81 = vector.load %arg6[%c320, %c0_87] : memref<392x16xbf16, #tpu.memory_space<vmem>>, vector<8x16xbf16>
    tpu.vector_store %arg6[%c320, %c0_87], %80 {strides = array<i32>} : memref<392x16xbf16, #tpu.memory_space<vmem>>, vector<8x16xbf16>,
    %c0_88 = arith.constant 0 : index
    %c46 = arith.constant 46 : index
    %82 = vector.load %arg1[%c0_88, %c46] : memref<8x128xbf16, #tpu.memory_space<vmem>>, vector<8x16xbf16>
    %c328 = arith.constant 328 : index
    %c0_89 = arith.constant 0 : index
    %83 = vector.load %arg6[%c328, %c0_89] : memref<392x16xbf16, #tpu.memory_space<vmem>>, vector<8x16xbf16>
    tpu.vector_store %arg6[%c328, %c0_89], %82 {strides = array<i32>} : memref<392x16xbf16, #tpu.memory_space<vmem>>, vector<8x16xbf16>,
    %c0_90 = arith.constant 0 : index
    %c48_91 = arith.constant 48 : index
    %84 = vector.load %arg1[%c0_90, %c48_91] : memref<8x128xbf16, #tpu.memory_space<vmem>>, vector<8x16xbf16>
    %c336 = arith.constant 336 : index
    %c0_92 = arith.constant 0 : index
    %85 = vector.load %arg6[%c336, %c0_92] : memref<392x16xbf16, #tpu.memory_space<vmem>>, vector<8x16xbf16>
    tpu.vector_store %arg6[%c336, %c0_92], %84 {strides = array<i32>} : memref<392x16xbf16, #tpu.memory_space<vmem>>, vector<8x16xbf16>,
    %c0_93 = arith.constant 0 : index
    %c49 = arith.constant 49 : index
    %86 = vector.load %arg1[%c0_93, %c49] : memref<8x128xbf16, #tpu.memory_space<vmem>>, vector<8x16xbf16>
    %c344 = arith.constant 344 : index
    %c0_94 = arith.constant 0 : index
    %87 = vector.load %arg6[%c344, %c0_94] : memref<392x16xbf16, #tpu.memory_space<vmem>>, vector<8x16xbf16>
    tpu.vector_store %arg6[%c344, %c0_94], %86 {strides = array<i32>} : memref<392x16xbf16, #tpu.memory_space<vmem>>, vector<8x16xbf16>,
    %c0_95 = arith.constant 0 : index
    %c50 = arith.constant 50 : index
    %88 = vector.load %arg1[%c0_95, %c50] : memref<8x128xbf16, #tpu.memory_space<vmem>>, vector<8x16xbf16>
    %c352 = arith.constant 352 : index
    %c0_96 = arith.constant 0 : index
    %89 = vector.load %arg6[%c352, %c0_96] : memref<392x16xbf16, #tpu.memory_space<vmem>>, vector<8x16xbf16>
    tpu.vector_store %arg6[%c352, %c0_96], %88 {strides = array<i32>} : memref<392x16xbf16, #tpu.memory_space<vmem>>, vector<8x16xbf16>,
    %c0_97 = arith.constant 0 : index
    %c51 = arith.constant 51 : index
    %90 = vector.load %arg1[%c0_97, %c51] : memref<8x128xbf16, #tpu.memory_space<vmem>>, vector<8x16xbf16>
    %c360 = arith.constant 360 : index
    %c0_98 = arith.constant 0 : index
    %91 = vector.load %arg6[%c360, %c0_98] : memref<392x16xbf16, #tpu.memory_space<vmem>>, vector<8x16xbf16>
    tpu.vector_store %arg6[%c360, %c0_98], %90 {strides = array<i32>} : memref<392x16xbf16, #tpu.memory_space<vmem>>, vector<8x16xbf16>,
    %c0_99 = arith.constant 0 : index
    %c52 = arith.constant 52 : index
    %92 = vector.load %arg1[%c0_99, %c52] : memref<8x128xbf16, #tpu.memory_space<vmem>>, vector<8x16xbf16>
    %c368 = arith.constant 368 : index
    %c0_100 = arith.constant 0 : index
    %93 = vector.load %arg6[%c368, %c0_100] : memref<392x16xbf16, #tpu.memory_space<vmem>>, vector<8x16xbf16>
    tpu.vector_store %arg6[%c368, %c0_100], %92 {strides = array<i32>} : memref<392x16xbf16, #tpu.memory_space<vmem>>, vector<8x16xbf16>,
    %c0_101 = arith.constant 0 : index
    %c53 = arith.constant 53 : index
    %94 = vector.load %arg1[%c0_101, %c53] : memref<8x128xbf16, #tpu.memory_space<vmem>>, vector<8x16xbf16>
    %c376 = arith.constant 376 : index
    %c0_102 = arith.constant 0 : index
    %95 = vector.load %arg6[%c376, %c0_102] : memref<392x16xbf16, #tpu.memory_space<vmem>>, vector<8x16xbf16>
    tpu.vector_store %arg6[%c376, %c0_102], %94 {strides = array<i32>} : memref<392x16xbf16, #tpu.memory_space<vmem>>, vector<8x16xbf16>,
    %c0_103 = arith.constant 0 : index
    %c54 = arith.constant 54 : index
    %96 = vector.load %arg1[%c0_103, %c54] : memref<8x128xbf16, #tpu.memory_space<vmem>>, vector<8x16xbf16>
    %c384 = arith.constant 384 : index
    %c0_104 = arith.constant 0 : index
    %97 = vector.load %arg6[%c384, %c0_104] : memref<392x16xbf16, #tpu.memory_space<vmem>>, vector<8x16xbf16>
    tpu.vector_store %arg6[%c384, %c0_104], %96 {strides = array<i32>} : memref<392x16xbf16, #tpu.memory_space<vmem>>, vector<8x16xbf16>,
    %c0_105 = arith.constant 0 : index
    %c0_106 = arith.constant 0 : index
    %98 = vector.load %arg2[%c0_105, %c0_106] : memref<8x392xbf16, #tpu.memory_space<vmem>>, vector<8x392xbf16>
    %c0_107 = arith.constant 0 : index
    %c0_108 = arith.constant 0 : index
    %99 = vector.load %arg6[%c0_107, %c0_108] : memref<392x16xbf16, #tpu.memory_space<vmem>>, vector<392x16xbf16>
    %cst = arith.constant dense<0.000000e+00> : vector<8x16xf32>
    %100 = tpu.matmul %98, %99, %cst {dimension_numbers = #tpu.dot_dimension_numbers<[1], [0], [0], [1], [0, 0, 1, 1], [], []>} : vector<8x392xbf16>, vector<392x16xbf16>, vector<8x16xf32> -> vector<8x16xf32>
    %c0_109 = arith.constant 0 : index
    %c0_110 = arith.constant 0 : index
    %101 = vector.load %arg3[%c0_109, %c0_110] : memref<8x1xf32, #tpu.memory_space<vmem>>, vector<8x1xf32>
    %102 = vector.broadcast %101 : vector<8x1xf32> to vector<8x16xf32>
    %103 = arith.addf %100, %102 : vector<8x16xf32>
    %cst_111 = arith.constant 0.000000e+00 : f32
    %104 = vector.broadcast %cst_111 : f32 to vector<8x16xf32>
    %105 = arith.maximumf %103, %104 : vector<8x16xf32>
    %106 = arith.truncf %105 : vector<8x16xf32> to vector<8x16xbf16>
    %c0_112 = arith.constant 0 : index
    %c0_113 = arith.constant 0 : index
    %107 = vector.load %arg4[%c0_112, %c0_113] : memref<16x128xbf16, #tpu.memory_space<vmem>>, vector<16x128xbf16>
    %cst_114 = arith.constant dense<0.000000e+00> : vector<8x128xf32>
    %108 = tpu.matmul %106, %107, %cst_114 {dimension_numbers = #tpu.dot_dimension_numbers<[1], [0], [0], [1], [0, 0, 1, 1], [], []>} : vector<8x16xbf16>, vector<16x128xbf16>, vector<8x128xf32> -> vector<8x128xf32>
    %109 = arith.truncf %108 : vector<8x128xf32> to vector<8x128xbf16>
    %c0_115 = arith.constant 0 : index
    %c0_116 = arith.constant 0 : index
    %110 = vector.load %arg5[%c0_115, %c0_116] : memref<8x128xbf16, #tpu.memory_space<vmem>>, vector<8x128xbf16>
    tpu.vector_store %arg5[%c0_115, %c0_116], %109 {strides = array<i32>} : memref<8x128xbf16, #tpu.memory_space<vmem>>, vector<8x128xbf16>,
    return
  }
  func.func @transform_0(%arg0: i32) -> (i32, i32) {
    %c0_i32 = arith.constant 0 : i32
    %c0_i32_0 = arith.constant 0 : i32
    return %c0_i32, %arg0 : i32, i32
  }
  func.func @transform_1(%arg0: i32) -> (i32, i32) {
    %c0_i32 = arith.constant 0 : i32
    %c0_i32_0 = arith.constant 0 : i32
    %c0_i32_1 = arith.constant 0 : i32
    return %c0_i32, %c0_i32_0 : i32, i32
  }
  func.func @transform_2(%arg0: i32) -> (i32, i32) {
    %c0_i32 = arith.constant 0 : i32
    %c0_i32_0 = arith.constant 0 : i32
    %c0_i32_1 = arith.constant 0 : i32
    return %c0_i32, %c0_i32_0 : i32, i32
  }
  func.func @transform_3(%arg0: i32) -> (i32, i32) {
    %c0_i32 = arith.constant 0 : i32
    %c0_i32_0 = arith.constant 0 : i32
    %c0_i32_1 = arith.constant 0 : i32
    return %c0_i32, %c0_i32_0 : i32, i32
  }
  func.func @transform_4(%arg0: i32) -> (i32, i32) {
    %c0_i32 = arith.constant 0 : i32
    %c0_i32_0 = arith.constant 0 : i32
    return %c0_i32, %arg0 : i32, i32
  }
}

module attributes {stable_mosaic.version = 11 : i64} {
  func.func @_conv_stage_kernel(%arg0: i32, %arg1: memref<8x256xbf16, #tpu.memory_space<vmem>>, %arg2: memref<8x8xbf16, #tpu.memory_space<vmem>>, %arg3: memref<8x1xf32, #tpu.memory_space<vmem>>, %arg4: memref<8x256xf32, #tpu.memory_space<vmem>>, %arg5: memref<8x256xbf16, #tpu.memory_space<vmem>>) attributes {dimension_semantics = [#tpu.dimension_semantics<parallel>], iteration_bounds = array<i64: 2>, scalar_prefetch = 0 : i64, scratch_operands = 1 : i64, tpu.core_type = #tpu.core_type<tc>, window_params = [{transform_indices = @transform_0, window_bounds = array<i64: 8, 256>}, {pipeline_mode = #tpu.pipeline_mode<synchronous>, transform_indices = @transform_1, window_bounds = array<i64: 8, 8>}, {pipeline_mode = #tpu.pipeline_mode<synchronous>, transform_indices = @transform_2, window_bounds = array<i64: 8, 1>}, {transform_indices = @transform_3, window_bounds = array<i64: 8, 256>}]} {
    %c0 = arith.constant 0 : index
    %c0_0 = arith.constant 0 : index
    %0 = vector.load %arg1[%c0, %c0_0] : memref<8x256xbf16, #tpu.memory_space<vmem>>, vector<8x256xbf16>
    %c0_1 = arith.constant 0 : index
    %c0_2 = arith.constant 0 : index
    %1 = vector.load %arg5[%c0_1, %c0_2] : memref<8x256xbf16, #tpu.memory_space<vmem>>, vector<8x256xbf16>
    tpu.vector_store %arg5[%c0_1, %c0_2], %0 {strides = array<i32>} : memref<8x256xbf16, #tpu.memory_space<vmem>>, vector<8x256xbf16>,
    %c0_3 = arith.constant 0 : index
    %c0_4 = arith.constant 0 : index
    %2 = vector.load %arg2[%c0_3, %c0_4] : memref<8x8xbf16, #tpu.memory_space<vmem>>, vector<8x8xbf16>
    %c0_5 = arith.constant 0 : index
    %c0_6 = arith.constant 0 : index
    %3 = vector.load %arg5[%c0_5, %c0_6] : memref<8x256xbf16, #tpu.memory_space<vmem>>, vector<8x256xbf16>
    %cst = arith.constant dense<0.000000e+00> : vector<8x256xf32>
    %4 = tpu.matmul %2, %3, %cst {dimension_numbers = #tpu.dot_dimension_numbers<[1], [0], [0], [1], [0, 0, 1, 1], [], []>} : vector<8x8xbf16>, vector<8x256xbf16>, vector<8x256xf32> -> vector<8x256xf32>
    %c0_7 = arith.constant 0 : index
    %c0_8 = arith.constant 0 : index
    %5 = vector.load %arg3[%c0_7, %c0_8] : memref<8x1xf32, #tpu.memory_space<vmem>>, vector<8x1xf32>
    %6 = vector.broadcast %5 : vector<8x1xf32> to vector<8x256xf32>
    %7 = arith.addf %4, %6 : vector<8x256xf32>
    %c0_9 = arith.constant 0 : index
    %c0_10 = arith.constant 0 : index
    %8 = vector.load %arg4[%c0_9, %c0_10] : memref<8x256xf32, #tpu.memory_space<vmem>>, vector<8x256xf32>
    tpu.vector_store %arg4[%c0_9, %c0_10], %7 {strides = array<i32>} : memref<8x256xf32, #tpu.memory_space<vmem>>, vector<8x256xf32>,
    return
  }
  func.func @transform_0(%arg0: i32) -> (i32, i32) {
    %c0_i32 = arith.constant 0 : i32
    %c0_i32_0 = arith.constant 0 : i32
    return %c0_i32, %arg0 : i32, i32
  }
  func.func @transform_1(%arg0: i32) -> (i32, i32) {
    %c0_i32 = arith.constant 0 : i32
    %c0_i32_0 = arith.constant 0 : i32
    %c0_i32_1 = arith.constant 0 : i32
    return %c0_i32, %c0_i32_0 : i32, i32
  }
  func.func @transform_2(%arg0: i32) -> (i32, i32) {
    %c0_i32 = arith.constant 0 : i32
    %c0_i32_0 = arith.constant 0 : i32
    %c0_i32_1 = arith.constant 0 : i32
    return %c0_i32, %c0_i32_0 : i32, i32
  }
  func.func @transform_3(%arg0: i32) -> (i32, i32) {
    %c0_i32 = arith.constant 0 : i32
    %c0_i32_0 = arith.constant 0 : i32
    return %c0_i32, %arg0 : i32, i32
  }
}

module attributes {stable_mosaic.version = 11 : i64} {
  func.func @_conv_stage_kernel(%arg0: i32, %arg1: memref<8x256xbf16, #tpu.memory_space<vmem>>, %arg2: memref<8x200xbf16, #tpu.memory_space<vmem>>, %arg3: memref<8x1xf32, #tpu.memory_space<vmem>>, %arg4: memref<96x256xbf16, #tpu.memory_space<vmem>>, %arg5: memref<8x256xbf16, #tpu.memory_space<vmem>>, %arg6: memref<200x96xbf16, #tpu.memory_space<vmem>>) attributes {dimension_semantics = [#tpu.dimension_semantics<parallel>], iteration_bounds = array<i64: 2>, scalar_prefetch = 0 : i64, scratch_operands = 1 : i64, tpu.core_type = #tpu.core_type<tc>, window_params = [{transform_indices = @transform_0, window_bounds = array<i64: 8, 256>}, {pipeline_mode = #tpu.pipeline_mode<synchronous>, transform_indices = @transform_1, window_bounds = array<i64: 8, 200>}, {pipeline_mode = #tpu.pipeline_mode<synchronous>, transform_indices = @transform_2, window_bounds = array<i64: 8, 1>}, {pipeline_mode = #tpu.pipeline_mode<synchronous>, transform_indices = @transform_3, window_bounds = array<i64: 96, 256>}, {transform_indices = @transform_4, window_bounds = array<i64: 8, 256>}]} {
    %c0 = arith.constant 0 : index
    %c0_0 = arith.constant 0 : index
    %0 = vector.load %arg1[%c0, %c0_0] : memref<8x256xbf16, #tpu.memory_space<vmem>>, vector<8x96xbf16>
    %c0_1 = arith.constant 0 : index
    %c0_2 = arith.constant 0 : index
    %1 = vector.load %arg6[%c0_1, %c0_2] : memref<200x96xbf16, #tpu.memory_space<vmem>>, vector<8x96xbf16>
    tpu.vector_store %arg6[%c0_1, %c0_2], %0 {strides = array<i32>} : memref<200x96xbf16, #tpu.memory_space<vmem>>, vector<8x96xbf16>,
    %c0_3 = arith.constant 0 : index
    %c1 = arith.constant 1 : index
    %2 = vector.load %arg1[%c0_3, %c1] : memref<8x256xbf16, #tpu.memory_space<vmem>>, vector<8x96xbf16>
    %c8 = arith.constant 8 : index
    %c0_4 = arith.constant 0 : index
    %3 = vector.load %arg6[%c8, %c0_4] : memref<200x96xbf16, #tpu.memory_space<vmem>>, vector<8x96xbf16>
    tpu.vector_store %arg6[%c8, %c0_4], %2 {strides = array<i32>} : memref<200x96xbf16, #tpu.memory_space<vmem>>, vector<8x96xbf16>,
    %c0_5 = arith.constant 0 : index
    %c2 = arith.constant 2 : index
    %4 = vector.load %arg1[%c0_5, %c2] : memref<8x256xbf16, #tpu.memory_space<vmem>>, vector<8x96xbf16>
    %c16 = arith.constant 16 : index
    %c0_6 = arith.constant 0 : index
    %5 = vector.load %arg6[%c16, %c0_6] : memref<200x96xbf16, #tpu.memory_space<vmem>>, vector<8x96xbf16>
    tpu.vector_store %arg6[%c16, %c0_6], %4 {strides = array<i32>} : memref<200x96xbf16, #tpu.memory_space<vmem>>, vector<8x96xbf16>,
    %c0_7 = arith.constant 0 : index
    %c3 = arith.constant 3 : index
    %6 = vector.load %arg1[%c0_7, %c3] : memref<8x256xbf16, #tpu.memory_space<vmem>>, vector<8x96xbf16>
    %c24 = arith.constant 24 : index
    %c0_8 = arith.constant 0 : index
    %7 = vector.load %arg6[%c24, %c0_8] : memref<200x96xbf16, #tpu.memory_space<vmem>>, vector<8x96xbf16>
    tpu.vector_store %arg6[%c24, %c0_8], %6 {strides = array<i32>} : memref<200x96xbf16, #tpu.memory_space<vmem>>, vector<8x96xbf16>,
    %c0_9 = arith.constant 0 : index
    %c4 = arith.constant 4 : index
    %8 = vector.load %arg1[%c0_9, %c4] : memref<8x256xbf16, #tpu.memory_space<vmem>>, vector<8x96xbf16>
    %c32 = arith.constant 32 : index
    %c0_10 = arith.constant 0 : index
    %9 = vector.load %arg6[%c32, %c0_10] : memref<200x96xbf16, #tpu.memory_space<vmem>>, vector<8x96xbf16>
    tpu.vector_store %arg6[%c32, %c0_10], %8 {strides = array<i32>} : memref<200x96xbf16, #tpu.memory_space<vmem>>, vector<8x96xbf16>,
    %c0_11 = arith.constant 0 : index
    %c12 = arith.constant 12 : index
    %10 = vector.load %arg1[%c0_11, %c12] : memref<8x256xbf16, #tpu.memory_space<vmem>>, vector<8x96xbf16>
    %c40 = arith.constant 40 : index
    %c0_12 = arith.constant 0 : index
    %11 = vector.load %arg6[%c40, %c0_12] : memref<200x96xbf16, #tpu.memory_space<vmem>>, vector<8x96xbf16>
    tpu.vector_store %arg6[%c40, %c0_12], %10 {strides = array<i32>} : memref<200x96xbf16, #tpu.memory_space<vmem>>, vector<8x96xbf16>,
    %c0_13 = arith.constant 0 : index
    %c13 = arith.constant 13 : index
    %12 = vector.load %arg1[%c0_13, %c13] : memref<8x256xbf16, #tpu.memory_space<vmem>>, vector<8x96xbf16>
    %c48 = arith.constant 48 : index
    %c0_14 = arith.constant 0 : index
    %13 = vector.load %arg6[%c48, %c0_14] : memref<200x96xbf16, #tpu.memory_space<vmem>>, vector<8x96xbf16>
    tpu.vector_store %arg6[%c48, %c0_14], %12 {strides = array<i32>} : memref<200x96xbf16, #tpu.memory_space<vmem>>, vector<8x96xbf16>,
    %c0_15 = arith.constant 0 : index
    %c14 = arith.constant 14 : index
    %14 = vector.load %arg1[%c0_15, %c14] : memref<8x256xbf16, #tpu.memory_space<vmem>>, vector<8x96xbf16>
    %c56 = arith.constant 56 : index
    %c0_16 = arith.constant 0 : index
    %15 = vector.load %arg6[%c56, %c0_16] : memref<200x96xbf16, #tpu.memory_space<vmem>>, vector<8x96xbf16>
    tpu.vector_store %arg6[%c56, %c0_16], %14 {strides = array<i32>} : memref<200x96xbf16, #tpu.memory_space<vmem>>, vector<8x96xbf16>,
    %c0_17 = arith.constant 0 : index
    %c15 = arith.constant 15 : index
    %16 = vector.load %arg1[%c0_17, %c15] : memref<8x256xbf16, #tpu.memory_space<vmem>>, vector<8x96xbf16>
    %c64 = arith.constant 64 : index
    %c0_18 = arith.constant 0 : index
    %17 = vector.load %arg6[%c64, %c0_18] : memref<200x96xbf16, #tpu.memory_space<vmem>>, vector<8x96xbf16>
    tpu.vector_store %arg6[%c64, %c0_18], %16 {strides = array<i32>} : memref<200x96xbf16, #tpu.memory_space<vmem>>, vector<8x96xbf16>,
    %c0_19 = arith.constant 0 : index
    %c16_20 = arith.constant 16 : index
    %18 = vector.load %arg1[%c0_19, %c16_20] : memref<8x256xbf16, #tpu.memory_space<vmem>>, vector<8x96xbf16>
    %c72 = arith.constant 72 : index
    %c0_21 = arith.constant 0 : index
    %19 = vector.load %arg6[%c72, %c0_21] : memref<200x96xbf16, #tpu.memory_space<vmem>>, vector<8x96xbf16>
    tpu.vector_store %arg6[%c72, %c0_21], %18 {strides = array<i32>} : memref<200x96xbf16, #tpu.memory_space<vmem>>, vector<8x96xbf16>,
    %c0_22 = arith.constant 0 : index
    %c24_23 = arith.constant 24 : index
    %20 = vector.load %arg1[%c0_22, %c24_23] : memref<8x256xbf16, #tpu.memory_space<vmem>>, vector<8x96xbf16>
    %c80 = arith.constant 80 : index
    %c0_24 = arith.constant 0 : index
    %21 = vector.load %arg6[%c80, %c0_24] : memref<200x96xbf16, #tpu.memory_space<vmem>>, vector<8x96xbf16>
    tpu.vector_store %arg6[%c80, %c0_24], %20 {strides = array<i32>} : memref<200x96xbf16, #tpu.memory_space<vmem>>, vector<8x96xbf16>,
    %c0_25 = arith.constant 0 : index
    %c25 = arith.constant 25 : index
    %22 = vector.load %arg1[%c0_25, %c25] : memref<8x256xbf16, #tpu.memory_space<vmem>>, vector<8x96xbf16>
    %c88 = arith.constant 88 : index
    %c0_26 = arith.constant 0 : index
    %23 = vector.load %arg6[%c88, %c0_26] : memref<200x96xbf16, #tpu.memory_space<vmem>>, vector<8x96xbf16>
    tpu.vector_store %arg6[%c88, %c0_26], %22 {strides = array<i32>} : memref<200x96xbf16, #tpu.memory_space<vmem>>, vector<8x96xbf16>,
    %c0_27 = arith.constant 0 : index
    %c26 = arith.constant 26 : index
    %24 = vector.load %arg1[%c0_27, %c26] : memref<8x256xbf16, #tpu.memory_space<vmem>>, vector<8x96xbf16>
    %c96 = arith.constant 96 : index
    %c0_28 = arith.constant 0 : index
    %25 = vector.load %arg6[%c96, %c0_28] : memref<200x96xbf16, #tpu.memory_space<vmem>>, vector<8x96xbf16>
    tpu.vector_store %arg6[%c96, %c0_28], %24 {strides = array<i32>} : memref<200x96xbf16, #tpu.memory_space<vmem>>, vector<8x96xbf16>,
    %c0_29 = arith.constant 0 : index
    %c27 = arith.constant 27 : index
    %26 = vector.load %arg1[%c0_29, %c27] : memref<8x256xbf16, #tpu.memory_space<vmem>>, vector<8x96xbf16>
    %c104 = arith.constant 104 : index
    %c0_30 = arith.constant 0 : index
    %27 = vector.load %arg6[%c104, %c0_30] : memref<200x96xbf16, #tpu.memory_space<vmem>>, vector<8x96xbf16>
    tpu.vector_store %arg6[%c104, %c0_30], %26 {strides = array<i32>} : memref<200x96xbf16, #tpu.memory_space<vmem>>, vector<8x96xbf16>,
    %c0_31 = arith.constant 0 : index
    %c28 = arith.constant 28 : index
    %28 = vector.load %arg1[%c0_31, %c28] : memref<8x256xbf16, #tpu.memory_space<vmem>>, vector<8x96xbf16>
    %c112 = arith.constant 112 : index
    %c0_32 = arith.constant 0 : index
    %29 = vector.load %arg6[%c112, %c0_32] : memref<200x96xbf16, #tpu.memory_space<vmem>>, vector<8x96xbf16>
    tpu.vector_store %arg6[%c112, %c0_32], %28 {strides = array<i32>} : memref<200x96xbf16, #tpu.memory_space<vmem>>, vector<8x96xbf16>,
    %c0_33 = arith.constant 0 : index
    %c36 = arith.constant 36 : index
    %30 = vector.load %arg1[%c0_33, %c36] : memref<8x256xbf16, #tpu.memory_space<vmem>>, vector<8x96xbf16>
    %c120 = arith.constant 120 : index
    %c0_34 = arith.constant 0 : index
    %31 = vector.load %arg6[%c120, %c0_34] : memref<200x96xbf16, #tpu.memory_space<vmem>>, vector<8x96xbf16>
    tpu.vector_store %arg6[%c120, %c0_34], %30 {strides = array<i32>} : memref<200x96xbf16, #tpu.memory_space<vmem>>, vector<8x96xbf16>,
    %c0_35 = arith.constant 0 : index
    %c37 = arith.constant 37 : index
    %32 = vector.load %arg1[%c0_35, %c37] : memref<8x256xbf16, #tpu.memory_space<vmem>>, vector<8x96xbf16>
    %c128 = arith.constant 128 : index
    %c0_36 = arith.constant 0 : index
    %33 = vector.load %arg6[%c128, %c0_36] : memref<200x96xbf16, #tpu.memory_space<vmem>>, vector<8x96xbf16>
    tpu.vector_store %arg6[%c128, %c0_36], %32 {strides = array<i32>} : memref<200x96xbf16, #tpu.memory_space<vmem>>, vector<8x96xbf16>,
    %c0_37 = arith.constant 0 : index
    %c38 = arith.constant 38 : index
    %34 = vector.load %arg1[%c0_37, %c38] : memref<8x256xbf16, #tpu.memory_space<vmem>>, vector<8x96xbf16>
    %c136 = arith.constant 136 : index
    %c0_38 = arith.constant 0 : index
    %35 = vector.load %arg6[%c136, %c0_38] : memref<200x96xbf16, #tpu.memory_space<vmem>>, vector<8x96xbf16>
    tpu.vector_store %arg6[%c136, %c0_38], %34 {strides = array<i32>} : memref<200x96xbf16, #tpu.memory_space<vmem>>, vector<8x96xbf16>,
    %c0_39 = arith.constant 0 : index
    %c39 = arith.constant 39 : index
    %36 = vector.load %arg1[%c0_39, %c39] : memref<8x256xbf16, #tpu.memory_space<vmem>>, vector<8x96xbf16>
    %c144 = arith.constant 144 : index
    %c0_40 = arith.constant 0 : index
    %37 = vector.load %arg6[%c144, %c0_40] : memref<200x96xbf16, #tpu.memory_space<vmem>>, vector<8x96xbf16>
    tpu.vector_store %arg6[%c144, %c0_40], %36 {strides = array<i32>} : memref<200x96xbf16, #tpu.memory_space<vmem>>, vector<8x96xbf16>,
    %c0_41 = arith.constant 0 : index
    %c40_42 = arith.constant 40 : index
    %38 = vector.load %arg1[%c0_41, %c40_42] : memref<8x256xbf16, #tpu.memory_space<vmem>>, vector<8x96xbf16>
    %c152 = arith.constant 152 : index
    %c0_43 = arith.constant 0 : index
    %39 = vector.load %arg6[%c152, %c0_43] : memref<200x96xbf16, #tpu.memory_space<vmem>>, vector<8x96xbf16>
    tpu.vector_store %arg6[%c152, %c0_43], %38 {strides = array<i32>} : memref<200x96xbf16, #tpu.memory_space<vmem>>, vector<8x96xbf16>,
    %c0_44 = arith.constant 0 : index
    %c48_45 = arith.constant 48 : index
    %40 = vector.load %arg1[%c0_44, %c48_45] : memref<8x256xbf16, #tpu.memory_space<vmem>>, vector<8x96xbf16>
    %c160 = arith.constant 160 : index
    %c0_46 = arith.constant 0 : index
    %41 = vector.load %arg6[%c160, %c0_46] : memref<200x96xbf16, #tpu.memory_space<vmem>>, vector<8x96xbf16>
    tpu.vector_store %arg6[%c160, %c0_46], %40 {strides = array<i32>} : memref<200x96xbf16, #tpu.memory_space<vmem>>, vector<8x96xbf16>,
    %c0_47 = arith.constant 0 : index
    %c49 = arith.constant 49 : index
    %42 = vector.load %arg1[%c0_47, %c49] : memref<8x256xbf16, #tpu.memory_space<vmem>>, vector<8x96xbf16>
    %c168 = arith.constant 168 : index
    %c0_48 = arith.constant 0 : index
    %43 = vector.load %arg6[%c168, %c0_48] : memref<200x96xbf16, #tpu.memory_space<vmem>>, vector<8x96xbf16>
    tpu.vector_store %arg6[%c168, %c0_48], %42 {strides = array<i32>} : memref<200x96xbf16, #tpu.memory_space<vmem>>, vector<8x96xbf16>,
    %c0_49 = arith.constant 0 : index
    %c50 = arith.constant 50 : index
    %44 = vector.load %arg1[%c0_49, %c50] : memref<8x256xbf16, #tpu.memory_space<vmem>>, vector<8x96xbf16>
    %c176 = arith.constant 176 : index
    %c0_50 = arith.constant 0 : index
    %45 = vector.load %arg6[%c176, %c0_50] : memref<200x96xbf16, #tpu.memory_space<vmem>>, vector<8x96xbf16>
    tpu.vector_store %arg6[%c176, %c0_50], %44 {strides = array<i32>} : memref<200x96xbf16, #tpu.memory_space<vmem>>, vector<8x96xbf16>,
    %c0_51 = arith.constant 0 : index
    %c51 = arith.constant 51 : index
    %46 = vector.load %arg1[%c0_51, %c51] : memref<8x256xbf16, #tpu.memory_space<vmem>>, vector<8x96xbf16>
    %c184 = arith.constant 184 : index
    %c0_52 = arith.constant 0 : index
    %47 = vector.load %arg6[%c184, %c0_52] : memref<200x96xbf16, #tpu.memory_space<vmem>>, vector<8x96xbf16>
    tpu.vector_store %arg6[%c184, %c0_52], %46 {strides = array<i32>} : memref<200x96xbf16, #tpu.memory_space<vmem>>, vector<8x96xbf16>,
    %c0_53 = arith.constant 0 : index
    %c52 = arith.constant 52 : index
    %48 = vector.load %arg1[%c0_53, %c52] : memref<8x256xbf16, #tpu.memory_space<vmem>>, vector<8x96xbf16>
    %c192 = arith.constant 192 : index
    %c0_54 = arith.constant 0 : index
    %49 = vector.load %arg6[%c192, %c0_54] : memref<200x96xbf16, #tpu.memory_space<vmem>>, vector<8x96xbf16>
    tpu.vector_store %arg6[%c192, %c0_54], %48 {strides = array<i32>} : memref<200x96xbf16, #tpu.memory_space<vmem>>, vector<8x96xbf16>,
    %c0_55 = arith.constant 0 : index
    %c0_56 = arith.constant 0 : index
    %50 = vector.load %arg2[%c0_55, %c0_56] : memref<8x200xbf16, #tpu.memory_space<vmem>>, vector<8x200xbf16>
    %c0_57 = arith.constant 0 : index
    %c0_58 = arith.constant 0 : index
    %51 = vector.load %arg6[%c0_57, %c0_58] : memref<200x96xbf16, #tpu.memory_space<vmem>>, vector<200x96xbf16>
    %cst = arith.constant dense<0.000000e+00> : vector<8x96xf32>
    %52 = tpu.matmul %50, %51, %cst {dimension_numbers = #tpu.dot_dimension_numbers<[1], [0], [0], [1], [0, 0, 1, 1], [], []>} : vector<8x200xbf16>, vector<200x96xbf16>, vector<8x96xf32> -> vector<8x96xf32>
    %c0_59 = arith.constant 0 : index
    %c0_60 = arith.constant 0 : index
    %53 = vector.load %arg3[%c0_59, %c0_60] : memref<8x1xf32, #tpu.memory_space<vmem>>, vector<8x1xf32>
    %54 = vector.broadcast %53 : vector<8x1xf32> to vector<8x96xf32>
    %55 = arith.addf %52, %54 : vector<8x96xf32>
    %cst_61 = arith.constant 0.000000e+00 : f32
    %56 = vector.broadcast %cst_61 : f32 to vector<8x96xf32>
    %57 = arith.maximumf %55, %56 : vector<8x96xf32>
    %58 = arith.truncf %57 : vector<8x96xf32> to vector<8x96xbf16>
    %c0_62 = arith.constant 0 : index
    %c0_63 = arith.constant 0 : index
    %59 = vector.load %arg4[%c0_62, %c0_63] : memref<96x256xbf16, #tpu.memory_space<vmem>>, vector<96x256xbf16>
    %cst_64 = arith.constant dense<0.000000e+00> : vector<8x256xf32>
    %60 = tpu.matmul %58, %59, %cst_64 {dimension_numbers = #tpu.dot_dimension_numbers<[1], [0], [0], [1], [0, 0, 1, 1], [], []>} : vector<8x96xbf16>, vector<96x256xbf16>, vector<8x256xf32> -> vector<8x256xf32>
    %61 = arith.truncf %60 : vector<8x256xf32> to vector<8x256xbf16>
    %c0_65 = arith.constant 0 : index
    %c0_66 = arith.constant 0 : index
    %62 = vector.load %arg5[%c0_65, %c0_66] : memref<8x256xbf16, #tpu.memory_space<vmem>>, vector<8x256xbf16>
    tpu.vector_store %arg5[%c0_65, %c0_66], %61 {strides = array<i32>} : memref<8x256xbf16, #tpu.memory_space<vmem>>, vector<8x256xbf16>,
    return
  }
  func.func @transform_0(%arg0: i32) -> (i32, i32) {
    %c0_i32 = arith.constant 0 : i32
    %c0_i32_0 = arith.constant 0 : i32
    return %c0_i32, %arg0 : i32, i32
  }
  func.func @transform_1(%arg0: i32) -> (i32, i32) {
    %c0_i32 = arith.constant 0 : i32
    %c0_i32_0 = arith.constant 0 : i32
    %c0_i32_1 = arith.constant 0 : i32
    return %c0_i32, %c0_i32_0 : i32, i32
  }
  func.func @transform_2(%arg0: i32) -> (i32, i32) {
    %c0_i32 = arith.constant 0 : i32
    %c0_i32_0 = arith.constant 0 : i32
    %c0_i32_1 = arith.constant 0 : i32
    return %c0_i32, %c0_i32_0 : i32, i32
  }
  func.func @transform_3(%arg0: i32) -> (i32, i32) {
    %c0_i32 = arith.constant 0 : i32
    %c0_i32_0 = arith.constant 0 : i32
    %c0_i32_1 = arith.constant 0 : i32
    return %c0_i32, %c0_i32_0 : i32, i32
  }
  func.func @transform_4(%arg0: i32) -> (i32, i32) {
    %c0_i32 = arith.constant 0 : i32
    %c0_i32_0 = arith.constant 0 : i32
    return %c0_i32, %arg0 : i32, i32
  }
}

</mosaic_0001>

<bundles_post_ra>
// kernel: segnet_forward.11
= control target key start
LH: loop header
LB: loop body
LE: loop exit
PB: predicated region body
PF: predicated region fallthrough
CT: control target
= control target key end

     0   :  { %s760_s15 = smov 0   ;;  %s854_s0 = inlined_call_operand.vmem [shape: bf16[8,256], index: 0, kind: input, shape index: {}]   ;;  %s855_s1 = inlined_call_operand.vmem [shape: bf16[8,200], index: 1, kind: input, shape index: {}]   ;;  %s856_s2 = inlined_call_operand.vmem [shape: f32[8,1], index: 2, kind: input, shape index: {}]   ;;  %s857_s3 = inlined_call_operand.vmem [shape: bf16[23,128], index: 3, kind: input, shape index: {}]   ;;  %s858_s4 = inlined_call_operand.vmem [shape: bf16[8,256], index: 4, kind: output, shape index: {}]  }
   0x1 LB: > { %s590_s16 = sadd.s32 4294967295, %s707_s15   ;;  %p594_p0 = scmp.ge.s32.totalorder %s707_s15, 1  ;;  %s707_s15 = sphi %s760_s15, %s14_s15  }
   0x2   : > { %p161_p1 = scmp.lt.s32.totalorder %s707_s15, 3 }
   0x4   : > { %p162_p2 = pnand %p594_p0, %p161_p1 }
   0x5   : > { %p185_p3 = scmp.lt.s32.totalorder (!%p162_p2), %s590_s16, 1  ;;  %s709_s21 = smov (!%p162_p2), 108  }
   0x6   : > { %165 = sbr.rel (%p162_p2) target bundleno = 681 (0x2a9), region = 36  ;;  %s710_s22 = smov (!%p162_p2), 110  }
   0x7   : > { %s711_s23 = smov (!%p162_p2), 112   ;;  %s712_s24 = smov (!%p162_p2), 104  }
   0x8   : > { %s713_s25 = smov (!%p162_p2), 109   ;;  %s714_s26 = smov (!%p162_p2), 111  }
   0x9   : > { %s715_s27 = smov (!%p162_p2), 92   ;;  %s716_s28 = smov (!%p162_p2), 117  }
   0xa   : > { %s717_s29 = smov (!%p162_p2), 116   ;;  %s718_s30 = smov (!%p162_p2), 118  }
   0xb   : > { %s860_s16 = smov (!%p185_p3, %s590_s16), 1  ;;  %s719_s5 = smov 119   ;;  %vm195_vm0 = vcmask 257024   ;;  %vm458_vm1 = vcmask 1043456   ;;  %v367_v52 = vld [vmem:[%s856_s2] sm:$0xff]  ;;  %v733_v53 = vmov 0  }
   0xc   : > { %s595_s17 = sshll.u32 %s860_s16, 2  ;;  %s720_s6 = smov 94   ;;  %700 = vset.pattern.permute.xlu0 %v733_v53  ;;  %vm454_vm2 = vcmask 588800   ;;  %vm516_vm3 = vcmask 1042432   ;;  %vm512_vm4 = vcmask 187392  }
   0xd   : > { %s776_s20 = scalar_lea.vmem %s854_s0, %s595_s17  ;;  %s721_s7 = smov 93  }
   0xe   : > { %v275_v0 = vld [vmem:[%s776_s20] sm:$0xf]  ;;  %s722_s8 = smov 124   ;;  %s723_s9 = smov 120  }
   0xf   : > { %v263_v1 = vld [vmem:[%s776_s20] sm:$0xf]  ;;  %277 = vrot.lane.b32.xlu0 %v275_v0, %s709_s21  ;;  %s724_s10 = smov 96   ;;  %s725_s11 = smov 95  }
  0x10   : > { %265 = vrot.lane.b32.xlu1 %v263_v1, %s710_s22  ;;  %v251_v2 = vld [vmem:[%s776_s20] sm:$0xf]  ;;  %s726_s12 = smov 126   ;;  %s727_s13 = smov 101  }
  0x11   : > { %253 = vrot.lane.b32.xlu2 %v251_v2, %s711_s23  ;;  %v281_v3 = vld [vmem:[%s776_s20] sm:$0xf]  ;;  %s728_s14 = smov 125   ;;  %s729_s18 = smov 100  }
  0x12   : > { %v269_v4 = vld [vmem:[%s776_s20] sm:$0xf]  ;;  %s730_s19 = smov 103   ;;  %s731_s21 = smov 127  }
  0x13   : > { %v257_v5 = vld [vmem:[%s776_s20] sm:$0xf]  ;;  %s732_s22 = smov 102  }
  0x14   : > { %v335_v6 = vld [vmem:[%s776_s20] sm:$0xf] }
  0x15   : > { %v239_v7 = vld [vmem:[%s776_s20] sm:$0xf] }
  0x16   : > { %v245_v8 = vld [vmem:[%s776_s20] sm:$0xf] }
  0x17   : > { %283 = vrot.lane.b32.xlu0 %v281_v3, %s712_s24  ;;  %v233_v9 = vld [vmem:[%s776_s20] sm:$0xf] }
  0x18   : > { %271 = vrot.lane.b32.xlu1 %v269_v4, %s713_s25  ;;  %v227_v10 = vld [vmem:[%s776_s20] sm:$0xf] }
  0x19   : > { %259 = vrot.lane.b32.xlu2 %v257_v5, %s714_s26  ;;  %v323_v11 = vld [vmem:[%s776_s20] sm:$0xf] }
  0x1a   : > { %v329_v12 = vld [vmem:[%s776_s20] sm:$0xf] }
  0x1b   : > { %v215_v13 = vld [vmem:[%s776_s20] sm:$0xf] }
  0x1c   : > { %v221_v14 = vld [vmem:[%s776_s20] sm:$0xf] }
  0x1d   : > { %v311_v15 = vld [vmem:[%s776_s20] sm:$0xf] }
  0x1e   : > { %v317_v16 = vld [vmem:[%s776_s20] sm:$0xf] }
  0x1f   : > { %337 = vrot.lane.b32.xlu0 %v335_v6, %s715_s27  ;;  %v203_v17 = vld [vmem:[%s776_s20] sm:$0xf] }
  0x20   : > { %241 = vrot.lane.b32.xlu1 %v239_v7, %s716_s28  ;;  %v299_v18 = vld [vmem:[%s776_s20] sm:$0xf] }
  0x21   : > { %247 = vrot.lane.b32.xlu2 %v245_v8, %s717_s29  ;;  %v209_v19 = vld [vmem:[%s776_s20] sm:$0xf] }
  0x22   : > { %v305_v20 = vld [vmem:[%s776_s20] sm:$0xf] }
  0x23   : > { %v287_v21 = vld [vmem:[%s776_s20] sm:$0xf] }
  0x24   : > { %v197_v22 = vld [vmem:[%s776_s20] sm:$0xf] }
  0x25   : > { %v293_v23 = vld [vmem:[%s776_s20] sm:$0xf] }
  0x26   : > { %v194_v43 = vld [vmem:[%s776_s20] sm:$0xf] }
  0x27   : > { %229 = vrot.lane.b32.xlu0 %v227_v10, %s719_s5  ;;  %196 = vst.msk [vmem:[#allocation2] sm:$0xf] %vm195_vm0, %v194_v43  ;;  %v341_v1 = vld [vmem:[%s855_s1] sm:$0xff] }
  0x28   : > { %235 = vrot.lane.b32.xlu1 %v233_v9, %s718_s30  ;;  %v375_v2 = vunpack.c.h.b16 %v341_v1  ;;  %v374_v3 = vunpack.c.l.b16 %v341_v1 }
  0x29   : > { %325 = vrot.lane.b32.xlu2 %v323_v11, %s720_s6  ;;  %s192_s6 = scalar_lea.vmem %s858_s4, %s595_s17 }
  0x2a   : > { %v377_v6 = vpack.c.b16 %v375_v2, %v375_v2  ;;  %v376_v7 = vpack.c.b16 %v374_v3, %v374_v3 }
  0x2f   : > { %331 = vrot.lane.b32.xlu0 %v329_v12, %s721_s7 }
  0x30   : > { %217 = vrot.lane.b32.xlu1 %v215_v13, %s722_s8 }
  0x31   : > { %223 = vrot.lane.b32.xlu2 %v221_v14, %s723_s9 }
  0x37   : > { %313 = vrot.lane.b32.xlu0 %v311_v15, %s724_s10 }
  0x38   : > { %319 = vrot.lane.b32.xlu1 %v317_v16, %s725_s11  ;;  %v502_v16 = vld [vmem:[%s857_s3 + $0x8] sm:$0xf] }
  0x39   : > { %205 = vrot.lane.b32.xlu2 %v203_v17, %s726_s12  ;;  %v508_v17 = vunpack.c.l.b16 %v502_v16 }
  0x3f   : > { %211 = vrot.lane.b32.xlu0 %v209_v19, %s728_s14 }
  0x40   : > { %301 = vrot.lane.b32.xlu1 %v299_v18, %s727_s13  ;;  %v734_v18 = vmov 65535  }
  0x41   : > { %307 = vrot.lane.b32.xlu2 %v305_v20, %s729_s18  ;;  %v517_v19 = vsel %vm516_vm3, 4294967295, %v734_v18 }
  0x42   : > { %v518_v20 = vsel %vm458_vm1, %v517_v19, 0 }
  0x47   : > { %199 = vrot.lane.b32.xlu0 %v197_v22, %s731_s21 }
  0x48   : > { %289 = vrot.lane.b32.xlu1 %v287_v21, %s730_s19  ;;  %v510_v21 = vpack.c.b16 %v508_v17, %v508_v17 }
  0x49   : > { %295 = vrot.lane.b32.xlu2 %v293_v23, %s732_s22 }
  0x4a   : > { %v520_v22 = vand.u32 %v518_v20, %v510_v21 }
  0x4c   : > { %528 = vmatpush.bf16.msra.mxu2 %v520_v22 }
  0x4f   : > { %370 = vperm.xlu0 %700, %v367_v52  }
  0x6b   : > { %v254_v24 = vpop.permute.xlu2 %253 }
  0x6c   : > { %256 = vst.msk [vmem:[#allocation2 + $0x28] sm:$0xf] %vm195_vm0, %v254_v24 }
  0x73   : > { %v260_v25 = vpop.permute.xlu2 %259 }
  0x74   : > { %262 = vst.msk [vmem:[#allocation2 + $0x2c] sm:$0xf] %vm195_vm0, %v260_v25  ;;  %v665_v25 = vld [vmem:[%s857_s3] sm:$0xff] }
  0x75   : > { %529 = vmatpush.bf16.msra.mxu2 %v665_v25 }
  0x7b   : > { %v248_v26 = vpop.permute.xlu2 %247  ;;  %v658_v40 = vld [vmem:[#allocation2 + $0x28] sm:$0xff] }
  0x7c   : > { %250 = vst.msk [vmem:[#allocation2 + $0x24] sm:$0xf] %vm195_vm0, %v248_v26 }
  0x81   : > { %v278_v27 = vpop.permute.xlu0 %277 }
  0x82   : > { %v266_v28 = vpop.permute.xlu1 %265  ;;  %280 = vst.msk [vmem:[#allocation2 + $0x38] sm:$0xf] %vm195_vm0, %v278_v27 }
  0x83   : > { %268 = vst.msk [vmem:[#allocation2 + $0x30] sm:$0xf] %vm195_vm0, %v266_v28  ;;  %v326_v29 = vpop.permute.xlu2 %325 }
  0x84   : > { %328 = vst.msk [vmem:[#allocation2 + $0x58] sm:$0xf] %vm195_vm0, %v326_v29 }
  0x89   : > { %v284_v30 = vpop.permute.xlu0 %283 }
  0x8a   : > { %v272_v31 = vpop.permute.xlu1 %271  ;;  %286 = vst.msk [vmem:[#allocation2 + $0x3c] sm:$0xf] %vm195_vm0, %v284_v30 }
  0x8b   : > { %274 = vst.msk [vmem:[#allocation2 + $0x34] sm:$0xf] %vm195_vm0, %v272_v31  ;;  %v224_v32 = vpop.permute.xlu2 %223 }
  0x8c   : > { %226 = vst.msk [vmem:[#allocation2 + $0x14] sm:$0xf] %vm195_vm0, %v224_v32 }
  0x91   : > { %v338_v33 = vpop.permute.xlu0 %337  ;;  %v660_v35 = vld [vmem:[#allocation2 + $0x38] sm:$0xff] }
  0x92   : > { %v242_v34 = vpop.permute.xlu1 %241  ;;  %340 = vst.msk [vmem:[#allocation2 + $0x60] sm:$0xf] %vm195_vm0, %v338_v33  ;;  %462 = vmatpush.bf16.msra.mxu0 %v660_v35  ;;  %v659_v37 = vld [vmem:[#allocation2 + $0x30] sm:$0xff] }
  0x93   : > { %244 = vst.msk [vmem:[#allocation2 + $0x20] sm:$0xf] %vm195_vm0, %v242_v34  ;;  %v206_v36 = vpop.permute.xlu2 %205 }
  0x94   : > { %208 = vst.msk [vmem:[#allocation2 + $0x8] sm:$0xf] %vm195_vm0, %v206_v36 }
  0x96   : > { %463 = vmatpush.bf16.msra.mxu0 %v659_v37 }
  0x99   : > { %v230_v39 = vpop.permute.xlu0 %229  ;;  %v366_v41 = vld [vmem:[#allocation2 + $0x60] sm:$0xf] }
  0x9a   : > { %v236_v38 = vpop.permute.xlu1 %235  ;;  %v428_v42 = vunpack.c.l.b16 %v366_v41  ;;  %232 = vst.msk [vmem:[#allocation2 + $0x18] sm:$0xf] %vm195_vm0, %v230_v39  ;;  %464 = vmatpush.bf16.msra.mxu0 %v658_v40  ;;  %v657_v46 = vld [vmem:[#allocation2 + $0x20] sm:$0xff] }
  0x9b   : > { %238 = vst.msk [vmem:[#allocation2 + $0x1c] sm:$0xf] %vm195_vm0, %v236_v38  ;;  %v308_v44 = vpop.permute.xlu2 %307 }
  0x9c   : > { %v441_v45 = vpack.c.b16 %v428_v42, %v428_v42  ;;  %310 = vst.msk [vmem:[#allocation2 + $0x4c] sm:$0xf] %vm195_vm0, %v308_v44 }
  0x9e   : > { %v460_v47 = vsel %vm458_vm1, %v441_v45, 0  ;;  %465 = vmatpush.bf16.msra.mxu0 %v657_v46 }
  0x9f   : > { %478 = vmatpush.bf16.msra.mxu1 %v460_v47 }
  0xa1   : > { %v332_v48 = vpop.permute.xlu0 %331 }
  0xa2   : > { %v218_v49 = vpop.permute.xlu1 %217  ;;  %334 = vst.msk [vmem:[#allocation2 + $0x5c] sm:$0xf] %vm195_vm0, %v332_v48  ;;  %v656_v50 = vld [vmem:[#allocation2 + $0x18] sm:$0xff] }
  0xa3   : > { %220 = vst.msk [vmem:[#allocation2 + $0x10] sm:$0xf] %vm195_vm0, %v218_v49  ;;  %v296_v51 = vpop.permute.xlu2 %295  ;;  %466 = vmatpush.bf16.msra.mxu0 %v656_v50 }
  0xa4   : > { %298 = vst.msk [vmem:[#allocation2 + $0x44] sm:$0xf] %vm195_vm0, %v296_v51 }
  0xa9   : > { %v314_v54 = vpop.permute.xlu0 %313  ;;  %v664_v56 = vld [vmem:[#allocation2 + $0x58] sm:$0xff] }
  0xaa   : > { %v320_v55 = vpop.permute.xlu1 %319  ;;  %316 = vst.msk [vmem:[#allocation2 + $0x50] sm:$0xf] %vm195_vm0, %v314_v54  ;;  %v655_v57 = vld [vmem:[#allocation2 + $0x10] sm:$0xff]  ;;  %479 = vmatpush.bf16.msra.mxu1 %v664_v56 }
  0xab   : > { %322 = vst.msk [vmem:[#allocation2 + $0x54] sm:$0xf] %vm195_vm0, %v320_v55  ;;  %467 = vmatpush.bf16.msra.mxu0 %v655_v57 }
  0xb1   : > { %v212_v59 = vpop.permute.xlu0 %211 }
  0xb2   : > { %v302_v58 = vpop.permute.xlu1 %301  ;;  %v663_v60 = vld [vmem:[#allocation2 + $0x50] sm:$0xff]  ;;  %214 = vst.msk [vmem:[#allocation2 + $0xc] sm:$0xf] %vm195_vm0, %v212_v59 }
  0xb3   : > { %304 = vst.msk [vmem:[#allocation2 + $0x48] sm:$0xf] %vm195_vm0, %v302_v58  ;;  %480 = vmatpush.bf16.msra.mxu1 %v663_v60 }
  0xb9   : > { %v200_v62 = vpop.permute.xlu0 %199  ;;  %v654_v0 = vld [vmem:[#allocation2 + $0x8] sm:$0xff] }
  0xba   : > { %v290_v61 = vpop.permute.xlu1 %289  ;;  %v662_v63 = vld [vmem:[#allocation2 + $0x48] sm:$0xff]  ;;  %202 = vst.msk [vmem:[#allocation2 + $0x4] sm:$0xf] %vm195_vm0, %v200_v62  ;;  %468 = vmatpush.bf16.msra.mxu0 %v654_v0 }
  0xbb   : > { %292 = vst.msk [vmem:[#allocation2 + $0x40] sm:$0xf] %vm195_vm0, %v290_v61  ;;  %481 = vmatpush.bf16.msra.mxu1 %v662_v63 }
  0xc1   : > { %v653_v5 = vld [vmem:[#allocation2] sm:$0xff]  ;;  %v371_v8 = vpop.permute.xlu0 %370 }
  0xc2   : > { %v661_v4 = vld [vmem:[#allocation2 + $0x40] sm:$0xff]  ;;  %469 = vmatpush.bf16.msra.mxu0 %v653_v5 }
  0xc3   : > { %482 = vmatpush.bf16.msra.mxu1 %v661_v4 }
  0xc5   : > { %470 = vmatmul.bf16.vlgmr.msra.gmra.mxu0 %v376_v7 }
  0xc6   : > { %645 = vmatmul.msk.bf16.vlgmr.msra.gmra.mxu1 %vm454_vm2, %v377_v6 }
 0x142   : > { %v471_v10 = vpop.f32.mrf.mxu0 }
 0x143   : > { %v484_v9 = vpop.f32.mrf.mxu1  ;;  %v472_v11 = vadd.f32 %v471_v10, %v371_v8 }
 0x145   : > { %v485_v12 = vadd.f32 %v484_v9, %v472_v11 }
 0x147   : > { %v488_v13 = vmax.f32 %v485_v12, 0.0 }
 0x149   : > { %490 = vrot.lane.b32.xlu1 %v488_v13, %s731_s21 }
 0x14a   : > { %v473_v15 = vpop.f32.mrf.mxu0 }
 0x14b   : > { %v486_v14 = vpop.f32.mrf.mxu1 }
 0x1bb   : > { %v491_v23 = vpop.permute.xlu1 %490 }
 0x1bc   : > { %v493_v24 = vmax.f32 %v488_v13, %v491_v23 }
 0x1be   : > { %495 = vrot.lane.b32.xlu2 %v493_v24, %s723_s9 }
 0x218   : > { %v496_v26 = vpop.permute.xlu2 %495 }
 0x219   : > { %v498_v27 = vmax.f32 %v493_v24, %v496_v26 }
 0x21b   : > { %v499_v28 = vpack.c.bf16 %v498_v27, %v498_v27 }
 0x21d   : > { %650 = vmatmul.msk.bf16.vlgmr.msra.gmra.mxu2 %vm512_vm4, %v499_v28 }
 0x2a0   : > { %v531_v29 = vpop.f32.mrf.mxu2 }
 0x2a1   : > { %v535_v30 = vpack.c.bf16 %v531_v29, %v531_v29 }
 0x2a3   : > { %536 = vst [vmem:[%s192_s6] sm:$0xf] %v535_v30 }
 0x2a8   : > { %v533_v31 = vpop.f32.mrf.mxu2 }
 0x2a9 PF: > { %s14_s15 = sadd.s32 1, %s707_s15  }
 0x2aa   : > { %p11_p4 = scmp.ge.s32.totalorder %s14_s15, 4  }
 0x2ac   :  { %13 = sbr.rel (!%p11_p4) target bundleno = 1 (0x1), region = 66 }

// kernel: segnet_forward.12
= control target key start
LH: loop header
LB: loop body
LE: loop exit
PB: predicated region body
PF: predicated region fallthrough
CT: control target
= control target key end

     0   :  { %s745_s15 = smov 0   ;;  %s834_s0 = inlined_call_operand.vmem [shape: bf16[8,256], index: 0, kind: input, shape index: {}]   ;;  %s835_s1 = inlined_call_operand.vmem [shape: bf16[8,200], index: 1, kind: input, shape index: {}]   ;;  %s836_s2 = inlined_call_operand.vmem [shape: f32[8,1], index: 2, kind: input, shape index: {}]   ;;  %s837_s3 = inlined_call_operand.vmem [shape: bf16[5,128], index: 3, kind: input, shape index: {}]   ;;  %s838_s4 = inlined_call_operand.vmem [shape: bf16[8,256], index: 4, kind: output, shape index: {}]  }
   0x1 LB: > { %s580_s16 = sadd.s32 4294967295, %s692_s15   ;;  %p584_p0 = scmp.ge.s32.totalorder %s692_s15, 1  ;;  %s692_s15 = sphi %s745_s15, %s14_s15  }
   0x2   : > { %p161_p1 = scmp.lt.s32.totalorder %s692_s15, 3 }
   0x4   : > { %p162_p2 = pnand %p584_p0, %p161_p1 }
   0x5   : > { %p185_p3 = scmp.lt.s32.totalorder (!%p162_p2), %s580_s16, 1  ;;  %s694_s21 = smov (!%p162_p2), 112  }
   0x6   : > { %165 = sbr.rel (%p162_p2) target bundleno = 681 (0x2a9), region = 36  ;;  %s695_s22 = smov (!%p162_p2), 114  }
   0x7   : > { %s696_s23 = smov (!%p162_p2), 116   ;;  %s697_s24 = smov (!%p162_p2), 110  }
   0x8   : > { %s698_s25 = smov (!%p162_p2), 113   ;;  %s699_s26 = smov (!%p162_p2), 115  }
   0x9   : > { %s700_s27 = smov (!%p162_p2), 100   ;;  %s701_s28 = smov (!%p162_p2), 119  }
   0xa   : > { %s702_s29 = smov (!%p162_p2), 118   ;;  %s703_s30 = smov (!%p162_p2), 120  }
   0xb   : > { %s840_s16 = smov (!%p185_p3, %s580_s16), 1  ;;  %s704_s5 = smov 121   ;;  %vm195_vm0 = vcmask 93184   ;;  %vm458_vm1 = vcmask 1043456   ;;  %v367_v52 = vld [vmem:[%s836_s2] sm:$0xff]  ;;  %v718_v53 = vmov 0  }
   0xc   : > { %s585_s17 = sshll.u32 %s840_s16, 2  ;;  %s705_s6 = smov 102   ;;  %685 = vset.pattern.permute.xlu0 %v718_v53  ;;  %vm454_vm2 = vcmask 588800   ;;  %vm505_vm3 = vcmask 1041408   ;;  %vm506_vm4 = vcmask 1042432   ;;  %vm501_vm5 = vcmask 39936  }
   0xd   : > { %s761_s20 = scalar_lea.vmem %s834_s0, %s585_s17  ;;  %s706_s7 = smov 101  }
   0xe   : > { %v275_v0 = vld [vmem:[%s761_s20] sm:$0xf]  ;;  %s707_s8 = smov 124   ;;  %s708_s9 = smov 122  }
   0xf   : > { %v263_v1 = vld [vmem:[%s761_s20] sm:$0xf]  ;;  %277 = vrot.lane.b32.xlu0 %v275_v0, %s694_s21  ;;  %s709_s10 = smov 104   ;;  %s710_s11 = smov 103  }
  0x10   : > { %265 = vrot.lane.b32.xlu1 %v263_v1, %s695_s22  ;;  %v251_v2 = vld [vmem:[%s761_s20] sm:$0xf]  ;;  %s711_s12 = smov 126   ;;  %s712_s13 = smov 107  }
  0x11   : > { %253 = vrot.lane.b32.xlu2 %v251_v2, %s696_s23  ;;  %v281_v3 = vld [vmem:[%s761_s20] sm:$0xf]  ;;  %s713_s14 = smov 125   ;;  %s714_s18 = smov 106  }
  0x12   : > { %v269_v4 = vld [vmem:[%s761_s20] sm:$0xf]  ;;  %s715_s19 = smov 109   ;;  %s716_s21 = smov 127  }
  0x13   : > { %v257_v5 = vld [vmem:[%s761_s20] sm:$0xf]  ;;  %s717_s22 = smov 108  }
  0x14   : > { %v335_v6 = vld [vmem:[%s761_s20] sm:$0xf] }
  0x15   : > { %v239_v7 = vld [vmem:[%s761_s20] sm:$0xf] }
  0x16   : > { %v245_v8 = vld [vmem:[%s761_s20] sm:$0xf] }
  0x17   : > { %283 = vrot.lane.b32.xlu0 %v281_v3, %s697_s24  ;;  %v233_v9 = vld [vmem:[%s761_s20] sm:$0xf] }
  0x18   : > { %271 = vrot.lane.b32.xlu1 %v269_v4, %s698_s25  ;;  %v227_v10 = vld [vmem:[%s761_s20] sm:$0xf] }
  0x19   : > { %259 = vrot.lane.b32.xlu2 %v257_v5, %s699_s26  ;;  %v323_v11 = vld [vmem:[%s761_s20] sm:$0xf] }
  0x1a   : > { %v329_v12 = vld [vmem:[%s761_s20] sm:$0xf] }
  0x1b   : > { %v215_v13 = vld [vmem:[%s761_s20] sm:$0xf] }
  0x1c   : > { %v221_v14 = vld [vmem:[%s761_s20] sm:$0xf] }
  0x1d   : > { %v311_v15 = vld [vmem:[%s761_s20] sm:$0xf] }
  0x1e   : > { %v317_v16 = vld [vmem:[%s761_s20] sm:$0xf] }
  0x1f   : > { %337 = vrot.lane.b32.xlu0 %v335_v6, %s700_s27  ;;  %v203_v17 = vld [vmem:[%s761_s20] sm:$0xf] }
  0x20   : > { %241 = vrot.lane.b32.xlu1 %v239_v7, %s701_s28  ;;  %v299_v18 = vld [vmem:[%s761_s20] sm:$0xf] }
  0x21   : > { %247 = vrot.lane.b32.xlu2 %v245_v8, %s702_s29  ;;  %v209_v19 = vld [vmem:[%s761_s20] sm:$0xf] }
  0x22   : > { %v305_v20 = vld [vmem:[%s761_s20] sm:$0xf] }
  0x23   : > { %v287_v21 = vld [vmem:[%s761_s20] sm:$0xf] }
  0x24   : > { %v197_v22 = vld [vmem:[%s761_s20] sm:$0xf] }
  0x25   : > { %v293_v23 = vld [vmem:[%s761_s20] sm:$0xf] }
  0x26   : > { %v194_v43 = vld [vmem:[%s761_s20] sm:$0xf] }
  0x27   : > { %229 = vrot.lane.b32.xlu0 %v227_v10, %s704_s5  ;;  %196 = vst.msk [vmem:[#allocation2] sm:$0xf] %vm195_vm0, %v194_v43  ;;  %v341_v1 = vld [vmem:[%s835_s1] sm:$0xff] }
  0x28   : > { %235 = vrot.lane.b32.xlu1 %v233_v9, %s703_s30  ;;  %v375_v2 = vunpack.c.h.b16 %v341_v1  ;;  %v374_v3 = vunpack.c.l.b16 %v341_v1  ;;  %s192_s30 = scalar_lea.vmem %s838_s4, %s585_s17 }
  0x29   : > { %325 = vrot.lane.b32.xlu2 %v323_v11, %s705_s6 }
  0x2a   : > { %v377_v6 = vpack.c.b16 %v375_v2, %v375_v2  ;;  %v376_v7 = vpack.c.b16 %v374_v3, %v374_v3 }
  0x2f   : > { %331 = vrot.lane.b32.xlu0 %v329_v12, %s706_s7 }
  0x30   : > { %217 = vrot.lane.b32.xlu1 %v215_v13, %s707_s8 }
  0x31   : > { %223 = vrot.lane.b32.xlu2 %v221_v14, %s708_s9 }
  0x37   : > { %313 = vrot.lane.b32.xlu0 %v311_v15, %s709_s10 }
  0x38   : > { %319 = vrot.lane.b32.xlu1 %v317_v16, %s710_s11 }
  0x39   : > { %205 = vrot.lane.b32.xlu2 %v203_v17, %s711_s12 }
  0x3f   : > { %211 = vrot.lane.b32.xlu0 %v209_v19, %s713_s14 }
  0x40   : > { %301 = vrot.lane.b32.xlu1 %v299_v18, %s712_s13  ;;  %v719_v18 = vmov 65535  }
  0x41   : > { %307 = vrot.lane.b32.xlu2 %v305_v20, %s714_s18  ;;  %v507_v19 = vsel %vm505_vm3, 4294967295, %v719_v18  ;;  %v500_v20 = vld [vmem:[%s837_s3] sm:$0x7] }
  0x47   : > { %199 = vrot.lane.b32.xlu0 %v197_v22, %s716_s21 }
  0x48   : > { %289 = vrot.lane.b32.xlu1 %v287_v21, %s715_s19  ;;  %v508_v21 = vsel %vm506_vm4, %v507_v19, 0 }
  0x49   : > { %295 = vrot.lane.b32.xlu2 %v293_v23, %s717_s22  ;;  %v510_v22 = vand.u32 %v508_v21, %v500_v20 }
  0x4b   : > { %519 = vmatpush.bf16.msra.mxu2 %v510_v22 }
  0x4f   : > { %370 = vperm.xlu0 %685, %v367_v52  }
  0x6b   : > { %v254_v24 = vpop.permute.xlu2 %253 }
  0x6c   : > { %256 = vst.msk [vmem:[#allocation2 + $0x28] sm:$0xf] %vm195_vm0, %v254_v24 }
  0x73   : > { %v260_v25 = vpop.permute.xlu2 %259 }
  0x74   : > { %262 = vst.msk [vmem:[#allocation2 + $0x2c] sm:$0xf] %vm195_vm0, %v260_v25 }
  0x7b   : > { %v248_v26 = vpop.permute.xlu2 %247  ;;  %v644_v40 = vld [vmem:[#allocation2 + $0x28] sm:$0xff] }
  0x7c   : > { %250 = vst.msk [vmem:[#allocation2 + $0x24] sm:$0xf] %vm195_vm0, %v248_v26 }
  0x81   : > { %v278_v27 = vpop.permute.xlu0 %277 }
  0x82   : > { %v266_v28 = vpop.permute.xlu1 %265  ;;  %280 = vst.msk [vmem:[#allocation2 + $0x38] sm:$0xf] %vm195_vm0, %v278_v27 }
  0x83   : > { %268 = vst.msk [vmem:[#allocation2 + $0x30] sm:$0xf] %vm195_vm0, %v266_v28  ;;  %v326_v29 = vpop.permute.xlu2 %325 }
  0x84   : > { %328 = vst.msk [vmem:[#allocation2 + $0x58] sm:$0xf] %vm195_vm0, %v326_v29 }
  0x89   : > { %v284_v30 = vpop.permute.xlu0 %283 }
  0x8a   : > { %v272_v31 = vpop.permute.xlu1 %271  ;;  %286 = vst.msk [vmem:[#allocation2 + $0x3c] sm:$0xf] %vm195_vm0, %v284_v30 }
  0x8b   : > { %274 = vst.msk [vmem:[#allocation2 + $0x34] sm:$0xf] %vm195_vm0, %v272_v31  ;;  %v224_v32 = vpop.permute.xlu2 %223 }
  0x8c   : > { %226 = vst.msk [vmem:[#allocation2 + $0x14] sm:$0xf] %vm195_vm0, %v224_v32 }
  0x91   : > { %v338_v33 = vpop.permute.xlu0 %337  ;;  %v646_v35 = vld [vmem:[#allocation2 + $0x38] sm:$0xff] }
  0x92   : > { %v242_v34 = vpop.permute.xlu1 %241  ;;  %340 = vst.msk [vmem:[#allocation2 + $0x60] sm:$0xf] %vm195_vm0, %v338_v33  ;;  %462 = vmatpush.bf16.msra.mxu0 %v646_v35  ;;  %v645_v37 = vld [vmem:[#allocation2 + $0x30] sm:$0xff] }
  0x93   : > { %244 = vst.msk [vmem:[#allocation2 + $0x20] sm:$0xf] %vm195_vm0, %v242_v34  ;;  %v206_v36 = vpop.permute.xlu2 %205 }
  0x94   : > { %208 = vst.msk [vmem:[#allocation2 + $0x8] sm:$0xf] %vm195_vm0, %v206_v36 }
  0x96   : > { %463 = vmatpush.bf16.msra.mxu0 %v645_v37 }
  0x99   : > { %v230_v39 = vpop.permute.xlu0 %229  ;;  %v366_v41 = vld [vmem:[#allocation2 + $0x60] sm:$0xf] }
  0x9a   : > { %v236_v38 = vpop.permute.xlu1 %235  ;;  %v428_v42 = vunpack.c.l.b16 %v366_v41  ;;  %232 = vst.msk [vmem:[#allocation2 + $0x18] sm:$0xf] %vm195_vm0, %v230_v39  ;;  %464 = vmatpush.bf16.msra.mxu0 %v644_v40  ;;  %v643_v46 = vld [vmem:[#allocation2 + $0x20] sm:$0xff] }
  0x9b   : > { %238 = vst.msk [vmem:[#allocation2 + $0x1c] sm:$0xf] %vm195_vm0, %v236_v38  ;;  %v308_v44 = vpop.permute.xlu2 %307 }
  0x9c   : > { %v441_v45 = vpack.c.b16 %v428_v42, %v428_v42  ;;  %310 = vst.msk [vmem:[#allocation2 + $0x4c] sm:$0xf] %vm195_vm0, %v308_v44 }
  0x9e   : > { %v460_v47 = vsel %vm458_vm1, %v441_v45, 0  ;;  %465 = vmatpush.bf16.msra.mxu0 %v643_v46 }
  0x9f   : > { %478 = vmatpush.bf16.msra.mxu1 %v460_v47 }
  0xa1   : > { %v332_v48 = vpop.permute.xlu0 %331 }
  0xa2   : > { %v218_v49 = vpop.permute.xlu1 %217  ;;  %334 = vst.msk [vmem:[#allocation2 + $0x5c] sm:$0xf] %vm195_vm0, %v332_v48  ;;  %v642_v50 = vld [vmem:[#allocation2 + $0x18] sm:$0xff] }
  0xa3   : > { %220 = vst.msk [vmem:[#allocation2 + $0x10] sm:$0xf] %vm195_vm0, %v218_v49  ;;  %v296_v51 = vpop.permute.xlu2 %295  ;;  %466 = vmatpush.bf16.msra.mxu0 %v642_v50 }
  0xa4   : > { %298 = vst.msk [vmem:[#allocation2 + $0x44] sm:$0xf] %vm195_vm0, %v296_v51 }
  0xa9   : > { %v314_v54 = vpop.permute.xlu0 %313  ;;  %v650_v56 = vld [vmem:[#allocation2 + $0x58] sm:$0xff] }
  0xaa   : > { %v320_v55 = vpop.permute.xlu1 %319  ;;  %316 = vst.msk [vmem:[#allocation2 + $0x50] sm:$0xf] %vm195_vm0, %v314_v54  ;;  %v641_v57 = vld [vmem:[#allocation2 + $0x10] sm:$0xff]  ;;  %479 = vmatpush.bf16.msra.mxu1 %v650_v56 }
  0xab   : > { %322 = vst.msk [vmem:[#allocation2 + $0x54] sm:$0xf] %vm195_vm0, %v320_v55  ;;  %467 = vmatpush.bf16.msra.mxu0 %v641_v57 }
  0xb1   : > { %v212_v59 = vpop.permute.xlu0 %211 }
  0xb2   : > { %v302_v58 = vpop.permute.xlu1 %301  ;;  %v649_v60 = vld [vmem:[#allocation2 + $0x50] sm:$0xff]  ;;  %214 = vst.msk [vmem:[#allocation2 + $0xc] sm:$0xf] %vm195_vm0, %v212_v59 }
  0xb3   : > { %304 = vst.msk [vmem:[#allocation2 + $0x48] sm:$0xf] %vm195_vm0, %v302_v58  ;;  %480 = vmatpush.bf16.msra.mxu1 %v649_v60 }
  0xb9   : > { %v200_v62 = vpop.permute.xlu0 %199  ;;  %v640_v0 = vld [vmem:[#allocation2 + $0x8] sm:$0xff] }
  0xba   : > { %v290_v61 = vpop.permute.xlu1 %289  ;;  %v648_v63 = vld [vmem:[#allocation2 + $0x48] sm:$0xff]  ;;  %202 = vst.msk [vmem:[#allocation2 + $0x4] sm:$0xf] %vm195_vm0, %v200_v62  ;;  %468 = vmatpush.bf16.msra.mxu0 %v640_v0 }
  0xbb   : > { %292 = vst.msk [vmem:[#allocation2 + $0x40] sm:$0xf] %vm195_vm0, %v290_v61  ;;  %481 = vmatpush.bf16.msra.mxu1 %v648_v63 }
  0xc1   : > { %v639_v5 = vld [vmem:[#allocation2] sm:$0xff]  ;;  %v371_v8 = vpop.permute.xlu0 %370 }
  0xc2   : > { %v647_v4 = vld [vmem:[#allocation2 + $0x40] sm:$0xff]  ;;  %469 = vmatpush.bf16.msra.mxu0 %v639_v5 }
  0xc3   : > { %482 = vmatpush.bf16.msra.mxu1 %v647_v4 }
  0xc5   : > { %470 = vmatmul.bf16.vlgmr.msra.gmra.mxu0 %v376_v7 }
  0xc6   : > { %635 = vmatmul.msk.bf16.vlgmr.msra.gmra.mxu1 %vm454_vm2, %v377_v6 }
 0x142   : > { %v471_v10 = vpop.f32.mrf.mxu0 }
 0x143   : > { %v484_v9 = vpop.f32.mrf.mxu1  ;;  %v472_v11 = vadd.f32 %v471_v10, %v371_v8 }
 0x145   : > { %v485_v12 = vadd.f32 %v484_v9, %v472_v11 }
 0x147   : > { %v488_v13 = vmax.f32 %v485_v12, 0.0 }
 0x149   : > { %490 = vrot.lane.b32.xlu1 %v488_v13, %s716_s21 }
 0x14a   : > { %v473_v15 = vpop.f32.mrf.mxu0 }
 0x14b   : > { %v486_v14 = vpop.f32.mrf.mxu1 }
 0x1bb   : > { %v491_v16 = vpop.permute.xlu1 %490 }
 0x1bc   : > { %v493_v17 = vmax.f32 %v488_v13, %v491_v16 }
 0x1be   : > { %495 = vrot.lane.b32.xlu2 %v493_v17, %s708_s9 }
 0x218   : > { %v496_v23 = vpop.permute.xlu2 %495 }
 0x219   : > { %v498_v24 = vmax.f32 %v493_v17, %v496_v23 }
 0x21b   : > { %v499_v25 = vpack.c.bf16 %v498_v24, %v498_v24 }
 0x21d   : > { %636 = vmatmul.msk.bf16.vlgmr.msra.gmra.mxu2 %vm501_vm5, %v499_v25 }
 0x2a0   : > { %v521_v26 = vpop.f32.mrf.mxu2 }
 0x2a1   : > { %v525_v27 = vpack.c.bf16 %v521_v26, %v521_v26 }
 0x2a3   : > { %526 = vst [vmem:[%s192_s30] sm:$0xf] %v525_v27 }
 0x2a8   : > { %v523_v28 = vpop.f32.mrf.mxu2 }
 0x2a9 PF: > { %s14_s15 = sadd.s32 1, %s692_s15  }
 0x2aa   : > { %p11_p4 = scmp.ge.s32.totalorder %s14_s15, 4  }
 0x2ac   :  { %13 = sbr.rel (!%p11_p4) target bundleno = 1 (0x1), region = 66 }

// kernel: segnet_forward.10
= control target key start
LH: loop header
LB: loop body
LE: loop exit
PB: predicated region body
PF: predicated region fallthrough
CT: control target
= control target key end

     0   :  { %s849_s15 = smov 0   ;;  %s942_s0 = inlined_call_operand.vmem [shape: bf16[8,512], index: 0, kind: input, shape index: {}]   ;;  %s943_s1 = inlined_call_operand.vmem [shape: bf16[8,200], index: 1, kind: input, shape index: {}]   ;;  %s944_s2 = inlined_call_operand.vmem [shape: f32[8,1], index: 2, kind: input, shape index: {}]   ;;  %s945_s3 = inlined_call_operand.vmem [shape: bf16[83,128], index: 3, kind: input, shape index: {}]   ;;  %s946_s4 = inlined_call_operand.vmem [shape: bf16[8,256], index: 4, kind: output, shape index: {}]  }
   0x1 LB: > { %s855_s16 = sadd.s32 4294967295, %s796_s15   ;;  %p662_p0 = scmp.ge.s32.totalorder %s796_s15, 1  ;;  %s796_s15 = sphi %s849_s15, %s14_s15  }
   0x2   : > { %p163_p1 = scmp.lt.s32.totalorder %s796_s15, 3 }
   0x4   : > { %p164_p2 = pnand %p662_p0, %p163_p1 }
   0x5   : > { %s663_s17 = sshll.u32 (!%p164_p2), %s855_s16, 1  ;;  %s798_s22 = smov (!%p164_p2), 92  }
   0x6   : > { %167 = sbr.rel (%p164_p2) target bundleno = 683 (0x2ab), region = 36  ;;  %p189_p3 = scmp.lt.s32.totalorder (!%p164_p2), %s663_s17, 3 }
   0x7   : > { %s799_s23 = smov (!%p164_p2), 102   ;;  %s800_s24 = smov (!%p164_p2), 104  }
   0x8   : > { %s801_s25 = smov (!%p164_p2), 100   ;;  %s802_s26 = smov (!%p164_p2), 101  }
   0x9   : > { %s803_s27 = smov (!%p164_p2), 103   ;;  %s804_s28 = smov (!%p164_p2), 76  }
   0xa   : > { %s805_s29 = smov (!%p164_p2), 113   ;;  %s806_s30 = smov (!%p164_p2), 112  }
   0xb   : > { %s948_s17 = smov (!%p189_p3, %s663_s17), 3  ;;  %s807_s5 = smov 78   ;;  %vm200_vm0 = vcmask 781312   ;;  %vm291_vm1 = vcmask 752640   ;;  %vm345_vm2 = vcmask 646144   ;;  %vm372_vm3 = vcmask 621568  }
   0xc   : > { %s664_s18 = sshll.u32 %s948_s17, 2  ;;  %s808_s6 = smov 77   ;;  %vm318_vm4 = vcmask 728064   ;;  %vm354_vm5 = vcmask 637952   ;;  %vm363_vm6 = vcmask 629760   ;;  %vm493_vm7 = vcmask 1043456  }
   0xd   : > { %s863_s21 = scalar_lea.vmem %s942_s0, %s664_s18  ;;  %s809_s7 = smov 115   ;;  %vm336_vm8 = vcmask 654336   ;;  %v402_v60 = vld [vmem:[%s944_s2] sm:$0xff]  ;;  %v822_v61 = vmov 0   ;;  %vm327_vm9 = vcmask 719872   ;;  %vm300_vm10 = vcmask 744448  }
   0xe   : > { %v286_v0 = vld [vmem:[%s863_s21] sm:$0xff]  ;;  %s810_s8 = smov 80   ;;  %s811_s9 = smov 114   ;;  %789 = vset.pattern.permute.xlu0 %v822_v61  ;;  %vm309_vm11 = vcmask 736256   ;;  %vm489_vm12 = vcmask 588800   ;;  %vm583_vm13 = vcmask 1040384  }
   0xf   : > { %v268_v1 = vld [vmem:[%s863_s21] sm:$0xf]  ;;  %288 = vrot.lane.b32.xlu0 %v286_v0, %s798_s22  ;;  %s812_s10 = smov 79   ;;  %s813_s11 = smov 116   ;;  %vm584_vm14 = vcmask 1041408   ;;  %vm579_vm15 = vcmask 678912  }
  0x10   : > { %270 = vrot.lane.b32.xlu1 %v268_v1, %s799_s23  ;;  %v256_v2 = vld [vmem:[%s863_s21] sm:$0xf]  ;;  %s814_s12 = smov 124   ;;  %s815_s13 = smov 89  }
  0x11   : > { %258 = vrot.lane.b32.xlu2 %v256_v2, %s800_s24  ;;  %v280_v3 = vld [vmem:[%s863_s21] sm:$0xf]  ;;  %s816_s14 = smov 88   ;;  %s817_s17 = smov 126  }
  0x12   : > { %v274_v4 = vld [vmem:[%s863_s21] sm:$0xf]  ;;  %s818_s18 = smov 125   ;;  %s819_s19 = smov 91  }
  0x13   : > { %v262_v5 = vld [vmem:[%s863_s21] sm:$0xf]  ;;  %s820_s20 = smov 90   ;;  %s821_s22 = smov 127  }
  0x14   : > { %v244_v6 = vld [vmem:[%s863_s21] sm:$0xf]  ;;  %p194_p4 = scmp.lt.s32.totalorder %s855_s16, 1 }
  0x15   : > { %v250_v7 = vld [vmem:[%s863_s21] sm:$0xf] }
  0x16   : > { %v232_v8 = vld [vmem:[%s863_s21] sm:$0xf]  ;;  %s950_s16 = smov (!%p194_p4, %s855_s16), 1 }
  0x17   : > { %282 = vrot.lane.b32.xlu0 %v280_v3, %s801_s25  ;;  %v238_v9 = vld [vmem:[%s863_s21] sm:$0xf] }
  0x18   : > { %276 = vrot.lane.b32.xlu1 %v274_v4, %s802_s26  ;;  %v226_v10 = vld [vmem:[%s863_s21] sm:$0xf] }
  0x19   : > { %264 = vrot.lane.b32.xlu2 %v262_v5, %s803_s27  ;;  %v220_v11 = vld [vmem:[%s863_s21] sm:$0xf] }
  0x1a   : > { %v208_v12 = vld [vmem:[%s863_s21] sm:$0xf] }
  0x1b   : > { %v214_v13 = vld [vmem:[%s863_s21] sm:$0xf] }
  0x1c   : > { %v202_v14 = vld [vmem:[%s863_s21] sm:$0xf] }
  0x1d   : > { %v199_v37 = vld [vmem:[%s863_s21] sm:$0xf] }
  0x1e   : > { %201 = vst.msk [vmem:[#allocation2] sm:$0xf] %vm200_vm0, %v199_v37  ;;  %v376_v4 = vld [vmem:[%s943_s1] sm:$0xff]  ;;  %v751_v37 = vld [vmem:[%s945_s3 + $0x8] sm:$0xff] }
  0x1f   : > { %369 = vrot.lane.b32.xlu0 %v286_v0, %s804_s28 }
  0x20   : > { %246 = vrot.lane.b32.xlu1 %v244_v6, %s805_s29 }
  0x21   : > { %252 = vrot.lane.b32.xlu2 %v250_v7, %s806_s30 }
  0x27   : > { %351 = vrot.lane.b32.xlu0 %v286_v0, %s807_s5 }
  0x28   : > { %360 = vrot.lane.b32.xlu1 %v286_v0, %s808_s6 }
  0x29   : > { %234 = vrot.lane.b32.xlu2 %v232_v8, %s809_s7 }
  0x2f   : > { %240 = vrot.lane.b32.xlu0 %v238_v9, %s811_s9 }
  0x30   : > { %333 = vrot.lane.b32.xlu1 %v286_v0, %s810_s8 }
  0x31   : > { %342 = vrot.lane.b32.xlu2 %v286_v0, %s812_s10 }
  0x37   : > { %222 = vrot.lane.b32.xlu0 %v220_v11, %s814_s12 }
  0x38   : > { %228 = vrot.lane.b32.xlu1 %v226_v10, %s813_s11  ;;  %v409_v10 = vunpack.c.l.b16 %v376_v4 }
  0x39   : > { %315 = vrot.lane.b32.xlu2 %v286_v0, %s815_s13  ;;  %s665_s13 = sshll.u32 %s950_s16, 2 }
  0x3f   : > { %324 = vrot.lane.b32.xlu0 %v286_v0, %s816_s14 }
  0x40   : > { %210 = vrot.lane.b32.xlu1 %v208_v12, %s817_s17 }
  0x41   : > { %216 = vrot.lane.b32.xlu2 %v214_v13, %s818_s18  ;;  %s197_s18 = scalar_lea.vmem %s946_s4, %s665_s13 }
  0x47   : > { %297 = vrot.lane.b32.xlu0 %v286_v0, %s819_s19 }
  0x48   : > { %306 = vrot.lane.b32.xlu1 %v286_v0, %s820_s20 }
  0x49   : > { %204 = vrot.lane.b32.xlu2 %v202_v14, %s821_s22 }
  0x4f   : > { %405 = vperm.xlu0 %789, %v402_v60  }
  0x6b   : > { %v259_v15 = vpop.permute.xlu2 %258 }
  0x6c   : > { %261 = vst.msk [vmem:[#allocation2 + $0x28] sm:$0xf] %vm200_vm0, %v259_v15  ;;  %v411_v15 = vpack.c.b16 %v409_v10, %v409_v10 }
  0x73   : > { %v265_v16 = vpop.permute.xlu2 %264 }
  0x74   : > { %267 = vst.msk [vmem:[#allocation2 + $0x2c] sm:$0xf] %vm200_vm0, %v265_v16  ;;  %v410_v16 = vunpack.c.h.b16 %v376_v4 }
  0x7b   : > { %v253_v17 = vpop.permute.xlu2 %252  ;;  %v743_v40 = vld [vmem:[#allocation2 + $0x28] sm:$0xff] }
  0x7c   : > { %255 = vst.msk [vmem:[#allocation2 + $0x24] sm:$0xf] %vm200_vm0, %v253_v17 }
  0x81   : > { %v289_v18 = vpop.permute.xlu0 %288 }
  0x82   : > { %v271_v19 = vpop.permute.xlu1 %270  ;;  %v290_v20 = vrot.slane %v289_v18, 4 }
  0x83   : > { %273 = vst.msk [vmem:[#allocation2 + $0x30] sm:$0xf] %vm200_vm0, %v271_v19  ;;  %v235_v21 = vpop.permute.xlu2 %234 }
  0x84   : > { %v292_v22 = vsel %vm291_vm1, %v289_v18, %v290_v20  ;;  %237 = vst.msk [vmem:[#allocation2 + $0x18] sm:$0xf] %vm200_vm0, %v235_v21  ;;  %v412_v18 = vpack.c.b16 %v410_v16, %v410_v16 }
  0x85   : > { %294 = vst.msk [vmem:[#allocation2 + $0x3c] sm:$0xf] %vm200_vm0, %v292_v22 }
  0x89   : > { %v283_v23 = vpop.permute.xlu0 %282 }
  0x8a   : > { %v277_v24 = vpop.permute.xlu1 %276  ;;  %285 = vst.msk [vmem:[#allocation2 + $0x38] sm:$0xf] %vm200_vm0, %v283_v23 }
  0x8b   : > { %279 = vst.msk [vmem:[#allocation2 + $0x34] sm:$0xf] %vm200_vm0, %v277_v24  ;;  %v343_v25 = vpop.permute.xlu2 %342 }
  0x8c   : > { %v344_v26 = vrot.slane %v343_v25, 4 }
  0x8e   : > { %v346_v27 = vsel %vm345_vm2, %v343_v25, %v344_v26 }
  0x8f   : > { %348 = vst.msk [vmem:[#allocation2 + $0x54] sm:$0xf] %vm200_vm0, %v346_v27  ;;  %v545_v27 = vld [vmem:[%s945_s3 + $0x28] sm:$0x3] }
  0x91   : > { %v370_v28 = vpop.permute.xlu0 %369  ;;  %v745_v30 = vld [vmem:[#allocation2 + $0x38] sm:$0xff] }
  0x92   : > { %v247_v29 = vpop.permute.xlu1 %246  ;;  %v371_v31 = vrot.slane %v370_v28, 4  ;;  %497 = vmatpush.bf16.msra.mxu0 %v745_v30  ;;  %v744_v35 = vld [vmem:[#allocation2 + $0x30] sm:$0xff] }
  0x93   : > { %249 = vst.msk [vmem:[#allocation2 + $0x20] sm:$0xf] %vm200_vm0, %v247_v29  ;;  %v316_v32 = vpop.permute.xlu2 %315  ;;  %v823_v29 = vmov 65535  }
  0x94   : > { %v373_v33 = vsel %vm372_vm3, %v370_v28, %v371_v31  ;;  %v317_v34 = vrot.slane %v316_v32, 4  ;;  %v567_v28 = vunpack.c.l.b16 %v545_v27  ;;  %v585_v30 = vsel %vm583_vm13, 4294967295, %v823_v29 }
  0x95   : > { %375 = vst.msk [vmem:[#allocation2 + $0x60] sm:$0xf] %vm200_vm0, %v373_v33  ;;  %v586_v31 = vsel %vm584_vm14, %v585_v30, 0 }
  0x96   : > { %v319_v36 = vsel %vm318_vm4, %v316_v32, %v317_v34  ;;  %498 = vmatpush.bf16.msra.mxu0 %v744_v35  ;;  %v573_v32 = vpack.c.b16 %v567_v28, %v567_v28  ;;  %v754_v34 = vld [vmem:[%s945_s3 + $0x20] sm:$0xff]  ;;  %v753_v35 = vld [vmem:[%s945_s3 + $0x18] sm:$0xff] }
  0x97   : > { %321 = vst.msk [vmem:[#allocation2 + $0x48] sm:$0xf] %vm200_vm0, %v319_v36  ;;  %v752_v36 = vld [vmem:[%s945_s3 + $0x10] sm:$0xff] }
  0x98   : > { %v588_v33 = vand.u32 %v586_v31, %v573_v32 }
  0x99   : > { %v352_v38 = vpop.permute.xlu0 %351 }
  0x9a   : > { %v361_v39 = vpop.permute.xlu1 %360  ;;  %v353_v41 = vrot.slane %v352_v38, 4  ;;  %499 = vmatpush.bf16.msra.mxu0 %v743_v40  ;;  %v742_v47 = vld [vmem:[#allocation2 + $0x20] sm:$0xff]  ;;  %592 = vmatpush.bf16.msra.mxu2 %v588_v33 }
  0x9b   : > { %v362_v42 = vrot.slane %v361_v39, 4  ;;  %v217_v43 = vpop.permute.xlu2 %216  ;;  %v750_v40 = vld [vmem:[%s945_s3] sm:$0xff] }
  0x9c   : > { %v355_v44 = vsel %vm354_vm5, %v352_v38, %v353_v41  ;;  %v401_v46 = vld [vmem:[#allocation2 + $0x60] sm:$0xf]  ;;  %219 = vst.msk [vmem:[#allocation2 + $0xc] sm:$0xf] %vm200_vm0, %v217_v43 }
  0x9d   : > { %v364_v45 = vsel %vm363_vm6, %v361_v39, %v362_v42  ;;  %357 = vst.msk [vmem:[#allocation2 + $0x58] sm:$0xf] %vm200_vm0, %v355_v44  ;;  %v463_v48 = vunpack.c.l.b16 %v401_v46 }
  0x9e   : > { %366 = vst.msk [vmem:[#allocation2 + $0x5c] sm:$0xf] %vm200_vm0, %v364_v45  ;;  %500 = vmatpush.bf16.msra.mxu0 %v742_v47  ;;  %593 = vmatpush.bf16.msra.mxu2 %v754_v34 }
  0x9f   : > { %v476_v49 = vpack.c.b16 %v463_v48, %v463_v48 }
  0xa1   : > { %v241_v51 = vpop.permute.xlu0 %240  ;;  %v495_v52 = vsel %vm493_vm7, %v476_v49, 0 }
  0xa2   : > { %v334_v50 = vpop.permute.xlu1 %333  ;;  %243 = vst.msk [vmem:[#allocation2 + $0x1c] sm:$0xf] %vm200_vm0, %v241_v51  ;;  %513 = vmatpush.bf16.msra.mxu1 %v495_v52  ;;  %594 = vmatpush.bf16.msra.mxu2 %v753_v35 }
  0xa3   : > { %v335_v53 = vrot.slane %v334_v50, 4  ;;  %v205_v54 = vpop.permute.xlu2 %204 }
  0xa4   : > { %207 = vst.msk [vmem:[#allocation2 + $0x4] sm:$0xf] %vm200_vm0, %v205_v54 }
  0xa5   : > { %v337_v55 = vsel %vm336_vm8, %v334_v50, %v335_v53  ;;  %v749_v56 = vld [vmem:[#allocation2 + $0x58] sm:$0xff] }
  0xa6   : > { %339 = vst.msk [vmem:[#allocation2 + $0x50] sm:$0xf] %vm200_vm0, %v337_v55  ;;  %514 = vmatpush.bf16.msra.mxu1 %v749_v56  ;;  %595 = vmatpush.bf16.msra.mxu2 %v752_v36 }
  0xa9   : > { %v223_v58 = vpop.permute.xlu0 %222  ;;  %v741_v59 = vld [vmem:[#allocation2 + $0x18] sm:$0xff] }
  0xaa   : > { %v229_v57 = vpop.permute.xlu1 %228  ;;  %225 = vst.msk [vmem:[#allocation2 + $0x10] sm:$0xf] %vm200_vm0, %v223_v58  ;;  %501 = vmatpush.bf16.msra.mxu0 %v741_v59  ;;  %596 = vmatpush.bf16.msra.mxu2 %v751_v37 }
  0xab   : > { %231 = vst.msk [vmem:[#allocation2 + $0x14] sm:$0xf] %vm200_vm0, %v229_v57  ;;  %v738_v11 = vld [vmem:[#allocation2] sm:$0xff] }
  0xad   : > { %v748_v62 = vld [vmem:[#allocation2 + $0x50] sm:$0xff] }
  0xae   : > { %515 = vmatpush.bf16.msra.mxu1 %v748_v62  ;;  %597 = vmatpush.bf16.msra.mxu2 %v750_v40 }
  0xb1   : > { %v325_v63 = vpop.permute.xlu0 %324 }
  0xb2   : > { %v211_v0 = vpop.permute.xlu1 %210  ;;  %v326_v1 = vrot.slane %v325_v63, 4  ;;  %v740_v2 = vld [vmem:[#allocation2 + $0x10] sm:$0xff] }
  0xb3   : > { %213 = vst.msk [vmem:[#allocation2 + $0x8] sm:$0xf] %vm200_vm0, %v211_v0  ;;  %502 = vmatpush.bf16.msra.mxu0 %v740_v2 }
  0xb4   : > { %v328_v3 = vsel %vm327_vm9, %v325_v63, %v326_v1 }
  0xb5   : > { %330 = vst.msk [vmem:[#allocation2 + $0x4c] sm:$0xf] %vm200_vm0, %v328_v3 }
  0xb9   : > { %v298_v5 = vpop.permute.xlu0 %297 }
  0xba   : > { %v307_v6 = vpop.permute.xlu1 %306  ;;  %v739_v7 = vld [vmem:[#allocation2 + $0x8] sm:$0xff]  ;;  %v299_v8 = vrot.slane %v298_v5, 4 }
  0xbb   : > { %v308_v9 = vrot.slane %v307_v6, 4  ;;  %503 = vmatpush.bf16.msra.mxu0 %v739_v7 }
  0xbc   : > { %v301_v12 = vsel %vm300_vm10, %v298_v5, %v299_v8  ;;  %v747_v14 = vld [vmem:[#allocation2 + $0x48] sm:$0xff] }
  0xbd   : > { %v310_v13 = vsel %vm309_vm11, %v307_v6, %v308_v9  ;;  %303 = vst.msk [vmem:[#allocation2 + $0x40] sm:$0xf] %vm200_vm0, %v301_v12  ;;  %516 = vmatpush.bf16.msra.mxu1 %v747_v14 }
  0xbe   : > { %312 = vst.msk [vmem:[#allocation2 + $0x44] sm:$0xf] %vm200_vm0, %v310_v13 }
  0xbf   : > { %504 = vmatpush.bf16.msra.mxu0 %v738_v11 }
  0xc1   : > { %v406_v20 = vpop.permute.xlu0 %405 }
  0xc2   : > { %505 = vmatmul.bf16.vlgmr.msra.gmra.mxu0 %v411_v15 }
  0xc5   : > { %v746_v17 = vld [vmem:[#allocation2 + $0x40] sm:$0xff] }
  0xc6   : > { %517 = vmatpush.bf16.msra.mxu1 %v746_v17 }
  0xc9   : > { %714 = vmatmul.msk.bf16.vlgmr.msra.gmra.mxu1 %vm489_vm12, %v412_v18 }
 0x13f   : > { %v506_v19 = vpop.f32.mrf.mxu0 }
 0x140   : > { %v507_v21 = vadd.f32 %v506_v19, %v406_v20 }
 0x146   : > { %v519_v22 = vpop.f32.mrf.mxu1 }
 0x147   : > { %v508_v23 = vpop.f32.mrf.mxu0  ;;  %v520_v24 = vadd.f32 %v519_v22, %v507_v21 }
 0x149   : > { %v523_v25 = vmax.f32 %v520_v24, 0.0 }
 0x14b   : > { %525 = vrot.lane.b32.xlu1 %v523_v25, %s821_s22 }
 0x14e   : > { %v521_v26 = vpop.f32.mrf.mxu1 }
 0x1bd   : > { %v526_v38 = vpop.permute.xlu1 %525 }
 0x1be   : > { %v528_v39 = vmax.f32 %v523_v25, %v526_v38 }
 0x1c0   : > { %530 = vrot.lane.b32.xlu2 %v528_v39, %s813_s11 }
 0x21a   : > { %v531_v41 = vpop.permute.xlu2 %530 }
 0x21b   : > { %v533_v42 = vmax.f32 %v528_v39, %v531_v41 }
 0x21d   : > { %v534_v43 = vpack.c.bf16 %v533_v42, %v533_v42 }
 0x21f   : > { %735 = vmatmul.msk.bf16.vlgmr.msra.gmra.mxu2 %vm579_vm15, %v534_v43 }
 0x2a2   : > { %v599_v44 = vpop.f32.mrf.mxu2 }
 0x2a3   : > { %v603_v45 = vpack.c.bf16 %v599_v44, %v599_v44 }
 0x2a5   : > { %604 = vst [vmem:[%s197_s18] sm:$0xf] %v603_v45 }
 0x2aa   : > { %v601_v46 = vpop.f32.mrf.mxu2 }
 0x2ab PF: > { %s14_s15 = sadd.s32 1, %s796_s15  }
 0x2ac   : > { %p11_p5 = scmp.ge.s32.totalorder %s14_s15, 4  }
 0x2ae   :  { %13 = sbr.rel (!%p11_p5) target bundleno = 1 (0x1), region = 66 }

// kernel: segnet_forward.13
= control target key start
LH: loop header
LB: loop body
LE: loop exit
PB: predicated region body
PF: predicated region fallthrough
CT: control target
= control target key end

     0   :  { %s735_s15 = smov 0   ;;  %s820_s0 = inlined_call_operand.vmem [shape: bf16[8,256], index: 0, kind: input, shape index: {}]   ;;  %s821_s1 = inlined_call_operand.vmem [shape: bf16[8,200], index: 1, kind: input, shape index: {}]   ;;  %s822_s2 = inlined_call_operand.vmem [shape: f32[8,1], index: 2, kind: input, shape index: {}]   ;;  %s823_s3 = inlined_call_operand.vmem [shape: bf16[5,128], index: 3, kind: input, shape index: {}]   ;;  %s824_s4 = inlined_call_operand.vmem [shape: bf16[8,256], index: 4, kind: output, shape index: {}]  }
   0x1 LB: > { %s570_s16 = sadd.s32 4294967295, %s682_s15   ;;  %p574_p0 = scmp.ge.s32.totalorder %s682_s15, 1  ;;  %s682_s15 = sphi %s735_s15, %s14_s15  }
   0x2   : > { %p161_p1 = scmp.lt.s32.totalorder %s682_s15, 3 }
   0x4   : > { %p162_p2 = pnand %p574_p0, %p161_p1 }
   0x5   : > { %p185_p3 = scmp.lt.s32.totalorder (!%p162_p2), %s570_s16, 1  ;;  %s684_s21 = smov (!%p162_p2), 114  }
   0x6   : > { %165 = sbr.rel (%p162_p2) target bundleno = 471 (0x1d7), region = 36  ;;  %s685_s22 = smov (!%p162_p2), 116  }
   0x7   : > { %s686_s23 = smov (!%p162_p2), 118   ;;  %s687_s24 = smov (!%p162_p2), 113  }
   0x8   : > { %s688_s25 = smov (!%p162_p2), 115   ;;  %s689_s26 = smov (!%p162_p2), 117  }
   0x9   : > { %s690_s27 = smov (!%p162_p2), 104   ;;  %s691_s28 = smov (!%p162_p2), 120  }
   0xa   : > { %s692_s29 = smov (!%p162_p2), 119   ;;  %s693_s30 = smov (!%p162_p2), 121  }
   0xb   : > { %s826_s16 = smov (!%p185_p3, %s570_s16), 1  ;;  %s694_s5 = smov 122   ;;  %vm195_vm0 = vcmask 35840   ;;  %vm458_vm1 = vcmask 1043456   ;;  %v367_v52 = vld [vmem:[%s822_s2] sm:$0xff]  ;;  %v708_v53 = vmov 0  }
   0xc   : > { %s575_s17 = sshll.u32 %s826_s16, 2  ;;  %s695_s6 = smov 106   ;;  %675 = vset.pattern.permute.xlu0 %v708_v53  ;;  %vm454_vm2 = vcmask 588800   ;;  %vm495_vm3 = vcmask 1041408   ;;  %vm496_vm4 = vcmask 1042432   ;;  %vm491_vm5 = vcmask 39936  }
   0xd   : > { %s751_s20 = scalar_lea.vmem %s820_s0, %s575_s17  ;;  %s696_s7 = smov 105  }
   0xe   : > { %v275_v0 = vld [vmem:[%s751_s20] sm:$0xf]  ;;  %s697_s8 = smov 124   ;;  %s698_s9 = smov 123  }
   0xf   : > { %v263_v1 = vld [vmem:[%s751_s20] sm:$0xf]  ;;  %277 = vrot.lane.b32.xlu0 %v275_v0, %s684_s21  ;;  %s699_s10 = smov 108   ;;  %s700_s11 = smov 107  }
  0x10   : > { %265 = vrot.lane.b32.xlu1 %v263_v1, %s685_s22  ;;  %v251_v2 = vld [vmem:[%s751_s20] sm:$0xf]  ;;  %s701_s12 = smov 126   ;;  %s702_s13 = smov 110  }
  0x11   : > { %253 = vrot.lane.b32.xlu2 %v251_v2, %s686_s23  ;;  %v281_v3 = vld [vmem:[%s751_s20] sm:$0xf]  ;;  %s703_s14 = smov 125   ;;  %s704_s18 = smov 109  }
  0x12   : > { %v269_v4 = vld [vmem:[%s751_s20] sm:$0xf]  ;;  %s705_s19 = smov 112   ;;  %s706_s21 = smov 127  }
  0x13   : > { %v257_v5 = vld [vmem:[%s751_s20] sm:$0xf]  ;;  %s707_s22 = smov 111  }
  0x14   : > { %v335_v6 = vld [vmem:[%s751_s20] sm:$0xf] }
  0x15   : > { %v239_v7 = vld [vmem:[%s751_s20] sm:$0xf] }
  0x16   : > { %v245_v8 = vld [vmem:[%s751_s20] sm:$0xf] }
  0x17   : > { %283 = vrot.lane.b32.xlu0 %v281_v3, %s687_s24  ;;  %v233_v9 = vld [vmem:[%s751_s20] sm:$0xf] }
  0x18   : > { %271 = vrot.lane.b32.xlu1 %v269_v4, %s688_s25  ;;  %v227_v10 = vld [vmem:[%s751_s20] sm:$0xf] }
  0x19   : > { %259 = vrot.lane.b32.xlu2 %v257_v5, %s689_s26  ;;  %v323_v11 = vld [vmem:[%s751_s20] sm:$0xf] }
  0x1a   : > { %v329_v12 = vld [vmem:[%s751_s20] sm:$0xf] }
  0x1b   : > { %v215_v13 = vld [vmem:[%s751_s20] sm:$0xf] }
  0x1c   : > { %v221_v14 = vld [vmem:[%s751_s20] sm:$0xf] }
  0x1d   : > { %v311_v15 = vld [vmem:[%s751_s20] sm:$0xf] }
  0x1e   : > { %v317_v16 = vld [vmem:[%s751_s20] sm:$0xf] }
  0x1f   : > { %337 = vrot.lane.b32.xlu0 %v335_v6, %s690_s27  ;;  %v203_v17 = vld [vmem:[%s751_s20] sm:$0xf] }
  0x20   : > { %241 = vrot.lane.b32.xlu1 %v239_v7, %s691_s28  ;;  %v299_v18 = vld [vmem:[%s751_s20] sm:$0xf] }
  0x21   : > { %247 = vrot.lane.b32.xlu2 %v245_v8, %s692_s29  ;;  %v209_v19 = vld [vmem:[%s751_s20] sm:$0xf]  ;;  %v709_v8 = vmov 65535  }
  0x22   : > { %v305_v20 = vld [vmem:[%s751_s20] sm:$0xf] }
  0x23   : > { %v287_v21 = vld [vmem:[%s751_s20] sm:$0xf] }
  0x24   : > { %v197_v22 = vld [vmem:[%s751_s20] sm:$0xf] }
  0x25   : > { %v293_v23 = vld [vmem:[%s751_s20] sm:$0xf] }
  0x26   : > { %v194_v43 = vld [vmem:[%s751_s20] sm:$0xf] }
  0x27   : > { %229 = vrot.lane.b32.xlu0 %v227_v10, %s694_s5  ;;  %196 = vst.msk [vmem:[#allocation2] sm:$0xf] %vm195_vm0, %v194_v43  ;;  %v341_v1 = vld [vmem:[%s821_s1] sm:$0xff] }
  0x28   : > { %235 = vrot.lane.b32.xlu1 %v233_v9, %s693_s30  ;;  %v375_v2 = vunpack.c.h.b16 %v341_v1  ;;  %v374_v3 = vunpack.c.l.b16 %v341_v1  ;;  %v497_v9 = vsel %vm495_vm3, 4294967295, %v709_v8  ;;  %v490_v10 = vld [vmem:[%s823_s3] sm:$0x7]  ;;  %s192_s30 = scalar_lea.vmem %s824_s4, %s575_s17 }
  0x29   : > { %325 = vrot.lane.b32.xlu2 %v323_v11, %s695_s6  ;;  %v498_v11 = vsel %vm496_vm4, %v497_v9, 0 }
  0x2a   : > { %v377_v6 = vpack.c.b16 %v375_v2, %v375_v2  ;;  %v376_v7 = vpack.c.b16 %v374_v3, %v374_v3 }
  0x2f   : > { %331 = vrot.lane.b32.xlu0 %v329_v12, %s696_s7  ;;  %v500_v12 = vand.u32 %v498_v11, %v490_v10 }
  0x30   : > { %217 = vrot.lane.b32.xlu1 %v215_v13, %s697_s8 }
  0x31   : > { %223 = vrot.lane.b32.xlu2 %v221_v14, %s698_s9  ;;  %509 = vmatpush.bf16.msra.mxu2 %v500_v12 }
  0x37   : > { %313 = vrot.lane.b32.xlu0 %v311_v15, %s699_s10 }
  0x38   : > { %319 = vrot.lane.b32.xlu1 %v317_v16, %s700_s11 }
  0x39   : > { %205 = vrot.lane.b32.xlu2 %v203_v17, %s701_s12 }
  0x3f   : > { %211 = vrot.lane.b32.xlu0 %v209_v19, %s703_s14 }
  0x40   : > { %301 = vrot.lane.b32.xlu1 %v299_v18, %s702_s13 }
  0x41   : > { %307 = vrot.lane.b32.xlu2 %v305_v20, %s704_s18 }
  0x47   : > { %199 = vrot.lane.b32.xlu0 %v197_v22, %s706_s21 }
  0x48   : > { %289 = vrot.lane.b32.xlu1 %v287_v21, %s705_s19 }
  0x49   : > { %295 = vrot.lane.b32.xlu2 %v293_v23, %s707_s22 }
  0x4f   : > { %370 = vperm.xlu0 %675, %v367_v52  }
  0x6b   : > { %v254_v24 = vpop.permute.xlu2 %253 }
  0x6c   : > { %256 = vst.msk [vmem:[#allocation2 + $0x28] sm:$0xf] %vm195_vm0, %v254_v24 }
  0x73   : > { %v260_v25 = vpop.permute.xlu2 %259 }
  0x74   : > { %262 = vst.msk [vmem:[#allocation2 + $0x2c] sm:$0xf] %vm195_vm0, %v260_v25 }
  0x7b   : > { %v248_v26 = vpop.permute.xlu2 %247  ;;  %v634_v40 = vld [vmem:[#allocation2 + $0x28] sm:$0xff] }
  0x7c   : > { %250 = vst.msk [vmem:[#allocation2 + $0x24] sm:$0xf] %vm195_vm0, %v248_v26 }
  0x81   : > { %v278_v27 = vpop.permute.xlu0 %277 }
  0x82   : > { %v266_v28 = vpop.permute.xlu1 %265  ;;  %280 = vst.msk [vmem:[#allocation2 + $0x38] sm:$0xf] %vm195_vm0, %v278_v27 }
  0x83   : > { %268 = vst.msk [vmem:[#allocation2 + $0x30] sm:$0xf] %vm195_vm0, %v266_v28  ;;  %v326_v29 = vpop.permute.xlu2 %325 }
  0x84   : > { %328 = vst.msk [vmem:[#allocation2 + $0x58] sm:$0xf] %vm195_vm0, %v326_v29 }
  0x89   : > { %v284_v30 = vpop.permute.xlu0 %283 }
  0x8a   : > { %v272_v31 = vpop.permute.xlu1 %271  ;;  %286 = vst.msk [vmem:[#allocation2 + $0x3c] sm:$0xf] %vm195_vm0, %v284_v30 }
  0x8b   : > { %274 = vst.msk [vmem:[#allocation2 + $0x34] sm:$0xf] %vm195_vm0, %v272_v31  ;;  %v224_v32 = vpop.permute.xlu2 %223 }
  0x8c   : > { %226 = vst.msk [vmem:[#allocation2 + $0x14] sm:$0xf] %vm195_vm0, %v224_v32 }
  0x91   : > { %v338_v33 = vpop.permute.xlu0 %337  ;;  %v636_v35 = vld [vmem:[#allocation2 + $0x38] sm:$0xff] }
  0x92   : > { %v242_v34 = vpop.permute.xlu1 %241  ;;  %340 = vst.msk [vmem:[#allocation2 + $0x60] sm:$0xf] %vm195_vm0, %v338_v33  ;;  %462 = vmatpush.bf16.msra.mxu0 %v636_v35  ;;  %v635_v37 = vld [vmem:[#allocation2 + $0x30] sm:$0xff] }
  0x93   : > { %244 = vst.msk [vmem:[#allocation2 + $0x20] sm:$0xf] %vm195_vm0, %v242_v34  ;;  %v206_v36 = vpop.permute.xlu2 %205 }
  0x94   : > { %208 = vst.msk [vmem:[#allocation2 + $0x8] sm:$0xf] %vm195_vm0, %v206_v36 }
  0x96   : > { %463 = vmatpush.bf16.msra.mxu0 %v635_v37 }
  0x99   : > { %v230_v39 = vpop.permute.xlu0 %229  ;;  %v366_v41 = vld [vmem:[#allocation2 + $0x60] sm:$0xf] }
  0x9a   : > { %v236_v38 = vpop.permute.xlu1 %235  ;;  %v428_v42 = vunpack.c.l.b16 %v366_v41  ;;  %232 = vst.msk [vmem:[#allocation2 + $0x18] sm:$0xf] %vm195_vm0, %v230_v39  ;;  %464 = vmatpush.bf16.msra.mxu0 %v634_v40  ;;  %v633_v46 = vld [vmem:[#allocation2 + $0x20] sm:$0xff] }
  0x9b   : > { %238 = vst.msk [vmem:[#allocation2 + $0x1c] sm:$0xf] %vm195_vm0, %v236_v38  ;;  %v308_v44 = vpop.permute.xlu2 %307 }
  0x9c   : > { %v441_v45 = vpack.c.b16 %v428_v42, %v428_v42  ;;  %310 = vst.msk [vmem:[#allocation2 + $0x4c] sm:$0xf] %vm195_vm0, %v308_v44 }
  0x9e   : > { %v460_v47 = vsel %vm458_vm1, %v441_v45, 0  ;;  %465 = vmatpush.bf16.msra.mxu0 %v633_v46 }
  0x9f   : > { %478 = vmatpush.bf16.msra.mxu1 %v460_v47 }
  0xa1   : > { %v332_v48 = vpop.permute.xlu0 %331 }
  0xa2   : > { %v218_v49 = vpop.permute.xlu1 %217  ;;  %334 = vst.msk [vmem:[#allocation2 + $0x5c] sm:$0xf] %vm195_vm0, %v332_v48  ;;  %v632_v50 = vld [vmem:[#allocation2 + $0x18] sm:$0xff] }
  0xa3   : > { %220 = vst.msk [vmem:[#allocation2 + $0x10] sm:$0xf] %vm195_vm0, %v218_v49  ;;  %v296_v51 = vpop.permute.xlu2 %295  ;;  %466 = vmatpush.bf16.msra.mxu0 %v632_v50 }
  0xa4   : > { %298 = vst.msk [vmem:[#allocation2 + $0x44] sm:$0xf] %vm195_vm0, %v296_v51 }
  0xa9   : > { %v314_v54 = vpop.permute.xlu0 %313  ;;  %v640_v56 = vld [vmem:[#allocation2 + $0x58] sm:$0xff] }
  0xaa   : > { %v320_v55 = vpop.permute.xlu1 %319  ;;  %316 = vst.msk [vmem:[#allocation2 + $0x50] sm:$0xf] %vm195_vm0, %v314_v54  ;;  %v631_v57 = vld [vmem:[#allocation2 + $0x10] sm:$0xff]  ;;  %479 = vmatpush.bf16.msra.mxu1 %v640_v56 }
  0xab   : > { %322 = vst.msk [vmem:[#allocation2 + $0x54] sm:$0xf] %vm195_vm0, %v320_v55  ;;  %467 = vmatpush.bf16.msra.mxu0 %v631_v57 }
  0xb1   : > { %v212_v59 = vpop.permute.xlu0 %211 }
  0xb2   : > { %v302_v58 = vpop.permute.xlu1 %301  ;;  %v639_v60 = vld [vmem:[#allocation2 + $0x50] sm:$0xff]  ;;  %214 = vst.msk [vmem:[#allocation2 + $0xc] sm:$0xf] %vm195_vm0, %v212_v59 }
  0xb3   : > { %304 = vst.msk [vmem:[#allocation2 + $0x48] sm:$0xf] %vm195_vm0, %v302_v58  ;;  %480 = vmatpush.bf16.msra.mxu1 %v639_v60 }
  0xb9   : > { %v200_v62 = vpop.permute.xlu0 %199  ;;  %v630_v0 = vld [vmem:[#allocation2 + $0x8] sm:$0xff] }
  0xba   : > { %v290_v61 = vpop.permute.xlu1 %289  ;;  %v638_v63 = vld [vmem:[#allocation2 + $0x48] sm:$0xff]  ;;  %202 = vst.msk [vmem:[#allocation2 + $0x4] sm:$0xf] %vm195_vm0, %v200_v62  ;;  %468 = vmatpush.bf16.msra.mxu0 %v630_v0 }
  0xbb   : > { %292 = vst.msk [vmem:[#allocation2 + $0x40] sm:$0xf] %vm195_vm0, %v290_v61  ;;  %481 = vmatpush.bf16.msra.mxu1 %v638_v63 }
  0xc1   : > { %v629_v5 = vld [vmem:[#allocation2] sm:$0xff]  ;;  %v371_v13 = vpop.permute.xlu0 %370 }
  0xc2   : > { %v637_v4 = vld [vmem:[#allocation2 + $0x40] sm:$0xff]  ;;  %469 = vmatpush.bf16.msra.mxu0 %v629_v5 }
  0xc3   : > { %482 = vmatpush.bf16.msra.mxu1 %v637_v4 }
  0xc5   : > { %470 = vmatmul.bf16.vlgmr.msra.gmra.mxu0 %v376_v7 }
  0xc6   : > { %625 = vmatmul.msk.bf16.vlgmr.msra.gmra.mxu1 %vm454_vm2, %v377_v6 }
 0x142   : > { %v471_v15 = vpop.f32.mrf.mxu0 }
 0x143   : > { %v484_v14 = vpop.f32.mrf.mxu1  ;;  %v472_v16 = vadd.f32 %v471_v15, %v371_v13 }
 0x145   : > { %v485_v17 = vadd.f32 %v484_v14, %v472_v16 }
 0x147   : > { %v488_v18 = vmax.f32 %v485_v17, 0.0 }
 0x149   : > { %v489_v19 = vpack.c.bf16 %v488_v18, %v488_v18 }
 0x14a   : > { %v473_v21 = vpop.f32.mrf.mxu0 }
 0x14b   : > { %v486_v20 = vpop.f32.mrf.mxu1  ;;  %626 = vmatmul.msk.bf16.vlgmr.msra.gmra.mxu2 %vm491_vm5, %v489_v19 }
 0x1ce   : > { %v511_v22 = vpop.f32.mrf.mxu2 }
 0x1cf   : > { %v515_v23 = vpack.c.bf16 %v511_v22, %v511_v22 }
 0x1d1   : > { %516 = vst [vmem:[%s192_s30] sm:$0xf] %v515_v23 }
 0x1d6   : > { %v513_v24 = vpop.f32.mrf.mxu2 }
 0x1d7 PF: > { %s14_s15 = sadd.s32 1, %s682_s15  }
 0x1d8   : > { %p11_p4 = scmp.ge.s32.totalorder %s14_s15, 4  }
 0x1da   :  { %13 = sbr.rel (!%p11_p4) target bundleno = 1 (0x1), region = 66 }

// kernel: segnet_forward.15
= control target key start
LH: loop header
LB: loop body
LE: loop exit
PB: predicated region body
PF: predicated region fallthrough
CT: control target
= control target key end

     0   :  { %s790_s15 = smov 0   ;;  %s894_s0 = inlined_call_operand.vmem [shape: bf16[8,256], index: 0, kind: input, shape index: {}]   ;;  %s895_s1 = inlined_call_operand.vmem [shape: bf16[8,200], index: 1, kind: input, shape index: {}]   ;;  %s896_s2 = inlined_call_operand.vmem [shape: f32[8,1], index: 2, kind: input, shape index: {}]   ;;  %s897_s3 = inlined_call_operand.vmem [shape: bf16[32,256], index: 3, kind: input, shape index: {}]   ;;  %s898_s4 = inlined_call_operand.vmem [shape: bf16[8,512], index: 4, kind: output, shape index: {}]  }
   0x1 LB: > { %s796_s16 = sadd.s32 4294967295, %s738_s15   ;;  %p609_p0 = scmp.ge.s32.totalorder %s738_s15, 1  ;;  %s738_s15 = sphi %s790_s15, %s14_s15  }
   0x2   : > { %p161_p1 = scmp.lt.s32.totalorder %s738_s15, 3 }
   0x4   : > { %p162_p2 = pnand %p609_p0, %p161_p1 }
   0x5   : > { %p186_p3 = scmp.lt.s32.totalorder (!%p162_p2), %s796_s16, 1  ;;  %s740_s22 = smov (!%p162_p2), 108  }
   0x6   : > { %165 = sbr.rel (%p162_p2) target bundleno = 472 (0x1d8), region = 36  ;;  %s741_s23 = smov (!%p162_p2), 110  }
   0x7   : > { %s742_s24 = smov (!%p162_p2), 112   ;;  %s743_s25 = smov (!%p162_p2), 104  }
   0x8   : > { %s744_s26 = smov (!%p162_p2), 109   ;;  %s745_s27 = smov (!%p162_p2), 111  }
   0x9   : > { %s746_s28 = smov (!%p162_p2), 92   ;;  %s747_s29 = smov (!%p162_p2), 117  }
   0xa   : > { %s748_s30 = smov (!%p162_p2), 116   ;;  %s749_s5 = smov (!%p162_p2), 118  }
   0xb   : > { %s187_s17 = scalar_select %p186_p3, %s796_s16, 1  ;;  %vm198_vm0 = vcmask 257024   ;;  %vm461_vm1 = vcmask 1043456   ;;  %v370_v52 = vld [vmem:[%s896_s2] sm:$0xff]  ;;  %v764_v53 = vmov 0   ;;  %vm457_vm2 = vcmask 588800  }
   0xc   : > { %s750_s6 = smov 119   ;;  %s751_s7 = smov 94   ;;  %731 = vset.pattern.permute.xlu0 %v764_v53  ;;  %vm517_vm3 = vcmask 261120  }
   0xd   : > { %s610_s18 = sshll.u32 %s187_s17, 2  ;;  %s752_s8 = smov 93  }
   0xe   : > { %s805_s21 = scalar_lea.vmem %s894_s0, %s610_s18  ;;  %s753_s9 = smov 124  }
   0xf   : > { %v278_v0 = vld [vmem:[%s805_s21] sm:$0xf]  ;;  %s754_s10 = smov 120   ;;  %s755_s11 = smov 96  }
  0x10   : > { %v266_v1 = vld [vmem:[%s805_s21] sm:$0xf]  ;;  %280 = vrot.lane.b32.xlu0 %v278_v0, %s740_s22  ;;  %s756_s12 = smov 95   ;;  %s757_s13 = smov 126  }
  0x11   : > { %268 = vrot.lane.b32.xlu1 %v266_v1, %s741_s23  ;;  %v254_v2 = vld [vmem:[%s805_s21] sm:$0xf]  ;;  %s758_s14 = smov 101   ;;  %s759_s17 = smov 125  }
  0x12   : > { %256 = vrot.lane.b32.xlu2 %v254_v2, %s742_s24  ;;  %v284_v3 = vld [vmem:[%s805_s21] sm:$0xf]  ;;  %s760_s18 = smov 100   ;;  %s761_s19 = smov 103  }
  0x13   : > { %v272_v4 = vld [vmem:[%s805_s21] sm:$0xf]  ;;  %s762_s20 = smov 127   ;;  %s763_s22 = smov 102  }
  0x14   : > { %v260_v5 = vld [vmem:[%s805_s21] sm:$0xf] }
  0x15   : > { %v338_v6 = vld [vmem:[%s805_s21] sm:$0xf] }
  0x16   : > { %v242_v7 = vld [vmem:[%s805_s21] sm:$0xf] }
  0x17   : > { %v248_v8 = vld [vmem:[%s805_s21] sm:$0xf] }
  0x18   : > { %286 = vrot.lane.b32.xlu0 %v284_v3, %s743_s25  ;;  %v236_v9 = vld [vmem:[%s805_s21] sm:$0xf] }
  0x19   : > { %274 = vrot.lane.b32.xlu1 %v272_v4, %s744_s26  ;;  %v230_v10 = vld [vmem:[%s805_s21] sm:$0xf] }
  0x1a   : > { %262 = vrot.lane.b32.xlu2 %v260_v5, %s745_s27  ;;  %v326_v11 = vld [vmem:[%s805_s21] sm:$0xf] }
  0x1b   : > { %v332_v12 = vld [vmem:[%s805_s21] sm:$0xf] }
  0x1c   : > { %v218_v13 = vld [vmem:[%s805_s21] sm:$0xf] }
  0x1d   : > { %v224_v14 = vld [vmem:[%s805_s21] sm:$0xf] }
  0x1e   : > { %v314_v15 = vld [vmem:[%s805_s21] sm:$0xf] }
  0x1f   : > { %v320_v16 = vld [vmem:[%s805_s21] sm:$0xf] }
  0x20   : > { %340 = vrot.lane.b32.xlu0 %v338_v6, %s746_s28  ;;  %v206_v17 = vld [vmem:[%s805_s21] sm:$0xf] }
  0x21   : > { %244 = vrot.lane.b32.xlu1 %v242_v7, %s747_s29  ;;  %v302_v18 = vld [vmem:[%s805_s21] sm:$0xf] }
  0x22   : > { %250 = vrot.lane.b32.xlu2 %v248_v8, %s748_s30  ;;  %v212_v19 = vld [vmem:[%s805_s21] sm:$0xf]  ;;  %v672_v8 = vld [vmem:[%s897_s3 + $0x10] sm:$0xf] }
  0x23   : > { %v308_v20 = vld [vmem:[%s805_s21] sm:$0xf] }
  0x24   : > { %v290_v21 = vld [vmem:[%s805_s21] sm:$0xf] }
  0x25   : > { %v200_v22 = vld [vmem:[%s805_s21] sm:$0xf] }
  0x26   : > { %v296_v23 = vld [vmem:[%s805_s21] sm:$0xf] }
  0x27   : > { %v197_v43 = vld [vmem:[%s805_s21] sm:$0xf] }
  0x28   : > { %232 = vrot.lane.b32.xlu0 %v230_v10, %s750_s6  ;;  %199 = vst.msk [vmem:[#allocation2] sm:$0xf] %vm198_vm0, %v197_v43  ;;  %v344_v1 = vld [vmem:[%s895_s1] sm:$0xff]  ;;  %v696_v10 = vld [vmem:[%s897_s3 + $0x14] sm:$0xf] }
  0x29   : > { %238 = vrot.lane.b32.xlu1 %v236_v9, %s749_s5  ;;  %v378_v2 = vunpack.c.h.b16 %v344_v1  ;;  %v377_v3 = vunpack.c.l.b16 %v344_v1  ;;  %v697_v9 = vld [vmem:[%s897_s3 + $0x14] sm:$0xf0] }
  0x2a   : > { %328 = vrot.lane.b32.xlu2 %v326_v11, %s751_s7  ;;  %v673_v11 = vor.u32 %v697_v9, %v672_v8 }
  0x2b   : > { %v380_v6 = vpack.c.b16 %v378_v2, %v378_v2  ;;  %v379_v7 = vpack.c.b16 %v377_v3, %v377_v3 }
  0x2c   : > { %527 = vmatpush.bf16.msra.mxu2 %v673_v11 }
  0x30   : > { %334 = vrot.lane.b32.xlu0 %v332_v12, %s752_s8  ;;  %v674_v12 = vld [vmem:[%s897_s3 + $0x18] sm:$0xf0] }
  0x31   : > { %220 = vrot.lane.b32.xlu1 %v218_v13, %s753_s9  ;;  %v677_v13 = vor.u32 %v696_v10, %v674_v12 }
  0x32   : > { %226 = vrot.lane.b32.xlu2 %v224_v14, %s754_s10  ;;  %v664_v14 = vld [vmem:[%s897_s3] sm:$0xf] }
  0x33   : > { %540 = vmatpush.bf16.msra.mxu3 %v677_v13 }
  0x38   : > { %316 = vrot.lane.b32.xlu0 %v314_v15, %s755_s11  ;;  %v695_v15 = vld [vmem:[%s897_s3 + $0x4] sm:$0xf0] }
  0x39   : > { %322 = vrot.lane.b32.xlu1 %v320_v16, %s756_s12  ;;  %v694_v16 = vld [vmem:[%s897_s3 + $0x4] sm:$0xf] }
  0x3a   : > { %208 = vrot.lane.b32.xlu2 %v206_v17, %s757_s13  ;;  %v665_v17 = vor.u32 %v695_v15, %v664_v14 }
  0x3c   : > { %528 = vmatpush.bf16.msra.mxu2 %v665_v17 }
  0x40   : > { %214 = vrot.lane.b32.xlu0 %v212_v19, %s759_s17 }
  0x41   : > { %304 = vrot.lane.b32.xlu1 %v302_v18, %s758_s14  ;;  %v666_v18 = vld [vmem:[%s897_s3 + $0x8] sm:$0xf0] }
  0x42   : > { %310 = vrot.lane.b32.xlu2 %v308_v20, %s760_s18  ;;  %v669_v19 = vor.u32 %v694_v16, %v666_v18  ;;  %s611_s18 = sshll.u32 %s796_s16, 1 }
  0x43   : > { %p191_p4 = scmp.lt.s32.totalorder %s611_s18, 3 }
  0x44   : > { %541 = vmatpush.bf16.msra.mxu3 %v669_v19 }
  0x45   : > { %s900_s18 = smov (!%p191_p4, %s611_s18), 3 }
  0x48   : > { %202 = vrot.lane.b32.xlu0 %v200_v22, %s762_s20 }
  0x49   : > { %292 = vrot.lane.b32.xlu1 %v290_v21, %s761_s19  ;;  %s612_s19 = sshll.u32 %s900_s18, 2 }
  0x4a   : > { %298 = vrot.lane.b32.xlu2 %v296_v23, %s763_s22  ;;  %s194_s21 = scalar_lea.vmem %s898_s4, %s612_s19 }
  0x50   : > { %373 = vperm.xlu0 %731, %v370_v52  }
  0x6c   : > { %v257_v24 = vpop.permute.xlu2 %256 }
  0x6d   : > { %259 = vst.msk [vmem:[#allocation2 + $0x28] sm:$0xf] %vm198_vm0, %v257_v24 }
  0x74   : > { %v263_v25 = vpop.permute.xlu2 %262 }
  0x75   : > { %265 = vst.msk [vmem:[#allocation2 + $0x2c] sm:$0xf] %vm198_vm0, %v263_v25 }
  0x7c   : > { %v251_v26 = vpop.permute.xlu2 %250  ;;  %v687_v40 = vld [vmem:[#allocation2 + $0x28] sm:$0xff] }
  0x7d   : > { %253 = vst.msk [vmem:[#allocation2 + $0x24] sm:$0xf] %vm198_vm0, %v251_v26 }
  0x82   : > { %v281_v27 = vpop.permute.xlu0 %280 }
  0x83   : > { %v269_v28 = vpop.permute.xlu1 %268  ;;  %283 = vst.msk [vmem:[#allocation2 + $0x38] sm:$0xf] %vm198_vm0, %v281_v27 }
  0x84   : > { %271 = vst.msk [vmem:[#allocation2 + $0x30] sm:$0xf] %vm198_vm0, %v269_v28  ;;  %v329_v29 = vpop.permute.xlu2 %328 }
  0x85   : > { %331 = vst.msk [vmem:[#allocation2 + $0x58] sm:$0xf] %vm198_vm0, %v329_v29 }
  0x8a   : > { %v287_v30 = vpop.permute.xlu0 %286 }
  0x8b   : > { %v275_v31 = vpop.permute.xlu1 %274  ;;  %289 = vst.msk [vmem:[#allocation2 + $0x3c] sm:$0xf] %vm198_vm0, %v287_v30 }
  0x8c   : > { %277 = vst.msk [vmem:[#allocation2 + $0x34] sm:$0xf] %vm198_vm0, %v275_v31  ;;  %v227_v32 = vpop.permute.xlu2 %226 }
  0x8d   : > { %229 = vst.msk [vmem:[#allocation2 + $0x14] sm:$0xf] %vm198_vm0, %v227_v32 }
  0x92   : > { %v341_v33 = vpop.permute.xlu0 %340  ;;  %v689_v35 = vld [vmem:[#allocation2 + $0x38] sm:$0xff] }
  0x93   : > { %v245_v34 = vpop.permute.xlu1 %244  ;;  %343 = vst.msk [vmem:[#allocation2 + $0x60] sm:$0xf] %vm198_vm0, %v341_v33  ;;  %465 = vmatpush.bf16.msra.mxu0 %v689_v35  ;;  %v688_v37 = vld [vmem:[#allocation2 + $0x30] sm:$0xff] }
  0x94   : > { %247 = vst.msk [vmem:[#allocation2 + $0x20] sm:$0xf] %vm198_vm0, %v245_v34  ;;  %v209_v36 = vpop.permute.xlu2 %208 }
  0x95   : > { %211 = vst.msk [vmem:[#allocation2 + $0x8] sm:$0xf] %vm198_vm0, %v209_v36 }
  0x97   : > { %466 = vmatpush.bf16.msra.mxu0 %v688_v37 }
  0x9a   : > { %v233_v39 = vpop.permute.xlu0 %232  ;;  %v369_v41 = vld [vmem:[#allocation2 + $0x60] sm:$0xf] }
  0x9b   : > { %v239_v38 = vpop.permute.xlu1 %238  ;;  %v431_v42 = vunpack.c.l.b16 %v369_v41  ;;  %235 = vst.msk [vmem:[#allocation2 + $0x18] sm:$0xf] %vm198_vm0, %v233_v39  ;;  %467 = vmatpush.bf16.msra.mxu0 %v687_v40  ;;  %v686_v46 = vld [vmem:[#allocation2 + $0x20] sm:$0xff] }
  0x9c   : > { %241 = vst.msk [vmem:[#allocation2 + $0x1c] sm:$0xf] %vm198_vm0, %v239_v38  ;;  %v311_v44 = vpop.permute.xlu2 %310 }
  0x9d   : > { %v444_v45 = vpack.c.b16 %v431_v42, %v431_v42  ;;  %313 = vst.msk [vmem:[#allocation2 + $0x4c] sm:$0xf] %vm198_vm0, %v311_v44 }
  0x9f   : > { %v463_v47 = vsel %vm461_vm1, %v444_v45, 0  ;;  %468 = vmatpush.bf16.msra.mxu0 %v686_v46 }
  0xa0   : > { %481 = vmatpush.bf16.msra.mxu1 %v463_v47 }
  0xa2   : > { %v335_v48 = vpop.permute.xlu0 %334 }
  0xa3   : > { %v221_v49 = vpop.permute.xlu1 %220  ;;  %337 = vst.msk [vmem:[#allocation2 + $0x5c] sm:$0xf] %vm198_vm0, %v335_v48  ;;  %v685_v50 = vld [vmem:[#allocation2 + $0x18] sm:$0xff] }
  0xa4   : > { %223 = vst.msk [vmem:[#allocation2 + $0x10] sm:$0xf] %vm198_vm0, %v221_v49  ;;  %v299_v51 = vpop.permute.xlu2 %298  ;;  %469 = vmatpush.bf16.msra.mxu0 %v685_v50 }
  0xa5   : > { %301 = vst.msk [vmem:[#allocation2 + $0x44] sm:$0xf] %vm198_vm0, %v299_v51 }
  0xaa   : > { %v317_v54 = vpop.permute.xlu0 %316  ;;  %v693_v56 = vld [vmem:[#allocation2 + $0x58] sm:$0xff] }
  0xab   : > { %v323_v55 = vpop.permute.xlu1 %322  ;;  %319 = vst.msk [vmem:[#allocation2 + $0x50] sm:$0xf] %vm198_vm0, %v317_v54  ;;  %v684_v57 = vld [vmem:[#allocation2 + $0x10] sm:$0xff]  ;;  %482 = vmatpush.bf16.msra.mxu1 %v693_v56 }
  0xac   : > { %325 = vst.msk [vmem:[#allocation2 + $0x54] sm:$0xf] %vm198_vm0, %v323_v55  ;;  %470 = vmatpush.bf16.msra.mxu0 %v684_v57 }
  0xb2   : > { %v215_v59 = vpop.permute.xlu0 %214 }
  0xb3   : > { %v305_v58 = vpop.permute.xlu1 %304  ;;  %v692_v60 = vld [vmem:[#allocation2 + $0x50] sm:$0xff]  ;;  %217 = vst.msk [vmem:[#allocation2 + $0xc] sm:$0xf] %vm198_vm0, %v215_v59 }
  0xb4   : > { %307 = vst.msk [vmem:[#allocation2 + $0x48] sm:$0xf] %vm198_vm0, %v305_v58  ;;  %483 = vmatpush.bf16.msra.mxu1 %v692_v60 }
  0xba   : > { %v203_v62 = vpop.permute.xlu0 %202  ;;  %v683_v0 = vld [vmem:[#allocation2 + $0x8] sm:$0xff] }
  0xbb   : > { %v293_v61 = vpop.permute.xlu1 %292  ;;  %v691_v63 = vld [vmem:[#allocation2 + $0x48] sm:$0xff]  ;;  %205 = vst.msk [vmem:[#allocation2 + $0x4] sm:$0xf] %vm198_vm0, %v203_v62  ;;  %471 = vmatpush.bf16.msra.mxu0 %v683_v0 }
  0xbc   : > { %295 = vst.msk [vmem:[#allocation2 + $0x40] sm:$0xf] %vm198_vm0, %v293_v61  ;;  %484 = vmatpush.bf16.msra.mxu1 %v691_v63 }
  0xc2   : > { %v682_v5 = vld [vmem:[#allocation2] sm:$0xff]  ;;  %v374_v20 = vpop.permute.xlu0 %373 }
  0xc3   : > { %v690_v4 = vld [vmem:[#allocation2 + $0x40] sm:$0xff]  ;;  %472 = vmatpush.bf16.msra.mxu0 %v682_v5 }
  0xc4   : > { %485 = vmatpush.bf16.msra.mxu1 %v690_v4 }
  0xc6   : > { %473 = vmatmul.bf16.vlgmr.msra.gmra.mxu0 %v379_v7 }
  0xc7   : > { %661 = vmatmul.msk.bf16.vlgmr.msra.gmra.mxu1 %vm457_vm2, %v380_v6 }
 0x143   : > { %v474_v22 = vpop.f32.mrf.mxu0 }
 0x144   : > { %v487_v21 = vpop.f32.mrf.mxu1  ;;  %v475_v23 = vadd.f32 %v474_v22, %v374_v20 }
 0x146   : > { %v488_v24 = vadd.f32 %v487_v21, %v475_v23 }
 0x148   : > { %v491_v25 = vmax.f32 %v488_v24, 0.0 }
 0x14a   : > { %v492_v26 = vpack.c.bf16 %v491_v25, %v491_v25 }
 0x14b   : > { %v476_v28 = vpop.f32.mrf.mxu0 }
 0x14c   : > { %v489_v27 = vpop.f32.mrf.mxu1  ;;  %678 = vmatmul.msk.bf16.vlgmr.msra.gmra.mxu2 %vm517_vm3, %v492_v26  ;;  %679 = vmatmul.msk.bf16.vlgmr.msra.gmra.mxu3 %vm517_vm3, %v492_v26 }
 0x1cf   : > { %v530_v29 = vpop.f32.mrf.mxu2  ;;  %v543_v30 = vpop.f32.mrf.mxu3 }
 0x1d0   : > { %v547_v31 = vpack.c.bf16 %v543_v30, %v530_v29 }
 0x1d2   : > { %548 = vst [vmem:[%s194_s21] sm:$0xff] %v547_v31 }
 0x1d7   : > { %v532_v32 = vpop.f32.mrf.mxu2  ;;  %v545_v33 = vpop.f32.mrf.mxu3 }
 0x1d8 PF: > { %s14_s15 = sadd.s32 1, %s738_s15  }
 0x1d9   : > { %p11_p5 = scmp.ge.s32.totalorder %s14_s15, 4  }
 0x1db   :  { %13 = sbr.rel (!%p11_p5) target bundleno = 1 (0x1), region = 66 }

// kernel: segnet_forward.14
= control target key start
LH: loop header
LB: loop body
LE: loop exit
PB: predicated region body
PF: predicated region fallthrough
CT: control target
= control target key end

     0   :  { %s1120_s15 = smov 0   ;;  %s1256_s0 = inlined_call_operand.vmem [shape: bf16[8,256], index: 0, kind: input, shape index: {}]   ;;  %s1257_s1 = inlined_call_operand.vmem [shape: bf16[8,392], index: 1, kind: input, shape index: {}]   ;;  %s1258_s2 = inlined_call_operand.vmem [shape: f32[8,1], index: 2, kind: input, shape index: {}]   ;;  %s1259_s3 = inlined_call_operand.vmem [shape: bf16[16,128], index: 3, kind: input, shape index: {}]   ;;  %s1260_s4 = inlined_call_operand.vmem [shape: bf16[8,256], index: 4, kind: output, shape index: {}]  }
   0x1 LB: > { %s844_s16 = sadd.s32 4294967295, %s1044_s15   ;;  %p848_p0 = scmp.ge.s32.totalorder %s1044_s15, 1  ;;  %s1044_s15 = sphi %s1120_s15, %s14_s15  }
   0x2   : > { %p161_p1 = scmp.lt.s32.totalorder %s1044_s15, 3 }
   0x4   : > { %p162_p2 = pnand %p848_p0, %p161_p1 }
   0x5   : > { %p185_p3 = scmp.lt.s32.totalorder (!%p162_p2), %s844_s16, 1  ;;  %s1046_s21 = smov (!%p162_p2), 76  }
   0x6   : > { %165 = sbr.rel (%p162_p2) target bundleno = 539 (0x21b), region = 36  ;;  %s1047_s22 = smov (!%p162_p2), 112  }
   0x7   : > { %s1048_s23 = smov (!%p162_p2), 94   ;;  %s1049_s24 = smov (!%p162_p2), 75  }
   0x8   : > { %s1050_s25 = smov (!%p162_p2), 111   ;;  %s1051_s26 = smov (!%p162_p2), 93  }
   0x9   : > { %s1052_s27 = smov (!%p162_p2), 78   ;;  %s1053_s28 = smov (!%p162_p2), 77  }
   0xa   : > { %s1054_s29 = smov (!%p162_p2), 115   ;;  %s1055_s30 = smov (!%p162_p2), 96  }
   0xb   : > { %s1262_s16 = smov (!%p185_p3, %s844_s16), 1  ;;  %s1056_s5 = smov 114   ;;  %vm195_vm0 = vcmask 125952   ;;  %vm706_vm1 = vcmask 1043456   ;;  %vm702_vm2 = vcmask 64512   ;;  %vm772_vm3 = vcmask 130048  }
   0xc   : > { %s849_s17 = sshll.u32 %s1262_s16, 2  ;;  %s1057_s6 = smov 95  }
   0xd   : > { %s1136_s20 = scalar_lea.vmem %s1256_s0, %s849_s17  ;;  %s1058_s7 = smov 79  }
   0xe   : > { %v467_v0 = vld [vmem:[%s1136_s20] sm:$0xf]  ;;  %s1059_s8 = smov 80   ;;  %s1060_s9 = smov 117  }
   0xf   : > { %v275_v1 = vld [vmem:[%s1136_s20] sm:$0xf]  ;;  %469 = vrot.lane.b32.xlu0 %v467_v0, %s1046_s21  ;;  %s1061_s10 = smov 99   ;;  %s1062_s11 = smov 116  }
  0x10   : > { %277 = vrot.lane.b32.xlu1 %v275_v1, %s1047_s22  ;;  %v371_v2 = vld [vmem:[%s1136_s20] sm:$0xf]  ;;  %s1063_s12 = smov 98   ;;  %s1064_s13 = smov 82  }
  0x11   : > { %373 = vrot.lane.b32.xlu2 %v371_v2, %s1048_s23  ;;  %v473_v3 = vld [vmem:[%s1136_s20] sm:$0xf]  ;;  %s1065_s14 = smov 83   ;;  %s1066_s18 = smov 119  }
  0x12   : > { %v281_v4 = vld [vmem:[%s1136_s20] sm:$0xf]  ;;  %s1067_s19 = smov 101   ;;  %s1068_s21 = smov 118  }
  0x13   : > { %v377_v5 = vld [vmem:[%s1136_s20] sm:$0xf]  ;;  %s1069_s22 = smov 100   ;;  %s1070_s23 = smov 84  }
  0x14   : > { %v455_v6 = vld [vmem:[%s1136_s20] sm:$0xf] }
  0x15   : > { %v461_v7 = vld [vmem:[%s1136_s20] sm:$0xf] }
  0x16   : > { %v263_v8 = vld [vmem:[%s1136_s20] sm:$0xf] }
  0x17   : > { %475 = vrot.lane.b32.xlu0 %v473_v3, %s1049_s24  ;;  %v359_v9 = vld [vmem:[%s1136_s20] sm:$0xf]  ;;  %s1071_s24 = smov 85  }
  0x18   : > { %283 = vrot.lane.b32.xlu1 %v281_v4, %s1050_s25  ;;  %v269_v10 = vld [vmem:[%s1136_s20] sm:$0xf]  ;;  %s1072_s25 = smov 122  }
  0x19   : > { %379 = vrot.lane.b32.xlu2 %v377_v5, %s1051_s26  ;;  %v365_v11 = vld [vmem:[%s1136_s20] sm:$0xf]  ;;  %s1073_s26 = smov 103  }
  0x1a   : > { %v449_v12 = vld [vmem:[%s1136_s20] sm:$0xf] }
  0x1b   : > { %v443_v13 = vld [vmem:[%s1136_s20] sm:$0xf] }
  0x1c   : > { %v251_v14 = vld [vmem:[%s1136_s20] sm:$0xf] }
  0x1d   : > { %v347_v15 = vld [vmem:[%s1136_s20] sm:$0xf] }
  0x1e   : > { %v257_v16 = vld [vmem:[%s1136_s20] sm:$0xf] }
  0x1f   : > { %457 = vrot.lane.b32.xlu0 %v455_v6, %s1052_s27  ;;  %v353_v17 = vld [vmem:[%s1136_s20] sm:$0xf]  ;;  %s1074_s27 = smov 120  }
  0x20   : > { %463 = vrot.lane.b32.xlu1 %v461_v7, %s1053_s28  ;;  %v437_v18 = vld [vmem:[%s1136_s20] sm:$0xf]  ;;  %s1075_s28 = smov 102  }
  0x21   : > { %265 = vrot.lane.b32.xlu2 %v263_v8, %s1054_s29  ;;  %v431_v19 = vld [vmem:[%s1136_s20] sm:$0xf]  ;;  %s1076_s29 = smov 86  }
  0x22   : > { %v239_v20 = vld [vmem:[%s1136_s20] sm:$0xf] }
  0x23   : > { %v335_v21 = vld [vmem:[%s1136_s20] sm:$0xf] }
  0x24   : > { %v245_v22 = vld [vmem:[%s1136_s20] sm:$0xf] }
  0x25   : > { %v341_v23 = vld [vmem:[%s1136_s20] sm:$0xf] }
  0x26   : > { %v425_v24 = vld [vmem:[%s1136_s20] sm:$0xf] }
  0x27   : > { %271 = vrot.lane.b32.xlu0 %v269_v10, %s1056_s5  ;;  %v419_v25 = vld [vmem:[%s1136_s20] sm:$0xf]  ;;  %s1078_s5 = smov 124  }
  0x28   : > { %361 = vrot.lane.b32.xlu1 %v359_v9, %s1055_s30  ;;  %v227_v26 = vld [vmem:[%s1136_s20] sm:$0xf]  ;;  %s1077_s30 = smov 87  }
  0x29   : > { %367 = vrot.lane.b32.xlu2 %v365_v11, %s1057_s6  ;;  %v323_v27 = vld [vmem:[%s1136_s20] sm:$0xf]  ;;  %s1079_s6 = smov 106  }
  0x2a   : > { %v233_v28 = vld [vmem:[%s1136_s20] sm:$0xf] }
  0x2b   : > { %v329_v29 = vld [vmem:[%s1136_s20] sm:$0xf] }
  0x2c   : > { %v413_v30 = vld [vmem:[%s1136_s20] sm:$0xf] }
  0x2d   : > { %v407_v31 = vld [vmem:[%s1136_s20] sm:$0xf] }
  0x2e   : > { %v215_v32 = vld [vmem:[%s1136_s20] sm:$0xf] }
  0x2f   : > { %445 = vrot.lane.b32.xlu0 %v443_v13, %s1059_s8  ;;  %v311_v33 = vld [vmem:[%s1136_s20] sm:$0xf]  ;;  %s1081_s8 = smov 104  }
  0x30   : > { %451 = vrot.lane.b32.xlu1 %v449_v12, %s1058_s7  ;;  %v221_v34 = vld [vmem:[%s1136_s20] sm:$0xf]  ;;  %s1080_s7 = smov 123  }
  0x31   : > { %253 = vrot.lane.b32.xlu2 %v251_v14, %s1060_s9  ;;  %v317_v35 = vld [vmem:[%s1136_s20] sm:$0xf]  ;;  %s1082_s9 = smov 88  }
  0x32   : > { %v401_v37 = vld [vmem:[%s1136_s20] sm:$0xf] }
  0x33   : > { %v395_v38 = vld [vmem:[%s1136_s20] sm:$0xf] }
  0x34   : > { %v203_v39 = vld [vmem:[%s1136_s20] sm:$0xf] }
  0x35   : > { %v479_v41 = vld [vmem:[%s1136_s20] sm:$0xf] }
  0x36   : > { %v209_v42 = vld [vmem:[%s1136_s20] sm:$0xf] }
  0x37   : > { %259 = vrot.lane.b32.xlu0 %v257_v16, %s1062_s11  ;;  %s1084_s11 = smov 126   ;;  %v299_v43 = vld [vmem:[%s1136_s20] sm:$0xf] }
  0x38   : > { %349 = vrot.lane.b32.xlu1 %v347_v15, %s1061_s10  ;;  %s1083_s10 = smov 90   ;;  %v383_v46 = vld [vmem:[%s1136_s20] sm:$0xf] }
  0x39   : > { %355 = vrot.lane.b32.xlu2 %v353_v17, %s1063_s12  ;;  %s1085_s12 = smov 74   ;;  %v305_v47 = vld [vmem:[%s1136_s20] sm:$0xf] }
  0x3a   : > { %v389_v48 = vld [vmem:[%s1136_s20] sm:$0xf] }
  0x3b   : > { %v287_v52 = vld [vmem:[%s1136_s20] sm:$0xf] }
  0x3c   : > { %v197_v53 = vld [vmem:[%s1136_s20] sm:$0xf] }
  0x3d   : > { %v293_v54 = vld [vmem:[%s1136_s20] sm:$0xf] }
  0x3f   : > { %433 = vrot.lane.b32.xlu0 %v431_v19, %s1065_s14  ;;  %s1087_s14 = smov 108  }
  0x40   : > { %439 = vrot.lane.b32.xlu1 %v437_v18, %s1064_s13  ;;  %s1086_s13 = smov 125  }
  0x41   : > { %241 = vrot.lane.b32.xlu2 %v239_v20, %s1066_s18  ;;  %s1088_s18 = smov 92  }
  0x47   : > { %247 = vrot.lane.b32.xlu0 %v245_v22, %s1068_s21  ;;  %s1090_s21 = smov 91  }
  0x48   : > { %337 = vrot.lane.b32.xlu1 %v335_v21, %s1067_s19  ;;  %s1089_s19 = smov 107  }
  0x49   : > { %343 = vrot.lane.b32.xlu2 %v341_v23, %s1069_s22  ;;  %s1091_s22 = smov 110  }
  0x4f   : > { %421 = vrot.lane.b32.xlu0 %v419_v25, %s1071_s24  ;;  %s1093_s24 = smov 109  }
  0x50   : > { %427 = vrot.lane.b32.xlu1 %v425_v24, %s1070_s23  ;;  %s1092_s23 = smov 127  }
  0x51   : > { %229 = vrot.lane.b32.xlu2 %v227_v26, %s1072_s25 }
  0x57   : > { %235 = vrot.lane.b32.xlu0 %v233_v28, %s1074_s27 }
  0x58   : > { %325 = vrot.lane.b32.xlu1 %v323_v27, %s1073_s26 }
  0x59   : > { %331 = vrot.lane.b32.xlu2 %v329_v29, %s1075_s28 }
  0x5f   : > { %409 = vrot.lane.b32.xlu0 %v407_v31, %s1077_s30 }
  0x60   : > { %415 = vrot.lane.b32.xlu1 %v413_v30, %s1076_s29 }
  0x61   : > { %217 = vrot.lane.b32.xlu2 %v215_v32, %s1078_s5 }
  0x67   : > { %223 = vrot.lane.b32.xlu0 %v221_v34, %s1080_s7 }
  0x68   : > { %313 = vrot.lane.b32.xlu1 %v311_v33, %s1079_s6 }
  0x69   : > { %319 = vrot.lane.b32.xlu2 %v317_v35, %s1081_s8  ;;  %s192_s8 = scalar_lea.vmem %s1260_s4, %s849_s17 }
  0x6b   : > { %v374_v36 = vpop.permute.xlu2 %373 }
  0x6c   : > { %376 = vst.msk [vmem:[#allocation2 + $0x78] sm:$0xf] %vm195_vm0, %v374_v36 }
  0x6f   : > { %397 = vrot.lane.b32.xlu0 %v395_v38, %s1083_s10  ;;  %v194_v38 = vld [vmem:[%s1136_s20] sm:$0xf] }
  0x70   : > { %403 = vrot.lane.b32.xlu1 %v401_v37, %s1082_s9  ;;  %196 = vst.msk [vmem:[#allocation2] sm:$0xf] %vm195_vm0, %v194_v38 }
  0x71   : > { %205 = vrot.lane.b32.xlu2 %v203_v39, %s1084_s11 }
  0x73   : > { %v380_v40 = vpop.permute.xlu2 %379 }
  0x74   : > { %382 = vst.msk [vmem:[#allocation2 + $0x7c] sm:$0xf] %vm195_vm0, %v380_v40 }
  0x77   : > { %211 = vrot.lane.b32.xlu0 %v209_v42, %s1086_s13 }
  0x78   : > { %481 = vrot.lane.b32.xlu1 %v479_v41, %s1085_s12 }
  0x79   : > { %301 = vrot.lane.b32.xlu2 %v299_v43, %s1087_s14 }
  0x7b   : > { %v970_v44 = vld [vmem:[#allocation2 + $0x78] sm:$0xff]  ;;  %v266_v45 = vpop.permute.xlu2 %265 }
  0x7c   : > { %268 = vst.msk [vmem:[#allocation2 + $0x30] sm:$0xf] %vm195_vm0, %v266_v45  ;;  %723 = vmatpush.bf16.msra.mxu1 %v970_v44  ;;  %v536_v45 = vld [vmem:[%s1258_s2] sm:$0xff] }
  0x7f   : > { %307 = vrot.lane.b32.xlu0 %v305_v47, %s1089_s19 }
  0x80   : > { %385 = vrot.lane.b32.xlu1 %v383_v46, %s1088_s18  ;;  %v1094_v46 = vmov 0  }
  0x81   : > { %v470_v49 = vpop.permute.xlu0 %469  ;;  %391 = vrot.lane.b32.xlu2 %v389_v48, %s1090_s21  ;;  %1037 = vset.pattern.permute.xlu0 %v1094_v46 }
  0x82   : > { %v278_v50 = vpop.permute.xlu1 %277  ;;  %472 = vst.msk [vmem:[#allocation2 + $0xb8] sm:$0xf] %vm195_vm0, %v470_v49 }
  0x83   : > { %280 = vst.msk [vmem:[#allocation2 + $0x38] sm:$0xf] %vm195_vm0, %v278_v50  ;;  %v368_v51 = vpop.permute.xlu2 %367  ;;  %v486_v50 = vld [vmem:[%s1257_s1 + $0x8] sm:$0xff] }
  0x84   : > { %370 = vst.msk [vmem:[#allocation2 + $0x74] sm:$0xf] %vm195_vm0, %v368_v51 }
  0x87   : > { %199 = vrot.lane.b32.xlu0 %v197_v53, %s1092_s23 }
  0x88   : > { %289 = vrot.lane.b32.xlu1 %v287_v52, %s1091_s22 }
  0x89   : > { %v476_v55 = vpop.permute.xlu0 %475  ;;  %295 = vrot.lane.b32.xlu2 %v293_v54, %s1093_s24 }
  0x8a   : > { %v284_v56 = vpop.permute.xlu1 %283  ;;  %478 = vst.msk [vmem:[#allocation2 + $0xbc] sm:$0xf] %vm195_vm0, %v476_v55 }
  0x8b   : > { %286 = vst.msk [vmem:[#allocation2 + $0x3c] sm:$0xf] %vm195_vm0, %v284_v56  ;;  %v254_v57 = vpop.permute.xlu2 %253  ;;  %v547_v56 = vunpack.c.h.b16 %v486_v50 }
  0x8c   : > { %256 = vst.msk [vmem:[#allocation2 + $0x28] sm:$0xf] %vm195_vm0, %v254_v57 }
  0x8f   : > { %539 = vperm.xlu0 %1037, %v536_v45  }
  0x91   : > { %v458_v58 = vpop.permute.xlu0 %457  ;;  %v978_v60 = vld [vmem:[#allocation2 + $0xb8] sm:$0xff] }
  0x92   : > { %v464_v59 = vpop.permute.xlu1 %463  ;;  %460 = vst.msk [vmem:[#allocation2 + $0xb0] sm:$0xf] %vm195_vm0, %v458_v58  ;;  %v962_v61 = vld [vmem:[#allocation2 + $0x38] sm:$0xff]  ;;  %736 = vmatpush.bf16.msra.mxu2 %v978_v60  ;;  %v979_v58 = vld [vmem:[%s1259_s3] sm:$0xff]  ;;  %v546_v60 = vunpack.c.l.b16 %v486_v50 }
  0x93   : > { %466 = vst.msk [vmem:[#allocation2 + $0xb4] sm:$0xf] %vm195_vm0, %v464_v59  ;;  %v356_v62 = vpop.permute.xlu2 %355  ;;  %710 = vmatpush.bf16.msra.mxu0 %v962_v61  ;;  %v551_v61 = vpack.c.b16 %v547_v56, %v547_v56 }
  0x94   : > { %358 = vst.msk [vmem:[#allocation2 + $0x6c] sm:$0xf] %vm195_vm0, %v356_v62 }
  0x99   : > { %v272_v0 = vpop.permute.xlu0 %271 }
  0x9a   : > { %v362_v63 = vpop.permute.xlu1 %361  ;;  %v977_v1 = vld [vmem:[#allocation2 + $0xb0] sm:$0xff]  ;;  %274 = vst.msk [vmem:[#allocation2 + $0x34] sm:$0xf] %vm195_vm0, %v272_v0 }
  0x9b   : > { %364 = vst.msk [vmem:[#allocation2 + $0x70] sm:$0xf] %vm195_vm0, %v362_v63  ;;  %v242_v2 = vpop.permute.xlu2 %241  ;;  %737 = vmatpush.bf16.msra.mxu2 %v977_v1 }
  0x9c   : > { %244 = vst.msk [vmem:[#allocation2 + $0x20] sm:$0xf] %vm195_vm0, %v242_v2  ;;  %v550_v2 = vpack.c.b16 %v546_v60, %v546_v60 }
  0xa1   : > { %v446_v4 = vpop.permute.xlu0 %445  ;;  %v961_v6 = vld [vmem:[#allocation2 + $0x30] sm:$0xff] }
  0xa2   : > { %v452_v3 = vpop.permute.xlu1 %451  ;;  %v969_v5 = vld [vmem:[#allocation2 + $0x70] sm:$0xff]  ;;  %448 = vst.msk [vmem:[#allocation2 + $0xa8] sm:$0xf] %vm195_vm0, %v446_v4  ;;  %711 = vmatpush.bf16.msra.mxu0 %v961_v6 }
  0xa3   : > { %454 = vst.msk [vmem:[#allocation2 + $0xac] sm:$0xf] %vm195_vm0, %v452_v3  ;;  %724 = vmatpush.bf16.msra.mxu1 %v969_v5  ;;  %v344_v7 = vpop.permute.xlu2 %343  ;;  %v485_v3 = vld [vmem:[%s1257_s1] sm:$0xff] }
  0xa4   : > { %346 = vst.msk [vmem:[#allocation2 + $0x64] sm:$0xf] %vm195_vm0, %v344_v7  ;;  %v545_v4 = vunpack.c.h.b16 %v485_v3  ;;  %v544_v5 = vunpack.c.l.b16 %v485_v3 }
  0xa9   : > { %v260_v9 = vpop.permute.xlu0 %259 }
  0xaa   : > { %v350_v8 = vpop.permute.xlu1 %349  ;;  %v976_v10 = vld [vmem:[#allocation2 + $0xa8] sm:$0xff]  ;;  %262 = vst.msk [vmem:[#allocation2 + $0x2c] sm:$0xf] %vm195_vm0, %v260_v9  ;;  %v548_v9 = vpack.c.b16 %v544_v5, %v544_v5 }
  0xab   : > { %352 = vst.msk [vmem:[#allocation2 + $0x68] sm:$0xf] %vm195_vm0, %v350_v8  ;;  %v230_v11 = vpop.permute.xlu2 %229  ;;  %738 = vmatpush.bf16.msra.mxu2 %v976_v10  ;;  %v549_v8 = vpack.c.b16 %v545_v4, %v545_v4 }
  0xac   : > { %232 = vst.msk [vmem:[#allocation2 + $0x18] sm:$0xf] %vm195_vm0, %v230_v11 }
  0xb1   : > { %v434_v13 = vpop.permute.xlu0 %433  ;;  %v960_v15 = vld [vmem:[#allocation2 + $0x28] sm:$0xff] }
  0xb2   : > { %v440_v12 = vpop.permute.xlu1 %439  ;;  %v968_v14 = vld [vmem:[#allocation2 + $0x68] sm:$0xff]  ;;  %436 = vst.msk [vmem:[#allocation2 + $0xa0] sm:$0xf] %vm195_vm0, %v434_v13  ;;  %712 = vmatpush.bf16.msra.mxu0 %v960_v15 }
  0xb3   : > { %442 = vst.msk [vmem:[#allocation2 + $0xa4] sm:$0xf] %vm195_vm0, %v440_v12  ;;  %725 = vmatpush.bf16.msra.mxu1 %v968_v14  ;;  %v332_v16 = vpop.permute.xlu2 %331 }
  0xb4   : > { %334 = vst.msk [vmem:[#allocation2 + $0x5c] sm:$0xf] %vm195_vm0, %v332_v16 }
  0xb9   : > { %v248_v18 = vpop.permute.xlu0 %247 }
  0xba   : > { %v338_v17 = vpop.permute.xlu1 %337  ;;  %v975_v19 = vld [vmem:[#allocation2 + $0xa0] sm:$0xff]  ;;  %250 = vst.msk [vmem:[#allocation2 + $0x24] sm:$0xf] %vm195_vm0, %v248_v18 }
  0xbb   : > { %340 = vst.msk [vmem:[#allocation2 + $0x60] sm:$0xf] %vm195_vm0, %v338_v17  ;;  %v218_v20 = vpop.permute.xlu2 %217  ;;  %739 = vmatpush.bf16.msra.mxu2 %v975_v19 }
  0xbc   : > { %220 = vst.msk [vmem:[#allocation2 + $0x10] sm:$0xf] %vm195_vm0, %v218_v20 }
  0xc1   : > { %v422_v22 = vpop.permute.xlu0 %421  ;;  %v959_v24 = vld [vmem:[#allocation2 + $0x20] sm:$0xff] }
  0xc2   : > { %v428_v21 = vpop.permute.xlu1 %427  ;;  %v967_v23 = vld [vmem:[#allocation2 + $0x60] sm:$0xff]  ;;  %424 = vst.msk [vmem:[#allocation2 + $0x98] sm:$0xf] %vm195_vm0, %v422_v22  ;;  %713 = vmatpush.bf16.msra.mxu0 %v959_v24 }
  0xc3   : > { %430 = vst.msk [vmem:[#allocation2 + $0x9c] sm:$0xf] %vm195_vm0, %v428_v21  ;;  %726 = vmatpush.bf16.msra.mxu1 %v967_v23  ;;  %v320_v25 = vpop.permute.xlu2 %319 }
  0xc4   : > { %322 = vst.msk [vmem:[#allocation2 + $0x54] sm:$0xf] %vm195_vm0, %v320_v25 }
  0xc9   : > { %v236_v27 = vpop.permute.xlu0 %235 }
  0xca   : > { %v326_v26 = vpop.permute.xlu1 %325  ;;  %v974_v28 = vld [vmem:[#allocation2 + $0x98] sm:$0xff]  ;;  %238 = vst.msk [vmem:[#allocation2 + $0x1c] sm:$0xf] %vm195_vm0, %v236_v27 }
  0xcb   : > { %328 = vst.msk [vmem:[#allocation2 + $0x58] sm:$0xf] %vm195_vm0, %v326_v26  ;;  %v206_v29 = vpop.permute.xlu2 %205  ;;  %740 = vmatpush.bf16.msra.mxu2 %v974_v28 }
  0xcc   : > { %208 = vst.msk [vmem:[#allocation2 + $0x8] sm:$0xf] %vm195_vm0, %v206_v29 }
  0xd1   : > { %v410_v31 = vpop.permute.xlu0 %409  ;;  %v958_v33 = vld [vmem:[#allocation2 + $0x18] sm:$0xff] }
  0xd2   : > { %v416_v30 = vpop.permute.xlu1 %415  ;;  %v966_v32 = vld [vmem:[#allocation2 + $0x58] sm:$0xff]  ;;  %412 = vst.msk [vmem:[#allocation2 + $0x90] sm:$0xf] %vm195_vm0, %v410_v31  ;;  %714 = vmatpush.bf16.msra.mxu0 %v958_v33 }
  0xd3   : > { %418 = vst.msk [vmem:[#allocation2 + $0x94] sm:$0xf] %vm195_vm0, %v416_v30  ;;  %727 = vmatpush.bf16.msra.mxu1 %v966_v32  ;;  %v302_v34 = vpop.permute.xlu2 %301 }
  0xd4   : > { %304 = vst.msk [vmem:[#allocation2 + $0x48] sm:$0xf] %vm195_vm0, %v302_v34 }
  0xd9   : > { %v224_v36 = vpop.permute.xlu0 %223 }
  0xda   : > { %v314_v35 = vpop.permute.xlu1 %313  ;;  %v973_v37 = vld [vmem:[#allocation2 + $0x90] sm:$0xff]  ;;  %226 = vst.msk [vmem:[#allocation2 + $0x14] sm:$0xf] %vm195_vm0, %v224_v36 }
  0xdb   : > { %316 = vst.msk [vmem:[#allocation2 + $0x50] sm:$0xf] %vm195_vm0, %v314_v35  ;;  %v392_v39 = vpop.permute.xlu2 %391  ;;  %741 = vmatpush.bf16.msra.mxu2 %v973_v37 }
  0xdc   : > { %394 = vst.msk [vmem:[#allocation2 + $0x84] sm:$0xf] %vm195_vm0, %v392_v39 }
  0xe1   : > { %v398_v41 = vpop.permute.xlu0 %397  ;;  %v957_v43 = vld [vmem:[#allocation2 + $0x10] sm:$0xff] }
  0xe2   : > { %v404_v40 = vpop.permute.xlu1 %403  ;;  %v965_v42 = vld [vmem:[#allocation2 + $0x50] sm:$0xff]  ;;  %400 = vst.msk [vmem:[#allocation2 + $0x88] sm:$0xf] %vm195_vm0, %v398_v41  ;;  %715 = vmatpush.bf16.msra.mxu0 %v957_v43 }
  0xe3   : > { %406 = vst.msk [vmem:[#allocation2 + $0x8c] sm:$0xf] %vm195_vm0, %v404_v40  ;;  %728 = vmatpush.bf16.msra.mxu1 %v965_v42  ;;  %v296_v44 = vpop.permute.xlu2 %295 }
  0xe4   : > { %298 = vst.msk [vmem:[#allocation2 + $0x44] sm:$0xf] %vm195_vm0, %v296_v44 }
  0xe9   : > { %v212_v48 = vpop.permute.xlu0 %211 }
  0xea   : > { %v482_v47 = vpop.permute.xlu1 %481  ;;  %v972_v49 = vld [vmem:[#allocation2 + $0x88] sm:$0xff]  ;;  %214 = vst.msk [vmem:[#allocation2 + $0xc] sm:$0xf] %vm195_vm0, %v212_v48 }
  0xeb   : > { %484 = vst.msk [vmem:[#allocation2 + $0xc0] sm:$0xf] %vm195_vm0, %v482_v47  ;;  %742 = vmatpush.bf16.msra.mxu2 %v972_v49 }
  0xf1   : > { %v308_v52 = vpop.permute.xlu0 %307  ;;  %v956_v54 = vld [vmem:[#allocation2 + $0x8] sm:$0xff] }
  0xf2   : > { %v386_v51 = vpop.permute.xlu1 %385  ;;  %v535_v53 = vld [vmem:[#allocation2 + $0xc0] sm:$0xf]  ;;  %310 = vst.msk [vmem:[#allocation2 + $0x4c] sm:$0xf] %vm195_vm0, %v308_v52  ;;  %716 = vmatpush.bf16.msra.mxu0 %v956_v54 }
  0xf3   : > { %388 = vst.msk [vmem:[#allocation2 + $0x80] sm:$0xf] %vm195_vm0, %v386_v51  ;;  %v652_v55 = vunpack.c.l.b16 %v535_v53 }
  0xf5   : > { %v677_v57 = vpack.c.b16 %v652_v55, %v652_v55 }
  0xf7   : > { %v708_v59 = vsel %vm706_vm1, %v677_v57, 0 }
  0xf8   : > { %756 = vmatpush.bf16.msra.mxu3 %v708_v59 }
  0xf9   : > { %v200_v63 = vpop.permute.xlu0 %199  ;;  %v964_v1 = vld [vmem:[#allocation2 + $0x48] sm:$0xff] }
  0xfa   : > { %v290_v62 = vpop.permute.xlu1 %289  ;;  %v971_v0 = vld [vmem:[#allocation2 + $0x80] sm:$0xff]  ;;  %202 = vst.msk [vmem:[#allocation2 + $0x4] sm:$0xf] %vm195_vm0, %v200_v63  ;;  %729 = vmatpush.bf16.msra.mxu1 %v964_v1 }
  0xfb   : > { %292 = vst.msk [vmem:[#allocation2 + $0x40] sm:$0xf] %vm195_vm0, %v290_v62  ;;  %947 = vmatmul.msk.bf16.vlgmr.msra.gmra.mxu3 %vm702_vm2, %v551_v61  ;;  %743 = vmatpush.bf16.msra.mxu2 %v971_v0 }
  0xfc   : > { %783 = vmatpush.bf16.msrb.mxu3 %v979_v58 }
  0xfe   : > { %744 = vmatmul.bf16.vlgmr.msra.gmra.mxu2 %v550_v2 }
 0x101   : > { %v955_v7 = vld [vmem:[#allocation2] sm:$0xff]  ;;  %v540_v12 = vpop.permute.xlu0 %539 }
 0x102   : > { %v963_v6 = vld [vmem:[#allocation2 + $0x40] sm:$0xff]  ;;  %717 = vmatpush.bf16.msra.mxu0 %v955_v7 }
 0x103   : > { %730 = vmatpush.bf16.msra.mxu1 %v963_v6 }
 0x105   : > { %718 = vmatmul.bf16.vlgmr.msra.gmra.mxu0 %v548_v9 }
 0x106   : > { %731 = vmatmul.bf16.vlgmr.msra.gmra.mxu1 %v549_v8 }
 0x17e   : > { %v758_v10 = vpop.f32.mrf.mxu3 }
 0x181   : > { %v745_v11 = vpop.f32.mrf.mxu2 }
 0x182   : > { %v719_v14 = vpop.f32.mrf.mxu0 }
 0x183   : > { %v732_v13 = vpop.f32.mrf.mxu1  ;;  %v720_v15 = vadd.f32 %v719_v14, %v540_v12 }
 0x185   : > { %v733_v17 = vadd.f32 %v732_v13, %v720_v15 }
 0x186   : > { %v760_v16 = vpop.f32.mrf.mxu3 }
 0x187   : > { %v746_v18 = vadd.f32 %v745_v11, %v733_v17 }
 0x189   : > { %v747_v19 = vpop.f32.mrf.mxu2  ;;  %v759_v20 = vadd.f32 %v758_v10, %v746_v18 }
 0x18a   : > { %v721_v22 = vpop.f32.mrf.mxu0 }
 0x18b   : > { %v734_v21 = vpop.f32.mrf.mxu1  ;;  %v762_v23 = vmax.f32 %v759_v20, 0.0 }
 0x18d   : > { %v763_v24 = vpack.c.bf16 %v762_v23, %v762_v23 }
 0x18f   : > { %952 = vmatmul.msk.bf16.vlgmr.msrb.gmra.mxu3 %vm772_vm3, %v763_v24 }
 0x212   : > { %v785_v25 = vpop.f32.mrf.mxu3 }
 0x213   : > { %v789_v26 = vpack.c.bf16 %v785_v25, %v785_v25 }
 0x215   : > { %790 = vst [vmem:[%s192_s8] sm:$0xf] %v789_v26 }
 0x21a   : > { %v787_v27 = vpop.f32.mrf.mxu3 }
 0x21b PF: > { %s14_s15 = sadd.s32 1, %s1044_s15  }
 0x21c   : > { %p11_p4 = scmp.ge.s32.totalorder %s14_s15, 4  }
 0x21e   :  { %13 = sbr.rel (!%p11_p4) target bundleno = 1 (0x1), region = 66 }

// kernel: segnet_forward.9
= control target key start
LH: loop header
LB: loop body
LE: loop exit
PB: predicated region body
PF: predicated region fallthrough
CT: control target
= control target key end

     0   :  { %s4222_s15 = smov 0   ;;  %s5265_s0 = inlined_call_operand.vmem [shape: bf16[8,1280], index: 0, kind: input, shape index: {}]   ;;  %s5266_s1 = inlined_call_operand.vmem [shape: bf16[8,648], index: 1, kind: input, shape index: {}]   ;;  %s5267_s2 = inlined_call_operand.vmem [shape: f32[8,1], index: 2, kind: input, shape index: {}]   ;;  %s5268_s3 = inlined_call_operand.vmem [shape: bf16[359,256], index: 3, kind: input, shape index: {}]   ;;  %s5269_s4 = inlined_call_operand.vmem [shape: bf16[8,512], index: 4, kind: output, shape index: {}]  }
   0x1 LB: > { %s3178_s16 = sadd.s32 4294967295, %s4117_s15   ;;  %p3182_p0 = scmp.ge.s32.totalorder %s4117_s15, 1  ;;  %s4117_s15 = sphi %s4222_s15, %s14_s15  }
   0x2   : > { %p163_p1 = scmp.lt.s32.totalorder %s4117_s15, 3 }
   0x4   : > { %p164_p2 = pnand %p3182_p0, %p163_p1 }
   0x5   : > { %s189_s17 = smul.u32 (!%p164_p2), 5, %s3178_s16  ;;  %s4119_s22 = smov (!%p164_p2), 88  }
   0x6   : > { %167 = sbr.rel (%p164_p2) target bundleno = 1155 (0x483), region = 36  ;;  %s4120_s23 = smov (!%p164_p2), 104  }
   0x7   : > { %p190_p3 = scmp.lt.s32.totalorder (!%p164_p2), %s189_s17, 9  ;;  %s4121_s24 = smov (!%p164_p2), 53  }
   0x8   : > { %s4122_s25 = smov (!%p164_p2), 52   ;;  %s4123_s26 = smov (!%p164_p2), 106  }
   0x9   : > { %s4124_s27 = smov (!%p164_p2), 105   ;;  %s4125_s28 = smov (!%p164_p2), 55  }
   0xa   : > { %s4126_s29 = smov (!%p164_p2), 54   ;;  %s4127_s30 = smov (!%p164_p2), 108  }
   0xb   : > { %s5271_s17 = smov (!%p190_p3, %s189_s17), 9  ;;  %s4128_s5 = smov 107   ;;  %vm216_vm0 = vcmask 1043456   ;;  %vm740_vm1 = vcmask 433152   ;;  %vm1284_vm2 = vcmask 859136   ;;  %vm1319_vm3 = vcmask 719872  }
   0xc   : > { %s3183_s18 = sshll.u32 %s5271_s17, 2  ;;  %s4129_s6 = smov 72   ;;  %vm362_vm4 = vcmask 850944   ;;  %vm758_vm5 = vcmask 424960   ;;  %vm1230_vm6 = vcmask 883712   ;;  %vm1266_vm7 = vcmask 867328  }
   0xd   : > { %s4235_s21 = scalar_lea.vmem %s5265_s0, %s3183_s18  ;;  %s4130_s7 = smov 56   ;;  %vm704_vm8 = vcmask 449536   ;;  %vm686_vm9 = vcmask 457728   ;;  %vm722_vm10 = vcmask 441344   ;;  %vm1248_vm11 = vcmask 875520  }
   0xe   : > { %v4238_v0 = vld [vmem:[%s4235_s21 + $0x4] sm:$0xff]  ;;  %v4248_v2 = vld [vmem:[%s4235_s21 + $0xc] sm:$0xff]  ;;  %s4131_s8 = smov 7   ;;  %s4132_s9 = smov 6   ;;  %vm1194_vm12 = vcmask 900096   ;;  %vm668_vm13 = vcmask 588800  }
   0xf   : > { %1312 = vrot.lane.b32.xlu1 %v4238_v0, %s4119_s22  ;;  %1295 = vrot.lane.b32.xlu0 %v4238_v0, %s4120_s23  ;;  %v4244_v1 = vld [vmem:[%s4235_s21] sm:$0xff]  ;;  %v4254_v3 = vld [vmem:[%s4235_s21 + $0x8] sm:$0xff]  ;;  %s4133_s10 = smov 110   ;;  %s4134_s11 = smov 109   ;;  %vm1028_vm14 = vcmask 56320   ;;  %vm470_vm15 = vcmask 801792  }
  0x10   : > { %733 = vrot.lane.b32.xlu2 %v4244_v1, %s4121_s24  ;;  %s4135_s12 = smov 99   ;;  %s4136_s13 = smov 98  }
  0x11   : > { %s4137_s14 = smov 74   ;;  %s4138_s17 = smov 73  }
  0x12   : > { %s4139_s18 = smov 24   ;;  %s4140_s19 = smov 8  }
  0x13   : > { %s4141_s20 = smov 112  }
  0x17   : > { %1314 = vrot.lane.b32.xlu1 %v4248_v2, %s4119_s22  ;;  %1297 = vrot.lane.b32.xlu0 %v4248_v2, %s4120_s23  ;;  %s4142_s22 = smov 111  }
  0x18   : > { %735 = vrot.lane.b32.xlu2 %v4254_v3, %s4121_s24  ;;  %s4143_s24 = smov 101  }
  0x1f   : > { %753 = vrot.lane.b32.xlu1 %v4254_v3, %s4122_s25  ;;  %751 = vrot.lane.b32.xlu0 %v4244_v1, %s4122_s25  ;;  %s4144_s25 = smov 100  }
  0x20   : > { %1259 = vrot.lane.b32.xlu2 %v4238_v0, %s4123_s26 }
  0x27   : > { %1277 = vrot.lane.b32.xlu1 %v4238_v0, %s4124_s27  ;;  %1261 = vrot.lane.b32.xlu0 %v4248_v2, %s4123_s26  ;;  %s4145_s26 = smov 76  }
  0x28   : > { %1279 = vrot.lane.b32.xlu2 %v4248_v2, %s4124_s27  ;;  %s4146_s27 = smov 75  }
  0x2f   : > { %699 = vrot.lane.b32.xlu1 %v4254_v3, %s4125_s28  ;;  %697 = vrot.lane.b32.xlu0 %v4244_v1, %s4125_s28  ;;  %s4147_s28 = smov 26  }
  0x30   : > { %715 = vrot.lane.b32.xlu2 %v4244_v1, %s4126_s29 }
  0x37   : > { %1223 = vrot.lane.b32.xlu1 %v4238_v0, %s4127_s30  ;;  %717 = vrot.lane.b32.xlu0 %v4254_v3, %s4126_s29  ;;  %s4148_s29 = smov 25  }
  0x38   : > { %1225 = vrot.lane.b32.xlu2 %v4248_v2, %s4127_s30  ;;  %s4149_s30 = smov 1  }
  0x3f   : > { %1243 = vrot.lane.b32.xlu1 %v4248_v2, %s4128_s5  ;;  %1241 = vrot.lane.b32.xlu0 %v4238_v0, %s4128_s5  ;;  %s4150_s5 = smov 103  }
  0x40   : > { %661 = vrot.lane.b32.xlu2 %v4244_v1, %s4129_s6 }
  0x47   : > { %679 = vrot.lane.b32.xlu1 %v4244_v1, %s4130_s7  ;;  %663 = vrot.lane.b32.xlu0 %v4254_v3, %s4129_s6  ;;  %s4151_s6 = smov 102  }
  0x48   : > { %681 = vrot.lane.b32.xlu2 %v4254_v3, %s4130_s7 }
  0x4f   : > { %1023 = vrot.lane.b32.xlu1 %v4254_v3, %s4131_s8  ;;  %1021 = vrot.lane.b32.xlu0 %v4244_v1, %s4131_s8  ;;  %s4152_s8 = smov 78  }
  0x50   : > { %1039 = vrot.lane.b32.xlu2 %v4244_v1, %s4132_s9 }
  0x57   : > { %1187 = vrot.lane.b32.xlu1 %v4238_v0, %s4133_s10  ;;  %1041 = vrot.lane.b32.xlu0 %v4254_v3, %s4132_s9  ;;  %s4153_s9 = smov 77  }
  0x58   : > { %1189 = vrot.lane.b32.xlu2 %v4248_v2, %s4133_s10  ;;  %s4154_s10 = smov 28  }
  0x5f   : > { %1207 = vrot.lane.b32.xlu1 %v4248_v2, %s4134_s11  ;;  %1205 = vrot.lane.b32.xlu0 %v4238_v0, %s4134_s11  ;;  %s4155_s11 = smov 27  }
  0x60   : > { %445 = vrot.lane.b32.xlu2 %v4244_v1, %s4135_s12 }
  0x67   : > { %463 = vrot.lane.b32.xlu1 %v4244_v1, %s4136_s13  ;;  %447 = vrot.lane.b32.xlu0 %v4254_v3, %s4135_s12  ;;  %s4156_s12 = smov 3  }
  0x68   : > { %465 = vrot.lane.b32.xlu2 %v4254_v3, %s4136_s13  ;;  %s4157_s13 = smov 2  }
  0x6a   : > { %v734_v4 = vpop.permute.xlu2 %733 }
  0x6b   : > { %v737_v5 = vrot.slane %v734_v4, 4 }
  0x6f   : > { %627 = vrot.lane.b32.xlu1 %v4254_v3, %s4137_s14  ;;  %625 = vrot.lane.b32.xlu0 %v4244_v1, %s4137_s14  ;;  %s4158_s14 = smov 120  }
  0x70   : > { %643 = vrot.lane.b32.xlu2 %v4244_v1, %s4138_s17 }
  0x72   : > { %v736_v6 = vpop.permute.xlu2 %735 }
  0x73   : > { %v738_v7 = vrot.slane %v736_v6, 4 }
  0x75   : > { %v739_v8 = vsel %vm216_vm0, %v737_v5, %v738_v7  ;;  %v742_v9 = vsel %vm740_vm1, %v736_v6, %v738_v7 }
  0x76   : > { %v741_v10 = vsel %vm740_vm1, %v734_v4, %v739_v8  ;;  %746 = vst [vmem:[#allocation2 + $0x170] sm:$0xf] %v742_v9  ;;  %vm1046_vm1 = vcmask 48128  }
  0x77   : > { %985 = vrot.lane.b32.xlu1 %v4244_v1, %s4139_s18  ;;  %645 = vrot.lane.b32.xlu0 %v4254_v3, %s4138_s17  ;;  %745 = vst [vmem:[#allocation2 + $0x168] sm:$0xff] %v741_v10  ;;  %s4159_s17 = smov 80  }
  0x78   : > { %987 = vrot.lane.b32.xlu2 %v4254_v3, %s4139_s18  ;;  %s4160_s18 = smov 79  }
  0x7a   : > { %v4296_v11 = vpop.permute.xlu2 %1259 }
  0x7b   : > { %v1263_v43 = vrot.slane %v4296_v11, 4 }
  0x7e   : > { %v3368_v54 = vld [vmem:[#allocation2 + $0x168] sm:$0xf] }
  0x7f   : > { %1005 = vrot.lane.b32.xlu1 %v4254_v3, %s4140_s19  ;;  %1003 = vrot.lane.b32.xlu0 %v4244_v1, %s4140_s19  ;;  %s4161_s19 = smov 30  }
  0x80   : > { %1151 = vrot.lane.b32.xlu2 %v4238_v0, %s4141_s20 }
  0x81   : > { %v1313_v12 = vpop.permute.xlu1 %1312  ;;  %v1296_v13 = vpop.permute.xlu0 %1295 }
  0x82   : > { %v4301_v14 = vpop.permute.xlu2 %1279  ;;  %v1316_v19 = vrot.slane %v1313_v12, 4  ;;  %v1299_v20 = vrot.slane %v1296_v13, 4 }
  0x83   : > { %v1282_v15 = vrot.slane %v4301_v14, 4 }
  0x85   : > { %v1286_v16 = vsel %vm1284_vm2, %v4301_v14, %v1282_v15 }
  0x86   : > { %1290 = vst [vmem:[#allocation2 + $0x2e4] sm:$0xf] %v1286_v16 }
  0x87   : > { %1169 = vrot.lane.b32.xlu1 %v4238_v0, %s4142_s22  ;;  %1153 = vrot.lane.b32.xlu0 %v4248_v2, %s4141_s20  ;;  %s4162_s20 = smov 29  }
  0x88   : > { %1171 = vrot.lane.b32.xlu2 %v4248_v2, %s4142_s22  ;;  %s4163_s22 = smov 5  }
  0x89   : > { %v1315_v17 = vpop.permute.xlu1 %1314  ;;  %v1298_v18 = vpop.permute.xlu0 %1297 }
  0x8a   : > { %v1317_v21 = vrot.slane %v1315_v17, 4  ;;  %v1300_v22 = vrot.slane %v1298_v18, 4  ;;  %v4311_v23 = vpop.permute.xlu2 %715 }
  0x8b   : > { %v719_v8 = vrot.slane %v4311_v23, 4 }
  0x8c   : > { %v1318_v24 = vsel %vm216_vm0, %v1316_v19, %v1317_v21  ;;  %v1321_v25 = vsel %vm1319_vm3, %v1315_v17, %v1317_v21  ;;  %v1301_v26 = vsel %vm216_vm0, %v1299_v20, %v1300_v22  ;;  %v1303_v29 = vsel %vm362_vm4, %v1298_v18, %v1300_v22 }
  0x8d   : > { %v1320_v27 = vsel %vm1319_vm3, %v1313_v12, %v1318_v24  ;;  %1325 = vst [vmem:[#allocation2 + $0x2fc] sm:$0xf] %v1321_v25  ;;  %v1302_v28 = vsel %vm362_vm4, %v1296_v13, %v1301_v26  ;;  %vm992_vm3 = vcmask 195584  }
  0x8e   : > { %1324 = vst [vmem:[#allocation2 + $0x2f4] sm:$0xff] %v1320_v27 }
  0x8f   : > { %1306 = vst [vmem:[#allocation2 + $0x2e8] sm:$0xff] %v1302_v28  ;;  %411 = vrot.lane.b32.xlu1 %v4254_v3, %s4143_s24  ;;  %409 = vrot.lane.b32.xlu0 %v4244_v1, %s4143_s24  ;;  %s4164_s24 = smov 4  }
  0x90   : > { %1307 = vst [vmem:[#allocation2 + $0x2f0] sm:$0xf] %v1303_v29  ;;  %427 = vrot.lane.b32.xlu2 %v4244_v1, %s4144_s25 }
  0x91   : > { %v754_v30 = vpop.permute.xlu1 %753  ;;  %v752_v31 = vpop.permute.xlu0 %751 }
  0x92   : > { %v756_v32 = vrot.slane %v754_v30, 4  ;;  %v755_v33 = vrot.slane %v752_v31, 4  ;;  %v4320_v34 = vpop.permute.xlu2 %1225 }
  0x93   : > { %v1228_v35 = vrot.slane %v4320_v34, 4 }
  0x94   : > { %v760_v36 = vsel %vm758_vm5, %v754_v30, %v756_v32  ;;  %v757_v37 = vsel %vm216_vm0, %v755_v33, %v756_v32 }
  0x95   : > { %764 = vst [vmem:[#allocation2 + $0x17c] sm:$0xf] %v760_v36  ;;  %v759_v38 = vsel %vm758_vm5, %v752_v31, %v757_v37  ;;  %v3943_v39 = vld [vmem:[#allocation2 + $0x2f0] sm:$0xf0]  ;;  %v1232_v40 = vsel %vm1230_vm6, %v4320_v34, %v1228_v35  ;;  %vm452_vm5 = vcmask 809984  }
  0x96   : > { %763 = vst [vmem:[#allocation2 + $0x174] sm:$0xff] %v759_v38  ;;  %v3560_v41 = vld [vmem:[#allocation2 + $0x2e8] sm:$0xf] }
  0x97   : > { %589 = vrot.lane.b32.xlu1 %v4244_v1, %s4145_s26  ;;  %429 = vrot.lane.b32.xlu0 %v4254_v3, %s4144_s25  ;;  %v3561_v42 = vor.u32 %v3943_v39, %v3560_v41  ;;  %1236 = vst [vmem:[#allocation2 + $0x2c0] sm:$0xf] %v1232_v40  ;;  %s4165_s25 = smov 122  }
  0x98   : > { %591 = vrot.lane.b32.xlu2 %v4254_v3, %s4145_s26  ;;  %s4166_s26 = smov 121  }
  0x99   : > { %2522 = vmatpush.bf16.msra.mxu3 %v3561_v42  ;;  %v1278_v44 = vpop.permute.xlu1 %1277  ;;  %v1262_v45 = vpop.permute.xlu0 %1261 }
  0x9a   : > { %v1281_v46 = vrot.slane %v1278_v44, 4  ;;  %v1264_v47 = vrot.slane %v1262_v45, 4  ;;  %v4332_v48 = vpop.permute.xlu2 %661 }
  0x9b   : > { %v665_v32 = vrot.slane %v4332_v48, 4 }
  0x9c   : > { %v1265_v49 = vsel %vm216_vm0, %v1263_v43, %v1264_v47  ;;  %v1268_v50 = vsel %vm1266_vm7, %v1262_v45, %v1264_v47  ;;  %v1283_v51 = vsel %vm216_vm0, %v1281_v46, %v1282_v15 }
  0x9d   : > { %v1267_v52 = vsel %vm1266_vm7, %v4296_v11, %v1265_v49  ;;  %1272 = vst [vmem:[#allocation2 + $0x2d8] sm:$0xf] %v1268_v50  ;;  %v1285_v53 = vsel %vm1284_vm2, %v1278_v44, %v1283_v51  ;;  %v3895_v55 = vld [vmem:[#allocation2 + $0x170] sm:$0xf0]  ;;  %vm1212_vm2 = vcmask 891904   ;;  %vm1176_vm7 = vcmask 908288  }
  0x9e   : > { %1271 = vst [vmem:[#allocation2 + $0x2d0] sm:$0xff] %v1267_v52  ;;  %v3369_v56 = vor.u32 %v3895_v55, %v3368_v54 }
  0x9f   : > { %1289 = vst [vmem:[#allocation2 + $0x2dc] sm:$0xff] %v1285_v53  ;;  %609 = vrot.lane.b32.xlu1 %v4254_v3, %s4146_s27  ;;  %607 = vrot.lane.b32.xlu0 %v4244_v1, %s4146_s27  ;;  %s4167_s27 = smov 97  }
  0xa0   : > { %2496 = vmatpush.bf16.msra.mxu1 %v3369_v56  ;;  %949 = vrot.lane.b32.xlu2 %v4244_v1, %s4147_s28 }
  0xa1   : > { %v700_v57 = vpop.permute.xlu1 %699  ;;  %v698_v58 = vpop.permute.xlu0 %697 }
  0xa2   : > { %v702_v59 = vrot.slane %v700_v57, 4  ;;  %v701_v60 = vrot.slane %v698_v58, 4  ;;  %v4343_v61 = vpop.permute.xlu2 %681 }
  0xa3   : > { %v684_v62 = vrot.slane %v4343_v61, 4 }
  0xa4   : > { %v706_v63 = vsel %vm704_vm8, %v700_v57, %v702_v59  ;;  %v703_v0 = vsel %vm216_vm0, %v701_v60, %v702_v59 }
  0xa5   : > { %710 = vst [vmem:[#allocation2 + $0x158] sm:$0xf] %v706_v63  ;;  %v705_v2 = vsel %vm704_vm8, %v698_v58, %v703_v0  ;;  %v3548_v4 = vld [vmem:[#allocation2 + $0x2d0] sm:$0xf]  ;;  %v688_v5 = vsel %vm686_vm9, %v4343_v61, %v684_v62  ;;  %vm650_vm8 = vcmask 596992  }
  0xa6   : > { %709 = vst [vmem:[#allocation2 + $0x150] sm:$0xff] %v705_v2  ;;  %v3940_v6 = vld [vmem:[#allocation2 + $0x2d8] sm:$0xf0] }
  0xa7   : > { %967 = vrot.lane.b32.xlu1 %v4244_v1, %s4148_s29  ;;  %951 = vrot.lane.b32.xlu0 %v4254_v3, %s4147_s28  ;;  %v3549_v7 = vor.u32 %v3940_v6, %v3548_v4  ;;  %692 = vst [vmem:[#allocation2 + $0x14c] sm:$0xf] %v688_v5  ;;  %s4168_s28 = smov 96  }
  0xa8   : > { %969 = vrot.lane.b32.xlu2 %v4254_v3, %s4148_s29  ;;  %s4169_s29 = smov 32  }
  0xa9   : > { %2523 = vmatpush.bf16.msra.mxu3 %v3549_v7  ;;  %v1224_v9 = vpop.permute.xlu1 %1223  ;;  %v718_v10 = vpop.permute.xlu0 %717 }
  0xaa   : > { %v1227_v11 = vrot.slane %v1224_v9, 4  ;;  %v720_v12 = vrot.slane %v718_v10, 4  ;;  %v4355_v13 = vpop.permute.xlu2 %1039 }
  0xab   : > { %v1043_v59 = vrot.slane %v4355_v13, 4 }
  0xac   : > { %v1229_v14 = vsel %vm216_vm0, %v1227_v11, %v1228_v35  ;;  %v721_v15 = vsel %vm216_vm0, %v719_v8, %v720_v12  ;;  %v724_v16 = vsel %vm722_vm10, %v718_v10, %v720_v12 }
  0xad   : > { %v1231_v17 = vsel %vm1230_vm6, %v1224_v9, %v1229_v14  ;;  %v723_v18 = vsel %vm722_vm10, %v4311_v23, %v721_v15  ;;  %728 = vst [vmem:[#allocation2 + $0x164] sm:$0xf] %v724_v16  ;;  %v3356_v29 = vld [vmem:[#allocation2 + $0x150] sm:$0xf]  ;;  %vm632_vm6 = vcmask 605184   ;;  %vm1010_vm10 = vcmask 64512  }
  0xae   : > { %1235 = vst [vmem:[#allocation2 + $0x2b8] sm:$0xff] %v1231_v17 }
  0xaf   : > { %727 = vst [vmem:[#allocation2 + $0x15c] sm:$0xff] %v723_v18  ;;  %1131 = vrot.lane.b32.xlu1 %v4254_v3, %s4149_s30  ;;  %1129 = vrot.lane.b32.xlu0 %v4244_v1, %s4149_s30  ;;  %s4170_s30 = smov 31  }
  0xb0   : > { %373 = vrot.lane.b32.xlu2 %v4244_v1, %s4150_s5 }
  0xb1   : > { %v1244_v19 = vpop.permute.xlu1 %1243  ;;  %v1242_v20 = vpop.permute.xlu0 %1241 }
  0xb2   : > { %v1246_v21 = vrot.slane %v1244_v19, 4  ;;  %v1245_v22 = vrot.slane %v1242_v20, 4  ;;  %v4366_v24 = vpop.permute.xlu2 %1189 }
  0xb3   : > { %v1192_v23 = vrot.slane %v4366_v24, 4 }
  0xb4   : > { %v1250_v25 = vsel %vm1248_vm11, %v1244_v19, %v1246_v21  ;;  %v1247_v26 = vsel %vm216_vm0, %v1245_v22, %v1246_v21 }
  0xb5   : > { %1254 = vst [vmem:[#allocation2 + $0x2cc] sm:$0xf] %v1250_v25  ;;  %v1249_v27 = vsel %vm1248_vm11, %v1242_v20, %v1247_v26  ;;  %v1196_v28 = vsel %vm1194_vm12, %v4366_v24, %v1192_v23  ;;  %v3536_v43 = vld [vmem:[#allocation2 + $0x2b8] sm:$0xf]  ;;  %vm596_vm11 = vcmask 621568  }
  0xb6   : > { %1253 = vst [vmem:[#allocation2 + $0x2c4] sm:$0xff] %v1249_v27  ;;  %v3892_v30 = vld [vmem:[#allocation2 + $0x158] sm:$0xf0] }
  0xb7   : > { %391 = vrot.lane.b32.xlu1 %v4244_v1, %s4151_s6  ;;  %375 = vrot.lane.b32.xlu0 %v4254_v3, %s4150_s5  ;;  %v3357_v31 = vor.u32 %v3892_v30, %v3356_v29  ;;  %1200 = vst [vmem:[#allocation2 + $0x2a8] sm:$0xf] %v1196_v28  ;;  %s4171_s5 = smov 58  }
  0xb8   : > { %393 = vrot.lane.b32.xlu2 %v4254_v3, %s4151_s6  ;;  %s4172_s6 = smov 57  }
  0xb9   : > { %2497 = vmatpush.bf16.msra.mxu1 %v3357_v31  ;;  %v680_v33 = vpop.permute.xlu1 %679  ;;  %v664_v34 = vpop.permute.xlu0 %663 }
  0xba   : > { %v683_v35 = vrot.slane %v680_v33, 4  ;;  %v666_v36 = vrot.slane %v664_v34, 4  ;;  %v4378_v37 = vpop.permute.xlu2 %445 }
  0xbb   : > { %v449_v21 = vrot.slane %v4378_v37, 4 }
  0xbc   : > { %v667_v38 = vsel %vm216_vm0, %v665_v32, %v666_v36  ;;  %v670_v39 = vsel %vm668_vm13, %v664_v34, %v666_v36  ;;  %v685_v40 = vsel %vm216_vm0, %v683_v35, %v684_v62 }
  0xbd   : > { %v669_v41 = vsel %vm668_vm13, %v4332_v48, %v667_v38  ;;  %674 = vst [vmem:[#allocation2 + $0x140] sm:$0xf] %v670_v39  ;;  %v687_v42 = vsel %vm686_vm9, %v680_v33, %v685_v40  ;;  %v3937_v44 = vld [vmem:[#allocation2 + $0x2c0] sm:$0xf0]  ;;  %vm416_vm13 = vcmask 826368  }
  0xbe   : > { %673 = vst [vmem:[#allocation2 + $0x138] sm:$0xff] %v669_v41  ;;  %v3537_v45 = vor.u32 %v3937_v44, %v3536_v43 }
  0xbf   : > { %691 = vst [vmem:[#allocation2 + $0x144] sm:$0xff] %v687_v42  ;;  %555 = vrot.lane.b32.xlu1 %v4254_v3, %s4152_s8  ;;  %553 = vrot.lane.b32.xlu0 %v4244_v1, %s4152_s8  ;;  %s4173_s8 = smov 124  }
  0xc0   : > { %2524 = vmatpush.bf16.msra.mxu3 %v3537_v45  ;;  %571 = vrot.lane.b32.xlu2 %v4244_v1, %s4153_s9 }
  0xc1   : > { %v1024_v46 = vpop.permute.xlu1 %1023  ;;  %v1022_v47 = vpop.permute.xlu0 %1021 }
  0xc2   : > { %v1026_v48 = vrot.slane %v1024_v46, 4  ;;  %v1025_v49 = vrot.slane %v1022_v47, 4  ;;  %v4389_v50 = vpop.permute.xlu2 %465 }
  0xc3   : > { %v468_v51 = vrot.slane %v4389_v50, 4 }
  0xc4   : > { %v1030_v52 = vsel %vm1028_vm14, %v1024_v46, %v1026_v48  ;;  %v1027_v53 = vsel %vm216_vm0, %v1025_v49, %v1026_v48 }
  0xc5   : > { %1034 = vst [vmem:[#allocation2 + $0x230] sm:$0xf] %v1030_v52  ;;  %v1029_v54 = vsel %vm1028_vm14, %v1022_v47, %v1027_v53  ;;  %v3344_v55 = vld [vmem:[#allocation2 + $0x138] sm:$0xf]  ;;  %v472_v56 = vsel %vm470_vm15, %v4389_v50, %v468_v51  ;;  %vm974_vm14 = vcmask 203776  }
  0xc6   : > { %1033 = vst [vmem:[#allocation2 + $0x228] sm:$0xff] %v1029_v54  ;;  %v3889_v57 = vld [vmem:[#allocation2 + $0x140] sm:$0xf0] }
  0xc7   : > { %913 = vrot.lane.b32.xlu1 %v4244_v1, %s4154_s10  ;;  %573 = vrot.lane.b32.xlu0 %v4254_v3, %s4153_s9  ;;  %v3345_v58 = vor.u32 %v3889_v57, %v3344_v55  ;;  %476 = vst [vmem:[#allocation2 + $0xbc] sm:$0xf] %v472_v56  ;;  %s4174_s9 = smov 123  }
  0xc8   : > { %915 = vrot.lane.b32.xlu2 %v4254_v3, %s4154_s10  ;;  %s4175_s10 = smov 49  }
  0xc9   : > { %2498 = vmatpush.bf16.msra.mxu1 %v3345_v58  ;;  %v1188_v60 = vpop.permute.xlu1 %1187  ;;  %v1042_v61 = vpop.permute.xlu0 %1041 }
  0xca   : > { %v1191_v62 = vrot.slane %v1188_v60, 4  ;;  %v1044_v63 = vrot.slane %v1042_v61, 4  ;;  %v4401_v0 = vpop.permute.xlu2 %643 }
  0xcb   : > { %v647_v48 = vrot.slane %v4401_v0, 4 }
  0xcc   : > { %v1045_v2 = vsel %vm216_vm0, %v1043_v59, %v1044_v63  ;;  %v1048_v4 = vsel %vm1046_vm1, %v1042_v61, %v1044_v63  ;;  %v1193_v5 = vsel %vm216_vm0, %v1191_v62, %v1192_v23 }
  0xcd   : > { %v1047_v6 = vsel %vm1046_vm1, %v4355_v13, %v1045_v2  ;;  %1052 = vst [vmem:[#allocation2 + $0x23c] sm:$0xf] %v1048_v4  ;;  %v1195_v7 = vsel %vm1194_vm12, %v1188_v60, %v1193_v5  ;;  %v3464_v17 = vld [vmem:[#allocation2 + $0x228] sm:$0xf]  ;;  %vm1158_vm12 = vcmask 916480   ;;  %vm614_vm1 = vcmask 613376  }
  0xce   : > { %1051 = vst [vmem:[#allocation2 + $0x234] sm:$0xff] %v1047_v6 }
  0xcf   : > { %1199 = vst [vmem:[#allocation2 + $0x2a0] sm:$0xff] %v1195_v7  ;;  %933 = vrot.lane.b32.xlu1 %v4254_v3, %s4155_s11  ;;  %931 = vrot.lane.b32.xlu0 %v4244_v1, %s4155_s11  ;;  %s4176_s11 = smov 48  }
  0xd0   : > { %1093 = vrot.lane.b32.xlu2 %v4244_v1, %s4156_s12 }
  0xd1   : > { %v1208_v8 = vpop.permute.xlu1 %1207  ;;  %v1206_v9 = vpop.permute.xlu0 %1205 }
  0xd2   : > { %v1210_v10 = vrot.slane %v1208_v8, 4  ;;  %v1209_v11 = vrot.slane %v1206_v9, 4  ;;  %v4412_v12 = vpop.permute.xlu2 %987 }
  0xd3   : > { %v990_v13 = vrot.slane %v4412_v12, 4 }
  0xd4   : > { %v1214_v14 = vsel %vm1212_vm2, %v1208_v8, %v1210_v10  ;;  %v1211_v15 = vsel %vm216_vm0, %v1209_v11, %v1210_v10  ;;  %v4475_v10 = vld [vmem:[%s4235_s21 + $0x8] sm:$0xff] }
  0xd5   : > { %1218 = vst [vmem:[#allocation2 + $0x2b4] sm:$0xf] %v1214_v14  ;;  %v1213_v16 = vsel %vm1212_vm2, %v1206_v9, %v1211_v15  ;;  %v3919_v18 = vld [vmem:[#allocation2 + $0x230] sm:$0xf0]  ;;  %v994_v19 = vsel %vm992_vm3, %v4412_v12, %v990_v13  ;;  %vm398_vm2 = vcmask 834560  }
  0xd6   : > { %1217 = vst [vmem:[#allocation2 + $0x2ac] sm:$0xff] %v1213_v16  ;;  %v3465_v20 = vor.u32 %v3919_v18, %v3464_v17  ;;  %v3524_v32 = vld [vmem:[#allocation2 + $0x2a0] sm:$0xf] }
  0xd7   : > { %1111 = vrot.lane.b32.xlu1 %v4244_v1, %s4157_s13  ;;  %1095 = vrot.lane.b32.xlu0 %v4254_v3, %s4156_s12  ;;  %998 = vst [vmem:[#allocation2 + $0x218] sm:$0xf] %v994_v19  ;;  %s4177_s12 = smov 60  }
  0xd8   : > { %2509 = vmatpush.bf16.msra.mxu2 %v3465_v20  ;;  %1113 = vrot.lane.b32.xlu2 %v4254_v3, %s4157_s13  ;;  %s4178_s13 = smov 59  }
  0xd9   : > { %v464_v22 = vpop.permute.xlu1 %463  ;;  %v448_v24 = vpop.permute.xlu0 %447 }
  0xda   : > { %v467_v23 = vrot.slane %v464_v22, 4  ;;  %v450_v25 = vrot.slane %v448_v24, 4  ;;  %v4424_v26 = vpop.permute.xlu2 %1151 }
  0xdb   : > { %v1155_v11 = vrot.slane %v4424_v26, 4 }
  0xdc   : > { %v451_v27 = vsel %vm216_vm0, %v449_v21, %v450_v25  ;;  %v454_v28 = vsel %vm452_vm5, %v448_v24, %v450_v25  ;;  %v469_v29 = vsel %vm216_vm0, %v467_v23, %v468_v51  ;;  %v4490_v25 = vld [vmem:[%s4235_s21] sm:$0xff] }
  0xdd   : > { %v453_v30 = vsel %vm452_vm5, %v4378_v37, %v451_v27  ;;  %458 = vst [vmem:[#allocation2 + $0xb0] sm:$0xf] %v454_v28  ;;  %v471_v31 = vsel %vm470_vm15, %v464_v22, %v469_v29  ;;  %v3934_v33 = vld [vmem:[#allocation2 + $0x2a8] sm:$0xf0]  ;;  %vm434_vm15 = vcmask 818176   ;;  %vm1136_vm5 = vcmask 7168  }
  0xde   : > { %457 = vst [vmem:[#allocation2 + $0xa8] sm:$0xff] %v453_v30  ;;  %v3525_v34 = vor.u32 %v3934_v33, %v3524_v32 }
  0xdf   : > { %475 = vst [vmem:[#allocation2 + $0xb4] sm:$0xff] %v471_v31  ;;  %339 = vrot.lane.b32.xlu1 %v4254_v3, %s4158_s14  ;;  %337 = vrot.lane.b32.xlu0 %v4244_v1, %s4158_s14  ;;  %s4179_s14 = smov 126  }
  0xe0   : > { %2525 = vmatpush.bf16.msra.mxu3 %v3525_v34  ;;  %355 = vrot.lane.b32.xlu2 %v4244_v1, %s4120_s23 }
  0xe1   : > { %v628_v35 = vpop.permute.xlu1 %627  ;;  %v626_v36 = vpop.permute.xlu0 %625 }
  0xe2   : > { %v630_v37 = vrot.slane %v628_v35, 4  ;;  %v629_v38 = vrot.slane %v626_v36, 4  ;;  %v4436_v39 = vpop.permute.xlu2 %1171 }
  0xe3   : > { %v1174_v40 = vrot.slane %v4436_v39, 4 }
  0xe4   : > { %v634_v41 = vsel %vm632_vm6, %v628_v35, %v630_v37  ;;  %v631_v42 = vsel %vm216_vm0, %v629_v38, %v630_v37  ;;  %v4504_v37 = vld [vmem:[%s4235_s21 + $0x4] sm:$0xff]  ;;  %v1144_v38 = vld [vmem:[%s4235_s21 + $0xc] sm:$0xf] }
  0xe5   : > { %638 = vst [vmem:[#allocation2 + $0x128] sm:$0xf] %v634_v41  ;;  %v633_v43 = vsel %vm632_vm6, %v626_v36, %v631_v42  ;;  %v3272_v44 = vld [vmem:[#allocation2 + $0xa8] sm:$0xf]  ;;  %v1178_v45 = vsel %vm1176_vm7, %v4436_v39, %v1174_v40  ;;  %vm920_vm6 = vcmask 228352  }
  0xe6   : > { %637 = vst [vmem:[#allocation2 + $0x120] sm:$0xff] %v633_v43  ;;  %v3871_v46 = vld [vmem:[#allocation2 + $0xb0] sm:$0xf0] }
  0xe7   : > { %517 = vrot.lane.b32.xlu1 %v4244_v1, %s4159_s17  ;;  %357 = vrot.lane.b32.xlu0 %v4254_v3, %s4120_s23  ;;  %v3273_v47 = vor.u32 %v3871_v46, %v3272_v44  ;;  %1182 = vst [vmem:[#allocation2 + $0x29c] sm:$0xf] %v1178_v45 }
  0xe8   : > { %519 = vrot.lane.b32.xlu2 %v4254_v3, %s4159_s17  ;;  %1145 = vst [vmem:[#allocation2 + $0x27c] sm:$0xff] %v4504_v37 }
  0xe9   : > { %2483 = vmatpush.bf16.msra.mxu0 %v3273_v47  ;;  %v986_v49 = vpop.permute.xlu1 %985  ;;  %v646_v50 = vpop.permute.xlu0 %645  ;;  %1146 = vst [vmem:[#allocation2 + $0x284] sm:$0xf] %v1144_v38 }
  0xea   : > { %v989_v51 = vrot.slane %v986_v49, 4  ;;  %v648_v52 = vrot.slane %v646_v50, 4  ;;  %v4451_v53 = vpop.permute.xlu2 %427 }
  0xeb   : > { %v431_v39 = vrot.slane %v4451_v53, 4 }
  0xec   : > { %v649_v54 = vsel %vm216_vm0, %v647_v48, %v648_v52  ;;  %v652_v55 = vsel %vm650_vm8, %v646_v50, %v648_v52  ;;  %v991_v56 = vsel %vm216_vm0, %v989_v51, %v990_v13 }
  0xed   : > { %v651_v57 = vsel %vm650_vm8, %v4401_v0, %v649_v54  ;;  %656 = vst [vmem:[#allocation2 + $0x134] sm:$0xf] %v652_v55  ;;  %v993_v58 = vsel %vm992_vm3, %v986_v49, %v991_v56  ;;  %v3332_v6 = vld [vmem:[#allocation2 + $0x120] sm:$0xf]  ;;  %vm956_vm3 = vcmask 211968   ;;  %vm560_vm8 = vcmask 637952  }
  0xee   : > { %655 = vst [vmem:[#allocation2 + $0x12c] sm:$0xff] %v651_v57 }
  0xef   : > { %997 = vst [vmem:[#allocation2 + $0x210] sm:$0xff] %v993_v58  ;;  %537 = vrot.lane.b32.xlu1 %v4254_v3, %s4160_s18  ;;  %535 = vrot.lane.b32.xlu0 %v4244_v1, %s4160_s18  ;;  %s4180_s18 = smov 125  }
  0xf0   : > { %877 = vrot.lane.b32.xlu2 %v4244_v1, %s4161_s19 }
  0xf1   : > { %v1006_v59 = vpop.permute.xlu1 %1005  ;;  %v1004_v60 = vpop.permute.xlu0 %1003 }
  0xf2   : > { %v1008_v61 = vrot.slane %v1006_v59, 4  ;;  %v1007_v62 = vrot.slane %v1004_v60, 4  ;;  %v4462_v63 = vpop.permute.xlu2 %591 }
  0xf3   : > { %v594_v0 = vrot.slane %v4462_v63, 4 }
  0xf4   : > { %v1012_v2 = vsel %vm1010_vm10, %v1006_v59, %v1008_v61  ;;  %v1009_v4 = vsel %vm216_vm0, %v1007_v62, %v1008_v61 }
  0xf5   : > { %1016 = vst [vmem:[#allocation2 + $0x224] sm:$0xf] %v1012_v2  ;;  %v1011_v5 = vsel %vm1010_vm10, %v1004_v60, %v1009_v4  ;;  %v3886_v7 = vld [vmem:[#allocation2 + $0x128] sm:$0xf0]  ;;  %v598_v8 = vsel %vm596_vm11, %v4462_v63, %v594_v0 }
  0xf6   : > { %1015 = vst [vmem:[#allocation2 + $0x21c] sm:$0xff] %v1011_v5  ;;  %v3333_v9 = vor.u32 %v3886_v7, %v3332_v6  ;;  %v3452_v22 = vld [vmem:[#allocation2 + $0x210] sm:$0xf] }
  0xf7   : > { %895 = vrot.lane.b32.xlu1 %v4244_v1, %s4162_s20  ;;  %879 = vrot.lane.b32.xlu0 %v4254_v3, %s4161_s19  ;;  %602 = vst [vmem:[#allocation2 + $0x110] sm:$0xf] %v598_v8  ;;  %s4181_s19 = smov 51  }
  0xf8   : > { %2499 = vmatpush.bf16.msra.mxu1 %v3333_v9  ;;  %897 = vrot.lane.b32.xlu2 %v4475_v10, %s4162_s20  ;;  %s4182_s20 = smov 50  }
  0xf9   : > { %v1170_v12 = vpop.permute.xlu1 %1169  ;;  %v1154_v13 = vpop.permute.xlu0 %1153 }
  0xfa   : > { %v1173_v14 = vrot.slane %v1170_v12, 4  ;;  %v1156_v15 = vrot.slane %v1154_v13, 4  ;;  %v4479_v16 = vpop.permute.xlu2 %949 }
  0xfb   : > { %v953_v63 = vrot.slane %v4479_v16, 4 }
  0xfc   : > { %v1157_v17 = vsel %vm216_vm0, %v1155_v11, %v1156_v15  ;;  %v1160_v18 = vsel %vm1158_vm12, %v1154_v13, %v1156_v15  ;;  %v1175_v19 = vsel %vm216_vm0, %v1173_v14, %v1174_v40 }
  0xfd   : > { %v1159_v20 = vsel %vm1158_vm12, %v4424_v26, %v1157_v17  ;;  %1164 = vst [vmem:[#allocation2 + $0x290] sm:$0xf] %v1160_v18  ;;  %v1177_v21 = vsel %vm1176_vm7, %v1170_v12, %v1175_v19  ;;  %v3916_v24 = vld [vmem:[#allocation2 + $0x218] sm:$0xf0]  ;;  %vm380_vm7 = vcmask 842752   ;;  %vm578_vm12 = vcmask 629760  }
  0xfe   : > { %1163 = vst [vmem:[#allocation2 + $0x288] sm:$0xff] %v1159_v20  ;;  %v3453_v23 = vor.u32 %v3916_v24, %v3452_v22 }
  0xff   : > { %1181 = vst [vmem:[#allocation2 + $0x294] sm:$0xff] %v1177_v21  ;;  %1059 = vrot.lane.b32.xlu1 %v4254_v3, %s4163_s22  ;;  %1057 = vrot.lane.b32.xlu0 %v4244_v1, %s4163_s22  ;;  %s4183_s22 = smov 62  }
 0x100   : > { %2510 = vmatpush.bf16.msra.mxu2 %v3453_v23  ;;  %1075 = vrot.lane.b32.xlu2 %v4490_v25, %s4164_s24 }
 0x101   : > { %v412_v26 = vpop.permute.xlu1 %411  ;;  %v410_v27 = vpop.permute.xlu0 %409 }
 0x102   : > { %v414_v28 = vrot.slane %v412_v26, 4  ;;  %v413_v29 = vrot.slane %v410_v27, 4  ;;  %v4493_v30 = vpop.permute.xlu2 %969 }
 0x103   : > { %v972_v3 = vrot.slane %v4493_v30, 4 }
 0x104   : > { %v418_v31 = vsel %vm416_vm13, %v412_v26, %v414_v28  ;;  %v415_v1 = vsel %vm216_vm0, %v413_v29, %v414_v28 }
 0x105   : > { %422 = vst [vmem:[#allocation2 + $0x98] sm:$0xf] %v418_v31  ;;  %v417_v32 = vsel %vm416_vm13, %v410_v27, %v415_v1  ;;  %v3512_v33 = vld [vmem:[#allocation2 + $0x288] sm:$0xf]  ;;  %v976_v34 = vsel %vm974_vm14, %v4493_v30, %v972_v3  ;;  %v4555_v30 = vld [vmem:[%s4235_s21 + $0xc] sm:$0xff]  ;;  %vm938_vm13 = vcmask 220160  }
 0x106   : > { %421 = vst [vmem:[#allocation2 + $0x90] sm:$0xff] %v417_v32  ;;  %v3931_v35 = vld [vmem:[#allocation2 + $0x290] sm:$0xf0] }
 0x107   : > { %1077 = vrot.lane.b32.xlu0 %v4475_v10, %s4164_s24  ;;  %301 = vrot.lane.b32.xlu1 %v4490_v25, %s4165_s25  ;;  %v3513_v36 = vor.u32 %v3931_v35, %v3512_v33  ;;  %980 = vst [vmem:[#allocation2 + $0x20c] sm:$0xf] %v976_v34  ;;  %v3928_v35 = vld [vmem:[#allocation2 + $0x278] sm:$0xf0]  ;;  %s4184_s24 = smov 61  }
 0x108   : > { %303 = vrot.lane.b32.xlu2 %v4475_v10, %s4165_s25  ;;  %s4185_s25 = smov 127  }
 0x109   : > { %2526 = vmatpush.bf16.msra.mxu3 %v3513_v36  ;;  %v590_v40 = vpop.permute.xlu1 %589  ;;  %v430_v41 = vpop.permute.xlu0 %429 }
 0x10a   : > { %v593_v42 = vrot.slane %v590_v40, 4  ;;  %v432_v43 = vrot.slane %v430_v41, 4  ;;  %v4510_v44 = vpop.permute.xlu2 %373 }
 0x10c   : > { %v595_v45 = vsel %vm216_vm0, %v593_v42, %v594_v0  ;;  %v433_v46 = vsel %vm216_vm0, %v431_v39, %v432_v43  ;;  %v436_v47 = vsel %vm434_vm15, %v430_v41, %v432_v43 }
 0x10d   : > { %v597_v48 = vsel %vm596_vm11, %v590_v40, %v595_v45  ;;  %v435_v49 = vsel %vm434_vm15, %v4451_v53, %v433_v46  ;;  %440 = vst [vmem:[#allocation2 + $0xa4] sm:$0xf] %v436_v47  ;;  %v3260_v60 = vld [vmem:[#allocation2 + $0x90] sm:$0xf]  ;;  %vm1118_vm11 = vcmask 15360   ;;  %vm1100_vm15 = vcmask 23552  }
 0x10e   : > { %601 = vst [vmem:[#allocation2 + $0x108] sm:$0xff] %v597_v48 }
 0x10f   : > { %439 = vst [vmem:[#allocation2 + $0x9c] sm:$0xff] %v435_v49  ;;  %319 = vrot.lane.b32.xlu0 %v4490_v25, %s4166_s26  ;;  %321 = vrot.lane.b32.xlu1 %v4475_v10, %s4166_s26  ;;  %s4186_s26 = smov 64  }
 0x110   : > { %481 = vrot.lane.b32.xlu2 %v4490_v25, %s4167_s27 }
 0x111   : > { %v610_v50 = vpop.permute.xlu1 %609  ;;  %v608_v51 = vpop.permute.xlu0 %607 }
 0x112   : > { %v612_v52 = vrot.slane %v610_v50, 4  ;;  %v611_v54 = vrot.slane %v608_v51, 4  ;;  %v4521_v55 = vpop.permute.xlu2 %393 }
 0x113   : > { %v396_v53 = vrot.slane %v4521_v55, 4 }
 0x114   : > { %v616_v56 = vsel %vm614_vm1, %v610_v50, %v612_v52  ;;  %v613_v57 = vsel %vm216_vm0, %v611_v54, %v612_v52 }
 0x115   : > { %620 = vst [vmem:[#allocation2 + $0x11c] sm:$0xf] %v616_v56  ;;  %v615_v58 = vsel %vm614_vm1, %v608_v51, %v613_v57  ;;  %v400_v59 = vsel %vm398_vm2, %v4521_v55, %v396_v53  ;;  %v3320_v13 = vld [vmem:[#allocation2 + $0x108] sm:$0xf]  ;;  %vm344_vm1 = vcmask 982016  }
 0x116   : > { %619 = vst [vmem:[#allocation2 + $0x114] sm:$0xff] %v615_v58  ;;  %v3868_v61 = vld [vmem:[#allocation2 + $0x98] sm:$0xf0] }
 0x117   : > { %483 = vrot.lane.b32.xlu0 %v4475_v10, %s4167_s27  ;;  %499 = vrot.lane.b32.xlu1 %v4490_v25, %s4168_s28  ;;  %v3261_v62 = vor.u32 %v3868_v61, %v3260_v60  ;;  %404 = vst [vmem:[#allocation2 + $0x8c] sm:$0xf] %v400_v59  ;;  %s4187_s27 = smov 63  }
 0x118   : > { %501 = vrot.lane.b32.xlu2 %v4475_v10, %s4168_s28  ;;  %s4188_s28 = smov 81  }
 0x119   : > { %2484 = vmatpush.bf16.msra.mxu0 %v3261_v62  ;;  %v968_v0 = vpop.permute.xlu1 %967  ;;  %v952_v2 = vpop.permute.xlu0 %951 }
 0x11a   : > { %v971_v4 = vrot.slane %v968_v0, 4  ;;  %v954_v5 = vrot.slane %v952_v2, 4  ;;  %v4533_v6 = vpop.permute.xlu2 %571 }
 0x11b   : > { %v575_v57 = vrot.slane %v4533_v6, 4 }
 0x11c   : > { %v973_v7 = vsel %vm216_vm0, %v971_v4, %v972_v3  ;;  %v955_v8 = vsel %vm216_vm0, %v953_v63, %v954_v5  ;;  %v958_v9 = vsel %vm956_vm3, %v952_v2, %v954_v5  ;;  %v377_v3 = vrot.slane %v4510_v44, 4 }
 0x11d   : > { %v975_v11 = vsel %vm974_vm14, %v968_v0, %v973_v7  ;;  %v957_v12 = vsel %vm956_vm3, %v4479_v16, %v955_v8  ;;  %962 = vst [vmem:[#allocation2 + $0x200] sm:$0xf] %v958_v9  ;;  %v3883_v14 = vld [vmem:[#allocation2 + $0x110] sm:$0xf0]  ;;  %vm524_vm14 = vcmask 654336   ;;  %vm542_vm3 = vcmask 646144  }
 0x11e   : > { %979 = vst [vmem:[#allocation2 + $0x204] sm:$0xff] %v975_v11  ;;  %v3321_v15 = vor.u32 %v3883_v14, %v3320_v13 }
 0x11f   : > { %961 = vst [vmem:[#allocation2 + $0x1f8] sm:$0xff] %v957_v12  ;;  %841 = vrot.lane.b32.xlu0 %v4490_v25, %s4169_s29  ;;  %843 = vrot.lane.b32.xlu1 %v4475_v10, %s4169_s29  ;;  %s4191_s29 = smov 85  }
 0x120   : > { %2500 = vmatpush.bf16.msra.mxu1 %v3321_v15  ;;  %859 = vrot.lane.b32.xlu2 %v4490_v25, %s4170_s30 }
 0x121   : > { %v1132_v17 = vpop.permute.xlu1 %1131  ;;  %v1130_v18 = vpop.permute.xlu0 %1129 }
 0x122   : > { %v1134_v19 = vrot.slane %v1132_v17, 4  ;;  %v1133_v16 = vrot.slane %v1130_v18, 4  ;;  %v4544_v20 = vpop.permute.xlu2 %915 }
 0x123   : > { %v918_v21 = vrot.slane %v4544_v20, 4 }
 0x124   : > { %v1138_v22 = vsel %vm1136_vm5, %v1132_v17, %v1134_v19  ;;  %v1135_v24 = vsel %vm216_vm0, %v1133_v16, %v1134_v19 }
 0x125   : > { %1142 = vst [vmem:[#allocation2 + $0x278] sm:$0xf] %v1138_v22  ;;  %v1137_v23 = vsel %vm1136_vm5, %v1130_v18, %v1135_v24  ;;  %v3913_v26 = vld [vmem:[#allocation2 + $0x200] sm:$0xf0]  ;;  %v922_v27 = vsel %vm920_vm6, %v4544_v20, %v918_v21  ;;  %vm308_vm5 = vcmask 998400  }
 0x126   : > { %1141 = vst [vmem:[#allocation2 + $0x270] sm:$0xff] %v1137_v23  ;;  %v3440_v28 = vld [vmem:[#allocation2 + $0x1f8] sm:$0xf] }
 0x127   : > { %861 = vrot.lane.b32.xlu0 %v4475_v10, %s4170_s30  ;;  %1581 = vrot.lane.b32.xlu1 %v4504_v37, %s4171_s5  ;;  %v3441_v29 = vor.u32 %v3913_v26, %v3440_v28  ;;  %926 = vst [vmem:[#allocation2 + $0x1e8] sm:$0xf] %v922_v27  ;;  %s4192_s30 = smov 84  }
 0x128   : > { %1583 = vrot.lane.b32.xlu2 %v4555_v30, %s4171_s5  ;;  %s4193_s5 = smov 87  }
 0x129   : > { %2511 = vmatpush.bf16.msra.mxu2 %v3441_v29  ;;  %v392_v31 = vpop.permute.xlu1 %391  ;;  %v376_v1 = vpop.permute.xlu0 %375 }
 0x12a   : > { %v395_v32 = vrot.slane %v392_v31, 4  ;;  %v378_v33 = vrot.slane %v376_v1, 4  ;;  %v4559_v34 = vpop.permute.xlu2 %1093 }
 0x12b   : > { %v1097_v20 = vrot.slane %v4559_v34, 4 }
 0x12c   : > { %v379_v36 = vsel %vm216_vm0, %v377_v3, %v378_v33  ;;  %v382_v38 = vsel %vm380_vm7, %v376_v1, %v378_v33  ;;  %v397_v39 = vsel %vm216_vm0, %v395_v32, %v396_v53 }
 0x12d   : > { %v381_v40 = vsel %vm380_vm7, %v4510_v44, %v379_v36  ;;  %386 = vst [vmem:[#allocation2 + $0x80] sm:$0xf] %v382_v38  ;;  %v399_v41 = vsel %vm398_vm2, %v392_v31, %v397_v39  ;;  %v3500_v42 = vld [vmem:[#allocation2 + $0x270] sm:$0xf]  ;;  %vm902_vm2 = vcmask 236544  }
 0x12e   : > { %385 = vst [vmem:[#allocation2 + $0x78] sm:$0xff] %v381_v40  ;;  %v3501_v43 = vor.u32 %v3928_v35, %v3500_v42 }
 0x12f   : > { %403 = vst [vmem:[#allocation2 + $0x84] sm:$0xff] %v399_v41  ;;  %1599 = vrot.lane.b32.xlu0 %v4504_v37, %s4172_s6  ;;  %1601 = vrot.lane.b32.xlu1 %v4555_v30, %s4172_s6  ;;  %s4194_s6 = smov 86  }
 0x130   : > { %2527 = vmatpush.bf16.msra.mxu3 %v3501_v43  ;;  %265 = vrot.lane.b32.xlu2 %v4490_v25, %s4173_s8 }
 0x131   : > { %v556_v45 = vpop.permute.xlu1 %555  ;;  %v554_v46 = vpop.permute.xlu0 %553 }
 0x132   : > { %v558_v44 = vrot.slane %v556_v45, 4  ;;  %v557_v47 = vrot.slane %v554_v46, 4  ;;  %v4572_v48 = vpop.permute.xlu2 %1113 }
 0x133   : > { %v1116_v49 = vrot.slane %v4572_v48, 4 }
 0x134   : > { %v562_v50 = vsel %vm560_vm8, %v556_v45, %v558_v44  ;;  %v559_v51 = vsel %vm216_vm0, %v557_v47, %v558_v44 }
 0x135   : > { %566 = vst [vmem:[#allocation2 + $0xf8] sm:$0xf] %v562_v50  ;;  %v561_v52 = vsel %vm560_vm8, %v554_v46, %v559_v51  ;;  %v3248_v54 = vld [vmem:[#allocation2 + $0x78] sm:$0xf]  ;;  %v1120_v55 = vsel %vm1118_vm11, %v4572_v48, %v1116_v49  ;;  %vm1064_vm8 = vcmask 39936  }
 0x136   : > { %565 = vst [vmem:[#allocation2 + $0xf0] sm:$0xff] %v561_v52  ;;  %v3865_v53 = vld [vmem:[#allocation2 + $0x80] sm:$0xf0] }
 0x137   : > { %283 = vrot.lane.b32.xlu1 %v4490_v25, %s4174_s9  ;;  %267 = vrot.lane.b32.xlu0 %v4475_v10, %s4173_s8  ;;  %v3249_v56 = vor.u32 %v3865_v53, %v3248_v54  ;;  %1124 = vst [vmem:[#allocation2 + $0x26c] sm:$0xf] %v1120_v55 }
 0x138   : > { %285 = vrot.lane.b32.xlu2 %v4475_v10, %s4174_s9 }
 0x139   : > { %2485 = vmatpush.bf16.msra.mxu0 %v3249_v56  ;;  %v914_v58 = vpop.permute.xlu1 %913  ;;  %v574_v59 = vpop.permute.xlu0 %573 }
 0x13a   : > { %v917_v60 = vrot.slane %v914_v58, 4  ;;  %v576_v61 = vrot.slane %v574_v59, 4  ;;  %v4584_v62 = vpop.permute.xlu2 %355 }
 0x13b   : > { %v359_v48 = vrot.slane %v4584_v62, 4 }
 0x13c   : > { %v577_v63 = vsel %vm216_vm0, %v575_v57, %v576_v61  ;;  %v580_v0 = vsel %vm578_vm12, %v574_v59, %v576_v61  ;;  %v919_v2 = vsel %vm216_vm0, %v917_v60, %v918_v21 }
 0x13d   : > { %v579_v4 = vsel %vm578_vm12, %v4533_v6, %v577_v63  ;;  %584 = vst [vmem:[#allocation2 + $0x104] sm:$0xf] %v580_v0  ;;  %v921_v5 = vsel %vm920_vm6, %v914_v58, %v919_v2  ;;  %v3308_v17 = vld [vmem:[#allocation2 + $0xf0] sm:$0xf]  ;;  %vm884_vm6 = vcmask 244736   ;;  %vm1082_vm12 = vcmask 31744  }
 0x13e   : > { %583 = vst [vmem:[#allocation2 + $0xfc] sm:$0xff] %v579_v4 }
 0x13f   : > { %925 = vst [vmem:[#allocation2 + $0x1e0] sm:$0xff] %v921_v5  ;;  %807 = vrot.lane.b32.xlu1 %v4475_v10, %s4175_s10  ;;  %805 = vrot.lane.b32.xlu0 %v4490_v25, %s4175_s10 }
 0x140   : > { %823 = vrot.lane.b32.xlu2 %v4490_v25, %s4176_s11 }
 0x141   : > { %v934_v7 = vpop.permute.xlu1 %933  ;;  %v932_v8 = vpop.permute.xlu0 %931 }
 0x142   : > { %v936_v9 = vrot.slane %v934_v7, 4  ;;  %v935_v11 = vrot.slane %v932_v8, 4  ;;  %v4595_v12 = vpop.permute.xlu2 %519 }
 0x143   : > { %v522_v6 = vrot.slane %v4595_v12, 4 }
 0x144   : > { %v940_v13 = vsel %vm938_vm13, %v934_v7, %v936_v9  ;;  %v937_v14 = vsel %vm216_vm0, %v935_v11, %v936_v9 }
 0x145   : > { %944 = vst [vmem:[#allocation2 + $0x1f4] sm:$0xf] %v940_v13  ;;  %v939_v15 = vsel %vm938_vm13, %v932_v8, %v937_v14  ;;  %v3880_v18 = vld [vmem:[#allocation2 + $0xf8] sm:$0xf0]  ;;  %v526_v19 = vsel %vm524_vm14, %v4595_v12, %v522_v6  ;;  %vm326_vm13 = vcmask 990208  }
 0x146   : > { %943 = vst [vmem:[#allocation2 + $0x1ec] sm:$0xff] %v939_v15  ;;  %v3309_v16 = vor.u32 %v3880_v18, %v3308_v17  ;;  %v3428_v1 = vld [vmem:[#allocation2 + $0x1e0] sm:$0xf] }
 0x147   : > { %1545 = vrot.lane.b32.xlu1 %v4504_v37, %s4177_s12  ;;  %825 = vrot.lane.b32.xlu0 %v4475_v10, %s4176_s11  ;;  %530 = vst [vmem:[#allocation2 + $0xe0] sm:$0xf] %v526_v19 }
 0x148   : > { %2501 = vmatpush.bf16.msra.mxu1 %v3309_v16  ;;  %1547 = vrot.lane.b32.xlu2 %v4555_v30, %s4177_s12 }
 0x149   : > { %v1112_v21 = vpop.permute.xlu1 %1111  ;;  %v1096_v22 = vpop.permute.xlu0 %1095 }
 0x14a   : > { %v1115_v24 = vrot.slane %v1112_v21, 4  ;;  %v1098_v23 = vrot.slane %v1096_v22, 4  ;;  %v4607_v26 = vpop.permute.xlu2 %877 }
 0x14b   : > { %v881_v12 = vrot.slane %v4607_v26, 4 }
 0x14c   : > { %v1099_v27 = vsel %vm216_vm0, %v1097_v20, %v1098_v23  ;;  %v1102_v28 = vsel %vm1100_vm15, %v1096_v22, %v1098_v23  ;;  %v1117_v29 = vsel %vm216_vm0, %v1115_v24, %v1116_v49 }
 0x14d   : > { %v1101_v3 = vsel %vm1100_vm15, %v4559_v34, %v1099_v27  ;;  %1106 = vst [vmem:[#allocation2 + $0x260] sm:$0xf] %v1102_v28  ;;  %v1119_v31 = vsel %vm1118_vm11, %v1112_v21, %v1117_v29  ;;  %v3910_v32 = vld [vmem:[#allocation2 + $0x1e8] sm:$0xf0]  ;;  %vm506_vm11 = vcmask 785408   ;;  %vm1588_vm15 = vcmask 474112  }
 0x14e   : > { %1105 = vst [vmem:[#allocation2 + $0x258] sm:$0xff] %v1101_v3  ;;  %v3429_v33 = vor.u32 %v3910_v32, %v3428_v1 }
 0x14f   : > { %1123 = vst [vmem:[#allocation2 + $0x264] sm:$0xff] %v1119_v31  ;;  %1565 = vrot.lane.b32.xlu1 %v4555_v30, %s4178_s13  ;;  %1563 = vrot.lane.b32.xlu0 %v4504_v37, %s4178_s13 }
 0x150   : > { %2512 = vmatpush.bf16.msra.mxu2 %v3429_v33  ;;  %229 = vrot.lane.b32.xlu2 %v4490_v25, %s4179_s14 }
 0x151   : > { %v340_v35 = vpop.permute.xlu1 %339  ;;  %v338_v34 = vpop.permute.xlu0 %337 }
 0x152   : > { %v342_v36 = vrot.slane %v340_v35, 4  ;;  %v341_v38 = vrot.slane %v338_v34, 4  ;;  %v4618_v39 = vpop.permute.xlu2 %897 }
 0x153   : > { %v900_v40 = vrot.slane %v4618_v39, 4 }
 0x154   : > { %v346_v41 = vsel %vm344_vm1, %v340_v35, %v342_v36  ;;  %v343_v42 = vsel %vm216_vm0, %v341_v38, %v342_v36 }
 0x155   : > { %350 = vst [vmem:[#allocation2 + $0x68] sm:$0xf] %v346_v41  ;;  %v345_v43 = vsel %vm344_vm1, %v338_v34, %v343_v42  ;;  %v3488_v45 = vld [vmem:[#allocation2 + $0x258] sm:$0xf]  ;;  %v904_v46 = vsel %vm902_vm2, %v4618_v39, %v900_v40  ;;  %vm488_vm1 = vcmask 793600  }
 0x156   : > { %349 = vst [vmem:[#allocation2 + $0x60] sm:$0xff] %v345_v43  ;;  %v3925_v44 = vld [vmem:[#allocation2 + $0x260] sm:$0xf0] }
 0x157   : > { %247 = vrot.lane.b32.xlu1 %v4490_v25, %s4180_s18  ;;  %231 = vrot.lane.b32.xlu0 %v4475_v10, %s4179_s14  ;;  %v3489_v47 = vor.u32 %v3925_v44, %v3488_v45  ;;  %908 = vst [vmem:[#allocation2 + $0x1dc] sm:$0xf] %v904_v46 }
 0x158   : > { %249 = vrot.lane.b32.xlu2 %v4475_v10, %s4180_s18 }
 0x159   : > { %2528 = vmatpush.bf16.msra.mxu3 %v3489_v47  ;;  %v518_v49 = vpop.permute.xlu1 %517  ;;  %v358_v50 = vpop.permute.xlu0 %357 }
 0x15a   : > { %v521_v51 = vrot.slane %v518_v49, 4  ;;  %v360_v52 = vrot.slane %v358_v50, 4  ;;  %v4630_v54 = vpop.permute.xlu2 %1075 }
 0x15b   : > { %v1079_v38 = vrot.slane %v4630_v54, 4 }
 0x15c   : > { %v523_v55 = vsel %vm216_vm0, %v521_v51, %v522_v6  ;;  %v361_v53 = vsel %vm216_vm0, %v359_v48, %v360_v52  ;;  %v364_v56 = vsel %vm362_vm4, %v358_v50, %v360_v52 }
 0x15d   : > { %v525_v57 = vsel %vm524_vm14, %v518_v49, %v523_v55  ;;  %v363_v58 = vsel %vm362_vm4, %v4584_v62, %v361_v53  ;;  %368 = vst [vmem:[#allocation2 + $0x74] sm:$0xf] %v364_v56  ;;  %v3236_v8 = vld [vmem:[#allocation2 + $0x60] sm:$0xf]  ;;  %v3370_v56 = vld [vmem:[#allocation2 + $0x174] sm:$0xf0] }
 0x15e   : > { %529 = vst [vmem:[#allocation2 + $0xd8] sm:$0xff] %v525_v57 }
 0x15f   : > { %367 = vst [vmem:[#allocation2 + $0x6c] sm:$0xff] %v363_v58  ;;  %771 = vrot.lane.b32.xlu1 %v4475_v10, %s4181_s19  ;;  %769 = vrot.lane.b32.xlu0 %v4490_v25, %s4181_s19 }
 0x160   : > { %787 = vrot.lane.b32.xlu2 %v4490_v25, %s4182_s20 }
 0x161   : > { %v538_v59 = vpop.permute.xlu1 %537  ;;  %v536_v60 = vpop.permute.xlu0 %535 }
 0x162   : > { %v540_v61 = vrot.slane %v538_v59, 4  ;;  %v539_v63 = vrot.slane %v536_v60, 4  ;;  %v4643_v0 = vpop.permute.xlu2 %303 }
 0x163   : > { %v306_v62 = vrot.slane %v4643_v0, 4 }
 0x164   : > { %v544_v2 = vsel %vm542_vm3, %v538_v59, %v540_v61  ;;  %v541_v4 = vsel %vm216_vm0, %v539_v63, %v540_v61  ;;  %v3894_v63 = vld [vmem:[#allocation2 + $0x16c] sm:$0xf] }
 0x165   : > { %548 = vst [vmem:[#allocation2 + $0xec] sm:$0xf] %v544_v2  ;;  %v543_v5 = vsel %vm542_vm3, %v536_v60, %v541_v4  ;;  %v310_v7 = vsel %vm308_vm5, %v4643_v0, %v306_v62  ;;  %v3296_v22 = vld [vmem:[#allocation2 + $0xd8] sm:$0xf]  ;;  %v3373_v0 = vor.u32 %v3894_v63, %v3370_v56  ;;  %v3358_v2 = vld [vmem:[#allocation2 + $0x15c] sm:$0xf0] }
 0x166   : > { %547 = vst [vmem:[#allocation2 + $0xe4] sm:$0xff] %v543_v5  ;;  %v3862_v9 = vld [vmem:[#allocation2 + $0x68] sm:$0xf0]  ;;  %vm290_vm3 = vcmask 1006592  }
 0x167   : > { %1509 = vrot.lane.b32.xlu1 %v4504_v37, %s4183_s22  ;;  %789 = vrot.lane.b32.xlu0 %v4475_v10, %s4182_s20  ;;  %v3237_v11 = vor.u32 %v3862_v9, %v3236_v8  ;;  %314 = vst [vmem:[#allocation2 + $0x50] sm:$0xf] %v310_v7  ;;  %v3891_v9 = vld [vmem:[#allocation2 + $0x154] sm:$0xf] }
 0x168   : > { %1511 = vrot.lane.b32.xlu2 %v4555_v30, %s4183_s22 }
 0x169   : > { %2486 = vmatpush.bf16.msra.mxu0 %v3237_v11  ;;  %v896_v6 = vpop.permute.xlu1 %895  ;;  %v880_v13 = vpop.permute.xlu0 %879 }
 0x16a   : > { %v899_v14 = vrot.slane %v896_v6, 4  ;;  %v882_v15 = vrot.slane %v880_v13, 4  ;;  %v4655_v17 = vpop.permute.xlu2 %481 }
 0x16c   : > { %v901_v18 = vsel %vm216_vm0, %v899_v14, %v900_v40  ;;  %v883_v19 = vsel %vm216_vm0, %v881_v12, %v882_v15  ;;  %v886_v16 = vsel %vm884_vm6, %v880_v13, %v882_v15  ;;  %v3361_v12 = vor.u32 %v3891_v9, %v3358_v2  ;;  %v3888_v15 = vld [vmem:[#allocation2 + $0x13c] sm:$0xf] }
 0x16d   : > { %v903_v20 = vsel %vm902_vm2, %v896_v6, %v901_v18  ;;  %v885_v21 = vsel %vm884_vm6, %v4607_v26, %v883_v19  ;;  %890 = vst [vmem:[#allocation2 + $0x1d0] sm:$0xf] %v886_v16  ;;  %v3877_v24 = vld [vmem:[#allocation2 + $0xe0] sm:$0xf0]  ;;  %v3346_v18 = vld [vmem:[#allocation2 + $0x144] sm:$0xf0] }
 0x16e   : > { %907 = vst [vmem:[#allocation2 + $0x1d4] sm:$0xff] %v903_v20  ;;  %v3297_v23 = vor.u32 %v3877_v24, %v3296_v22  ;;  %v3349_v24 = vor.u32 %v3888_v15, %v3346_v18  ;;  %vm848_vm2 = vcmask 261120   ;;  %v3298_v56 = vld [vmem:[#allocation2 + $0xe4] sm:$0xf0]  ;;  %vm1606_vm6 = vcmask 465920  }
 0x16f   : > { %889 = vst [vmem:[#allocation2 + $0x1c8] sm:$0xff] %v885_v21  ;;  %1529 = vrot.lane.b32.xlu1 %v4555_v30, %s4184_s24  ;;  %1527 = vrot.lane.b32.xlu0 %v4504_v37, %s4184_s24 }
 0x170   : > { %2502 = vmatpush.bf16.msra.mxu1 %v3297_v23  ;;  %210 = vrot.lane.b32.xlu2 %v4490_v25, %s4185_s25  ;;  %v3334_v23 = vld [vmem:[#allocation2 + $0x12c] sm:$0xf0] }
 0x171   : > { %v1060_v27 = vpop.permute.xlu1 %1059  ;;  %v1058_v28 = vpop.permute.xlu0 %1057 }
 0x172   : > { %v1062_v26 = vrot.slane %v1060_v27, 4  ;;  %v1061_v29 = vrot.slane %v1058_v28, 4  ;;  %v4667_v3 = vpop.permute.xlu2 %501 }
 0x173   : > { %v504_v31 = vrot.slane %v4667_v3, 4 }
 0x174   : > { %v1066_v1 = vsel %vm1064_vm8, %v1060_v27, %v1062_v26  ;;  %v1063_v32 = vsel %vm216_vm0, %v1061_v29, %v1062_v26  ;;  %v3885_v29 = vld [vmem:[#allocation2 + $0x124] sm:$0xf] }
 0x175   : > { %1070 = vst [vmem:[#allocation2 + $0x248] sm:$0xf] %v1066_v1  ;;  %v1065_v33 = vsel %vm1064_vm8, %v1058_v28, %v1063_v32  ;;  %v3907_v35 = vld [vmem:[#allocation2 + $0x1d0] sm:$0xf0]  ;;  %v508_v25 = vsel %vm506_vm11, %v4667_v3, %v504_v31  ;;  %vm1552_vm8 = vcmask 490496  }
 0x176   : > { %1069 = vst [vmem:[#allocation2 + $0x240] sm:$0xff] %v1065_v33  ;;  %v3416_v34 = vld [vmem:[#allocation2 + $0x1c8] sm:$0xf] }
 0x177   : > { %1473 = vrot.lane.b32.xlu1 %v4504_v37, %s4186_s26  ;;  %212 = vrot.lane.b32.xlu0 %v4475_v10, %s4185_s25  ;;  %v3417_v36 = vor.u32 %v3907_v35, %v3416_v34  ;;  %512 = vst [vmem:[#allocation2 + $0xd4] sm:$0xf] %v508_v25  ;;  %v3322_v35 = vld [vmem:[#allocation2 + $0x114] sm:$0xf0] }
 0x178   : > { %1475 = vrot.lane.b32.xlu2 %v4555_v30, %s4186_s26 }
 0x179   : > { %2513 = vmatpush.bf16.msra.mxu2 %v3417_v36  ;;  %v1078_v39 = vpop.permute.xlu0 %1077  ;;  %v302_v40 = vpop.permute.xlu1 %301 }
 0x17a   : > { %v1080_v41 = vrot.slane %v1078_v39, 4  ;;  %v305_v42 = vrot.slane %v302_v40, 4  ;;  %v4680_v43 = vpop.permute.xlu2 %859 }
 0x17c   : > { %v1081_v45 = vsel %vm216_vm0, %v1079_v38, %v1080_v41  ;;  %v1084_v46 = vsel %vm1082_vm12, %v1078_v39, %v1080_v41  ;;  %v307_v10 = vsel %vm216_vm0, %v305_v42, %v306_v62  ;;  %v485_v62 = vrot.slane %v4655_v17, 4  ;;  %v3882_v39 = vld [vmem:[#allocation2 + $0x10c] sm:$0xf] }
 0x17d   : > { %v1083_v44 = vsel %vm1082_vm12, %v4630_v54, %v1081_v45  ;;  %1088 = vst [vmem:[#allocation2 + $0x254] sm:$0xf] %v1084_v46  ;;  %v309_v47 = vsel %vm308_vm5, %v302_v40, %v307_v10  ;;  %v3476_v58 = vld [vmem:[#allocation2 + $0x240] sm:$0xf]  ;;  %v3325_v41 = vor.u32 %v3882_v39, %v3322_v35  ;;  %v863_v42 = vrot.slane %v4680_v43, 4 }
 0x17e   : > { %1087 = vst [vmem:[#allocation2 + $0x24c] sm:$0xff] %v1083_v44  ;;  %v3310_v45 = vld [vmem:[#allocation2 + $0xfc] sm:$0xf0]  ;;  %vm866_vm5 = vcmask 252928   ;;  %vm812_vm12 = vcmask 400384  }
 0x17f   : > { %313 = vst [vmem:[#allocation2 + $0x48] sm:$0xff] %v309_v47  ;;  %1493 = vrot.lane.b32.xlu1 %v4555_v30, %s4187_s27  ;;  %1491 = vrot.lane.b32.xlu0 %v4504_v37, %s4187_s27 }
 0x180   : > { %1617 = vrot.lane.b32.xlu2 %v4504_v37, %s4130_s7 }
 0x181   : > { %v320_v48 = vpop.permute.xlu0 %319  ;;  %v322_v49 = vpop.permute.xlu1 %321 }
 0x182   : > { %v323_v50 = vrot.slane %v320_v48, 4  ;;  %v324_v51 = vrot.slane %v322_v49, 4  ;;  %v4692_v52 = vpop.permute.xlu2 %1583 }
 0x183   : > { %v1586_v54 = vrot.slane %v4692_v52, 4 }
 0x184   : > { %v325_v55 = vsel %vm216_vm0, %v323_v50, %v324_v51  ;;  %v328_v53 = vsel %vm326_vm13, %v322_v49, %v324_v51 }
 0x185   : > { %v327_v57 = vsel %vm326_vm13, %v320_v48, %v325_v55  ;;  %332 = vst [vmem:[#allocation2 + $0x5c] sm:$0xf] %v328_v53  ;;  %v3922_v59 = vld [vmem:[#allocation2 + $0x248] sm:$0xf0]  ;;  %v1590_v60 = vsel %vm1588_vm15, %v4692_v52, %v1586_v54  ;;  %v3879_v48 = vld [vmem:[#allocation2 + $0xf4] sm:$0xf] }
 0x186   : > { %331 = vst [vmem:[#allocation2 + $0x54] sm:$0xff] %v327_v57  ;;  %v3477_v61 = vor.u32 %v3922_v59, %v3476_v58  ;;  %v3224_v20 = vld [vmem:[#allocation2 + $0x48] sm:$0xf]  ;;  %v3313_v50 = vor.u32 %v3879_v48, %v3310_v45  ;;  %v3876_v59 = vld [vmem:[#allocation2 + $0xdc] sm:$0xf]  ;;  %vm254_vm13 = vcmask 1022976  }
 0x187   : > { %1438 = vrot.lane.b32.xlu1 %v4504_v37, %s4188_s28  ;;  %1619 = vrot.lane.b32.xlu0 %v4555_v30, %s4130_s7  ;;  %1594 = vst [vmem:[#allocation2 + $0x3b0] sm:$0xf] %v1590_v60  ;;  %s4189_s7 = smov 83   ;;  %v3301_v60 = vor.u32 %v3876_v59, %v3298_v56 }
 0x188   : > { %2529 = vmatpush.bf16.msra.mxu3 %v3477_v61  ;;  %1440 = vrot.lane.b32.xlu2 %v4555_v30, %s4188_s28 }
 0x189   : > { %v484_v4 = vpop.permute.xlu0 %483  ;;  %v500_v5 = vpop.permute.xlu1 %499 }
 0x18a   : > { %v486_v7 = vrot.slane %v484_v4, 4  ;;  %v503_v8 = vrot.slane %v500_v5, 4  ;;  %v4705_v11 = vpop.permute.xlu2 %265 }
 0x18c   : > { %2574 = vmatpush.bf16.msrb.mxu3 %v3373_v0  ;;  %v487_v6 = vsel %vm216_vm0, %v485_v62, %v486_v7  ;;  %v490_v13 = vsel %vm488_vm1, %v484_v4, %v486_v7  ;;  %v505_v14 = vsel %vm216_vm0, %v503_v8, %v504_v31  ;;  %v3337_v31 = vor.u32 %v3885_v29, %v3334_v23 }
 0x18d   : > { %v489_v19 = vsel %vm488_vm1, %v4655_v17, %v487_v6  ;;  %494 = vst [vmem:[#allocation2 + $0xc8] sm:$0xf] %v490_v13  ;;  %v507_v16 = vsel %vm506_vm11, %v500_v5, %v505_v14  ;;  %v3859_v21 = vld [vmem:[#allocation2 + $0x50] sm:$0xf0]  ;;  %v269_v14 = vrot.slane %v4705_v11, 4  ;;  %vm272_vm11 = vcmask 1014784  }
 0x18e   : > { %493 = vst [vmem:[#allocation2 + $0xc0] sm:$0xff] %v489_v19  ;;  %v3225_v22 = vor.u32 %v3859_v21, %v3224_v20  ;;  %vm1570_vm1 = vcmask 482304  }
 0x18f   : > { %511 = vst [vmem:[#allocation2 + $0xcc] sm:$0xff] %v507_v16  ;;  %1458 = vrot.lane.b32.xlu1 %v4555_v30, %s4159_s17  ;;  %1456 = vrot.lane.b32.xlu0 %v4504_v37, %s4159_s17  ;;  %s4190_s17 = smov 82  }
 0x190   : > { %2575 = vmatpush.bf16.msrb.mxu3 %v3361_v12  ;;  %2487 = vmatpush.bf16.msra.mxu0 %v3225_v22 }
 0x191   : > { %1402 = vrot.lane.b32.xlu2 %v4504_v37, %s4189_s7  ;;  %v842_v17 = vpop.permute.xlu0 %841  ;;  %v844_v27 = vpop.permute.xlu1 %843 }
 0x192   : > { %v845_v28 = vrot.slane %v842_v17, 4  ;;  %v846_v26 = vrot.slane %v844_v27, 4  ;;  %v4718_v3 = vpop.permute.xlu2 %285 }
 0x193   : > { %v288_v1 = vrot.slane %v4718_v3, 4 }
 0x194   : > { %2576 = vmatpush.bf16.msrb.mxu3 %v3349_v24  ;;  %v847_v32 = vsel %vm216_vm0, %v845_v28, %v846_v26  ;;  %v850_v33 = vsel %vm848_vm2, %v844_v27, %v846_v26 }
 0x195   : > { %v849_v25 = vsel %vm848_vm2, %v842_v17, %v847_v32  ;;  %854 = vst [vmem:[#allocation2 + $0x1b8] sm:$0xf] %v850_v33  ;;  %v3284_v34 = vld [vmem:[#allocation2 + $0xc0] sm:$0xf]  ;;  %v292_v36 = vsel %vm290_vm3, %v4718_v3, %v288_v1  ;;  %v3873_v61 = vld [vmem:[#allocation2 + $0xc4] sm:$0xf] }
 0x196   : > { %853 = vst [vmem:[#allocation2 + $0x1b0] sm:$0xff] %v849_v25  ;;  %v3874_v38 = vld [vmem:[#allocation2 + $0xc8] sm:$0xf0]  ;;  %v3286_v52 = vld [vmem:[#allocation2 + $0xcc] sm:$0xf0]  ;;  %vm1516_vm2 = vcmask 506880  }
 0x197   : > { %1420 = vrot.lane.b32.xlu1 %v4504_v37, %s4190_s17  ;;  %1404 = vrot.lane.b32.xlu0 %v4555_v30, %s4189_s7  ;;  %v3285_v40 = vor.u32 %v3874_v38, %v3284_v34  ;;  %296 = vst [vmem:[#allocation2 + $0x44] sm:$0xf] %v292_v36  ;;  %v3289_v2 = vor.u32 %v3873_v61, %v3286_v52 }
 0x198   : > { %2577 = vmatpush.bf16.msrb.mxu3 %v3337_v31 }
 0x199   : > { %1422 = vrot.lane.b32.xlu2 %v4555_v30, %s4190_s17  ;;  %2503 = vmatpush.bf16.msra.mxu1 %v3285_v40  ;;  %v862_v46 = vpop.permute.xlu0 %861  ;;  %v1582_v10 = vpop.permute.xlu1 %1581 }
 0x19a   : > { %v864_v44 = vrot.slane %v862_v46, 4  ;;  %v1585_v47 = vrot.slane %v1582_v10, 4  ;;  %v4730_v49 = vpop.permute.xlu2 %823 }
 0x19c   : > { %2578 = vmatpush.bf16.msrb.mxu3 %v3325_v41  ;;  %v865_v51 = vsel %vm216_vm0, %v863_v42, %v864_v44  ;;  %v868_v55 = vsel %vm866_vm5, %v862_v46, %v864_v44  ;;  %v1587_v53 = vsel %vm216_vm0, %v1585_v47, %v1586_v54 }
 0x19d   : > { %v867_v57 = vsel %vm866_vm5, %v4680_v43, %v865_v51  ;;  %872 = vst [vmem:[#allocation2 + $0x1c4] sm:$0xf] %v868_v55  ;;  %v1589_v58 = vsel %vm1588_vm15, %v1582_v10, %v1587_v53  ;;  %v3404_v9 = vld [vmem:[#allocation2 + $0x1b0] sm:$0xf]  ;;  %vm830_vm15 = vcmask 392192   ;;  %vm776_vm5 = vcmask 416768  }
 0x19e   : > { %871 = vst [vmem:[#allocation2 + $0x1bc] sm:$0xff] %v867_v57 }
 0x19f   : > { %1593 = vst [vmem:[#allocation2 + $0x3a8] sm:$0xff] %v1589_v58  ;;  %1368 = vrot.lane.b32.xlu1 %v4555_v30, %s4191_s29  ;;  %1366 = vrot.lane.b32.xlu0 %v4504_v37, %s4191_s29 }
 0x1a0   : > { %2579 = vmatpush.bf16.msrb.mxu3 %v3313_v50 }
 0x1a1   : > { %1384 = vrot.lane.b32.xlu2 %v4504_v37, %s4192_s30  ;;  %v1600_v43 = vpop.permute.xlu0 %1599  ;;  %v1602_v54 = vpop.permute.xlu1 %1601 }
 0x1a2   : > { %v1603_v63 = vrot.slane %v1600_v43, 4  ;;  %v1604_v0 = vrot.slane %v1602_v54, 4  ;;  %v4741_v62 = vpop.permute.xlu2 %1547 }
 0x1a3   : > { %v1550_v4 = vrot.slane %v4741_v62, 4 }
 0x1a4   : > { %2580 = vmatpush.bf16.msrb.mxu3 %v3301_v60  ;;  %v1605_v5 = vsel %vm216_vm0, %v1603_v63, %v1604_v0  ;;  %v1608_v7 = vsel %vm1606_vm6, %v1602_v54, %v1604_v0 }
 0x1a5   : > { %v1607_v8 = vsel %vm1606_vm6, %v1600_v43, %v1605_v5  ;;  %1612 = vst [vmem:[#allocation2 + $0x3bc] sm:$0xf] %v1608_v7  ;;  %v3904_v12 = vld [vmem:[#allocation2 + $0x1b8] sm:$0xf0]  ;;  %v1554_v6 = vsel %vm1552_vm8, %v4741_v62, %v1550_v4  ;;  %vm1480_vm6 = vcmask 523264  }
 0x1a6   : > { %1611 = vst [vmem:[#allocation2 + $0x3b4] sm:$0xff] %v1607_v8  ;;  %v3405_v13 = vor.u32 %v3904_v12, %v3404_v9  ;;  %v203_v8 = vld [vmem:[%s4235_s21 + $0x8] sm:$0xf]  ;;  %v202_v9 = vld [vmem:[%s4235_s21] sm:$0xff] }
 0x1a7   : > { %1330 = vrot.lane.b32.xlu1 %v4504_v37, %s4193_s5  ;;  %1386 = vrot.lane.b32.xlu0 %v4555_v30, %s4192_s30  ;;  %1558 = vst [vmem:[#allocation2 + $0x398] sm:$0xf] %v1554_v6  ;;  %s3184_s30 = sshll.u32 %s3178_s16, 1 }
 0x1a8   : > { %2581 = vmatpush.bf16.msrb.mxu3 %v3289_v2  ;;  %2514 = vmatpush.bf16.msra.mxu2 %v3405_v13  ;;  %205 = vst [vmem:[#allocation2 + $0x8] sm:$0xf] %v203_v8  ;;  %v3250_v8 = vld [vmem:[#allocation2 + $0x84] sm:$0xf0]  ;;  %p196_p4 = scmp.lt.s32.totalorder %s3184_s30, 3 }
 0x1a9   : > { %1332 = vrot.lane.b32.xlu2 %v4555_v30, %s4193_s5  ;;  %v284_v15 = vpop.permute.xlu1 %283  ;;  %v268_v18 = vpop.permute.xlu0 %267  ;;  %204 = vst [vmem:[#allocation2] sm:$0xff] %v202_v9 }
 0x1aa   : > { %v287_v19 = vrot.slane %v284_v15, 4  ;;  %v270_v16 = vrot.slane %v268_v18, 4  ;;  %v4753_v20 = vpop.permute.xlu2 %229  ;;  %s5273_s30 = smov (!%p196_p4, %s3184_s30), 3 }
 0x1ab   : > { %v233_v61 = vrot.slane %v4753_v20, 4  ;;  %s3185_s5 = sshll.u32 %s5273_s30, 2 }
 0x1ac   : > { %v271_v21 = vsel %vm216_vm0, %v269_v14, %v270_v16  ;;  %v274_v22 = vsel %vm272_vm11, %v268_v18, %v270_v16  ;;  %v289_v24 = vsel %vm216_vm0, %v287_v19, %v288_v1  ;;  %v1631_v18 = vld [vmem:[%s5266_s1 + $0x8] sm:$0xff]  ;;  %s199_s9 = scalar_lea.vmem %s5269_s4, %s3185_s5 }
 0x1ad   : > { %v273_v23 = vsel %vm272_vm11, %v4705_v11, %v271_v21  ;;  %278 = vst [vmem:[#allocation2 + $0x38] sm:$0xf] %v274_v22  ;;  %v291_v17 = vsel %vm290_vm3, %v284_v15, %v289_v24  ;;  %vm236_vm3 = vcmask 1031168   ;;  %v1807_v16 = vunpack.c.h.b16 %v1631_v18 }
 0x1ae   : > { %277 = vst [vmem:[#allocation2 + $0x30] sm:$0xff] %v273_v23  ;;  %vm1534_vm11 = vcmask 498688  }
 0x1af   : > { %295 = vst [vmem:[#allocation2 + $0x3c] sm:$0xff] %v291_v17  ;;  %1350 = vrot.lane.b32.xlu1 %v4555_v30, %s4194_s6  ;;  %1348 = vrot.lane.b32.xlu0 %v4504_v37, %s4194_s6  ;;  %v827_v37 = vrot.slane %v4730_v49, 4  ;;  %v4802_v17 = vpack.c.b16 %v1807_v16, %v1807_v16 }
 0x1b1   : > { %v808_v27 = vpop.permute.xlu1 %807  ;;  %v806_v28 = vpop.permute.xlu0 %805  ;;  %2530 = vmatmul.bf16.vlgmr.msra.gmra.mxu3 %v4802_v17 }
 0x1b2   : > { %v810_v26 = vrot.slane %v808_v27, 4  ;;  %v809_v29 = vrot.slane %v806_v28, 4  ;;  %v250_v3 = vpop.permute.xlu2 %249 }
 0x1b3   : > { %v252_v31 = vrot.slane %v250_v3, 4 }
 0x1b4   : > { %v814_v1 = vsel %vm812_vm12, %v808_v27, %v810_v26  ;;  %v811_v11 = vsel %vm216_vm0, %v809_v29, %v810_v26 }
 0x1b5   : > { %818 = vst [vmem:[#allocation2 + $0x1a0] sm:$0xf] %v814_v1  ;;  %v813_v32 = vsel %vm812_vm12, %v806_v28, %v811_v11  ;;  %v3212_v33 = vld [vmem:[#allocation2 + $0x30] sm:$0xf]  ;;  %v256_v35 = vsel %vm254_vm13, %v250_v3, %v252_v31  ;;  %vm1445_vm12 = vcmask 662528  }
 0x1b6   : > { %817 = vst [vmem:[#allocation2 + $0x198] sm:$0xff] %v813_v32  ;;  %v3856_v30 = vld [vmem:[#allocation2 + $0x38] sm:$0xf0] }
 0x1b7   : > { %v3213_v25 = vor.u32 %v3856_v30, %v3212_v33  ;;  %260 = vst [vmem:[#allocation2 + $0x2c] sm:$0xf] %v256_v35 }
 0x1b9   : > { %2488 = vmatpush.bf16.msra.mxu0 %v3213_v25  ;;  %v1546_v34 = vpop.permute.xlu1 %1545  ;;  %v826_v36 = vpop.permute.xlu0 %825 }
 0x1ba   : > { %v1549_v38 = vrot.slane %v1546_v34, 4  ;;  %v828_v39 = vrot.slane %v826_v36, 4  ;;  %v4766_v40 = vpop.permute.xlu2 %787 }
 0x1bb   : > { %v791_v26 = vrot.slane %v4766_v40, 4 }
 0x1bc   : > { %v829_v41 = vsel %vm216_vm0, %v827_v37, %v828_v39  ;;  %v832_v42 = vsel %vm830_vm15, %v826_v36, %v828_v39  ;;  %v1551_v45 = vsel %vm216_vm0, %v1549_v38, %v1550_v4 }
 0x1bd   : > { %v831_v46 = vsel %vm830_vm15, %v4730_v49, %v829_v41  ;;  %836 = vst [vmem:[#allocation2 + $0x1ac] sm:$0xf] %v832_v42  ;;  %v1553_v10 = vsel %vm1552_vm8, %v1546_v34, %v1551_v45  ;;  %v3392_v57 = vld [vmem:[#allocation2 + $0x198] sm:$0xf]  ;;  %vm794_vm8 = vcmask 408576   ;;  %v4819_v41 = vld [vmem:[%s5266_s1] sm:$0xff] }
 0x1be   : > { %835 = vst [vmem:[#allocation2 + $0x1a4] sm:$0xff] %v831_v46  ;;  %vm1498_vm15 = vcmask 515072  }
 0x1bf   : > { %1557 = vst [vmem:[#allocation2 + $0x390] sm:$0xff] %v1553_v10  ;;  %v3870_v10 = vld [vmem:[#allocation2 + $0xac] sm:$0xf] }
 0x1c1   : > { %v1566_v44 = vpop.permute.xlu1 %1565  ;;  %v1564_v47 = vpop.permute.xlu0 %1563 }
 0x1c2   : > { %v1568_v48 = vrot.slane %v1566_v44, 4  ;;  %v1567_v50 = vrot.slane %v1564_v47, 4  ;;  %v4774_v51 = vpop.permute.xlu2 %1511 }
 0x1c3   : > { %v1514_v55 = vrot.slane %v4774_v51, 4 }
 0x1c4   : > { %v1572_v53 = vsel %vm1570_vm1, %v1566_v44, %v1568_v48  ;;  %v1569_v56 = vsel %vm216_vm0, %v1567_v50, %v1568_v48  ;;  %v3274_v44 = vld [vmem:[#allocation2 + $0xb4] sm:$0xf0] }
 0x1c5   : > { %1576 = vst [vmem:[#allocation2 + $0x3a4] sm:$0xf] %v1572_v53  ;;  %v1571_v49 = vsel %vm1570_vm1, %v1564_v47, %v1569_v56  ;;  %v3901_v58 = vld [vmem:[#allocation2 + $0x1a0] sm:$0xf0]  ;;  %v1518_v59 = vsel %vm1516_vm2, %v4774_v51, %v1514_v55  ;;  %vm1427_vm1 = vcmask 670720  }
 0x1c6   : > { %1575 = vst [vmem:[#allocation2 + $0x39c] sm:$0xff] %v1571_v49  ;;  %v3393_v60 = vor.u32 %v3901_v58, %v3392_v57  ;;  %v3277_v49 = vor.u32 %v3870_v10, %v3274_v44  ;;  %v3644_v10 = vld [vmem:[#allocation2 + $0x390] sm:$0xf] }
 0x1c7   : > { %1522 = vst [vmem:[#allocation2 + $0x380] sm:$0xf] %v1518_v59  ;;  %v3262_v59 = vld [vmem:[#allocation2 + $0x9c] sm:$0xf0] }
 0x1c8   : > { %2515 = vmatpush.bf16.msra.mxu2 %v3393_v60 }
 0x1c9   : > { %v248_v52 = vpop.permute.xlu1 %247  ;;  %v232_v43 = vpop.permute.xlu0 %231 }
 0x1ca   : > { %v251_v54 = vrot.slane %v248_v52, 4  ;;  %v234_v63 = vrot.slane %v232_v43, 4  ;;  %v4783_v0 = vpop.permute.xlu2 %210 }
 0x1cb   : > { %v214_v58 = vrot.slane %v4783_v0, 4 }
 0x1cc   : > { %v235_v62 = vsel %vm216_vm0, %v233_v61, %v234_v63  ;;  %v238_v2 = vsel %vm236_vm3, %v232_v43, %v234_v63  ;;  %v253_v4 = vsel %vm216_vm0, %v251_v54, %v252_v31  ;;  %v3867_v54 = vld [vmem:[#allocation2 + $0x94] sm:$0xf] }
 0x1cd   : > { %v237_v5 = vsel %vm236_vm3, %v4753_v20, %v235_v62  ;;  %242 = vst [vmem:[#allocation2 + $0x20] sm:$0xf] %v238_v2  ;;  %v255_v7 = vsel %vm254_vm13, %v248_v52, %v253_v4  ;;  %vm218_vm13 = vcmask 1039360   ;;  %v3265_v62 = vor.u32 %v3867_v54, %v3262_v59 }
 0x1ce   : > { %241 = vst [vmem:[#allocation2 + $0x18] sm:$0xff] %v237_v5  ;;  %vm1391_vm3 = vcmask 687104  }
 0x1cf   : > { %259 = vst [vmem:[#allocation2 + $0x24] sm:$0xff] %v255_v7  ;;  %v3864_v7 = vld [vmem:[#allocation2 + $0x7c] sm:$0xf] }
 0x1d1   : > { %v772_v12 = vpop.permute.xlu1 %771  ;;  %v770_v6 = vpop.permute.xlu0 %769 }
 0x1d2   : > { %v774_v13 = vrot.slane %v772_v12, 4  ;;  %v773_v14 = vrot.slane %v770_v6, 4  ;;  %v4791_v15 = vpop.permute.xlu2 %1475 }
 0x1d3   : > { %v1478_v19 = vrot.slane %v4791_v15, 4 }
 0x1d4   : > { %v778_v20 = vsel %vm776_vm5, %v772_v12, %v774_v13  ;;  %v775_v21 = vsel %vm216_vm0, %v773_v14, %v774_v13  ;;  %v3238_v13 = vld [vmem:[#allocation2 + $0x6c] sm:$0xf0] }
 0x1d5   : > { %782 = vst [vmem:[#allocation2 + $0x188] sm:$0xf] %v778_v20  ;;  %v777_v22 = vsel %vm776_vm5, %v770_v6, %v775_v21  ;;  %v3200_v24 = vld [vmem:[#allocation2 + $0x18] sm:$0xf]  ;;  %v1482_v23 = vsel %vm1480_vm6, %v4791_v15, %v1478_v19  ;;  %v3253_v6 = vor.u32 %v3864_v7, %v3250_v8  ;;  %v3849_v7 = vld [vmem:[#allocation2 + $0x4] sm:$0xf] }
 0x1d6   : > { %781 = vst [vmem:[#allocation2 + $0x180] sm:$0xff] %v777_v22  ;;  %v3853_v27 = vld [vmem:[#allocation2 + $0x20] sm:$0xf0]  ;;  %vm1355_vm5 = vcmask 703488  }
 0x1d7   : > { %v3201_v28 = vor.u32 %v3853_v27, %v3200_v24  ;;  %1486 = vst [vmem:[#allocation2 + $0x368] sm:$0xf] %v1482_v23  ;;  %v3226_v27 = vld [vmem:[#allocation2 + $0x54] sm:$0xf0] }
 0x1d9   : > { %2489 = vmatpush.bf16.msra.mxu0 %v3201_v28  ;;  %v1510_v29 = vpop.permute.xlu1 %1509  ;;  %v790_v3 = vpop.permute.xlu0 %789  ;;  %v3967_v28 = vld [vmem:[#allocation2 + $0x3b0] sm:$0xf0] }
 0x1da   : > { %v1513_v31 = vrot.slane %v1510_v29, 4  ;;  %v792_v1 = vrot.slane %v790_v3, 4  ;;  %v4806_v11 = vpop.permute.xlu2 %1617 }
 0x1dc   : > { %v793_v32 = vsel %vm216_vm0, %v791_v26, %v792_v1  ;;  %v796_v33 = vsel %vm794_vm8, %v790_v3, %v792_v1  ;;  %v1515_v35 = vsel %vm216_vm0, %v1513_v31, %v1514_v55  ;;  %v1806_v55 = vunpack.c.l.b16 %v1631_v18 }
 0x1dd   : > { %v795_v30 = vsel %vm794_vm8, %v4766_v40, %v793_v32  ;;  %800 = vst [vmem:[#allocation2 + $0x194] sm:$0xf] %v796_v33  ;;  %v1517_v25 = vsel %vm1516_vm2, %v1510_v29, %v1515_v35  ;;  %v1805_v40 = vunpack.c.h.b16 %v4819_v41  ;;  %v3380_v48 = vld [vmem:[#allocation2 + $0x180] sm:$0xf]  ;;  %v1804_v31 = vunpack.c.l.b16 %v4819_v41  ;;  %v3858_v32 = vld [vmem:[#allocation2 + $0x4c] sm:$0xf] }
 0x1de   : > { %799 = vst [vmem:[#allocation2 + $0x18c] sm:$0xff] %v795_v30  ;;  %v4830_v57 = vpack.c.b16 %v1806_v55, %v1806_v55  ;;  %v3656_v33 = vld [vmem:[#allocation2 + $0x3a8] sm:$0xf]  ;;  %v3229_v35 = vor.u32 %v3858_v32, %v3226_v27  ;;  %vm1373_vm2 = vcmask 695296  }
 0x1df   : > { %1521 = vst [vmem:[#allocation2 + $0x378] sm:$0xff] %v1517_v25  ;;  %v4828_v53 = vpack.c.b16 %v1805_v40, %v1805_v40  ;;  %v3657_v30 = vor.u32 %v3967_v28, %v3656_v33  ;;  %v3855_v25 = vld [vmem:[#allocation2 + $0x34] sm:$0xf] }
 0x1e1   : > { %v1530_v37 = vpop.permute.xlu1 %1529  ;;  %v1528_v34 = vpop.permute.xlu0 %1527  ;;  %2504 = vmatmul.bf16.vlgmr.msra.gmra.mxu1 %v4828_v53  ;;  %2582 = vmatmul.bf16.vlgmr.msrb.gmra.mxu3 %v4828_v53 }
 0x1e2   : > { %v1532_v36 = vrot.slane %v1530_v37, 4  ;;  %v1531_v38 = vrot.slane %v1528_v34, 4  ;;  %v4814_v39 = vpop.permute.xlu2 %1440 }
 0x1e3   : > { %v1443_v42 = vrot.slane %v4814_v39, 4 }
 0x1e4   : > { %v1536_v45 = vsel %vm1534_vm11, %v1530_v37, %v1532_v36  ;;  %v1533_v46 = vsel %vm216_vm0, %v1531_v38, %v1532_v36  ;;  %v4857_v37 = vpack.c.b16 %v1804_v31, %v1804_v31  ;;  %v3964_v36 = vld [vmem:[#allocation2 + $0x398] sm:$0xf0]  ;;  %v3214_v38 = vld [vmem:[#allocation2 + $0x3c] sm:$0xf0] }
 0x1e5   : > { %1540 = vst [vmem:[#allocation2 + $0x38c] sm:$0xf] %v1536_v45  ;;  %v1535_v47 = vsel %vm1534_vm11, %v1528_v34, %v1533_v46  ;;  %v3898_v50 = vld [vmem:[#allocation2 + $0x188] sm:$0xf0]  ;;  %v1447_v51 = vsel %vm1445_vm12, %v4814_v39, %v1443_v42  ;;  %v1621_v34 = vrot.slane %v4806_v11, 4 }
 0x1e6   : > { %1539 = vst [vmem:[#allocation2 + $0x384] sm:$0xff] %v1535_v47  ;;  %v3381_v56 = vor.u32 %v3898_v50, %v3380_v48  ;;  %v3645_v47 = vor.u32 %v3964_v36, %v3644_v10  ;;  %v3217_v48 = vor.u32 %v3855_v25, %v3214_v38  ;;  %v3454_v31 = vld [vmem:[#allocation2 + $0x21c] sm:$0xf0]  ;;  %v3364_v25 = vld [vmem:[#allocation2 + $0x158] sm:$0xf] }
 0x1e7   : > { %1451 = vst [vmem:[#allocation2 + $0x350] sm:$0xf] %v1447_v51  ;;  %v3646_v36 = vld [vmem:[#allocation2 + $0x39c] sm:$0xf0]  ;;  %v3915_v38 = vld [vmem:[#allocation2 + $0x214] sm:$0xf] }
 0x1e8   : > { %2516 = vmatpush.bf16.msra.mxu2 %v3381_v56  ;;  %v3852_v56 = vld [vmem:[#allocation2 + $0x1c] sm:$0xf]  ;;  %v3442_v10 = vld [vmem:[#allocation2 + $0x204] sm:$0xf0] }
 0x1e9   : > { %v1474_v60 = vpop.permute.xlu1 %1473  ;;  %v213_v61 = vpop.permute.xlu0 %212 }
 0x1ea   : > { %v1477_v52 = vrot.slane %v1474_v60, 4  ;;  %v215_v43 = vrot.slane %v213_v61, 4 }
 0x1eb   : > { %v4835_v63 = vpop.permute.xlu2 %1402  ;;  %2517 = vmatmul.bf16.vlgmr.msra.gmra.mxu2 %v4830_v57 }
 0x1ec   : > { %2561 = vmatpush.bf16.msrb.mxu2 %v3277_v49  ;;  %v217_v2 = vsel %vm216_vm0, %v214_v58, %v215_v43  ;;  %v220_v4 = vsel %vm218_vm13, %v213_v61, %v215_v43  ;;  %v1479_v5 = vsel %vm216_vm0, %v1477_v52, %v1478_v19  ;;  %v3861_v19 = vld [vmem:[#allocation2 + $0x64] sm:$0xf]  ;;  %v3202_v49 = vld [vmem:[#allocation2 + $0x24] sm:$0xf0]  ;;  %v3896_v61 = vld [vmem:[#allocation2 + $0x178] sm:$0xf0] }
 0x1ed   : > { %v219_v9 = vsel %vm218_vm13, %v4783_v0, %v217_v2  ;;  %224 = vst [vmem:[#allocation2 + $0x14] sm:$0xf] %v220_v4  ;;  %v1481_v12 = vsel %vm1480_vm6, %v1474_v60, %v1479_v5  ;;  %v3241_v21 = vor.u32 %v3861_v19, %v3238_v13  ;;  %v3188_v0 = vld [vmem:[#allocation2] sm:$0xf]  ;;  %v3961_v58 = vld [vmem:[#allocation2 + $0x380] sm:$0xf0]  ;;  %v3205_v39 = vor.u32 %v3852_v56, %v3202_v49 }
 0x1ee   : > { %223 = vst [vmem:[#allocation2 + $0xc] sm:$0xff] %v219_v9  ;;  %v3632_v52 = vld [vmem:[#allocation2 + $0x378] sm:$0xf]  ;;  %v3376_v4 = vld [vmem:[#allocation2 + $0x170] sm:$0xf] }
 0x1ef   : > { %1485 = vst [vmem:[#allocation2 + $0x360] sm:$0xff] %v1481_v12  ;;  %v3633_v2 = vor.u32 %v3961_v58, %v3632_v52  ;;  %v4874_v5 = vld [vmem:[%s5266_s1 + $0x10] sm:$0xff]  ;;  %v3893_v19 = vld [vmem:[#allocation2 + $0x160] sm:$0xf0]  ;;  %v3634_v56 = vld [vmem:[#allocation2 + $0x384] sm:$0xf0] }
 0x1f0   : > { %2562 = vmatpush.bf16.msrb.mxu2 %v3265_v62  ;;  %v3466_v62 = vld [vmem:[#allocation2 + $0x234] sm:$0xf0] }
 0x1f1   : > { %v1494_v14 = vpop.permute.xlu1 %1493  ;;  %v1492_v18 = vpop.permute.xlu0 %1491 }
 0x1f2   : > { %v1496_v15 = vrot.slane %v1494_v14, 4  ;;  %v1495_v16 = vrot.slane %v1492_v18, 4 }
 0x1f3   : > { %v4846_v20 = vpop.permute.xlu2 %1422 }
 0x1f4   : > { %2563 = vmatpush.bf16.msrb.mxu2 %v3253_v6  ;;  %v1425_v22 = vrot.slane %v4846_v20, 4  ;;  %v1500_v24 = vsel %vm1498_vm15, %v1494_v14, %v1496_v15  ;;  %v1497_v23 = vsel %vm216_vm0, %v1495_v16, %v1496_v15  ;;  %v1809_v6 = vunpack.c.h.b16 %v4874_v5 }
 0x1f5   : > { %1504 = vst [vmem:[#allocation2 + $0x374] sm:$0xf] %v1500_v24  ;;  %v1499_v26 = vsel %vm1498_vm15, %v1492_v18, %v1497_v23  ;;  %v3850_v29 = vld [vmem:[#allocation2 + $0x8] sm:$0xf0]  ;;  %v3190_v8 = vld [vmem:[#allocation2 + $0xc] sm:$0xf0]  ;;  %v3377_v16 = vor.u32 %v3896_v61, %v3376_v4 }
 0x1f6   : > { %v1429_v3 = vsel %vm1427_vm1, %v4846_v20, %v1425_v22  ;;  %1503 = vst [vmem:[#allocation2 + $0x36c] sm:$0xff] %v1499_v26  ;;  %v3189_v1 = vor.u32 %v3850_v29, %v3188_v0  ;;  %v3658_v18 = vld [vmem:[#allocation2 + $0x3b4] sm:$0xf0]  ;;  %v3620_v24 = vld [vmem:[#allocation2 + $0x360] sm:$0xf]  ;;  %v3193_v29 = vor.u32 %v3849_v7, %v3190_v8  ;;  %v4882_v32 = vpack.c.b16 %v1809_v6, %v1809_v6 }
 0x1f7   : > { %1433 = vst [vmem:[#allocation2 + $0x344] sm:$0xf] %v1429_v3  ;;  %v3966_v3 = vld [vmem:[#allocation2 + $0x3ac] sm:$0xf]  ;;  %v3960_v61 = vld [vmem:[#allocation2 + $0x37c] sm:$0xf] }
 0x1f8   : > { %2564 = vmatpush.bf16.msrb.mxu2 %v3241_v21  ;;  %2490 = vmatpush.bf16.msra.mxu0 %v3189_v1  ;;  %v3887_v7 = vld [vmem:[#allocation2 + $0x130] sm:$0xf0]  ;;  %v3340_v20 = vld [vmem:[#allocation2 + $0x128] sm:$0xf] }
 0x1f9   : > { %v1439_v40 = vpop.permute.xlu1 %1438  ;;  %v1620_v45 = vpop.permute.xlu0 %1619 }
 0x1fa   : > { %v1442_v41 = vrot.slane %v1439_v40, 4  ;;  %v1622_v46 = vrot.slane %v1620_v45, 4 }
 0x1fb   : > { %v4860_v44 = vpop.permute.xlu2 %1384  ;;  %2491 = vmatmul.bf16.vlgmr.msra.gmra.mxu0 %v4857_v37 }
 0x1fc   : > { %2565 = vmatpush.bf16.msrb.mxu2 %v3229_v35  ;;  %2535 = vmatpush.bf16.msrb.mxu0 %v3657_v30  ;;  %v1623_v50 = vsel %vm216_vm0, %v1621_v34, %v1622_v46  ;;  %v1625_v51 = vsel %vm686_vm9, %v1620_v45, %v1622_v46  ;;  %v1444_v55 = vsel %vm216_vm0, %v1442_v41, %v1443_v42  ;;  %v3918_v42 = vld [vmem:[#allocation2 + $0x22c] sm:$0xf] }
 0x1fd   : > { %v1624_v59 = vsel %vm686_vm9, %v4806_v11, %v1623_v50  ;;  %1629 = vst [vmem:[#allocation2 + $0x3c8] sm:$0xf] %v1625_v51  ;;  %v1446_v60 = vsel %vm1445_vm12, %v1439_v40, %v1444_v55  ;;  %v3958_v11 = vld [vmem:[#allocation2 + $0x368] sm:$0xf0]  ;;  %v3469_v15 = vor.u32 %v3918_v42, %v3466_v62  ;;  %v3661_v30 = vor.u32 %v3966_v3, %v3658_v18  ;;  %v3912_v50 = vld [vmem:[#allocation2 + $0x1fc] sm:$0xf] }
 0x1fe   : > { %v2223_v43 = vunpack.c.l.b16 %v1624_v59  ;;  %v2224_v54 = vunpack.c.h.b16 %v1624_v59  ;;  %1450 = vst [vmem:[#allocation2 + $0x348] sm:$0xff] %v1446_v60  ;;  %v3621_v26 = vor.u32 %v3958_v11, %v3620_v24  ;;  %vm1337_vm9 = vcmask 711680   ;;  %v3890_v40 = vld [vmem:[#allocation2 + $0x148] sm:$0xf0]  ;;  %v3430_v62 = vld [vmem:[#allocation2 + $0x1ec] sm:$0xf0] }
 0x1ff   : > { %v3457_v41 = vor.u32 %v3915_v38, %v3454_v31  ;;  %v3365_v46 = vor.u32 %v3893_v19, %v3364_v25  ;;  %v1406_v51 = vrot.slane %v4835_v63, 4  ;;  %v3445_v52 = vor.u32 %v3912_v50, %v3442_v10  ;;  %v3622_v4 = vld [vmem:[#allocation2 + $0x36c] sm:$0xf0]  ;;  %v3909_v11 = vld [vmem:[#allocation2 + $0x1e4] sm:$0xf] }
 0x200   : > { %2536 = vmatpush.bf16.msrb.mxu0 %v3645_v47  ;;  %2566 = vmatpush.bf16.msrb.mxu2 %v3217_v48  ;;  %v2346_v9 = vpack.c.b16 %v2223_v43, %v2223_v43  ;;  %v2347_v12 = vpack.c.b16 %v2224_v54, %v2224_v54  ;;  %v3352_v47 = vld [vmem:[#allocation2 + $0x140] sm:$0xf]  ;;  %v3963_v48 = vld [vmem:[#allocation2 + $0x394] sm:$0xf]  ;;  %v3637_v54 = vor.u32 %v3960_v61, %v3634_v56  ;;  %v3418_v18 = vld [vmem:[#allocation2 + $0x1d4] sm:$0xf0] }
 0x201   : > { %v1459_v13 = vpop.permute.xlu1 %1458  ;;  %v1457_v14 = vpop.permute.xlu0 %1456  ;;  %v3649_v55 = vor.u32 %v3963_v48, %v3646_v36  ;;  %v3353_v43 = vor.u32 %v3890_v40, %v3352_v47  ;;  %v3316_v36 = vld [vmem:[#allocation2 + $0xf8] sm:$0xf]  ;;  %v3881_v38 = vld [vmem:[#allocation2 + $0x100] sm:$0xf0]  ;;  %v4195_v56 = vmov 0  }
 0x202   : > { %v1461_v21 = vrot.slane %v1459_v13, 4  ;;  %v1460_v0 = vrot.slane %v1457_v14, 4  ;;  %v2475_v23 = vsel %vm216_vm0, %v2346_v9, 0  ;;  %v2478_v27 = vsel %vm216_vm0, %v2347_v12, 0  ;;  %4099 = vset.pattern.permute.xlu2 %v4195_v56  ;;  %4110 = vset.pattern.permute.xlu0 %v4195_v56 }
 0x203   : > { %v4879_v28 = vpop.permute.xlu2 %1332  ;;  %2555 = vmatpush.bf16.msrb.mxu1 %v2475_v23  ;;  %2633 = vmatpush.bf16.msra.mxu3 %v2478_v27 }
 0x204   : > { %2567 = vmatpush.bf16.msrb.mxu2 %v3205_v39  ;;  %2537 = vmatpush.bf16.msrb.mxu0 %v3633_v2  ;;  %v1335_v1 = vrot.slane %v4879_v28, 4  ;;  %v1464_v33 = vsel %vm524_vm14, %v1459_v13, %v1461_v21  ;;  %v1462_v35 = vsel %vm216_vm0, %v1460_v0, %v1461_v21  ;;  %v3884_v21 = vld [vmem:[#allocation2 + $0x118] sm:$0xf0]  ;;  %v1794_v40 = vld [vmem:[#allocation2 + $0x3c8] sm:$0xf] }
 0x205   : > { %1468 = vst [vmem:[#allocation2 + $0x35c] sm:$0xf] %v1464_v33  ;;  %v1463_v34 = vsel %vm524_vm14, %v1457_v14, %v1462_v35  ;;  %vm1409_vm14 = vcmask 678912   ;;  %v3608_v12 = vld [vmem:[#allocation2 + $0x348] sm:$0xf]  ;;  %v3433_v14 = vor.u32 %v3909_v11, %v3430_v62 }
 0x206   : > { %v1339_v45 = vsel %vm1337_vm9, %v4879_v28, %v1335_v1  ;;  %1467 = vst [vmem:[#allocation2 + $0x354] sm:$0xff] %v1463_v34  ;;  %3666 = vmatmul.msk.bf16.vlgmr.msrb.gmra.mxu1 %vm1010_vm10, %v4882_v32  ;;  %3667 = vmatmul.msk.bf16.vlgmr.msra.gmra.mxu3 %vm1010_vm10, %v4882_v32  ;;  %v3954_v3 = vld [vmem:[#allocation2 + $0x34c] sm:$0xf]  ;;  %v3406_v33 = vld [vmem:[#allocation2 + $0x1bc] sm:$0xf0] }
 0x207   : > { %2587 = vmatpush.bf16.msra.mxu1 %v3469_v15  ;;  %2652 = vmatpush.bf16.msrb.mxu3 %v3377_v16  ;;  %1343 = vst [vmem:[#allocation2 + $0x308] sm:$0xf] %v1339_v45  ;;  %v3341_v15 = vor.u32 %v3887_v7, %v3340_v20  ;;  %v3906_v16 = vld [vmem:[#allocation2 + $0x1cc] sm:$0xf]  ;;  %v3903_v34 = vld [vmem:[#allocation2 + $0x1b4] sm:$0xf] }
 0x208   : > { %2538 = vmatpush.bf16.msrb.mxu0 %v3621_v26  ;;  %2568 = vmatpush.bf16.msrb.mxu2 %v3193_v29  ;;  %v3421_v26 = vor.u32 %v3906_v16, %v3418_v18  ;;  %v3328_v29 = vld [vmem:[#allocation2 + $0x110] sm:$0xf]  ;;  %v3409_v48 = vor.u32 %v3903_v34, %v3406_v33  ;;  %v3872_v7 = vld [vmem:[#allocation2 + $0xb8] sm:$0xf0] }
 0x209   : > { %v1421_v49 = vpop.permute.xlu1 %1420  ;;  %v1405_v58 = vpop.permute.xlu0 %1404  ;;  %v3329_v31 = vor.u32 %v3884_v21, %v3328_v29  ;;  %v3382_v11 = vld [vmem:[#allocation2 + $0x18c] sm:$0xf0] }
 0x20a   : > { %v1424_v59 = vrot.slane %v1421_v49, 4  ;;  %v1407_v60 = vrot.slane %v1405_v58, 4 }
 0x20b   : > { %2588 = vmatpush.bf16.msra.mxu1 %v3457_v41  ;;  %2653 = vmatpush.bf16.msrb.mxu3 %v3365_v46 }
 0x20c   : > { %2613 = vmatpush.bf16.msra.mxu2 %v3661_v30  ;;  %v1408_v39 = vsel %vm216_vm0, %v1406_v51, %v1407_v60  ;;  %v1411_v2 = vsel %vm1409_vm14, %v1405_v58, %v1407_v60  ;;  %v1426_v42 = vsel %vm216_vm0, %v1424_v59, %v1425_v22  ;;  %v3957_v22 = vld [vmem:[#allocation2 + $0x364] sm:$0xf]  ;;  %v3317_v51 = vor.u32 %v3881_v38, %v3316_v36  ;;  %v3878_v60 = vld [vmem:[#allocation2 + $0xe8] sm:$0xf0] }
 0x20d   : > { %2569 = vmatmul.bf16.vlgmr.msrb.gmra.mxu2 %v4857_v37  ;;  %v1410_v8 = vsel %vm1409_vm14, %v4835_v63, %v1408_v39  ;;  %1415 = vst [vmem:[#allocation2 + $0x338] sm:$0xf] %v1411_v2  ;;  %v1428_v9 = vsel %vm1427_vm1, %v1421_v49, %v1426_v42  ;;  %v3955_v6 = vld [vmem:[#allocation2 + $0x350] sm:$0xf0]  ;;  %v3625_v19 = vor.u32 %v3957_v22, %v3622_v4  ;;  %v3610_v24 = vld [vmem:[#allocation2 + $0x354] sm:$0xf0] }
 0x20e   : > { %1414 = vst [vmem:[#allocation2 + $0x330] sm:$0xff] %v1410_v8  ;;  %v3609_v13 = vor.u32 %v3955_v6, %v3608_v12  ;;  %v3613_v25 = vor.u32 %v3954_v3, %v3610_v24  ;;  %v1795_v49 = vld [vmem:[%s5267_s2] sm:$0xff]  ;;  %v1388_v58 = vrot.slane %v4860_v44, 4  ;;  %v3292_v6 = vld [vmem:[#allocation2 + $0xc8] sm:$0xf] }
 0x20f   : > { %2589 = vmatpush.bf16.msra.mxu1 %v3445_v52  ;;  %2654 = vmatpush.bf16.msrb.mxu3 %v3353_v43  ;;  %1432 = vst [vmem:[#allocation2 + $0x33c] sm:$0xff] %v1428_v9  ;;  %v3900_v43 = vld [vmem:[#allocation2 + $0x19c] sm:$0xf]  ;;  %v3304_v42 = vld [vmem:[#allocation2 + $0xe0] sm:$0xf] }
 0x210   : > { %2614 = vmatpush.bf16.msra.mxu2 %v3649_v55  ;;  %2539 = vmatpush.bf16.msrb.mxu0 %v3609_v13  ;;  %v3394_v55 = vld [vmem:[#allocation2 + $0x1a4] sm:$0xf0]  ;;  %v3305_v4 = vor.u32 %v3878_v60, %v3304_v42  ;;  %v3875_v13 = vld [vmem:[#allocation2 + $0xd0] sm:$0xf0]  ;;  %v3897_v22 = vld [vmem:[#allocation2 + $0x184] sm:$0xf] }
 0x211   : > { %v1369_v63 = vpop.permute.xlu1 %1368  ;;  %v1367_v0 = vpop.permute.xlu0 %1366  ;;  %1798 = vperm.xlu2 %4099, %v1795_v49   ;;  %v3397_v2 = vor.u32 %v3900_v43, %v3394_v55  ;;  %v3385_v16 = vor.u32 %v3897_v22, %v3382_v11  ;;  %v3860_v55 = vld [vmem:[#allocation2 + $0x58] sm:$0xf0]  ;;  %v3857_v11 = vld [vmem:[#allocation2 + $0x40] sm:$0xf0] }
 0x212   : > { %v1371_v23 = vrot.slane %v1369_v63, 4  ;;  %v1370_v27 = vrot.slane %v1367_v0, 4 }
 0x213   : > { %2590 = vmatpush.bf16.msra.mxu1 %v3433_v14  ;;  %2655 = vmatpush.bf16.msrb.mxu3 %v3341_v15  ;;  %v3280_v14 = vld [vmem:[#allocation2 + $0xb0] sm:$0xf] }
 0x214   : > { %2615 = vmatpush.bf16.msra.mxu2 %v3637_v54  ;;  %v1375_v35 = vsel %vm1373_vm2, %v1369_v63, %v1371_v23  ;;  %v1372_v30 = vsel %vm216_vm0, %v1370_v27, %v1371_v23  ;;  %v2225_v54 = vunpack.c.l.b16 %v1794_v40  ;;  %v3281_v28 = vor.u32 %v3872_v7, %v3280_v14  ;;  %v3268_v23 = vld [vmem:[#allocation2 + $0x98] sm:$0xf]  ;;  %v3854_v14 = vld [vmem:[#allocation2 + $0x28] sm:$0xf0] }
 0x215   : > { %1379 = vst [vmem:[#allocation2 + $0x320] sm:$0xf] %v1375_v35  ;;  %v1374_v45 = vsel %vm1373_vm2, %v1367_v0, %v1372_v30  ;;  %v3596_v41 = vld [vmem:[#allocation2 + $0x330] sm:$0xf]  ;;  %v3951_v46 = vld [vmem:[#allocation2 + $0x334] sm:$0xf] }
 0x216   : > { %1378 = vst [vmem:[#allocation2 + $0x318] sm:$0xff] %v1374_v45  ;;  %v3952_v10 = vld [vmem:[#allocation2 + $0x338] sm:$0xf0]  ;;  %v3598_v47 = vld [vmem:[#allocation2 + $0x33c] sm:$0xf0]  ;;  %v2348_v15 = vpack.c.b16 %v2225_v54, %v2225_v54 }
 0x217   : > { %2591 = vmatpush.bf16.msra.mxu1 %v3421_v26  ;;  %2656 = vmatpush.bf16.msrb.mxu3 %v3329_v31  ;;  %v3597_v50 = vor.u32 %v3952_v10, %v3596_v41  ;;  %v3601_v59 = vor.u32 %v3951_v46, %v3598_v47  ;;  %v3866_v26 = vld [vmem:[#allocation2 + $0x88] sm:$0xf0]  ;;  %v3256_v35 = vld [vmem:[#allocation2 + $0x80] sm:$0xf]  ;;  %v3863_v45 = vld [vmem:[#allocation2 + $0x70] sm:$0xf0] }
 0x218   : > { %2616 = vmatpush.bf16.msra.mxu2 %v3625_v19  ;;  %v3293_v19 = vor.u32 %v3875_v13, %v3292_v6  ;;  %v3257_v40 = vor.u32 %v3866_v26, %v3256_v35  ;;  %v3244_v41 = vld [vmem:[#allocation2 + $0x68] sm:$0xf]  ;;  %v3942_v46 = vld [vmem:[#allocation2 + $0x2ec] sm:$0xf]  ;;  %v3562_v10 = vld [vmem:[#allocation2 + $0x2f4] sm:$0xf0] }
 0x219   : > { %2540 = vmatpush.bf16.msrb.mxu0 %v3597_v50  ;;  %v1331_v61 = vpop.permute.xlu1 %1330  ;;  %v1387_v52 = vpop.permute.xlu0 %1386  ;;  %v3944_v47 = vld [vmem:[#allocation2 + $0x2f8] sm:$0xf0]  ;;  %v3941_v54 = vld [vmem:[#allocation2 + $0x2e0] sm:$0xf0]  ;;  %v3208_v13 = vld [vmem:[#allocation2 + $0x20] sm:$0xf] }
 0x21a   : > { %v1334_v62 = vrot.slane %v1331_v61, 4  ;;  %v1389_v39 = vrot.slane %v1387_v52, 4  ;;  %v3930_v26 = vld [vmem:[#allocation2 + $0x28c] sm:$0xf]  ;;  %v3965_v35 = vld [vmem:[#allocation2 + $0x3a0] sm:$0xf0] }
 0x21b   : > { %2592 = vmatpush.bf16.msra.mxu1 %v3409_v48  ;;  %2657 = vmatpush.bf16.msrb.mxu3 %v3317_v51  ;;  %v3245_v48 = vor.u32 %v3863_v45, %v3244_v41  ;;  %v3568_v51 = vld [vmem:[#allocation2 + $0x2f0] sm:$0xf]  ;;  %v3652_v45 = vld [vmem:[#allocation2 + $0x398] sm:$0xf] }
 0x21c   : > { %2617 = vmatpush.bf16.msra.mxu2 %v3613_v25  ;;  %v1390_v8 = vsel %vm216_vm0, %v1388_v58, %v1389_v39  ;;  %v1393_v9 = vsel %vm1391_vm3, %v1387_v52, %v1389_v39  ;;  %v1336_v12 = vsel %vm216_vm0, %v1334_v62, %v1335_v1  ;;  %v3869_v1 = vld [vmem:[#allocation2 + $0xa0] sm:$0xf0]  ;;  %v3569_v52 = vor.u32 %v3944_v47, %v3568_v51  ;;  %v3232_v62 = vld [vmem:[#allocation2 + $0x50] sm:$0xf]  ;;  %v3939_v39 = vld [vmem:[#allocation2 + $0x2d4] sm:$0xf] }
 0x21d   : > { %v1392_v20 = vsel %vm1391_vm3, %v4860_v44, %v1390_v8  ;;  %1397 = vst [vmem:[#allocation2 + $0x32c] sm:$0xf] %v1393_v9  ;;  %v1338_v18 = vsel %vm1337_vm9, %v1331_v61, %v1336_v12  ;;  %v2481_v44 = vsel %vm216_vm0, %v2348_v15, 0  ;;  %v3269_v27 = vor.u32 %v3869_v1, %v3268_v23  ;;  %v3584_v31 = vld [vmem:[#allocation2 + $0x318] sm:$0xf] }
 0x21e   : > { %1396 = vst [vmem:[#allocation2 + $0x324] sm:$0xff] %v1392_v20  ;;  %v3948_v33 = vld [vmem:[#allocation2 + $0x31c] sm:$0xf]  ;;  %v3565_v61 = vor.u32 %v3942_v46, %v3562_v10  ;;  %v3233_v42 = vor.u32 %v3860_v55, %v3232_v62  ;;  %v3538_v9 = vld [vmem:[#allocation2 + $0x2c4] sm:$0xf0]  ;;  %v3653_v41 = vor.u32 %v3965_v35, %v3652_v45 }
 0x21f   : > { %2593 = vmatpush.bf16.msra.mxu1 %v3397_v2  ;;  %2658 = vmatpush.bf16.msrb.mxu3 %v3305_v4  ;;  %1342 = vst [vmem:[#allocation2 + $0x300] sm:$0xff] %v1338_v18  ;;  %v3556_v2 = vld [vmem:[#allocation2 + $0x2d8] sm:$0xf]  ;;  %v3938_v12 = vld [vmem:[#allocation2 + $0x2c8] sm:$0xf0] }
 0x220   : > { %2618 = vmatpush.bf16.msra.mxu2 %v3601_v59  ;;  %v3220_v4 = vld [vmem:[#allocation2 + $0x38] sm:$0xf]  ;;  %v3557_v8 = vor.u32 %v3941_v54, %v3556_v2  ;;  %v3936_v20 = vld [vmem:[#allocation2 + $0x2bc] sm:$0xf]  ;;  %v3544_v18 = vld [vmem:[#allocation2 + $0x2c0] sm:$0xf] }
 0x221   : > { %v1351_v21 = vpop.permute.xlu1 %1350  ;;  %v1349_v63 = vpop.permute.xlu0 %1348  ;;  %v3221_v6 = vor.u32 %v3857_v11, %v3220_v4  ;;  %v3541_v22 = vor.u32 %v3936_v20, %v3538_v9  ;;  %v3545_v15 = vor.u32 %v3938_v12, %v3544_v18  ;;  %v3196_v1 = vld [vmem:[#allocation2 + $0x8] sm:$0xf]  ;;  %v3520_v23 = vld [vmem:[#allocation2 + $0x290] sm:$0xf]  ;;  %v3962_v46 = vld [vmem:[#allocation2 + $0x388] sm:$0xf0] }
 0x222   : > { %v1353_v0 = vrot.slane %v1351_v21, 4  ;;  %v1352_v24 = vrot.slane %v1349_v63, 4  ;;  %v3490_v51 = vld [vmem:[#allocation2 + $0x264] sm:$0xf0]  ;;  %v3640_v55 = vld [vmem:[#allocation2 + $0x380] sm:$0xf] }
 0x223   : > { %2594 = vmatpush.bf16.msra.mxu1 %v3385_v16  ;;  %2659 = vmatpush.bf16.msrb.mxu3 %v3293_v19  ;;  %v3526_v16 = vld [vmem:[#allocation2 + $0x2ac] sm:$0xf0]  ;;  %v3935_v19 = vld [vmem:[#allocation2 + $0x2b0] sm:$0xf0]  ;;  %v3921_v62 = vld [vmem:[#allocation2 + $0x244] sm:$0xf] }
 0x224   : > { %v1357_v29 = vsel %vm1355_vm5, %v1351_v21, %v1353_v0  ;;  %v1354_v3 = vsel %vm216_vm0, %v1352_v24, %v1353_v0  ;;  %v3851_v21 = vld [vmem:[#allocation2 + $0x10] sm:$0xf0]  ;;  %v3472_v4 = vld [vmem:[#allocation2 + $0x230] sm:$0xf]  ;;  %v3604_v12 = vld [vmem:[#allocation2 + $0x338] sm:$0xf] }
 0x225   : > { %1361 = vst [vmem:[#allocation2 + $0x314] sm:$0xf] %v1357_v29  ;;  %v1356_v30 = vsel %vm1355_vm5, %v1349_v63, %v1354_v3  ;;  %v3949_v25 = vld [vmem:[#allocation2 + $0x320] sm:$0xf0]  ;;  %v3586_v34 = vld [vmem:[#allocation2 + $0x324] sm:$0xf0]  ;;  %v3197_v3 = vor.u32 %v3851_v21, %v3196_v1 }
 0x226   : > { %2595 = vmatmul.bf16.vlgmr.msra.gmra.mxu1 %v4830_v57  ;;  %2660 = vmatmul.bf16.vlgmr.msrb.gmra.mxu3 %v4828_v53  ;;  %1360 = vst [vmem:[#allocation2 + $0x30c] sm:$0xff] %v1356_v30  ;;  %v3585_v36 = vor.u32 %v3949_v25, %v3584_v31  ;;  %v3589_v38 = vor.u32 %v3948_v33, %v3586_v34  ;;  %v1808_v53 = vunpack.c.l.b16 %v4874_v5  ;;  %v3572_v50 = vld [vmem:[#allocation2 + $0x300] sm:$0xf]  ;;  %v3945_v49 = vld [vmem:[#allocation2 + $0x304] sm:$0xf] }
 0x227   : > { %2639 = vmatpush.bf16.msrb.mxu1 %v3281_v28  ;;  %2711 = vmatpush.bf16.msra.mxu3 %v2481_v44  ;;  %v3550_v5 = vld [vmem:[#allocation2 + $0x2dc] sm:$0xf0]  ;;  %v3209_v28 = vor.u32 %v3854_v14, %v3208_v13  ;;  %v3933_v63 = vld [vmem:[#allocation2 + $0x2a4] sm:$0xf]  ;;  %v3532_v44 = vld [vmem:[#allocation2 + $0x2a8] sm:$0xf] }
 0x228   : > { %2541 = vmatpush.bf16.msrb.mxu0 %v3585_v36  ;;  %2619 = vmatpush.bf16.msra.mxu2 %v3589_v38  ;;  %v4927_v43 = vpack.c.b16 %v1808_v53, %v1808_v53  ;;  %v3553_v7 = vor.u32 %v3939_v39, %v3550_v5  ;;  %v3529_v0 = vor.u32 %v3933_v63, %v3526_v16  ;;  %v3514_v29 = vld [vmem:[#allocation2 + $0x294] sm:$0xf0]  ;;  %v3664_v31 = vld [vmem:[#allocation2 + $0x3b0] sm:$0xf]  ;;  %v3502_v34 = vld [vmem:[#allocation2 + $0x27c] sm:$0xf0] }
 0x229   : > { %v3533_v24 = vor.u32 %v3935_v19, %v3532_v44  ;;  %v3517_v30 = vor.u32 %v3930_v26, %v3514_v29  ;;  %v3929_v36 = vld [vmem:[#allocation2 + $0x280] sm:$0xf0]  ;;  %v3927_v38 = vld [vmem:[#allocation2 + $0x274] sm:$0xf]  ;;  %v3496_v53 = vld [vmem:[#allocation2 + $0x260] sm:$0xf] }
 0x22a   : > { %v3505_v10 = vor.u32 %v3927_v38, %v3502_v34  ;;  %v3484_v39 = vld [vmem:[#allocation2 + $0x248] sm:$0xf]  ;;  %v3956_v5 = vld [vmem:[#allocation2 + $0x358] sm:$0xf0]  ;;  %v3460_v13 = vld [vmem:[#allocation2 + $0x218] sm:$0xf] }
 0x22b   : > { %2640 = vmatpush.bf16.msrb.mxu1 %v3269_v27  ;;  %v3932_v27 = vld [vmem:[#allocation2 + $0x298] sm:$0xf0]  ;;  %v3448_v20 = vld [vmem:[#allocation2 + $0x200] sm:$0xf]  ;;  %v3914_v18 = vld [vmem:[#allocation2 + $0x208] sm:$0xf0] }
 0x22c   : > { %v3521_v25 = vor.u32 %v3932_v27, %v3520_v23  ;;  %v3449_v16 = vor.u32 %v3914_v18, %v3448_v20  ;;  %v3592_v19 = vld [vmem:[#allocation2 + $0x320] sm:$0xf]  ;;  %v3947_v21 = vld [vmem:[#allocation2 + $0x310] sm:$0xf0]  ;;  %v3436_v63 = vld [vmem:[#allocation2 + $0x1e8] sm:$0xf] }
 0x22d   : > { %v3946_v56 = vld [vmem:[#allocation2 + $0x308] sm:$0xf0]  ;;  %v3574_v58 = vld [vmem:[#allocation2 + $0x30c] sm:$0xf0]  ;;  %v3905_v27 = vld [vmem:[#allocation2 + $0x1c0] sm:$0xf0] }
 0x22e   : > { %v3573_v59 = vor.u32 %v3946_v56, %v3572_v50  ;;  %v3577_v60 = vor.u32 %v3945_v49, %v3574_v58  ;;  %v3924_v50 = vld [vmem:[#allocation2 + $0x25c] sm:$0xf]  ;;  %v3641_v56 = vor.u32 %v3962_v46, %v3640_v55  ;;  %v3959_v49 = vld [vmem:[#allocation2 + $0x370] sm:$0xf0]  ;;  %v3412_v29 = vld [vmem:[#allocation2 + $0x1b8] sm:$0xf] }
 0x22f   : > { %2641 = vmatpush.bf16.msrb.mxu1 %v3257_v40  ;;  %v3508_v40 = vld [vmem:[#allocation2 + $0x278] sm:$0xf]  ;;  %v3493_v58 = vor.u32 %v3924_v50, %v3490_v51 }
 0x230   : > { %2542 = vmatpush.bf16.msrb.mxu0 %v3573_v59  ;;  %2620 = vmatpush.bf16.msra.mxu2 %v3577_v60  ;;  %v3509_v47 = vor.u32 %v3929_v36, %v3508_v40  ;;  %v3478_v60 = vld [vmem:[#allocation2 + $0x24c] sm:$0xf0]  ;;  %v3388_v36 = vld [vmem:[#allocation2 + $0x188] sm:$0xf] }
 0x231   : > { %v3481_v2 = vor.u32 %v3921_v62, %v3478_v60 }
 0x233   : > { %2642 = vmatpush.bf16.msrb.mxu1 %v3245_v48  ;;  %2543 = vmatmul.bf16.vlgmr.msrb.gmra.mxu0 %v4927_v43  ;;  %v3926_v48 = vld [vmem:[#allocation2 + $0x268] sm:$0xf0] }
 0x234   : > { %2600 = vmatpush.bf16.msra.mxu0 %v3565_v61  ;;  %2678 = vmatpush.bf16.msrb.mxu2 %v3569_v52  ;;  %v3497_v59 = vor.u32 %v3926_v48, %v3496_v53  ;;  %v3923_v61 = vld [vmem:[#allocation2 + $0x250] sm:$0xf0]  ;;  %v3628_v52 = vld [vmem:[#allocation2 + $0x368] sm:$0xf]  ;;  %v2531_v26 = vpop.f32.mrf.mxu3 }
 0x235   : > { %2621 = vmatmul.bf16.vlgmr.msra.gmra.mxu2 %v4927_v43  ;;  %v3629_v54 = vor.u32 %v3959_v49, %v3628_v52 }
 0x236   : > { %3668 = vmatmul.msk.bf16.vlgmr.msra.gmra.mxu3 %vm1010_vm10, %v4882_v32  ;;  %v3968_v32 = vld [vmem:[#allocation2 + $0x3b8] sm:$0xf0]  ;;  %vm3033_vm10 = vcmask 1042432  }
 0x237   : > { %2643 = vmatpush.bf16.msrb.mxu1 %v3233_v42  ;;  %v3665_v33 = vor.u32 %v3968_v32, %v3664_v31  ;;  %v3485_v42 = vor.u32 %v3923_v61, %v3484_v39  ;;  %v3580_v32 = vld [vmem:[#allocation2 + $0x308] sm:$0xf]  ;;  %v3902_v31 = vld [vmem:[#allocation2 + $0x1a8] sm:$0xf0] }
 0x238   : > { %2601 = vmatpush.bf16.msra.mxu0 %v3553_v7  ;;  %2679 = vmatpush.bf16.msrb.mxu2 %v3557_v8  ;;  %v3616_v7 = vld [vmem:[#allocation2 + $0x350] sm:$0xf]  ;;  %v3917_v8 = vld [vmem:[#allocation2 + $0x220] sm:$0xf0]  ;;  %v3581_v23 = vor.u32 %v3947_v21, %v3580_v32 }
 0x239   : > { %v3617_v9 = vor.u32 %v3956_v5, %v3616_v7  ;;  %v3461_v14 = vor.u32 %v3917_v8, %v3460_v13 }
 0x23b   : > { %2644 = vmatpush.bf16.msrb.mxu1 %v3221_v6  ;;  %v3953_v6 = vld [vmem:[#allocation2 + $0x340] sm:$0xf0] }
 0x23c   : > { %2602 = vmatpush.bf16.msra.mxu0 %v3541_v22  ;;  %2680 = vmatpush.bf16.msrb.mxu2 %v3545_v15  ;;  %v3605_v22 = vor.u32 %v3953_v6, %v3604_v12  ;;  %v3950_v15 = vld [vmem:[#allocation2 + $0x328] sm:$0xf0]  ;;  %v2533_v34 = vpop.f32.mrf.mxu3 }
 0x23d   : > { %v3593_v1 = vor.u32 %v3950_v15, %v3592_v19 }
 0x23f   : > { %2645 = vmatpush.bf16.msrb.mxu1 %v3209_v28  ;;  %v3911_v28 = vld [vmem:[#allocation2 + $0x1f0] sm:$0xf0] }
 0x240   : > { %2603 = vmatpush.bf16.msra.mxu0 %v3529_v0  ;;  %2681 = vmatpush.bf16.msrb.mxu2 %v3533_v24  ;;  %v3437_v44 = vor.u32 %v3911_v28, %v3436_v63  ;;  %v3424_v0 = vld [vmem:[#allocation2 + $0x1d0] sm:$0xf]  ;;  %v3908_v24 = vld [vmem:[#allocation2 + $0x1d8] sm:$0xf0] }
 0x243   : > { %2646 = vmatpush.bf16.msrb.mxu1 %v3197_v3  ;;  %v3413_v3 = vor.u32 %v3905_v27, %v3412_v29 }
 0x244   : > { %2604 = vmatpush.bf16.msra.mxu0 %v3517_v30  ;;  %2682 = vmatpush.bf16.msrb.mxu2 %v3521_v25  ;;  %v3899_v25 = vld [vmem:[#allocation2 + $0x190] sm:$0xf0] }
 0x245   : > { %v3389_v38 = vor.u32 %v3899_v25, %v3388_v36  ;;  %v3727_v36 = vld [vmem:[%s5268_s3 + $0x70] sm:$0xf] }
 0x246   : > { %2647 = vmatmul.bf16.vlgmr.msrb.gmra.mxu1 %v4857_v37  ;;  %v3920_v37 = vld [vmem:[#allocation2 + $0x238] sm:$0xf0] }
 0x247   : > { %2691 = vmatpush.bf16.msra.mxu1 %v3665_v33  ;;  %v3473_v11 = vor.u32 %v3920_v37, %v3472_v4  ;;  %v3400_v33 = vld [vmem:[#allocation2 + $0x1a0] sm:$0xf] }
 0x248   : > { %2605 = vmatpush.bf16.msra.mxu0 %v3505_v10  ;;  %2683 = vmatpush.bf16.msrb.mxu2 %v3509_v47  ;;  %v3401_v35 = vor.u32 %v3902_v31, %v3400_v33  ;;  %v4958_v31 = vld [vmem:[%s5268_s3 + $0x160] sm:$0xff] }
 0x249   : > { %v2937_v33 = vunpack.c.l.b16 %v4958_v31 }
 0x24b   : > { %2692 = vmatpush.bf16.msra.mxu1 %v3653_v41  ;;  %v2983_v34 = vpack.c.b16 %v2937_v33, %v2937_v33 }
 0x24c   : > { %2606 = vmatpush.bf16.msra.mxu0 %v3493_v58  ;;  %2684 = vmatpush.bf16.msrb.mxu2 %v3497_v59 }
 0x24f   : > { %2693 = vmatpush.bf16.msra.mxu1 %v3641_v56 }
 0x250   : > { %2607 = vmatpush.bf16.msra.mxu0 %v3481_v2  ;;  %2685 = vmatpush.bf16.msrb.mxu2 %v3485_v42 }
 0x253   : > { %2694 = vmatpush.bf16.msra.mxu1 %v3629_v54  ;;  %2608 = vmatmul.bf16.vlgmr.msra.gmra.mxu0 %v4802_v17 }
 0x254   : > { %2665 = vmatpush.bf16.msrb.mxu0 %v3473_v11  ;;  %2686 = vmatmul.bf16.vlgmr.msrb.gmra.mxu2 %v4802_v17  ;;  %v3425_v17 = vor.u32 %v3908_v24, %v3424_v0 }
 0x257   : > { %2695 = vmatpush.bf16.msra.mxu1 %v3617_v9 }
 0x258   : > { %2666 = vmatpush.bf16.msrb.mxu0 %v3461_v14 }
 0x25b   : > { %2696 = vmatpush.bf16.msra.mxu1 %v3605_v22 }
 0x25c   : > { %2667 = vmatpush.bf16.msrb.mxu0 %v3449_v16 }
 0x25e   : > { %v2505_v30 = vpop.f32.mrf.mxu1 }
 0x25f   : > { %2697 = vmatpush.bf16.msra.mxu1 %v3593_v1 }
 0x260   : > { %2668 = vmatpush.bf16.msrb.mxu0 %v3437_v44 }
 0x263   : > { %2698 = vmatpush.bf16.msra.mxu1 %v3581_v23 }
 0x264   : > { %2669 = vmatpush.bf16.msrb.mxu0 %v3425_v17  ;;  %v2583_v56 = vpop.f32.mrf.mxu3 }
 0x266   : > { %2699 = vmatmul.bf16.vlgmr.msra.gmra.mxu1 %v4927_v43  ;;  %v2507_v40 = vpop.f32.mrf.mxu1 }
 0x267   : > { %v3839_v40 = vld [vmem:[%s5268_s3 + $0x150] sm:$0xf] }
 0x268   : > { %2670 = vmatpush.bf16.msrb.mxu0 %v3413_v3 }
 0x26b   : > { %v1799_v41 = vpop.permute.xlu2 %1798 }
 0x26c   : > { %2671 = vmatpush.bf16.msrb.mxu0 %v3401_v35  ;;  %v2585_v58 = vpop.f32.mrf.mxu3  ;;  %v4196_v35 = vmov 65535  }
 0x26e   : > { %v2518_v45 = vpop.f32.mrf.mxu2 }
 0x270   : > { %2672 = vmatpush.bf16.msrb.mxu0 %v3389_v38  ;;  %v3984_v38 = vld [vmem:[%s5268_s3 + $0x74] sm:$0xf0] }
 0x273   : > { %2673 = vmatmul.bf16.vlgmr.msrb.gmra.mxu0 %v4830_v57 }
 0x276   : > { %v2520_v46 = vpop.f32.mrf.mxu2 }
 0x277   : > { %v3719_v46 = vld [vmem:[%s5268_s3 + $0x60] sm:$0xf] }
 0x278   : > { %v2492_v43 = vpop.f32.mrf.mxu0 }
 0x279   : > { %v2493_v10 = vadd.f32 %v2492_v43, %v1799_v41 }
 0x27b   : > { %v2506_v47 = vadd.f32 %v2505_v30, %v2493_v10  ;;  %v3034_v30 = vsel %vm3033_vm10, 4294967295, %v4196_v35  ;;  %v3982_v10 = vld [vmem:[%s5268_s3 + $0x64] sm:$0xf0]  ;;  %v3695_v35 = vld [vmem:[%s5268_s3 + $0x30] sm:$0xf] }
 0x27c   : > { %v4962_v25 = vsel %vm216_vm0, %v3034_v30, 0  ;;  %v3976_v30 = vld [vmem:[%s5268_s3 + $0x34] sm:$0xf0] }
 0x27d   : > { %v2519_v53 = vadd.f32 %v2518_v45, %v2506_v47  ;;  %v4012_v45 = vld [vmem:[%s5268_s3 + $0x154] sm:$0xf0]  ;;  %v3037_v43 = vand.u32 %v4962_v25, %v2983_v34  ;;  %v3831_v47 = vld [vmem:[%s5268_s3 + $0x140] sm:$0xf]  ;;  %v3696_v34 = vor.u32 %v3976_v30, %v3695_v35 }
 0x27f   : > { %v2532_v48 = vadd.f32 %v2531_v26, %v2519_v53  ;;  %v3720_v53 = vor.u32 %v3982_v10, %v3719_v46  ;;  %3069 = vmatpush.bf16.msrb.mxu3 %v3037_v43  ;;  %v3995_v46 = vld [vmem:[%s5268_s3 + $0xd4] sm:$0xf]  ;;  %v3777_v43 = vld [vmem:[%s5268_s3 + $0xd8] sm:$0xf0] }
 0x280   : > { %v2494_v50 = vpop.f32.mrf.mxu0 }
 0x281   : > { %v3840_v50 = vor.u32 %v4012_v45, %v3839_v40  ;;  %v3979_v40 = vld [vmem:[%s5268_s3 + $0x54] sm:$0xf] }
 0x283   : > { %v2557_v51 = vpop.f32.mrf.mxu1  ;;  %3070 = vmatpush.bf16.msrb.mxu3 %v3840_v50  ;;  %v3767_v50 = vld [vmem:[%s5268_s3 + $0xc0] sm:$0xf] }
 0x289   : > { %v2635_v61 = vpop.f32.mrf.mxu3 }
 0x28b   : > { %v2559_v55 = vpop.f32.mrf.mxu1 }
 0x28c   : > { %v3791_v55 = vld [vmem:[%s5268_s3 + $0xf0] sm:$0xf] }
 0x290   : > { %v2570_v49 = vpop.f32.mrf.mxu2 }
 0x291   : > { %v2637_v37 = vpop.f32.mrf.mxu3  ;;  %v2571_v7 = vadd.f32 %v2570_v49, %v1799_v41  ;;  %v4010_v49 = vld [vmem:[%s5268_s3 + $0x144] sm:$0xf0] }
 0x292   : > { %v3832_v37 = vor.u32 %v4010_v49, %v3831_v47  ;;  %v3780_v47 = vor.u32 %v3995_v46, %v3777_v43  ;;  %v3705_v49 = vld [vmem:[%s5268_s3 + $0x48] sm:$0xf0] }
 0x293   : > { %v2584_v12 = vadd.f32 %v2583_v56, %v2571_v7  ;;  %v4000_v56 = vld [vmem:[%s5268_s3 + $0xf4] sm:$0xf0]  ;;  %v3737_v46 = vld [vmem:[%s5268_s3 + $0x88] sm:$0xf0] }
 0x294   : > { %v3792_v58 = vor.u32 %v4000_v56, %v3791_v55  ;;  %3071 = vmatpush.bf16.msrb.mxu3 %v3832_v37  ;;  %v3994_v55 = vld [vmem:[%s5268_s3 + $0xc4] sm:$0xf0]  ;;  %v3977_v56 = vld [vmem:[%s5268_s3 + $0x44] sm:$0xf]  ;;  %v3679_v37 = vld [vmem:[%s5268_s3 + $0x10] sm:$0xf] }
 0x296   : > { %3055 = vmatpush.bf16.msra.mxu2 %v3792_v58  ;;  %v2938_v58 = vunpack.c.h.b16 %v4958_v31  ;;  %v3972_v31 = vld [vmem:[%s5268_s3 + $0x14] sm:$0xf0] }
 0x298   : > { %v2572_v59 = vpop.f32.mrf.mxu2 }
 0x299   : > { %v3983_v59 = vld [vmem:[%s5268_s3 + $0x74] sm:$0xf] }
 0x2a3   : > { %v2596_v60 = vpop.f32.mrf.mxu1 }
 0x2a4   : > { %v2597_v6 = vadd.f32 %v2596_v60, %v2584_v12  ;;  %v3729_v60 = vld [vmem:[%s5268_s3 + $0x78] sm:$0xf0] }
 0x2a9   : > { %v2661_v5 = vpop.f32.mrf.mxu3 }
 0x2ab   : > { %v2598_v52 = vpop.f32.mrf.mxu1 }
 0x2b0   : > { %v2544_v57 = vpop.f32.mrf.mxu0 }
 0x2b1   : > { %v2545_v54 = vadd.f32 %v2544_v57, %v2532_v48  ;;  %v2663_v4 = vpop.f32.mrf.mxu3  ;;  %v3711_v48 = vld [vmem:[%s5268_s3 + $0x50] sm:$0xf]  ;;  %v3703_v57 = vld [vmem:[%s5268_s3 + $0x40] sm:$0xf] }
 0x2b2   : > { %v3815_v4 = vld [vmem:[%s5268_s3 + $0x120] sm:$0xf] }
 0x2b3   : > { %v4938_v62 = vadd.f32 %v2557_v51, %v2545_v54  ;;  %v3980_v51 = vld [vmem:[%s5268_s3 + $0x54] sm:$0xf0]  ;;  %v3978_v54 = vld [vmem:[%s5268_s3 + $0x44] sm:$0xf0] }
 0x2b4   : > { %v3712_v52 = vor.u32 %v3980_v51, %v3711_v48  ;;  %v3974_v48 = vld [vmem:[%s5268_s3 + $0x24] sm:$0xf0] }
 0x2b5   : > { %v2717_v26 = vmax.f32 %v4938_v62, 0.0  ;;  %v3783_v62 = vld [vmem:[%s5268_s3 + $0xe0] sm:$0xf] }
 0x2b8   : > { %v2622_v39 = vpop.f32.mrf.mxu2  ;;  %v2546_v2 = vpop.f32.mrf.mxu0 }
 0x2b9   : > { %v2713_v8 = vpop.f32.mrf.mxu3  ;;  %v3704_v2 = vor.u32 %v3978_v54, %v3703_v57  ;;  %v3759_v54 = vld [vmem:[%s5268_s3 + $0xb0] sm:$0xf] }
 0x2c0   : > { %v2624_v42 = vpop.f32.mrf.mxu2 }
 0x2c1   : > { %v2715_v20 = vpop.f32.mrf.mxu3 }
 0x2c3   : > { %v2648_v11 = vpop.f32.mrf.mxu1 }
 0x2c4   : > { %v2649_v63 = vadd.f32 %v2648_v11, %v1799_v41  ;;  %v3728_v41 = vor.u32 %v3984_v38, %v3727_v36  ;;  %v4006_v11 = vld [vmem:[%s5268_s3 + $0x124] sm:$0xf0]  ;;  %v3775_v36 = vld [vmem:[%s5268_s3 + $0xd0] sm:$0xf]  ;;  %v3996_v38 = vld [vmem:[%s5268_s3 + $0xd4] sm:$0xf0] }
 0x2c5   : > { %v3816_v7 = vor.u32 %v4006_v11, %v3815_v4  ;;  %v3776_v45 = vor.u32 %v3996_v38, %v3775_v36  ;;  %v3991_v4 = vld [vmem:[%s5268_s3 + $0xb4] sm:$0xf]  ;;  %v3986_v36 = vld [vmem:[%s5268_s3 + $0x84] sm:$0xf0]  ;;  %v3969_v38 = vld [vmem:[%s5268_s3 + $0x4] sm:$0xf] }
 0x2c6   : > { %v2662_v44 = vadd.f32 %v2661_v5, %v2649_v63  ;;  %3042 = vmatpush.bf16.msra.mxu0 %v3728_v41  ;;  %v4008_v5 = vld [vmem:[%s5268_s3 + $0x134] sm:$0xf0]  ;;  %v3713_v41 = vld [vmem:[%s5268_s3 + $0x58] sm:$0xf0] }
 0x2c7   : > { %v3716_v10 = vor.u32 %v3979_v40, %v3713_v41  ;;  %v3985_v41 = vld [vmem:[%s5268_s3 + $0x84] sm:$0xf] }
 0x2ca   : > { %3043 = vmatpush.bf16.msra.mxu0 %v3720_v53  ;;  %v3687_v53 = vld [vmem:[%s5268_s3 + $0x20] sm:$0xf] }
 0x2cb   : > { %v2650_v9 = vpop.f32.mrf.mxu1  ;;  %v3688_v51 = vor.u32 %v3974_v48, %v3687_v53  ;;  %v3833_v53 = vld [vmem:[%s5268_s3 + $0x148] sm:$0xf0] }
 0x2cc   : > { %v4004_v9 = vld [vmem:[%s5268_s3 + $0x114] sm:$0xf0] }
 0x2ce   : > { %3044 = vmatpush.bf16.msra.mxu0 %v3712_v52  ;;  %v3769_v52 = vld [vmem:[%s5268_s3 + $0xc8] sm:$0xf0] }
 0x2d0   : > { %v2609_v13 = vpop.f32.mrf.mxu0 }
 0x2d1   : > { %v2610_v14 = vadd.f32 %v2609_v13, %v2597_v6  ;;  %v3799_v13 = vld [vmem:[%s5268_s3 + $0x100] sm:$0xf] }
 0x2d2   : > { %3045 = vmatpush.bf16.msra.mxu0 %v3704_v2  ;;  %v3975_v2 = vld [vmem:[%s5268_s3 + $0x34] sm:$0xf] }
 0x2d3   : > { %v2623_v18 = vadd.f32 %v2622_v39, %v2610_v14  ;;  %v3823_v39 = vld [vmem:[%s5268_s3 + $0x130] sm:$0xf]  ;;  %v4002_v14 = vld [vmem:[%s5268_s3 + $0x104] sm:$0xf0] }
 0x2d4   : > { %v3824_v42 = vor.u32 %v4008_v5, %v3823_v39  ;;  %v3992_v39 = vld [vmem:[%s5268_s3 + $0xb4] sm:$0xf0]  ;;  %v3680_v5 = vor.u32 %v3972_v31, %v3679_v37  ;;  %v3809_v37 = vld [vmem:[%s5268_s3 + $0x118] sm:$0xf0] }
 0x2d5   : > { %v4940_v22 = vadd.f32 %v2635_v61, %v2623_v18  ;;  %v3732_v61 = vor.u32 %v3983_v59, %v3729_v60  ;;  %v3768_v59 = vor.u32 %v3994_v55, %v3767_v50  ;;  %v3708_v60 = vor.u32 %v3977_v56, %v3705_v49  ;;  %v4007_v50 = vld [vmem:[%s5268_s3 + $0x134] sm:$0xf]  ;;  %v4005_v56 = vld [vmem:[%s5268_s3 + $0x124] sm:$0xf]  ;;  %v3817_v49 = vld [vmem:[%s5268_s3 + $0x128] sm:$0xf0] }
 0x2d6   : > { %3072 = vmatpush.bf16.msrb.mxu3 %v3824_v42  ;;  %3046 = vmatpush.bf16.msra.mxu0 %v3696_v34  ;;  %v3697_v42 = vld [vmem:[%s5268_s3 + $0x38] sm:$0xf0]  ;;  %v3760_v11 = vor.u32 %v3992_v39, %v3759_v54  ;;  %v3735_v34 = vld [vmem:[%s5268_s3 + $0x80] sm:$0xf]  ;;  %v4001_v54 = vld [vmem:[%s5268_s3 + $0x104] sm:$0xf] }
 0x2d7   : > { %v2687_v15 = vpop.f32.mrf.mxu2  ;;  %v2718_v16 = vmax.f32 %v4940_v22, 0.0  ;;  %3081 = vmatpush.bf16.msrb.mxu1 %v3732_v61  ;;  %v3998_v22 = vld [vmem:[%s5268_s3 + $0xe4] sm:$0xf0]  ;;  %v3993_v61 = vld [vmem:[%s5268_s3 + $0xc4] sm:$0xf]  ;;  %v3736_v40 = vor.u32 %v3986_v36, %v3735_v34 }
 0x2d8   : > { %v2611_v19 = vpop.f32.mrf.mxu0  ;;  %v3772_v57 = vor.u32 %v3993_v61, %v3769_v52  ;;  %v4003_v52 = vld [vmem:[%s5268_s3 + $0x114] sm:$0xf] }
 0x2d9   : > { %2725 = vrot.lane.b32.xlu1 %v2718_v16, %s4185_s25  ;;  %v3793_v19 = vld [vmem:[%s5268_s3 + $0xf8] sm:$0xf0]  ;;  %v3812_v31 = vor.u32 %v4003_v52, %v3809_v37 }
 0x2da   : > { %3073 = vmatpush.bf16.msrb.mxu3 %v3816_v7  ;;  %3047 = vmatpush.bf16.msra.mxu0 %v3688_v51  ;;  %v3761_v7 = vld [vmem:[%s5268_s3 + $0xb8] sm:$0xf0] }
 0x2db   : > { %v3825_v51 = vld [vmem:[%s5268_s3 + $0x138] sm:$0xf0] }
 0x2dc   : > { %v3828_v55 = vor.u32 %v4007_v50, %v3825_v51 }
 0x2de   : > { %3048 = vmatpush.bf16.msra.mxu0 %v3680_v5 }
 0x2df   : > { %v2689_v1 = vpop.f32.mrf.mxu2 }
 0x2e3   : > { %v2700_v28 = vpop.f32.mrf.mxu1 }
 0x2eb   : > { %v2702_v21 = vpop.f32.mrf.mxu1 }
 0x2f0   : > { %v2674_v32 = vpop.f32.mrf.mxu0 }
 0x2f1   : > { %v2675_v0 = vadd.f32 %v2674_v32, %v2662_v44  ;;  %v3800_v44 = vor.u32 %v4002_v14, %v3799_v13  ;;  %v3764_v13 = vor.u32 %v3991_v4, %v3761_v7  ;;  %v3751_v14 = vld [vmem:[%s5268_s3 + $0xa0] sm:$0xf] }
 0x2f3   : > { %v2688_v24 = vadd.f32 %v2687_v15, %v2675_v0  ;;  %v3999_v15 = vld [vmem:[%s5268_s3 + $0xf4] sm:$0xf] }
 0x2f5   : > { %v2701_v23 = vadd.f32 %v2700_v28, %v2688_v24  ;;  %v3796_v24 = vor.u32 %v3999_v15, %v3793_v19  ;;  %v3689_v15 = vld [vmem:[%s5268_s3 + $0x28] sm:$0xf0]  ;;  %v3989_v19 = vld [vmem:[%s5268_s3 + $0xa4] sm:$0xf] }
 0x2f7   : > { %v4946_v17 = vadd.f32 %v2713_v8, %v2701_v23  ;;  %v3807_v8 = vld [vmem:[%s5268_s3 + $0x110] sm:$0xf] }
 0x2f8   : > { %v2676_v27 = vpop.f32.mrf.mxu0  ;;  %v3808_v12 = vor.u32 %v4004_v9, %v3807_v8  ;;  %v3671_v8 = vld [vmem:[%s5268_s3] sm:$0xf]  ;;  %v3970_v9 = vld [vmem:[%s5268_s3 + $0x4] sm:$0xf0] }
 0x2f9   : > { %v2719_v29 = vmax.f32 %v4946_v17, 0.0  ;;  %v3784_v17 = vor.u32 %v3998_v22, %v3783_v62  ;;  %v3721_v27 = vld [vmem:[%s5268_s3 + $0x68] sm:$0xf0] }
 0x2fa   : > { %3074 = vmatpush.bf16.msrb.mxu3 %v3808_v12  ;;  %v2984_v12 = vpack.c.b16 %v2938_v58, %v2938_v58 }
 0x2fb   : > { %v4100_v3 = vpack.i.bf16 %v2717_v26, %v2719_v29  ;;  %3056 = vmatpush.bf16.msra.mxu2 %v3784_v17  ;;  %v3841_v17 = vld [vmem:[%s5268_s3 + $0x158] sm:$0xf0] }
 0x2fd   : > { %4101 = vrot.lane.b32.xlu0 %v4100_v3, %s4185_s25 }
 0x2fe   : > { %3075 = vmatpush.bf16.msrb.mxu3 %v3800_v44  ;;  %v3040_v44 = vand.u32 %v4962_v25, %v2984_v12  ;;  %v4011_v25 = vld [vmem:[%s5268_s3 + $0x154] sm:$0xf] }
 0x2ff   : > { %3057 = vmatpush.bf16.msra.mxu2 %v3776_v45  ;;  %v3673_v45 = vld [vmem:[%s5268_s3 + $0x8] sm:$0xf0] }
 0x300   : > { %v3676_v43 = vor.u32 %v3969_v38, %v3673_v45 }
 0x302   : > { %3094 = vmatpush.bf16.msra.mxu3 %v3796_v24  ;;  %v3743_v24 = vld [vmem:[%s5268_s3 + $0x90] sm:$0xf] }
 0x303   : > { %3058 = vmatpush.bf16.msra.mxu2 %v3768_v59 }
 0x307   : > { %3059 = vmatpush.bf16.msra.mxu2 %v3760_v11 }
 0x34b   : > { %v2726_v28 = vpop.permute.xlu1 %2725 }
 0x36f   : > { %v4102_v6 = vpop.permute.xlu0 %4101 }
 0x370   : > { %v4104_v20 = vunpack.i.h.bf16 %v4102_v6  ;;  %v4103_v18 = vunpack.i.l.bf16 %v4102_v6  ;;  %v3700_v6 = vor.u32 %v3975_v2, %v3697_v42 }
 0x372   : > { %v2730_v1 = vsel %vm218_vm13, %v4104_v20, %v2726_v28  ;;  %v2731_v21 = vsel %vm218_vm13, %v2726_v28, %v4103_v18  ;;  %v5047_v63 = vmax.f32 %v2719_v29, %v4103_v18  ;;  %v3785_v29 = vld [vmem:[%s5268_s3 + $0xe8] sm:$0xf0]  ;;  %v3990_v20 = vld [vmem:[%s5268_s3 + $0xa4] sm:$0xf0]  ;;  %v3973_v18 = vld [vmem:[%s5268_s3 + $0x24] sm:$0xf] }
 0x373   : > { %v5051_v32 = vmax.f32 %v2717_v26, %v2730_v1  ;;  %v5055_v0 = vmax.f32 %v2718_v16, %v2731_v21  ;;  %v3981_v16 = vld [vmem:[%s5268_s3 + $0x64] sm:$0xf]  ;;  %v3753_v28 = vld [vmem:[%s5268_s3 + $0xa8] sm:$0xf0]  ;;  %v3672_v1 = vor.u32 %v3970_v9, %v3671_v8  ;;  %v3752_v21 = vor.u32 %v3990_v20, %v3751_v14 }
 0x374   : > { %v3997_v26 = vld [vmem:[%s5268_s3 + $0xe4] sm:$0xf]  ;;  %v3724_v3 = vor.u32 %v3981_v16, %v3721_v27  ;;  %v3692_v62 = vor.u32 %v3973_v18, %v3689_v15  ;;  %v3756_v22 = vor.u32 %v3989_v19, %v3753_v28  ;;  %v3971_v16 = vld [vmem:[%s5268_s3 + $0x14] sm:$0xf]  ;;  %v3681_v27 = vld [vmem:[%s5268_s3 + $0x18] sm:$0xf0] }
 0x375   : > { %v4105_v23 = vpack.i.bf16 %v5051_v32, %v5047_v63  ;;  %2743 = vrot.lane.b32.xlu0 %v5055_v0, %s4120_s23  ;;  %v3788_v33 = vor.u32 %v3997_v26, %v3785_v29  ;;  %v3987_v26 = vld [vmem:[%s5268_s3 + $0x94] sm:$0xf]  ;;  %v3745_v29 = vld [vmem:[%s5268_s3 + $0x98] sm:$0xf0]  ;;  %3049 = vmatpush.bf16.msra.mxu0 %v3672_v1  ;;  %v3684_v35 = vor.u32 %v3971_v16, %v3681_v27 }
 0x376   : > { %3082 = vmatpush.bf16.msrb.mxu1 %v3724_v3  ;;  %3060 = vmatpush.bf16.msra.mxu2 %v3752_v21  ;;  %v3748_v30 = vor.u32 %v3987_v26, %v3745_v29 }
 0x377   : > { %4106 = vrot.lane.b32.xlu2 %v4105_v23, %s4120_s23  ;;  %3095 = vmatpush.bf16.msra.mxu3 %v3788_v33  ;;  %v3988_v23 = vld [vmem:[%s5268_s3 + $0x94] sm:$0xf0]  ;;  %v3844_v33 = vor.u32 %v4011_v25, %v3841_v17 }
 0x378   : > { %v3744_v3 = vor.u32 %v3988_v23, %v3743_v24 }
 0x379   : > { %3108 = vmatpush.bf16.msrb.mxu0 %v3040_v44 }
 0x37a   : > { %3083 = vmatpush.bf16.msrb.mxu1 %v3716_v10  ;;  %3061 = vmatpush.bf16.msra.mxu2 %v3744_v3  ;;  %v3740_v10 = vor.u32 %v3985_v41, %v3737_v46 }
 0x37b   : > { %3096 = vmatpush.bf16.msra.mxu3 %v3780_v47  ;;  %v4009_v47 = vld [vmem:[%s5268_s3 + $0x144] sm:$0xf] }
 0x37c   : > { %v3836_v48 = vor.u32 %v4009_v47, %v3833_v53 }
 0x37d   : > { %3109 = vmatpush.bf16.msrb.mxu0 %v3844_v33 }
 0x37e   : > { %3084 = vmatpush.bf16.msrb.mxu1 %v3708_v60  ;;  %3062 = vmatpush.bf16.msra.mxu2 %v3736_v40  ;;  %v3820_v60 = vor.u32 %v4005_v56, %v3817_v49 }
 0x37f   : > { %3097 = vmatpush.bf16.msra.mxu3 %v3772_v57 }
 0x381   : > { %3110 = vmatpush.bf16.msrb.mxu0 %v3836_v48 }
 0x382   : > { %3085 = vmatpush.bf16.msrb.mxu1 %v3700_v6 }
 0x383   : > { %3098 = vmatpush.bf16.msra.mxu3 %v3764_v13 }
 0x385   : > { %3111 = vmatpush.bf16.msrb.mxu0 %v3828_v55 }
 0x386   : > { %3086 = vmatpush.bf16.msrb.mxu1 %v3692_v62 }
 0x387   : > { %3099 = vmatpush.bf16.msra.mxu3 %v3756_v22 }
 0x389   : > { %3112 = vmatpush.bf16.msrb.mxu0 %v3820_v60 }
 0x38a   : > { %3087 = vmatpush.bf16.msrb.mxu1 %v3684_v35 }
 0x38b   : > { %3100 = vmatpush.bf16.msra.mxu3 %v3748_v30 }
 0x38d   : > { %3113 = vmatpush.bf16.msrb.mxu0 %v3812_v31 }
 0x38e   : > { %3088 = vmatpush.bf16.msrb.mxu1 %v3676_v43 }
 0x38f   : > { %3101 = vmatpush.bf16.msra.mxu3 %v3740_v10 }
 0x3d1   : > { %v4107_v58 = vpop.permute.xlu2 %4106 }
 0x3d2   : > { %v4108_v59 = vunpack.i.l.bf16 %v4107_v58  ;;  %v4109_v5 = vunpack.i.h.bf16 %v4107_v58 }
 0x3d4   : > { %v2755_v61 = vmax.f32 %v5047_v63, %v4108_v59  ;;  %v3801_v63 = vld [vmem:[%s5268_s3 + $0x108] sm:$0xf0] }
 0x3d5   : > { %v3804_v39 = vor.u32 %v4001_v54, %v3801_v63 }
 0x3d6   : > { %v2758_v57 = vpack.c.bf16 %v2755_v61, %v2755_v61 }
 0x3d7   : > { %3114 = vmatpush.bf16.msrb.mxu0 %v3804_v39 }
 0x3d8   : > { %3845 = vmatmul.msk.bf16.vlgmr.msrb.gmra.mxu3 %vm380_vm7, %v2758_v57 }
 0x3e7   : > { %v2744_v2 = vpop.permute.xlu0 %2743 }
 0x3e8   : > { %v2748_v42 = vsel %vm362_vm4, %v4109_v5, %v2744_v2  ;;  %v2749_v4 = vsel %vm362_vm4, %v2744_v2, %v4108_v59 }
 0x3e9   : > { %v2753_v11 = vmax.f32 %v5051_v32, %v2748_v42  ;;  %v2754_v7 = vmax.f32 %v5055_v0, %v2749_v4 }
 0x3eb   : > { %v2756_v8 = vpack.c.bf16 %v2753_v11, %v2753_v11  ;;  %v2757_v9 = vpack.c.bf16 %v2754_v7, %v2754_v7 }
 0x3ed   : > { %3050 = vmatmul.bf16.vlgmr.msra.gmra.mxu0 %v2756_v8  ;;  %3063 = vmatmul.bf16.vlgmr.msra.gmra.mxu2 %v2757_v9 }
 0x3ee   : > { %3089 = vmatmul.bf16.vlgmr.msrb.gmra.mxu1 %v2756_v8  ;;  %3102 = vmatmul.bf16.vlgmr.msra.gmra.mxu3 %v2757_v9 }
 0x3fd   : > { %3846 = vmatmul.msk.bf16.vlgmr.msrb.gmra.mxu0 %vm380_vm7, %v2758_v57 }
 0x45b   : > { %v3077_v12 = vpop.f32.mrf.mxu3 }
 0x463   : > { %v3079_v6 = vpop.f32.mrf.mxu3 }
 0x46a   : > { %v3051_v13 = vpop.f32.mrf.mxu0 }
 0x46b   : > { %v3090_v14 = vpop.f32.mrf.mxu1 }
 0x470   : > { %v3064_v20 = vpop.f32.mrf.mxu2 }
 0x471   : > { %v3103_v18 = vpop.f32.mrf.mxu3  ;;  %v3065_v0 = vadd.f32 %v3064_v20, %v3051_v13 }
 0x472   : > { %v3053_v32 = vpop.f32.mrf.mxu0  ;;  %v3104_v28 = vadd.f32 %v3103_v18, %v3090_v14 }
 0x473   : > { %v3092_v15 = vpop.f32.mrf.mxu1  ;;  %v3078_v44 = vadd.f32 %v3077_v12, %v3065_v0 }
 0x478   : > { %v3066_v19 = vpop.f32.mrf.mxu2 }
 0x479   : > { %v3105_v1 = vpop.f32.mrf.mxu3 }
 0x47a   : > { %v3116_v21 = vpop.f32.mrf.mxu0 }
 0x47b   : > { %v3117_v24 = vadd.f32 %v3116_v21, %v3104_v28 }
 0x47d   : > { %v3120_v23 = vpack.c.bf16 %v3117_v24, %v3078_v44 }
 0x47f   : > { %3121 = vst [vmem:[%s199_s9] sm:$0xff] %v3120_v23 }
 0x482   : > { %v3118_v62 = vpop.f32.mrf.mxu0 }
 0x483 PF: > { %s14_s15 = sadd.s32 1, %s4117_s15  }
 0x484   : > { %p11_p5 = scmp.ge.s32.totalorder %s14_s15, 4  }
 0x486   :  { %13 = sbr.rel (!%p11_p5) target bundleno = 1 (0x1), region = 66 }

// kernel: segnet_forward.17
= control target key start
LH: loop header
LB: loop body
LE: loop exit
PB: predicated region body
PF: predicated region fallthrough
CT: control target
= control target key end

     0   :  { %s337_s12 = smov 0   ;;  %s360_s0 = inlined_call_operand.vmem [shape: bf16[8,512], index: 0, kind: input, shape index: {}]   ;;  %s361_s1 = inlined_call_operand.vmem [shape: bf16[8,8], index: 1, kind: input, shape index: {}]   ;;  %s362_s2 = inlined_call_operand.vmem [shape: f32[8,1], index: 2, kind: input, shape index: {}]   ;;  %s363_s3 = inlined_call_operand.vmem [shape: f32[8,512], index: 3, kind: output, shape index: {}]  }
   0x1 LB: > { %s285_s13 = sadd.s32 4294967295, %s314_s12   ;;  %p289_p0 = scmp.ge.s32.totalorder %s314_s12, 1  ;;  %s314_s12 = sphi %s337_s12, %s13_s12  }
   0x2   : > { %p138_p1 = scmp.lt.s32.totalorder %s314_s12, 3 }
   0x4   : > { %p139_p2 = pnand %p289_p0, %p138_p1 }
   0x5   : > { %s290_s14 = sshll.u32 (!%p139_p2), %s285_s13, 1 }
   0x6   : > { %142 = sbr.rel (%p139_p2) target bundleno = 157 (0x9d), region = 32  ;;  %p163_p3 = scmp.lt.s32.totalorder (!%p139_p2), %s290_s14, 3 }
   0xb   : > { %v316_v0 = vmov 0   ;;  %v179_v1 = vld [vmem:[%s362_s2] sm:$0xff]  ;;  %s365_s14 = smov (!%p163_p3, %s290_s14), 3  ;;  %vm194_vm0 = vcmask 1043456   ;;  %vm190_vm1 = vcmask 64512  }
   0xc   : > { %307 = vset.pattern.permute.xlu0 %v316_v0  ;;  %s291_s17 = sshll.u32 %s365_s14, 2  ;;  %v177_v9 = vld [vmem:[%s361_s1] sm:$0xf]  ;;  %s293_s23 = sshll.u32 %s365_s14, 3 }
   0xd   : > { %182 = vperm.xlu0 %307, %v179_v1   ;;  %s166_s20 = scalar_lea.vmem %s360_s0, %s291_s17  ;;  %s172_s26 = scalar_lea.vmem %s363_s3, %s293_s23 }
   0xe   : > { %v175_v2 = vld [vmem:[%s166_s20] sm:$0xff] }
   0xf   : > { %v186_v3 = vunpack.c.l.b16 %v175_v2  ;;  %v187_v4 = vunpack.c.h.b16 %v175_v2 }
  0x11   : > { %v188_v5 = vpack.c.b16 %v186_v3, %v186_v3  ;;  %v189_v6 = vpack.c.b16 %v187_v4, %v187_v4 }
  0x13   : > { %v196_v7 = vsel %vm194_vm0, %v188_v5, 0  ;;  %v199_v8 = vsel %vm194_vm0, %v189_v6, 0 }
  0x14   : > { %208 = vmatpush.bf16.msra.mxu0 %v196_v7  ;;  %221 = vmatpush.bf16.msra.mxu1 %v199_v8 }
  0x17   : > { %294 = vmatmul.msk.bf16.vlgmr.msra.gmra.mxu0 %vm190_vm1, %v177_v9  ;;  %295 = vmatmul.msk.bf16.vlgmr.msra.gmra.mxu1 %vm190_vm1, %v177_v9 }
  0x7f   : > { %v183_v10 = vpop.permute.xlu0 %182 }
  0x94   : > { %v210_v11 = vpop.f32.mrf.mxu0  ;;  %v223_v12 = vpop.f32.mrf.mxu1 }
  0x95   : > { %v211_v13 = vadd.f32 %v210_v11, %v183_v10  ;;  %v224_v14 = vadd.f32 %v223_v12, %v183_v10 }
  0x97   : > { %227 = vst [vmem:[%s172_s26] sm:$0xff] %v211_v13 }
  0x98   : > { %228 = vst [vmem:[%s172_s26 + $0x8] sm:$0xff] %v224_v14 }
  0x9c   : > { %v212_v15 = vpop.f32.mrf.mxu0  ;;  %v225_v16 = vpop.f32.mrf.mxu1 }
  0x9d PF: > { %s13_s12 = sadd.s32 1, %s314_s12  }
  0x9e   : > { %p10_p4 = scmp.ge.s32.totalorder %s13_s12, 4  }
  0xa0   :  { %12 = sbr.rel (!%p10_p4) target bundleno = 1 (0x1), region = 62 }

// kernel: segnet_forward.16
= control target key start
LH: loop header
LB: loop body
LE: loop exit
PB: predicated region body
PF: predicated region fallthrough
CT: control target
= control target key end

     0   :  { %s914_s15 = smov 0   ;;  %s1059_s0 = inlined_call_operand.vmem [shape: bf16[8,512], index: 0, kind: input, shape index: {}]   ;;  %s1060_s1 = inlined_call_operand.vmem [shape: bf16[8,200], index: 1, kind: input, shape index: {}]   ;;  %s1061_s2 = inlined_call_operand.vmem [shape: f32[8,1], index: 2, kind: input, shape index: {}]   ;;  %s1062_s3 = inlined_call_operand.vmem [shape: bf16[96,256], index: 3, kind: input, shape index: {}]   ;;  %s1063_s4 = inlined_call_operand.vmem [shape: bf16[8,512], index: 4, kind: output, shape index: {}]  }
   0x1 LB: > { %s688_s16 = sadd.s32 4294967295, %s862_s15   ;;  %p692_p0 = scmp.ge.s32.totalorder %s862_s15, 1  ;;  %s862_s15 = sphi %s914_s15, %s14_s15  }
   0x2   : > { %p163_p1 = scmp.lt.s32.totalorder %s862_s15, 3 }
   0x4   : > { %p164_p2 = pnand %p692_p0, %p163_p1 }
   0x5   : > { %s693_s17 = sshll.u32 (!%p164_p2), %s688_s16, 1  ;;  %s864_s22 = smov (!%p164_p2), 92  }
   0x6   : > { %167 = sbr.rel (%p164_p2) target bundleno = 473 (0x1d9), region = 36  ;;  %p190_p3 = scmp.lt.s32.totalorder (!%p164_p2), %s693_s17, 3 }
   0x7   : > { %s865_s23 = smov (!%p164_p2), 102   ;;  %s866_s24 = smov (!%p164_p2), 104  }
   0x8   : > { %s867_s25 = smov (!%p164_p2), 100   ;;  %s868_s26 = smov (!%p164_p2), 101  }
   0x9   : > { %s869_s27 = smov (!%p164_p2), 103   ;;  %s870_s28 = smov (!%p164_p2), 76  }
   0xa   : > { %s871_s29 = smov (!%p164_p2), 113   ;;  %s872_s30 = smov (!%p164_p2), 112  }
   0xb   : > { %s1065_s17 = smov (!%p190_p3, %s693_s17), 3  ;;  %s873_s5 = smov 78   ;;  %vm203_vm0 = vcmask 781312   ;;  %vm294_vm1 = vcmask 752640   ;;  %vm348_vm2 = vcmask 646144   ;;  %vm375_vm3 = vcmask 621568  }
   0xc   : > { %s694_s18 = sshll.u32 %s1065_s17, 2  ;;  %s874_s6 = smov 77   ;;  %vm321_vm4 = vcmask 728064   ;;  %vm357_vm5 = vcmask 637952   ;;  %vm366_vm6 = vcmask 629760   ;;  %vm496_vm7 = vcmask 1043456  }
   0xd   : > { %s930_s21 = scalar_lea.vmem %s1059_s0, %s694_s18  ;;  %s875_s7 = smov 115   ;;  %vm339_vm8 = vcmask 654336   ;;  %v405_v60 = vld [vmem:[%s1061_s2] sm:$0xff]  ;;  %v788_v61 = vld [vmem:[%s1062_s3 + $0x50] sm:$0xf]  ;;  %v888_v62 = vmov 0  }
   0xe   : > { %v289_v0 = vld [vmem:[%s930_s21] sm:$0xff]  ;;  %s876_s8 = smov 80   ;;  %s877_s9 = smov 114   ;;  %855 = vset.pattern.permute.xlu0 %v888_v62  ;;  %v821_v63 = vld [vmem:[%s1062_s3 + $0x54] sm:$0xf0]  ;;  %vm330_vm9 = vcmask 719872  }
   0xf   : > { %v271_v1 = vld [vmem:[%s930_s21] sm:$0xf]  ;;  %291 = vrot.lane.b32.xlu0 %v289_v0, %s864_s22  ;;  %s878_s10 = smov 79   ;;  %s879_s11 = smov 116   ;;  %vm303_vm10 = vcmask 744448   ;;  %vm312_vm11 = vcmask 736256  }
  0x10   : > { %273 = vrot.lane.b32.xlu1 %v271_v1, %s865_s23  ;;  %v259_v2 = vld [vmem:[%s930_s21] sm:$0xf]  ;;  %s880_s12 = smov 124   ;;  %s881_s13 = smov 89   ;;  %v789_v1 = vor.u32 %v821_v63, %v788_v61  ;;  %vm492_vm12 = vcmask 588800   ;;  %vm600_vm13 = vcmask 785408  }
  0x11   : > { %261 = vrot.lane.b32.xlu2 %v259_v2, %s866_s24  ;;  %v283_v3 = vld [vmem:[%s930_s21] sm:$0xf]  ;;  %s882_s14 = smov 88   ;;  %s883_s16 = smov 126   ;;  %v820_v2 = vld [vmem:[%s1062_s3 + $0x54] sm:$0xf] }
  0x12   : > { %v277_v4 = vld [vmem:[%s930_s21] sm:$0xf]  ;;  %s884_s19 = smov 125   ;;  %s885_s20 = smov 91   ;;  %606 = vmatpush.bf16.msra.mxu2 %v789_v1 }
  0x13   : > { %v265_v5 = vld [vmem:[%s930_s21] sm:$0xf]  ;;  %s886_s22 = smov 90   ;;  %s887_s23 = smov 127  }
  0x14   : > { %v247_v6 = vld [vmem:[%s930_s21] sm:$0xf] }
  0x15   : > { %v253_v7 = vld [vmem:[%s930_s21] sm:$0xf] }
  0x16   : > { %v235_v8 = vld [vmem:[%s930_s21] sm:$0xf] }
  0x17   : > { %285 = vrot.lane.b32.xlu0 %v283_v3, %s867_s25  ;;  %v241_v9 = vld [vmem:[%s930_s21] sm:$0xf]  ;;  %v790_v3 = vld [vmem:[%s1062_s3 + $0x58] sm:$0xf0] }
  0x18   : > { %279 = vrot.lane.b32.xlu1 %v277_v4, %s868_s26  ;;  %v229_v10 = vld [vmem:[%s930_s21] sm:$0xf]  ;;  %v793_v4 = vor.u32 %v820_v2, %v790_v3 }
  0x19   : > { %267 = vrot.lane.b32.xlu2 %v265_v5, %s869_s27  ;;  %v223_v11 = vld [vmem:[%s930_s21] sm:$0xf] }
  0x1a   : > { %v211_v12 = vld [vmem:[%s930_s21] sm:$0xf]  ;;  %619 = vmatpush.bf16.msra.mxu3 %v793_v4 }
  0x1b   : > { %v217_v13 = vld [vmem:[%s930_s21] sm:$0xf] }
  0x1c   : > { %v205_v14 = vld [vmem:[%s930_s21] sm:$0xf] }
  0x1d   : > { %v202_v37 = vld [vmem:[%s930_s21] sm:$0xf] }
  0x1e   : > { %204 = vst.msk [vmem:[#allocation2] sm:$0xf] %vm203_vm0, %v202_v37  ;;  %v780_v5 = vld [vmem:[%s1062_s3 + $0x40] sm:$0xf] }
  0x1f   : > { %372 = vrot.lane.b32.xlu0 %v289_v0, %s870_s28  ;;  %v764_v37 = vld [vmem:[%s1062_s3 + $0x20] sm:$0xf] }
  0x20   : > { %249 = vrot.lane.b32.xlu1 %v247_v6, %s871_s29  ;;  %v819_v6 = vld [vmem:[%s1062_s3 + $0x44] sm:$0xf0] }
  0x21   : > { %255 = vrot.lane.b32.xlu2 %v253_v7, %s872_s30  ;;  %v818_v7 = vld [vmem:[%s1062_s3 + $0x44] sm:$0xf] }
  0x27   : > { %354 = vrot.lane.b32.xlu0 %v289_v0, %s873_s5  ;;  %s199_s5 = scalar_lea.vmem %s1063_s4, %s694_s18 }
  0x28   : > { %363 = vrot.lane.b32.xlu1 %v289_v0, %s874_s6 }
  0x29   : > { %237 = vrot.lane.b32.xlu2 %v235_v8, %s875_s7  ;;  %v781_v8 = vor.u32 %v819_v6, %v780_v5 }
  0x2b   : > { %607 = vmatpush.bf16.msra.mxu2 %v781_v8 }
  0x2f   : > { %243 = vrot.lane.b32.xlu0 %v241_v9, %s877_s9  ;;  %v782_v9 = vld [vmem:[%s1062_s3 + $0x48] sm:$0xf0] }
  0x30   : > { %336 = vrot.lane.b32.xlu1 %v289_v0, %s876_s8 }
  0x31   : > { %345 = vrot.lane.b32.xlu2 %v289_v0, %s878_s10 }
  0x37   : > { %225 = vrot.lane.b32.xlu0 %v223_v11, %s880_s12  ;;  %v772_v11 = vld [vmem:[%s1062_s3 + $0x30] sm:$0xf] }
  0x38   : > { %231 = vrot.lane.b32.xlu1 %v229_v10, %s879_s11  ;;  %v785_v10 = vor.u32 %v818_v7, %v782_v9 }
  0x39   : > { %318 = vrot.lane.b32.xlu2 %v289_v0, %s881_s13 }
  0x3a   : > { %620 = vmatpush.bf16.msra.mxu3 %v785_v10 }
  0x3f   : > { %327 = vrot.lane.b32.xlu0 %v289_v0, %s882_s14 }
  0x40   : > { %213 = vrot.lane.b32.xlu1 %v211_v12, %s883_s16  ;;  %v817_v12 = vld [vmem:[%s1062_s3 + $0x34] sm:$0xf0] }
  0x41   : > { %219 = vrot.lane.b32.xlu2 %v217_v13, %s884_s19  ;;  %v816_v13 = vld [vmem:[%s1062_s3 + $0x34] sm:$0xf] }
  0x47   : > { %300 = vrot.lane.b32.xlu0 %v289_v0, %s885_s20 }
  0x48   : > { %309 = vrot.lane.b32.xlu1 %v289_v0, %s886_s22 }
  0x49   : > { %207 = vrot.lane.b32.xlu2 %v205_v14, %s887_s23  ;;  %v774_v14 = vld [vmem:[%s1062_s3 + $0x38] sm:$0xf0] }
  0x4f   : > { %408 = vperm.xlu0 %855, %v405_v60  }
  0x6b   : > { %v262_v15 = vpop.permute.xlu2 %261 }
  0x6c   : > { %264 = vst.msk [vmem:[#allocation2 + $0x28] sm:$0xf] %vm203_vm0, %v262_v15 }
  0x73   : > { %v268_v16 = vpop.permute.xlu2 %267 }
  0x74   : > { %270 = vst.msk [vmem:[#allocation2 + $0x2c] sm:$0xf] %vm203_vm0, %v268_v16 }
  0x7b   : > { %v256_v17 = vpop.permute.xlu2 %255  ;;  %v803_v40 = vld [vmem:[#allocation2 + $0x28] sm:$0xff] }
  0x7c   : > { %258 = vst.msk [vmem:[#allocation2 + $0x24] sm:$0xf] %vm203_vm0, %v256_v17 }
  0x81   : > { %v292_v18 = vpop.permute.xlu0 %291 }
  0x82   : > { %v274_v19 = vpop.permute.xlu1 %273  ;;  %v293_v20 = vrot.slane %v292_v18, 4 }
  0x83   : > { %276 = vst.msk [vmem:[#allocation2 + $0x30] sm:$0xf] %vm203_vm0, %v274_v19  ;;  %v238_v21 = vpop.permute.xlu2 %237  ;;  %v773_v19 = vor.u32 %v817_v12, %v772_v11 }
  0x84   : > { %v295_v22 = vsel %vm294_vm1, %v292_v18, %v293_v20  ;;  %240 = vst.msk [vmem:[#allocation2 + $0x18] sm:$0xf] %vm203_vm0, %v238_v21  ;;  %v777_v20 = vor.u32 %v816_v13, %v774_v14 }
  0x85   : > { %297 = vst.msk [vmem:[#allocation2 + $0x3c] sm:$0xf] %vm203_vm0, %v295_v22  ;;  %608 = vmatpush.bf16.msra.mxu2 %v773_v19  ;;  %v379_v22 = vld [vmem:[%s1060_s1] sm:$0xff] }
  0x86   : > { %621 = vmatpush.bf16.msra.mxu3 %v777_v20 }
  0x89   : > { %v286_v23 = vpop.permute.xlu0 %285 }
  0x8a   : > { %v280_v24 = vpop.permute.xlu1 %279  ;;  %288 = vst.msk [vmem:[#allocation2 + $0x38] sm:$0xf] %vm203_vm0, %v286_v23 }
  0x8b   : > { %282 = vst.msk [vmem:[#allocation2 + $0x34] sm:$0xf] %vm203_vm0, %v280_v24  ;;  %v346_v25 = vpop.permute.xlu2 %345 }
  0x8c   : > { %v347_v26 = vrot.slane %v346_v25, 4 }
  0x8e   : > { %v349_v27 = vsel %vm348_vm2, %v346_v25, %v347_v26 }
  0x8f   : > { %351 = vst.msk [vmem:[#allocation2 + $0x54] sm:$0xf] %vm203_vm0, %v349_v27 }
  0x91   : > { %v373_v28 = vpop.permute.xlu0 %372  ;;  %v805_v30 = vld [vmem:[#allocation2 + $0x38] sm:$0xff] }
  0x92   : > { %v250_v29 = vpop.permute.xlu1 %249  ;;  %v374_v31 = vrot.slane %v373_v28, 4  ;;  %500 = vmatpush.bf16.msra.mxu0 %v805_v30  ;;  %v804_v35 = vld [vmem:[#allocation2 + $0x30] sm:$0xff] }
  0x93   : > { %252 = vst.msk [vmem:[#allocation2 + $0x20] sm:$0xf] %vm203_vm0, %v250_v29  ;;  %v319_v32 = vpop.permute.xlu2 %318 }
  0x94   : > { %v376_v33 = vsel %vm375_vm3, %v373_v28, %v374_v31  ;;  %v320_v34 = vrot.slane %v319_v32, 4  ;;  %v412_v28 = vunpack.c.l.b16 %v379_v22 }
  0x95   : > { %378 = vst.msk [vmem:[#allocation2 + $0x60] sm:$0xf] %vm203_vm0, %v376_v33 }
  0x96   : > { %v322_v36 = vsel %vm321_vm4, %v319_v32, %v320_v34  ;;  %501 = vmatpush.bf16.msra.mxu0 %v804_v35  ;;  %v414_v33 = vpack.c.b16 %v412_v28, %v412_v28  ;;  %v413_v34 = vunpack.c.h.b16 %v379_v22 }
  0x97   : > { %324 = vst.msk [vmem:[#allocation2 + $0x48] sm:$0xf] %vm203_vm0, %v322_v36 }
  0x98   : > { %v415_v36 = vpack.c.b16 %v413_v34, %v413_v34 }
  0x99   : > { %v355_v38 = vpop.permute.xlu0 %354 }
  0x9a   : > { %v364_v39 = vpop.permute.xlu1 %363  ;;  %v356_v41 = vrot.slane %v355_v38, 4  ;;  %502 = vmatpush.bf16.msra.mxu0 %v803_v40  ;;  %v802_v47 = vld [vmem:[#allocation2 + $0x20] sm:$0xff] }
  0x9b   : > { %v365_v42 = vrot.slane %v364_v39, 4  ;;  %v220_v43 = vpop.permute.xlu2 %219 }
  0x9c   : > { %v358_v44 = vsel %vm357_vm5, %v355_v38, %v356_v41  ;;  %v404_v46 = vld [vmem:[#allocation2 + $0x60] sm:$0xf]  ;;  %222 = vst.msk [vmem:[#allocation2 + $0xc] sm:$0xf] %vm203_vm0, %v220_v43  ;;  %v815_v38 = vld [vmem:[%s1062_s3 + $0x24] sm:$0xf0] }
  0x9d   : > { %v367_v45 = vsel %vm366_vm6, %v364_v39, %v365_v42  ;;  %360 = vst.msk [vmem:[#allocation2 + $0x58] sm:$0xf] %vm203_vm0, %v358_v44  ;;  %v466_v48 = vunpack.c.l.b16 %v404_v46  ;;  %v814_v39 = vld [vmem:[%s1062_s3 + $0x24] sm:$0xf]  ;;  %v765_v40 = vor.u32 %v815_v38, %v764_v37  ;;  %v766_v41 = vld [vmem:[%s1062_s3 + $0x28] sm:$0xf0] }
  0x9e   : > { %369 = vst.msk [vmem:[#allocation2 + $0x5c] sm:$0xf] %vm203_vm0, %v367_v45  ;;  %503 = vmatpush.bf16.msra.mxu0 %v802_v47  ;;  %v769_v42 = vor.u32 %v814_v39, %v766_v41  ;;  %v756_v43 = vld [vmem:[%s1062_s3 + $0x10] sm:$0xf]  ;;  %v813_v44 = vld [vmem:[%s1062_s3 + $0x14] sm:$0xf0] }
  0x9f   : > { %v479_v49 = vpack.c.b16 %v466_v48, %v466_v48  ;;  %609 = vmatpush.bf16.msra.mxu2 %v765_v40  ;;  %v812_v45 = vld [vmem:[%s1062_s3 + $0x14] sm:$0xf]  ;;  %v757_v46 = vor.u32 %v813_v44, %v756_v43  ;;  %v758_v47 = vld [vmem:[%s1062_s3 + $0x18] sm:$0xf0] }
  0xa0   : > { %622 = vmatpush.bf16.msra.mxu3 %v769_v42  ;;  %v761_v48 = vor.u32 %v812_v45, %v758_v47 }
  0xa1   : > { %v244_v51 = vpop.permute.xlu0 %243  ;;  %v498_v52 = vsel %vm496_vm7, %v479_v49, 0  ;;  %v748_v49 = vld [vmem:[%s1062_s3] sm:$0xf] }
  0xa2   : > { %v337_v50 = vpop.permute.xlu1 %336  ;;  %246 = vst.msk [vmem:[#allocation2 + $0x1c] sm:$0xf] %vm203_vm0, %v244_v51  ;;  %516 = vmatpush.bf16.msra.mxu1 %v498_v52  ;;  %v810_v51 = vld [vmem:[%s1062_s3 + $0x4] sm:$0xf] }
  0xa3   : > { %v338_v53 = vrot.slane %v337_v50, 4  ;;  %v208_v54 = vpop.permute.xlu2 %207  ;;  %610 = vmatpush.bf16.msra.mxu2 %v757_v46 }
  0xa4   : > { %210 = vst.msk [vmem:[#allocation2 + $0x4] sm:$0xf] %vm203_vm0, %v208_v54  ;;  %623 = vmatpush.bf16.msra.mxu3 %v761_v48 }
  0xa5   : > { %v340_v55 = vsel %vm339_vm8, %v337_v50, %v338_v53  ;;  %v809_v56 = vld [vmem:[#allocation2 + $0x58] sm:$0xff]  ;;  %v811_v50 = vld [vmem:[%s1062_s3 + $0x4] sm:$0xf0]  ;;  %v750_v53 = vld [vmem:[%s1062_s3 + $0x8] sm:$0xf0] }
  0xa6   : > { %342 = vst.msk [vmem:[#allocation2 + $0x50] sm:$0xf] %vm203_vm0, %v340_v55  ;;  %517 = vmatpush.bf16.msra.mxu1 %v809_v56  ;;  %v749_v52 = vor.u32 %v811_v50, %v748_v49  ;;  %v753_v54 = vor.u32 %v810_v51, %v750_v53 }
  0xa8   : > { %611 = vmatpush.bf16.msra.mxu2 %v749_v52  ;;  %624 = vmatpush.bf16.msra.mxu3 %v753_v54 }
  0xa9   : > { %v226_v58 = vpop.permute.xlu0 %225  ;;  %v801_v59 = vld [vmem:[#allocation2 + $0x18] sm:$0xff] }
  0xaa   : > { %v232_v57 = vpop.permute.xlu1 %231  ;;  %228 = vst.msk [vmem:[#allocation2 + $0x10] sm:$0xf] %vm203_vm0, %v226_v58  ;;  %504 = vmatpush.bf16.msra.mxu0 %v801_v59 }
  0xab   : > { %234 = vst.msk [vmem:[#allocation2 + $0x14] sm:$0xf] %vm203_vm0, %v232_v57  ;;  %v798_v29 = vld [vmem:[#allocation2] sm:$0xff] }
  0xad   : > { %v808_v0 = vld [vmem:[#allocation2 + $0x50] sm:$0xff] }
  0xae   : > { %518 = vmatpush.bf16.msra.mxu1 %v808_v0 }
  0xb1   : > { %v328_v15 = vpop.permute.xlu0 %327 }
  0xb2   : > { %v214_v16 = vpop.permute.xlu1 %213  ;;  %v329_v17 = vrot.slane %v328_v15, 4  ;;  %v800_v18 = vld [vmem:[#allocation2 + $0x10] sm:$0xff] }
  0xb3   : > { %216 = vst.msk [vmem:[#allocation2 + $0x8] sm:$0xf] %vm203_vm0, %v214_v16  ;;  %505 = vmatpush.bf16.msra.mxu0 %v800_v18 }
  0xb4   : > { %v331_v21 = vsel %vm330_vm9, %v328_v15, %v329_v17 }
  0xb5   : > { %333 = vst.msk [vmem:[#allocation2 + $0x4c] sm:$0xf] %vm203_vm0, %v331_v21 }
  0xb9   : > { %v301_v23 = vpop.permute.xlu0 %300 }
  0xba   : > { %v310_v24 = vpop.permute.xlu1 %309  ;;  %v799_v25 = vld [vmem:[#allocation2 + $0x8] sm:$0xff]  ;;  %v302_v26 = vrot.slane %v301_v23, 4 }
  0xbb   : > { %v311_v27 = vrot.slane %v310_v24, 4  ;;  %506 = vmatpush.bf16.msra.mxu0 %v799_v25 }
  0xbc   : > { %v304_v30 = vsel %vm303_vm10, %v301_v23, %v302_v26  ;;  %v807_v32 = vld [vmem:[#allocation2 + $0x48] sm:$0xff] }
  0xbd   : > { %v313_v31 = vsel %vm312_vm11, %v310_v24, %v311_v27  ;;  %306 = vst.msk [vmem:[#allocation2 + $0x40] sm:$0xf] %vm203_vm0, %v304_v30  ;;  %519 = vmatpush.bf16.msra.mxu1 %v807_v32 }
  0xbe   : > { %315 = vst.msk [vmem:[#allocation2 + $0x44] sm:$0xf] %vm203_vm0, %v313_v31 }
  0xbf   : > { %507 = vmatpush.bf16.msra.mxu0 %v798_v29 }
  0xc1   : > { %v409_v56 = vpop.permute.xlu0 %408 }
  0xc2   : > { %508 = vmatmul.bf16.vlgmr.msra.gmra.mxu0 %v414_v33 }
  0xc5   : > { %v806_v35 = vld [vmem:[#allocation2 + $0x40] sm:$0xff] }
  0xc6   : > { %520 = vmatpush.bf16.msra.mxu1 %v806_v35 }
  0xc9   : > { %745 = vmatmul.msk.bf16.vlgmr.msra.gmra.mxu1 %vm492_vm12, %v415_v36 }
 0x13f   : > { %v509_v55 = vpop.f32.mrf.mxu0 }
 0x140   : > { %v510_v57 = vadd.f32 %v509_v55, %v409_v56 }
 0x146   : > { %v522_v58 = vpop.f32.mrf.mxu1 }
 0x147   : > { %v511_v59 = vpop.f32.mrf.mxu0  ;;  %v523_v60 = vadd.f32 %v522_v58, %v510_v57 }
 0x149   : > { %v526_v61 = vmax.f32 %v523_v60, 0.0 }
 0x14b   : > { %v527_v62 = vpack.c.bf16 %v526_v61, %v526_v61 }
 0x14d   : > { %794 = vmatmul.msk.bf16.vlgmr.msra.gmra.mxu2 %vm600_vm13, %v527_v62  ;;  %795 = vmatmul.msk.bf16.vlgmr.msra.gmra.mxu3 %vm600_vm13, %v527_v62 }
 0x14e   : > { %v524_v63 = vpop.f32.mrf.mxu1 }
 0x1d0   : > { %v613_v0 = vpop.f32.mrf.mxu2  ;;  %v626_v1 = vpop.f32.mrf.mxu3 }
 0x1d1   : > { %v630_v2 = vpack.c.bf16 %v626_v1, %v613_v0 }
 0x1d3   : > { %631 = vst [vmem:[%s199_s5] sm:$0xff] %v630_v2 }
 0x1d8   : > { %v615_v3 = vpop.f32.mrf.mxu2  ;;  %v628_v4 = vpop.f32.mrf.mxu3 }
 0x1d9 PF: > { %s14_s15 = sadd.s32 1, %s862_s15  }
 0x1da   : > { %p11_p4 = scmp.ge.s32.totalorder %s14_s15, 4  }
 0x1dc   :  { %13 = sbr.rel (!%p11_p4) target bundleno = 1 (0x1), region = 66 }

</bundles_post_ra>
